<compile_context>
chip_gen: v6e
topology: v6e:2x2x1
jax: 0.10.0
libtpu: 0.0.40
codegen_flags: <defaults>
</compile_context>

<pallas_src>
import numpy as np
import jax
import jax.numpy as jnp
from jax import lax
from jax.experimental import pallas as pl
from jax.experimental.pallas import tpu as pltpu

# ---- model hyper-parameters (from the PyTorch module) ----
d_k = d_v = 64
d_model = 512
n_heads = 8
d_ff = 2048
LN_EPS = 1e-5
MASK_FILL = -1e9  # torch masked_fill_(-1000000000.0)


def _layernorm(x):
    # nn.LayerNorm(d_model) created fresh in forward -> gamma=1, beta=0, eps=1e-5
    mean = jnp.mean(x, axis=-1, keepdims=True)
    var = jnp.mean(jnp.square(x - mean), axis=-1, keepdims=True)
    return (x - mean) * lax.rsqrt(var + LN_EPS)


# ---------------- fused encoder-layer kernel ----------------

def _encoder_layer_kernel(x_ref, mask_ref, wq_ref, wk_ref, wv_ref, wo_ref,
                          w1_ref, w2_ref, out_ref, attn_ref):
    """One batch element: MHA + residual + LN, then FFN + residual + LN."""
    x = x_ref[0]                                   # (L, D)   f32
    mask = mask_ref[0]                             # (L, L)   f32, 1.0 = masked
    L = x.shape[0]

    xb = x.astype(jnp.bfloat16)
    xh = jnp.broadcast_to(xb, (n_heads, L, d_model))          # (H, L, D) bf16

    # Per-head QKV projections, batched over heads (single einsum each).
    q = jnp.einsum("hld,hdk->hlk", xh, wq_ref[...],
                   preferred_element_type=jnp.float32)        # (H, L, d_k)
    k = jnp.einsum("hld,hdk->hlk", xh, wk_ref[...],
                   preferred_element_type=jnp.float32)        # (H, L, d_k)
    v = jnp.einsum("hld,hdk->hlk", xh, wv_ref[...],
                   preferred_element_type=jnp.float32)        # (H, L, d_v)

    # Scaled dot-product attention for all heads at once.
    scale = jnp.float32(1.0 / np.sqrt(d_k))
    scores = jnp.einsum("hqd,hkd->hqk", q.astype(jnp.bfloat16),
                        k.astype(jnp.bfloat16),
                        preferred_element_type=jnp.float32) * scale   # (H, L, L)
    scores = jnp.where(mask[None] > 0, jnp.float32(MASK_FILL), scores)

    m = jnp.max(scores, axis=-1, keepdims=True)
    e = jnp.exp(scores - m)
    denom = jnp.sum(e, axis=-1, keepdims=True)
    p = e * pl.reciprocal(denom, approx=True)                 # (H, L, L) f32
    attn_ref[0] = p                                           # single store

    ctx = jnp.einsum("hqk,hkd->hqd", p.astype(jnp.bfloat16),
                     v.astype(jnp.bfloat16),
                     preferred_element_type=jnp.float32)      # (H, L, d_v)

    # Output projection, batched over heads, then reduced over the head axis.
    proj = jnp.einsum("hqd,hdo->hqo", ctx.astype(jnp.bfloat16), wo_ref[...],
                      preferred_element_type=jnp.float32)     # (H, L, D)
    attn_out = jnp.sum(proj, axis=0)                          # (L, D)

    y = _layernorm(attn_out + x)                              # Add & Norm (f32)

    # Position-wise feed-forward network + Add & Norm.
    h = jnp.dot(y.astype(jnp.bfloat16), w1_ref[...],
                preferred_element_type=jnp.float32)           # (L, d_ff)
    h = jnp.maximum(h, 0.0)
    ff = jnp.dot(h.astype(jnp.bfloat16), w2_ref[...],
                 preferred_element_type=jnp.float32)          # (L, D)
    out_ref[0] = _layernorm(ff + y)


def _vmem_limit_bytes():
    """Generation-aware VMEM budget (v7x only has 64 MiB per TensorCore)."""
    cap = None
    try:
        cap = getattr(pltpu.get_tpu_info(), "vmem_capacity_bytes", None)
    except Exception:
        cap = None
    if not cap:
        cap = 64 * 1024 * 1024  # conservative default (v7x)
    return max(32 * 1024 * 1024, min(int(cap * 3 // 4), 96 * 1024 * 1024))


def encoder_layer(enc_inputs, enc_self_attn_mask, params):
    """enc_inputs: (B, L, d_model) f32; enc_self_attn_mask: (B, L, L) bool/int."""
    B, L, D = enc_inputs.shape

    # Layout plumbing in the wrapper (one-time, outside the kernel):
    # split the head axis out of the weight matrices and cast to bf16.
    wq = params["wq"].reshape(D, n_heads, d_k).transpose(1, 0, 2).astype(jnp.bfloat16)
    wk = params["wk"].reshape(D, n_heads, d_k).transpose(1, 0, 2).astype(jnp.bfloat16)
    wv = params["wv"].reshape(D, n_heads, d_v).transpose(1, 0, 2).astype(jnp.bfloat16)
    wo = params["wo"].reshape(n_heads, d_v, D).astype(jnp.bfloat16)
    w1 = params["w1"].astype(jnp.bfloat16)
    w2 = params["w2"].astype(jnp.bfloat16)
    mask_f = enc_self_attn_mask.astype(jnp.float32)

    out, attn = pl.pallas_call(
        _encoder_layer_kernel,
        out_shape=(jax.ShapeDtypeStruct((B, L, D), jnp.float32),
                   jax.ShapeDtypeStruct((B, n_heads, L, L), jnp.float32)),
        grid=(B,),
        in_specs=[
            pl.BlockSpec((1, L, D), lambda b: (b, 0, 0)),
            pl.BlockSpec((1, L, L), lambda b: (b, 0, 0)),
            pl.BlockSpec((n_heads, D, d_k), lambda b: (0, 0, 0)),
            pl.BlockSpec((n_heads, D, d_k), lambda b: (0, 0, 0)),
            pl.BlockSpec((n_heads, D, d_v), lambda b: (0, 0, 0)),
            pl.BlockSpec((n_heads, d_v, D), lambda b: (0, 0, 0)),
            pl.BlockSpec((D, d_ff), lambda b: (0, 0)),
            pl.BlockSpec((d_ff, D), lambda b: (0, 0)),
        ],
        out_specs=(
            pl.BlockSpec((1, L, D), lambda b: (b, 0, 0)),
            pl.BlockSpec((1, n_heads, L, L), lambda b: (b, 0, 0, 0)),
        ),
        compiler_params=pltpu.CompilerParams(
            dimension_semantics=("arbitrary",),   # weights stay resident; no
                                                  # duplicate weight DMA on v7x
            vmem_limit_bytes=_vmem_limit_bytes()),
    )(enc_inputs.astype(jnp.float32), mask_f, wq, wk, wv, wo, w1, w2)
    return out, attn


# ---------------- pure-JAX f32 reference (for correctness check) ----------------

def encoder_layer_ref(x, attn_mask, params):
    B, L, D = x.shape
    q = (x @ params["wq"]).reshape(B, L, n_heads, d_k).transpose(0, 2, 1, 3)
    k = (x @ params["wk"]).reshape(B, L, n_heads, d_k).transpose(0, 2, 1, 3)
    v = (x @ params["wv"]).reshape(B, L, n_heads, d_v).transpose(0, 2, 1, 3)
    scores = jnp.einsum("bhqd,bhkd->bhqk", q, k) / np.sqrt(d_k)
    scores = jnp.where(attn_mask[:, None], jnp.float32(MASK_FILL), scores)
    attn = jax.nn.softmax(scores, axis=-1)
    ctx = jnp.einsum("bhqk,bhkd->bhqd", attn, v)
    ctx = ctx.transpose(0, 2, 1, 3).reshape(B, L, n_heads * d_v)
    y = _layernorm(ctx @ params["wo"] + x)
    h = jnp.maximum(y @ params["w1"], 0.0)
    out = _layernorm(h @ params["w2"] + y)
    return out, attn


# ---------------- driver ----------------

if __name__ == "__main__":
    key = jax.random.PRNGKey(0)
    kx, kq, kk, kv, ko, k1, k2 = jax.random.split(key, 7)

    B, L = 2, 8
    s = 0.02
    params = dict(
        wq=s * jax.random.normal(kq, (d_model, n_heads * d_k), jnp.float32),
        wk=s * jax.random.normal(kk, (d_model, n_heads * d_k), jnp.float32),
        wv=s * jax.random.normal(kv, (d_model, n_heads * d_v), jnp.float32),
        wo=s * jax.random.normal(ko, (n_heads * d_v, d_model), jnp.float32),
        w1=s * jax.random.normal(k1, (d_model, d_ff), jnp.float32),
        w2=s * jax.random.normal(k2, (d_ff, d_model), jnp.float32),
    )

    enc_inputs = jax.random.normal(kx, (B, L, d_model), jnp.float32)
    # pad mask: pretend the last key position of batch 0 is a pad token
    pad = jnp.zeros((B, L), jnp.bool_).at[0, L - 1].set(True)
    enc_self_attn_mask = jnp.broadcast_to(pad[:, None, :], (B, L, L))

    out, attn = jax.jit(encoder_layer)(enc_inputs, enc_self_attn_mask, params)
    jax.block_until_ready(out)
    jax.block_until_ready(attn)

    assert out.shape == (B, L, d_model)
    assert attn.shape == (B, n_heads, L, L)
    assert bool(jnp.all(jnp.isfinite(out)))
    assert bool(jnp.all(jnp.isfinite(attn)))

    # softmax rows sum to ~1 and the padded key column gets ~zero attention
    row_sums = jnp.sum(attn, axis=-1)
    assert float(jnp.max(jnp.abs(row_sums - 1.0))) < 1e-2
    assert float(jnp.max(attn[0, :, :, L - 1])) < 1e-6

    # compare against a pure-JAX f32 reference (kernel uses bf16 MXU inputs)
    ref_out, ref_attn = encoder_layer_ref(enc_inputs, enc_self_attn_mask, params)
    assert float(jnp.max(jnp.abs(attn - ref_attn))) < 5e-2
    assert float(jnp.max(jnp.abs(out - ref_out))) < 1e-1

    print("KERNEL_OK")
</pallas_src>

<mosaic_0001>
module attributes {stable_mosaic.version = 11 : i64} {
  func.func @_encoder_layer_kernel(%arg0: i32, %arg1: memref<1x8x512xf32, #tpu.memory_space<vmem>>, %arg2: memref<1x8x8xf32, #tpu.memory_space<vmem>>, %arg3: memref<8x512x64xbf16, #tpu.memory_space<vmem>>, %arg4: memref<8x512x64xbf16, #tpu.memory_space<vmem>>, %arg5: memref<8x512x64xbf16, #tpu.memory_space<vmem>>, %arg6: memref<8x64x512xbf16, #tpu.memory_space<vmem>>, %arg7: memref<512x2048xbf16, #tpu.memory_space<vmem>>, %arg8: memref<2048x512xbf16, #tpu.memory_space<vmem>>, %arg9: memref<1x8x512xf32, #tpu.memory_space<vmem>>, %arg10: memref<1x8x8x8xf32, #tpu.memory_space<vmem>>) attributes {dimension_semantics = [#tpu.dimension_semantics<arbitrary>], iteration_bounds = array<i64: 2>, scalar_prefetch = 0 : i64, scratch_operands = 0 : i64, tpu.core_type = #tpu.core_type<tc>, window_params = [{transform_indices = @transform_0, window_bounds = array<i64: 1, 8, 512>}, {transform_indices = @transform_1, window_bounds = array<i64: 1, 8, 8>}, {pipeline_mode = #tpu.pipeline_mode<synchronous>, transform_indices = @transform_2, window_bounds = array<i64: 8, 512, 64>}, {pipeline_mode = #tpu.pipeline_mode<synchronous>, transform_indices = @transform_3, window_bounds = array<i64: 8, 512, 64>}, {pipeline_mode = #tpu.pipeline_mode<synchronous>, transform_indices = @transform_4, window_bounds = array<i64: 8, 512, 64>}, {pipeline_mode = #tpu.pipeline_mode<synchronous>, transform_indices = @transform_5, window_bounds = array<i64: 8, 64, 512>}, {pipeline_mode = #tpu.pipeline_mode<synchronous>, transform_indices = @transform_6, window_bounds = array<i64: 512, 2048>}, {pipeline_mode = #tpu.pipeline_mode<synchronous>, transform_indices = @transform_7, window_bounds = array<i64: 2048, 512>}, {transform_indices = @transform_8, window_bounds = array<i64: 1, 8, 512>}, {transform_indices = @transform_9, window_bounds = array<i64: 1, 8, 8, 8>}]} {
    %c0 = arith.constant 0 : index
    %c0_0 = arith.constant 0 : index
    %c0_1 = arith.constant 0 : index
    %0 = vector.load %arg1[%c0, %c0_0, %c0_1] : memref<1x8x512xf32, #tpu.memory_space<vmem>>, vector<1x8x512xf32>
    %1 = vector.shape_cast %0 : vector<1x8x512xf32> to vector<8x512xf32>
    %c0_2 = arith.constant 0 : index
    %c0_3 = arith.constant 0 : index
    %c0_4 = arith.constant 0 : index
    %2 = vector.load %arg2[%c0_2, %c0_3, %c0_4] : memref<1x8x8xf32, #tpu.memory_space<vmem>>, vector<1x8x8xf32>
    %3 = vector.shape_cast %2 : vector<1x8x8xf32> to vector<8x8xf32>
    %4 = arith.truncf %1 : vector<8x512xf32> to vector<8x512xbf16>
    %5 = vector.shape_cast %4 : vector<8x512xbf16> to vector<1x8x512xbf16>
    %6 = vector.broadcast %5 : vector<1x8x512xbf16> to vector<8x8x512xbf16>
    %c0_5 = arith.constant 0 : index
    %c0_6 = arith.constant 0 : index
    %c0_7 = arith.constant 0 : index
    %7 = vector.load %arg3[%c0_5, %c0_6, %c0_7] : memref<8x512x64xbf16, #tpu.memory_space<vmem>>, vector<8x512x64xbf16>
    "tpu.trace_start"() <{level = 10 : i32, message = "hld,hdk->hlk"}> : () -> ()
    %cst = arith.constant dense<0.000000e+00> : vector<8x8x64xf32>
    %8 = tpu.matmul %6, %7, %cst {dimension_numbers = #tpu.dot_dimension_numbers<[2], [1], [1], [2], [0, 0, 0, 1, 1, 2], [0], [0]>} : vector<8x8x512xbf16>, vector<8x512x64xbf16>, vector<8x8x64xf32> -> vector<8x8x64xf32>
    "tpu.trace_stop"() : () -> ()
    %c0_8 = arith.constant 0 : index
    %c0_9 = arith.constant 0 : index
    %c0_10 = arith.constant 0 : index
    %9 = vector.load %arg4[%c0_8, %c0_9, %c0_10] : memref<8x512x64xbf16, #tpu.memory_space<vmem>>, vector<8x512x64xbf16>
    "tpu.trace_start"() <{level = 10 : i32, message = "hld,hdk->hlk"}> : () -> ()
    %cst_11 = arith.constant dense<0.000000e+00> : vector<8x8x64xf32>
    %10 = tpu.matmul %6, %9, %cst_11 {dimension_numbers = #tpu.dot_dimension_numbers<[2], [1], [1], [2], [0, 0, 0, 1, 1, 2], [0], [0]>} : vector<8x8x512xbf16>, vector<8x512x64xbf16>, vector<8x8x64xf32> -> vector<8x8x64xf32>
    "tpu.trace_stop"() : () -> ()
    %c0_12 = arith.constant 0 : index
    %c0_13 = arith.constant 0 : index
    %c0_14 = arith.constant 0 : index
    %11 = vector.load %arg5[%c0_12, %c0_13, %c0_14] : memref<8x512x64xbf16, #tpu.memory_space<vmem>>, vector<8x512x64xbf16>
    "tpu.trace_start"() <{level = 10 : i32, message = "hld,hdk->hlk"}> : () -> ()
    %cst_15 = arith.constant dense<0.000000e+00> : vector<8x8x64xf32>
    %12 = tpu.matmul %6, %11, %cst_15 {dimension_numbers = #tpu.dot_dimension_numbers<[2], [1], [1], [2], [0, 0, 0, 1, 1, 2], [0], [0]>} : vector<8x8x512xbf16>, vector<8x512x64xbf16>, vector<8x8x64xf32> -> vector<8x8x64xf32>
    "tpu.trace_stop"() : () -> ()
    %13 = arith.truncf %8 : vector<8x8x64xf32> to vector<8x8x64xbf16>
    %14 = arith.truncf %10 : vector<8x8x64xf32> to vector<8x8x64xbf16>
    "tpu.trace_start"() <{level = 10 : i32, message = "hqd,hkd->hqk"}> : () -> ()
    %cst_16 = arith.constant dense<0.000000e+00> : vector<8x8x8xf32>
    %15 = tpu.matmul %13, %14, %cst_16 {dimension_numbers = #tpu.dot_dimension_numbers<[2], [2], [1], [1], [0, 0, 0, 1, 1, 1], [0], [0]>} : vector<8x8x64xbf16>, vector<8x8x64xbf16>, vector<8x8x8xf32> -> vector<8x8x8xf32>
    "tpu.trace_stop"() : () -> ()
    %cst_17 = arith.constant 1.250000e-01 : f32
    %16 = vector.broadcast %cst_17 : f32 to vector<8x8x8xf32>
    %17 = arith.mulf %15, %16 : vector<8x8x8xf32>
    %18 = vector.shape_cast %3 : vector<8x8xf32> to vector<1x8x8xf32>
    %cst_18 = arith.constant 0.000000e+00 : f32
    %19 = vector.broadcast %cst_18 : f32 to vector<1x8x8xf32>
    %20 = arith.cmpf ogt, %18, %19 : vector<1x8x8xf32>
    %cst_19 = arith.constant -1.000000e+09 : f32
    %21 = vector.shape_cast %20 : vector<1x8x8xi1> to vector<1x8x8xi1>
    %22 = vector.broadcast %21 : vector<1x8x8xi1> to vector<8x8x8xi1>
    %23 = vector.broadcast %cst_19 : f32 to vector<8x8x8xf32>
    %24 = arith.select %22, %23, %17 : vector<8x8x8xi1>, vector<8x8x8xf32>
    %cst_20 = arith.constant dense<0xFF800000> : vector<8x8xf32>
    %25 = vector.multi_reduction <maximumf>, %24, %cst_20 [2] : vector<8x8x8xf32> to vector<8x8xf32>
    %26 = vector.shape_cast %25 : vector<8x8xf32> to vector<8x8x1xf32>
    %27 = vector.broadcast %26 : vector<8x8x1xf32> to vector<8x8x8xf32>
    %28 = arith.subf %24, %27 : vector<8x8x8xf32>
    %29 = math.exp %28 : vector<8x8x8xf32>
    %cst_21 = arith.constant dense<0.000000e+00> : vector<8x8xf32>
    %30 = vector.multi_reduction <add>, %29, %cst_21 [2] : vector<8x8x8xf32> to vector<8x8xf32>
    %31 = vector.shape_cast %30 : vector<8x8xf32> to vector<8x8x1xf32>
    %32 = tpu.reciprocal %31 {approx = true} : vector<8x8x1xf32> -> vector<8x8x1xf32>
    %33 = vector.broadcast %32 : vector<8x8x1xf32> to vector<8x8x8xf32>
    %34 = arith.mulf %29, %33 : vector<8x8x8xf32>
    %c0_22 = arith.constant 0 : index
    %c0_23 = arith.constant 0 : index
    %c0_24 = arith.constant 0 : index
    %c0_25 = arith.constant 0 : index
    %35 = vector.load %arg10[%c0_22, %c0_23, %c0_24, %c0_25] : memref<1x8x8x8xf32, #tpu.memory_space<vmem>>, vector<1x8x8x8xf32>
    %36 = vector.shape_cast %35 : vector<1x8x8x8xf32> to vector<8x8x8xf32>
    %37 = vector.shape_cast %34 : vector<8x8x8xf32> to vector<1x8x8x8xf32>
    tpu.vector_store %arg10[%c0_22, %c0_23, %c0_24, %c0_25], %37 {strides = array<i32>} : memref<1x8x8x8xf32, #tpu.memory_space<vmem>>, vector<1x8x8x8xf32>,
    %38 = arith.truncf %34 : vector<8x8x8xf32> to vector<8x8x8xbf16>
    %39 = arith.truncf %12 : vector<8x8x64xf32> to vector<8x8x64xbf16>
    "tpu.trace_start"() <{level = 10 : i32, message = "hqk,hkd->hqd"}> : () -> ()
    %cst_26 = arith.constant dense<0.000000e+00> : vector<8x8x64xf32>
    %40 = tpu.matmul %38, %39, %cst_26 {dimension_numbers = #tpu.dot_dimension_numbers<[2], [1], [1], [2], [0, 0, 0, 1, 1, 2], [0], [0]>} : vector<8x8x8xbf16>, vector<8x8x64xbf16>, vector<8x8x64xf32> -> vector<8x8x64xf32>
    "tpu.trace_stop"() : () -> ()
    %41 = arith.truncf %40 : vector<8x8x64xf32> to vector<8x8x64xbf16>
    %c0_27 = arith.constant 0 : index
    %c0_28 = arith.constant 0 : index
    %c0_29 = arith.constant 0 : index
    %42 = vector.load %arg6[%c0_27, %c0_28, %c0_29] : memref<8x64x512xbf16, #tpu.memory_space<vmem>>, vector<8x64x512xbf16>
    "tpu.trace_start"() <{level = 10 : i32, message = "hqd,hdo->hqo"}> : () -> ()
    %cst_30 = arith.constant dense<0.000000e+00> : vector<8x8x512xf32>
    %43 = tpu.matmul %41, %42, %cst_30 {dimension_numbers = #tpu.dot_dimension_numbers<[2], [1], [1], [2], [0, 0, 0, 1, 1, 2], [0], [0]>} : vector<8x8x64xbf16>, vector<8x64x512xbf16>, vector<8x8x512xf32> -> vector<8x8x512xf32>
    "tpu.trace_stop"() : () -> ()
    %cst_31 = arith.constant dense<0.000000e+00> : vector<8x512xf32>
    %44 = vector.multi_reduction <add>, %43, %cst_31 [0] : vector<8x8x512xf32> to vector<8x512xf32>
    %45 = arith.addf %44, %1 : vector<8x512xf32>
    %cst_32 = arith.constant dense<0.000000e+00> : vector<8xf32>
    %46 = vector.multi_reduction <add>, %45, %cst_32 [1] : vector<8x512xf32> to vector<8xf32>
    %47 = vector.shape_cast %46 : vector<8xf32> to vector<8x1xf32>
    %cst_33 = arith.constant 5.120000e+02 : f32
    %48 = vector.broadcast %cst_33 : f32 to vector<8x1xf32>
    %49 = arith.divf %47, %48 : vector<8x1xf32>
    %50 = vector.broadcast %49 : vector<8x1xf32> to vector<8x512xf32>
    %51 = arith.subf %45, %50 : vector<8x512xf32>
    %52 = arith.mulf %51, %51 : vector<8x512xf32>
    %cst_34 = arith.constant dense<0.000000e+00> : vector<8xf32>
    %53 = vector.multi_reduction <add>, %52, %cst_34 [1] : vector<8x512xf32> to vector<8xf32>
    %54 = vector.shape_cast %53 : vector<8xf32> to vector<8x1xf32>
    %cst_35 = arith.constant 5.120000e+02 : f32
    %55 = vector.broadcast %cst_35 : f32 to vector<8x1xf32>
    %56 = arith.divf %54, %55 : vector<8x1xf32>
    %57 = vector.broadcast %49 : vector<8x1xf32> to vector<8x512xf32>
    %58 = arith.subf %45, %57 : vector<8x512xf32>
    %cst_36 = arith.constant 9.99999974E-6 : f32
    %59 = vector.broadcast %cst_36 : f32 to vector<8x1xf32>
    %60 = arith.addf %56, %59 : vector<8x1xf32>
    %61 = math.rsqrt %60 : vector<8x1xf32>
    %62 = vector.broadcast %61 : vector<8x1xf32> to vector<8x512xf32>
    %63 = arith.mulf %58, %62 : vector<8x512xf32>
    %64 = arith.truncf %63 : vector<8x512xf32> to vector<8x512xbf16>
    %c0_37 = arith.constant 0 : index
    %c0_38 = arith.constant 0 : index
    %65 = vector.load %arg7[%c0_37, %c0_38] : memref<512x2048xbf16, #tpu.memory_space<vmem>>, vector<512x2048xbf16>
    %cst_39 = arith.constant dense<0.000000e+00> : vector<8x2048xf32>
    %66 = tpu.matmul %64, %65, %cst_39 {dimension_numbers = #tpu.dot_dimension_numbers<[1], [0], [0], [1], [0, 0, 1, 1], [], []>} : vector<8x512xbf16>, vector<512x2048xbf16>, vector<8x2048xf32> -> vector<8x2048xf32>
    %cst_40 = arith.constant 0.000000e+00 : f32
    %67 = vector.broadcast %cst_40 : f32 to vector<8x2048xf32>
    %68 = arith.maximumf %66, %67 : vector<8x2048xf32>
    %69 = arith.truncf %68 : vector<8x2048xf32> to vector<8x2048xbf16>
    %c0_41 = arith.constant 0 : index
    %c0_42 = arith.constant 0 : index
    %70 = vector.load %arg8[%c0_41, %c0_42] : memref<2048x512xbf16, #tpu.memory_space<vmem>>, vector<2048x512xbf16>
    %cst_43 = arith.constant dense<0.000000e+00> : vector<8x512xf32>
    %71 = tpu.matmul %69, %70, %cst_43 {dimension_numbers = #tpu.dot_dimension_numbers<[1], [0], [0], [1], [0, 0, 1, 1], [], []>} : vector<8x2048xbf16>, vector<2048x512xbf16>, vector<8x512xf32> -> vector<8x512xf32>
    %72 = arith.addf %71, %63 : vector<8x512xf32>
    %cst_44 = arith.constant dense<0.000000e+00> : vector<8xf32>
    %73 = vector.multi_reduction <add>, %72, %cst_44 [1] : vector<8x512xf32> to vector<8xf32>
    %74 = vector.shape_cast %73 : vector<8xf32> to vector<8x1xf32>
    %cst_45 = arith.constant 5.120000e+02 : f32
    %75 = vector.broadcast %cst_45 : f32 to vector<8x1xf32>
    %76 = arith.divf %74, %75 : vector<8x1xf32>
    %77 = vector.broadcast %76 : vector<8x1xf32> to vector<8x512xf32>
    %78 = arith.subf %72, %77 : vector<8x512xf32>
    %79 = arith.mulf %78, %78 : vector<8x512xf32>
    %cst_46 = arith.constant dense<0.000000e+00> : vector<8xf32>
    %80 = vector.multi_reduction <add>, %79, %cst_46 [1] : vector<8x512xf32> to vector<8xf32>
    %81 = vector.shape_cast %80 : vector<8xf32> to vector<8x1xf32>
    %cst_47 = arith.constant 5.120000e+02 : f32
    %82 = vector.broadcast %cst_47 : f32 to vector<8x1xf32>
    %83 = arith.divf %81, %82 : vector<8x1xf32>
    %84 = vector.broadcast %76 : vector<8x1xf32> to vector<8x512xf32>
    %85 = arith.subf %72, %84 : vector<8x512xf32>
    %cst_48 = arith.constant 9.99999974E-6 : f32
    %86 = vector.broadcast %cst_48 : f32 to vector<8x1xf32>
    %87 = arith.addf %83, %86 : vector<8x1xf32>
    %88 = math.rsqrt %87 : vector<8x1xf32>
    %89 = vector.broadcast %88 : vector<8x1xf32> to vector<8x512xf32>
    %90 = arith.mulf %85, %89 : vector<8x512xf32>
    %c0_49 = arith.constant 0 : index
    %c0_50 = arith.constant 0 : index
    %c0_51 = arith.constant 0 : index
    %91 = vector.load %arg9[%c0_49, %c0_50, %c0_51] : memref<1x8x512xf32, #tpu.memory_space<vmem>>, vector<1x8x512xf32>
    %92 = vector.shape_cast %91 : vector<1x8x512xf32> to vector<8x512xf32>
    %93 = vector.shape_cast %90 : vector<8x512xf32> to vector<1x8x512xf32>
    tpu.vector_store %arg9[%c0_49, %c0_50, %c0_51], %93 {strides = array<i32>} : memref<1x8x512xf32, #tpu.memory_space<vmem>>, vector<1x8x512xf32>,
    return
  }
  func.func @transform_0(%arg0: i32) -> (i32, i32, i32) {
    %c0_i32 = arith.constant 0 : i32
    %c0_i32_0 = arith.constant 0 : i32
    %c0_i32_1 = arith.constant 0 : i32
    return %arg0, %c0_i32, %c0_i32_0 : i32, i32, i32
  }
  func.func @transform_1(%arg0: i32) -> (i32, i32, i32) {
    %c0_i32 = arith.constant 0 : i32
    %c0_i32_0 = arith.constant 0 : i32
    %c0_i32_1 = arith.constant 0 : i32
    return %arg0, %c0_i32, %c0_i32_0 : i32, i32, i32
  }
  func.func @transform_2(%arg0: i32) -> (i32, i32, i32) {
    %c0_i32 = arith.constant 0 : i32
    %c0_i32_0 = arith.constant 0 : i32
    %c0_i32_1 = arith.constant 0 : i32
    %c0_i32_2 = arith.constant 0 : i32
    return %c0_i32, %c0_i32_0, %c0_i32_1 : i32, i32, i32
  }
  func.func @transform_3(%arg0: i32) -> (i32, i32, i32) {
    %c0_i32 = arith.constant 0 : i32
    %c0_i32_0 = arith.constant 0 : i32
    %c0_i32_1 = arith.constant 0 : i32
    %c0_i32_2 = arith.constant 0 : i32
    return %c0_i32, %c0_i32_0, %c0_i32_1 : i32, i32, i32
  }
  func.func @transform_4(%arg0: i32) -> (i32, i32, i32) {
    %c0_i32 = arith.constant 0 : i32
    %c0_i32_0 = arith.constant 0 : i32
    %c0_i32_1 = arith.constant 0 : i32
    %c0_i32_2 = arith.constant 0 : i32
    return %c0_i32, %c0_i32_0, %c0_i32_1 : i32, i32, i32
  }
  func.func @transform_5(%arg0: i32) -> (i32, i32, i32) {
    %c0_i32 = arith.constant 0 : i32
    %c0_i32_0 = arith.constant 0 : i32
    %c0_i32_1 = arith.constant 0 : i32
    %c0_i32_2 = arith.constant 0 : i32
    return %c0_i32, %c0_i32_0, %c0_i32_1 : i32, i32, i32
  }
  func.func @transform_6(%arg0: i32) -> (i32, i32) {
    %c0_i32 = arith.constant 0 : i32
    %c0_i32_0 = arith.constant 0 : i32
    %c0_i32_1 = arith.constant 0 : i32
    return %c0_i32, %c0_i32_0 : i32, i32
  }
  func.func @transform_7(%arg0: i32) -> (i32, i32) {
    %c0_i32 = arith.constant 0 : i32
    %c0_i32_0 = arith.constant 0 : i32
    %c0_i32_1 = arith.constant 0 : i32
    return %c0_i32, %c0_i32_0 : i32, i32
  }
  func.func @transform_8(%arg0: i32) -> (i32, i32, i32) {
    %c0_i32 = arith.constant 0 : i32
    %c0_i32_0 = arith.constant 0 : i32
    %c0_i32_1 = arith.constant 0 : i32
    return %arg0, %c0_i32, %c0_i32_0 : i32, i32, i32
  }
  func.func @transform_9(%arg0: i32) -> (i32, i32, i32, i32) {
    %c0_i32 = arith.constant 0 : i32
    %c0_i32_0 = arith.constant 0 : i32
    %c0_i32_1 = arith.constant 0 : i32
    %c0_i32_2 = arith.constant 0 : i32
    return %arg0, %c0_i32, %c0_i32_0, %c0_i32_1 : i32, i32, i32, i32
  }
}

</mosaic_0001>

<bundles_post_ra>
// kernel: encoder_layer.1
= control target key start
LH: loop header
LB: loop body
LE: loop exit
PB: predicated region body
PF: predicated region fallthrough
CT: control target
= control target key end

     0   :  { %s30179_s0 = inlined_call_operand.vmem [shape: f32[2,8,512], index: 0, kind: input, shape index: {}]   ;;  %s30180_s1 = inlined_call_operand.vmem [shape: f32[2,8,8], index: 1, kind: input, shape index: {}]   ;;  %s30181_s2 = inlined_call_operand.vmem [shape: bf16[8,512,64], index: 2, kind: input, shape index: {}]   ;;  %s30182_s3 = inlined_call_operand.vmem [shape: bf16[8,512,64], index: 3, kind: input, shape index: {}]   ;;  %s30183_s4 = inlined_call_operand.vmem [shape: bf16[8,512,64], index: 4, kind: input, shape index: {}]   ;;  %s30184_s5 = inlined_call_operand.vmem [shape: bf16[8,64,512], index: 5, kind: input, shape index: {}]   ;;  %s30185_s6 = inlined_call_operand.vmem [shape: bf16[512,2048], index: 6, kind: input, shape index: {}]   ;;  %s30186_s7 = inlined_call_operand.vmem [shape: bf16[2048,512], index: 7, kind: input, shape index: {}]   ;;  %s30187_s8 = inlined_call_operand.hbm [shape: f32[2,8,512], index: 8, kind: output, shape index: {0}]   ;;  %s30188_s9 = inlined_call_operand.hbm [shape: f32[2,8,8,8], index: 9, kind: output, shape index: {1}]  }
   0x1   :  { %30189 = sst [smem:[#allocation8_spill]] %s30179_s0 }
   0x2   :  { %15 = vsyncpa [#allocation3], 0 }
   0x3   :  { %17 = vsyncpa [#allocation3 + $0x1], 0 }
   0x4   :  { %18 = vsyncpa [#allocation5], 0 }
   0x5   :  { %20 = vsyncpa [#allocation5 + $0x1], 0  ;;  %s23617_s30 = smov 0   ;;  %s23619_s10 = smov 0  }
   0x6   :  { %s23621_s11 = smov 0   ;;  %s23623_s12 = smov 0  }
   0x7 LB: > { %s23638_s13 = sadd.s32 4294967295, %s23558_s12   ;;  %s18495_s14 = sadd.s32 4294967294, %s23558_s12   ;;  %s23558_s12 = sphi %s23623_s12, %s30196_s12   ;;  %s23554_s11 = sphi %s23621_s11, %s30195_s11   ;;  %s23550_s10 = sphi %s23619_s10, %s30194_s10   ;;  %s23546_s30 = sphi %s23617_s30, %s30193_s30  }
   0x8   : > { %s23642_s15 = sadd.s32 1, %s23558_s12   ;;  %s211_s16 = sadd.s32 1, %s23554_s11 }
   0x9   : > { %s208_s17 = ssub.s32 %s23558_s12, %s23642_s15  ;;  %p221_p0 = scmp.ne.s32.totalorder %s23554_s11, %s23550_s10 }
   0xa   : > { %p209_p1 = scmp.eq.s32.totalorder %s208_s17, 0  ;;  %p222_p2 = scmp.eq.s32.totalorder %s23638_s13, 1 }
   0xb   : > { %p227_p3 = scmp.ne.s32.totalorder %s23550_s10, %s23546_s30  ;;  %p228_p4 = scmp.eq.s32.totalorder %s18495_s14, 1 }
   0xc   : > { %s23653_s18 = scalar_select %p209_p1, %s23554_s11, %s211_s16  }
   0xd   : > { %p23655_p5 = por %p222_p2, %p221_p0  ;;  %p23659_p6 = por %p228_p4, %p227_p3 }
   0xe   : > { %p18498_p7 = scmp.ge.s32.totalorder %s23558_s12, 1  ;;  %p305_p8 = scmp.lt.s32.totalorder %s23558_s12, 3 }
  0x10   : > { %p306_p9 = pnand %p18498_p7, %p305_p8 }
  0x11   : > { %p350_p10 = scmp.lt.s32.totalorder (!%p306_p9), %s23638_s13, 1  ;;  %s30192_s0 = sld [smem:[#allocation8_spill]] (!%p306_p9) }
  0x12   : > { %309 = sbr.rel (%p306_p9) target bundleno = 3617 (0xe21), region = 52  ;;  %s20466_s17 = sshll.u32 (!%p306_p9), %s23638_s13, 10 }
  0x13   : > { %s23563_s23 = smov (!%p306_p9), [#allocation4]  }
  0x14   : > { %s23472_s24 = sshll.u32 (!%p306_p9), %s23563_s23, 4  ;;  %s23473_s24 = int_to_ptr.vmem [resolvable:$false] %s23472_s24 }
  0x17   : > { %v21700_v0 = vld [vmem:[%s30181_s2 + $0x78] sm:$0xff]   ;;  %v21704_v4 = vld [vmem:[%s30181_s2 + $0x70] sm:$0xff]   ;;  %v21708_v8 = vld [vmem:[%s30181_s2 + $0x68] sm:$0xff]   ;;  %s23736_s16 = scalar_select %p350_p10, %s23638_s13, 1  ;;  %vm8449_vm0 = vcmask 523264   ;;  %vm23561_vm1 = vmmov 0  }
  0x18   : > { %v21701_v1 = vld [vmem:[%s30181_s2 + $0xf8] sm:$0xff]   ;;  %20467 = vmatprep.subr.bf16.mxu0 %v21700_v0  ;;  %v21705_v5 = vld [vmem:[%s30181_s2 + $0xf0] sm:$0xff]   ;;  %v21709_v9 = vld [vmem:[%s30181_s2 + $0xe8] sm:$0xff]   ;;  %vm8953_vm2 = vcmask 1043456   ;;  %vm8837_vm4 = vcmask 64512  }
  0x19   : > { %v21702_v2 = vld [vmem:[%s30181_s2 + $0x38] sm:$0xff]   ;;  %20489 = vmatprep.subr.bf16.mxu1 %v21701_v1  ;;  %v21706_v6 = vld [vmem:[%s30181_s2 + $0x30] sm:$0xff]   ;;  %v21710_v10 = vld [vmem:[%s30181_s2 + $0x28] sm:$0xff]   ;;  %s20464_s28 = sshll.u32 %s23736_s16, 5  ;;  %s18503_s22 = sshll.u32 %s23736_s16, 3 }
  0x1a   : > { %v21703_v3 = vld [vmem:[%s30181_s2 + $0xb8] sm:$0xff]   ;;  %20468 = vmatpush3.bf16.msra.mxu0 %v21702_v2  ;;  %v21707_v7 = vld [vmem:[%s30181_s2 + $0xb0] sm:$0xff]   ;;  %v21711_v11 = vld [vmem:[%s30181_s2 + $0xa8] sm:$0xff]   ;;  %s23763_s26 = scalar_lea.vmem %s30192_s0, %s20464_s28  ;;  %s358_s25 = scalar_lea.vmem %s30180_s1, %s18503_s22 }
  0x1b   : > { %20490 = vmatpush3.bf16.msra.mxu1 %v21703_v3  ;;  %20469 = vmatprep.subr.bf16.mxu0 %v21704_v4  ;;  %v21712_v12 = vld [vmem:[%s30181_s2 + $0x60] sm:$0xff]   ;;  %v21716_v16 = vld [vmem:[%s30181_s2 + $0x58] sm:$0xff]   ;;  %v21720_v20 = vld [vmem:[%s30181_s2 + $0x50] sm:$0xff]   ;;  %s26277_s16 = sand.u32 1, %s23550_s10  }
  0x1c   : > { %20491 = vmatprep.subr.bf16.mxu1 %v21705_v5  ;;  %v21713_v13 = vld [vmem:[%s30181_s2 + $0xe0] sm:$0xff]   ;;  %v21717_v17 = vld [vmem:[%s30181_s2 + $0xd8] sm:$0xff]   ;;  %v21721_v21 = vld [vmem:[%s30181_s2 + $0xd0] sm:$0xff]   ;;  %s18500_s27 = sshll.u32 %s26277_s16, 6  ;;  %s18362_s0 = scalar_lea.sflag [#allocation5], %s26277_s16 }
  0x1d   : > { %v21714_v14 = vld [vmem:[%s30181_s2 + $0x20] sm:$0xff]   ;;  %v21718_v18 = vld [vmem:[%s30181_s2 + $0x18] sm:$0xff]   ;;  %v21722_v22 = vld [vmem:[%s30181_s2 + $0x10] sm:$0xff]   ;;  %s26282_s29 = scalar_lea.vmem [#allocation4], %s18500_s27 }
  0x1e   : > { %20470 = vmatpush3.bf16.msra.mxu0 %v21706_v6  ;;  %v21715_v15 = vld [vmem:[%s30181_s2 + $0xa0] sm:$0xff]   ;;  %v21719_v19 = vld [vmem:[%s30181_s2 + $0x98] sm:$0xff]   ;;  %v21723_v23 = vld [vmem:[%s30181_s2 + $0x90] sm:$0xff]   ;;  %s18389_s14 = sshll.u32 %s26282_s29, 4  ;;  %s30102_s14 = int_to_ptr.vmem [resolvable:$true] %s18389_s14 }
  0x1f   : > { %20492 = vmatpush3.bf16.msra.mxu1 %v21707_v7  ;;  %20471 = vmatprep.subr.bf16.mxu0 %v21708_v8  ;;  %v21724_v24 = vld [vmem:[%s30181_s2 + $0x48] sm:$0xff]   ;;  %v21728_v28 = vld [vmem:[%s30181_s2 + $0x40] sm:$0xff]   ;;  %v363_v33 = vld [vmem:[%s23763_s26 + $0x18] sm:$0xff]  ;;  %s23468_s22 = scalar_lea.vmem %s30102_s14, 1024  ;;  %p23475_p0 = scmp.lt.s32.totalorder %s30102_s14, %s23473_s24 }
  0x20   : > { %20493 = vmatprep.subr.bf16.mxu1 %v21709_v9  ;;  %v21725_v25 = vld [vmem:[%s30181_s2 + $0xc8] sm:$0xff]   ;;  %v21729_v29 = vld [vmem:[%s30181_s2 + $0xc0] sm:$0xff]   ;;  %v23776_v36 = vpack.c.bf16 %v363_v33, %v363_v33  ;;  %v362_v38 = vld [vmem:[%s23763_s26 + $0x10] sm:$0xff]  ;;  %p23469_p11 = scmp.ne.s32.totalorder %s30102_s14, %s23468_s22 }
  0x21   : > { %v21726_v26 = vld [vmem:[%s30181_s2 + $0x8] sm:$0xff]   ;;  %v21730_v30 = vld [vmem:[%s30181_s2] sm:$0xff]   ;;  %v23781_v39 = vpack.c.bf16 %v362_v38, %v362_v38  ;;  %v21732_v40 = vld [vmem:[%s30181_s2 + $0x178] sm:$0xff]  }
  0x22   : > { %20472 = vmatpush3.bf16.msra.mxu0 %v21710_v10  ;;  %v21727_v27 = vld [vmem:[%s30181_s2 + $0x88] sm:$0xff]   ;;  %v21731_v31 = vld [vmem:[%s30181_s2 + $0x80] sm:$0xff]   ;;  %1145 = vmatprep.mubr.bf16.mxu1 %v23776_v36  ;;  %v21733_v41 = vld [vmem:[%s30181_s2 + $0x1f8] sm:$0xff]   ;;  %p23470_p12 = pnand %p23469_p11, %p23655_p5 }
  0x23   : > { %20494 = vmatpush3.bf16.msra.mxu1 %v21711_v11  ;;  %20473 = vmatprep.subr.bf16.mxu0 %v21712_v12  ;;  %v361_v32 = vld [vmem:[%s23763_s26 + $0x8] sm:$0xff]  ;;  %v360_v34 = vld [vmem:[%s23763_s26] sm:$0xff]  ;;  %v21734_v42 = vld [vmem:[%s30181_s2 + $0x138] sm:$0xff]  }
  0x24   : > { %20495 = vmatprep.subr.bf16.mxu1 %v21713_v13  ;;  %v23774_v35 = vpack.c.bf16 %v361_v32, %v361_v32  ;;  %v23778_v37 = vpack.c.bf16 %v360_v34, %v360_v34  ;;  %v21735_v43 = vld [vmem:[%s30181_s2 + $0x1b8] sm:$0xff]   ;;  %v21736_v44 = vld [vmem:[%s30181_s2 + $0x170] sm:$0xff]   ;;  %v21740_v48 = vld [vmem:[%s30181_s2 + $0x168] sm:$0xff]   ;;  %p23471_p13 = pneg %p23470_p12 }
  0x25   : > { %v21737_v45 = vld [vmem:[%s30181_s2 + $0x1f0] sm:$0xff]   ;;  %v21741_v49 = vld [vmem:[%s30181_s2 + $0x1e8] sm:$0xff]   ;;  %v21744_v52 = vld [vmem:[%s30181_s2 + $0x160] sm:$0xff]  }
  0x26   : > { %20474 = vmatpush3.bf16.msra.mxu0 %v21714_v14  ;;  %1105 = vmatprep.mubr.bf16.mxu0 %v23774_v35  ;;  %v21738_v46 = vld [vmem:[%s30181_s2 + $0x130] sm:$0xff]   ;;  %v21742_v50 = vld [vmem:[%s30181_s2 + $0x128] sm:$0xff]   ;;  %v21745_v53 = vld [vmem:[%s30181_s2 + $0x1e0] sm:$0xff]  }
  0x27   : > { %20496 = vmatpush3.bf16.msra.mxu1 %v21715_v15  ;;  %20475 = vmatprep.subr.bf16.mxu0 %v21716_v16  ;;  %v21739_v47 = vld [vmem:[%s30181_s2 + $0x1b0] sm:$0xff]   ;;  %v21743_v51 = vld [vmem:[%s30181_s2 + $0x1a8] sm:$0xff]   ;;  %v21746_v54 = vld [vmem:[%s30181_s2 + $0x120] sm:$0xff]  }
  0x28   : > { %20497 = vmatprep.subr.bf16.mxu1 %v21717_v17  ;;  %v21747_v55 = vld [vmem:[%s30181_s2 + $0x1a0] sm:$0xff]   ;;  %v21748_v56 = vld [vmem:[%s30181_s2 + $0x158] sm:$0xff]   ;;  %v21752_v60 = vld [vmem:[%s30181_s2 + $0x150] sm:$0xff]  }
  0x29   : > { %v21749_v57 = vld [vmem:[%s30181_s2 + $0x1d8] sm:$0xff]   ;;  %v21753_v61 = vld [vmem:[%s30181_s2 + $0x1d0] sm:$0xff]   ;;  %v21756_v0 = vld [vmem:[%s30181_s2 + $0x148] sm:$0xff]  }
  0x2a   : > { %20476 = vmatpush3.bf16.msra.mxu0 %v21718_v18  ;;  %v21750_v58 = vld [vmem:[%s30181_s2 + $0x118] sm:$0xff]   ;;  %v21754_v62 = vld [vmem:[%s30181_s2 + $0x110] sm:$0xff]   ;;  %v21757_v1 = vld [vmem:[%s30181_s2 + $0x1c8] sm:$0xff]  }
  0x2b   : > { %20498 = vmatpush3.bf16.msra.mxu1 %v21719_v19  ;;  %20477 = vmatprep.subr.bf16.mxu0 %v21720_v20  ;;  %v21751_v59 = vld [vmem:[%s30181_s2 + $0x198] sm:$0xff]   ;;  %v21755_v63 = vld [vmem:[%s30181_s2 + $0x190] sm:$0xff]   ;;  %v21758_v2 = vld [vmem:[%s30181_s2 + $0x108] sm:$0xff]  }
  0x2c   : > { %20499 = vmatprep.subr.bf16.mxu1 %v21721_v21  ;;  %v21759_v3 = vld [vmem:[%s30181_s2 + $0x188] sm:$0xff]   ;;  %v21760_v4 = vld [vmem:[%s30181_s2 + $0x140] sm:$0xff]   ;;  %v21764_v8 = vld [vmem:[%s30181_s2 + $0x278] sm:$0xff]  }
  0x2d   : > { %v21761_v5 = vld [vmem:[%s30181_s2 + $0x1c0] sm:$0xff]   ;;  %v21765_v9 = vld [vmem:[%s30181_s2 + $0x2f8] sm:$0xff]   ;;  %v21768_v12 = vld [vmem:[%s30181_s2 + $0x270] sm:$0xff]  }
  0x2e   : > { %20478 = vmatpush3.bf16.msra.mxu0 %v21722_v22  ;;  %v21762_v6 = vld [vmem:[%s30181_s2 + $0x100] sm:$0xff]   ;;  %v21766_v10 = vld [vmem:[%s30181_s2 + $0x238] sm:$0xff]   ;;  %v21769_v13 = vld [vmem:[%s30181_s2 + $0x2f0] sm:$0xff]  }
  0x2f   : > { %20500 = vmatpush3.bf16.msra.mxu1 %v21723_v23  ;;  %20479 = vmatprep.subr.bf16.mxu0 %v21724_v24  ;;  %v21763_v7 = vld [vmem:[%s30181_s2 + $0x180] sm:$0xff]   ;;  %v21767_v11 = vld [vmem:[%s30181_s2 + $0x2b8] sm:$0xff]   ;;  %v21770_v14 = vld [vmem:[%s30181_s2 + $0x230] sm:$0xff]  }
  0x30   : > { %20501 = vmatprep.subr.bf16.mxu1 %v21725_v25  ;;  %v21771_v15 = vld [vmem:[%s30181_s2 + $0x2b0] sm:$0xff]   ;;  %v21772_v16 = vld [vmem:[%s30181_s2 + $0x268] sm:$0xff]   ;;  %v21776_v20 = vld [vmem:[%s30181_s2 + $0x260] sm:$0xff]  }
  0x31   : > { %v21773_v17 = vld [vmem:[%s30181_s2 + $0x2e8] sm:$0xff]   ;;  %v21777_v21 = vld [vmem:[%s30181_s2 + $0x2e0] sm:$0xff]   ;;  %v21780_v24 = vld [vmem:[%s30181_s2 + $0x258] sm:$0xff]  }
  0x32   : > { %20480 = vmatpush3.bf16.msra.mxu0 %v21726_v26  ;;  %v21774_v18 = vld [vmem:[%s30181_s2 + $0x228] sm:$0xff]   ;;  %v21778_v22 = vld [vmem:[%s30181_s2 + $0x220] sm:$0xff]   ;;  %v21781_v25 = vld [vmem:[%s30181_s2 + $0x2d8] sm:$0xff]  }
  0x33   : > { %20502 = vmatpush3.bf16.msra.mxu1 %v21727_v27  ;;  %20481 = vmatprep.subr.bf16.mxu0 %v21728_v28  ;;  %v21775_v19 = vld [vmem:[%s30181_s2 + $0x2a8] sm:$0xff]   ;;  %v21779_v23 = vld [vmem:[%s30181_s2 + $0x2a0] sm:$0xff]   ;;  %v21782_v26 = vld [vmem:[%s30181_s2 + $0x218] sm:$0xff]  }
  0x34   : > { %20503 = vmatprep.subr.bf16.mxu1 %v21729_v29  ;;  %v21783_v27 = vld [vmem:[%s30181_s2 + $0x298] sm:$0xff]   ;;  %v21784_v28 = vld [vmem:[%s30181_s2 + $0x250] sm:$0xff]   ;;  %v21788_v32 = vld [vmem:[%s30181_s2 + $0x248] sm:$0xff]  }
  0x35   : > { %v21785_v29 = vld [vmem:[%s30181_s2 + $0x2d0] sm:$0xff]   ;;  %v21789_v33 = vld [vmem:[%s30181_s2 + $0x2c8] sm:$0xff]  }
  0x36   : > { %20482 = vmatpush3.bf16.msra.mxu0 %v21730_v30  ;;  %v21786_v30 = vld [vmem:[%s30181_s2 + $0x210] sm:$0xff]   ;;  %v21790_v34 = vld [vmem:[%s30181_s2 + $0x208] sm:$0xff]  }
  0x37   : > { %20504 = vmatpush3.bf16.msra.mxu1 %v21731_v31  ;;  %20511 = vmatprep.subr.bf16.mxu0 %v21732_v40  ;;  %v21787_v31 = vld [vmem:[%s30181_s2 + $0x290] sm:$0xff]   ;;  %v21791_v38 = vld [vmem:[%s30181_s2 + $0x288] sm:$0xff]   ;;  %v21792_v40 = vld [vmem:[%s30181_s2 + $0x240] sm:$0xff]  }
  0x38   : > { %20533 = vmatprep.subr.bf16.mxu1 %v21733_v41  ;;  %v21793_v41 = vld [vmem:[%s30181_s2 + $0x2c0] sm:$0xff]  }
  0x39   : > { %1106 = vmatmul.mubr.bf16.vlgmr.msra.gmra.mxu0 %v23778_v37 }
  0x3a   : > { %1146 = vmatmul.mubr.bf16.vlgmr.msra.gmra.mxu1 %v23781_v39  ;;  %20512 = vmatpush3.bf16.msra.mxu0 %v21734_v42  ;;  %v21794_v42 = vld [vmem:[%s30181_s2 + $0x200] sm:$0xff]  }
  0x3b   : > { %1377 = vmatprep.mubr.bf16.mxu0 %v23774_v35  ;;  %20534 = vmatpush3.bf16.msra.mxu1 %v21735_v43  ;;  %v21795_v43 = vld [vmem:[%s30181_s2 + $0x280] sm:$0xff]  }
  0x3c   : > { %1417 = vmatprep.mubr.bf16.mxu1 %v23776_v36  ;;  %20513 = vmatprep.subr.bf16.mxu0 %v21736_v44  ;;  %v21796_v44 = vld [vmem:[%s30181_s2 + $0x378] sm:$0xff]  }
  0x3d   : > { %20535 = vmatprep.subr.bf16.mxu1 %v21737_v45  ;;  %v21797_v45 = vld [vmem:[%s30181_s2 + $0x3f8] sm:$0xff]  }
  0x3e   : > { %20514 = vmatpush3.bf16.msra.mxu0 %v21738_v46  ;;  %v21798_v46 = vld [vmem:[%s30181_s2 + $0x338] sm:$0xff]  }
  0x3f   : > { %20536 = vmatpush3.bf16.msra.mxu1 %v21739_v47  ;;  %20515 = vmatprep.subr.bf16.mxu0 %v21740_v48  ;;  %v21799_v47 = vld [vmem:[%s30181_s2 + $0x3b8] sm:$0xff]   ;;  %v21800_v48 = vld [vmem:[%s30181_s2 + $0x370] sm:$0xff]  }
  0x40   : > { %20537 = vmatprep.subr.bf16.mxu1 %v21741_v49  ;;  %v21801_v49 = vld [vmem:[%s30181_s2 + $0x3f0] sm:$0xff]  }
  0x42   : > { %20516 = vmatpush3.bf16.msra.mxu0 %v21742_v50  ;;  %v21802_v50 = vld [vmem:[%s30181_s2 + $0x330] sm:$0xff]  }
  0x43   : > { %20538 = vmatpush3.bf16.msra.mxu1 %v21743_v51  ;;  %20517 = vmatprep.subr.bf16.mxu0 %v21744_v52  ;;  %v21803_v51 = vld [vmem:[%s30181_s2 + $0x3b0] sm:$0xff]   ;;  %v21804_v52 = vld [vmem:[%s30181_s2 + $0x368] sm:$0xff]  }
  0x44   : > { %20539 = vmatprep.subr.bf16.mxu1 %v21745_v53  ;;  %v21805_v53 = vld [vmem:[%s30181_s2 + $0x3e8] sm:$0xff]  }
  0x46   : > { %20518 = vmatpush3.bf16.msra.mxu0 %v21746_v54  ;;  %v21806_v54 = vld [vmem:[%s30181_s2 + $0x328] sm:$0xff]  }
  0x47   : > { %20540 = vmatpush3.bf16.msra.mxu1 %v21747_v55  ;;  %20519 = vmatprep.subr.bf16.mxu0 %v21748_v56  ;;  %v21807_v55 = vld [vmem:[%s30181_s2 + $0x3a8] sm:$0xff]   ;;  %v21808_v56 = vld [vmem:[%s30181_s2 + $0x360] sm:$0xff]  }
  0x48   : > { %20541 = vmatprep.subr.bf16.mxu1 %v21749_v57  ;;  %v21809_v57 = vld [vmem:[%s30181_s2 + $0x3e0] sm:$0xff]  }
  0x4a   : > { %20520 = vmatpush3.bf16.msra.mxu0 %v21750_v58  ;;  %v21810_v58 = vld [vmem:[%s30181_s2 + $0x320] sm:$0xff]  }
  0x4b   : > { %20542 = vmatpush3.bf16.msra.mxu1 %v21751_v59  ;;  %20521 = vmatprep.subr.bf16.mxu0 %v21752_v60  ;;  %v21811_v59 = vld [vmem:[%s30181_s2 + $0x3a0] sm:$0xff]   ;;  %v21812_v60 = vld [vmem:[%s30181_s2 + $0x358] sm:$0xff]  }
  0x4c   : > { %20543 = vmatprep.subr.bf16.mxu1 %v21753_v61  ;;  %v21813_v61 = vld [vmem:[%s30181_s2 + $0x3d8] sm:$0xff]  }
  0x4e   : > { %20522 = vmatpush3.bf16.msra.mxu0 %v21754_v62  ;;  %v21814_v62 = vld [vmem:[%s30181_s2 + $0x318] sm:$0xff]  }
  0x4f   : > { %20544 = vmatpush3.bf16.msra.mxu1 %v21755_v63  ;;  %20523 = vmatprep.subr.bf16.mxu0 %v21756_v0  ;;  %v21815_v63 = vld [vmem:[%s30181_s2 + $0x398] sm:$0xff]   ;;  %v21816_v0 = vld [vmem:[%s30181_s2 + $0x350] sm:$0xff]  }
  0x50   : > { %20545 = vmatprep.subr.bf16.mxu1 %v21757_v1  ;;  %v21817_v1 = vld [vmem:[%s30181_s2 + $0x3d0] sm:$0xff]  }
  0x52   : > { %20524 = vmatpush3.bf16.msra.mxu0 %v21758_v2  ;;  %v21818_v2 = vld [vmem:[%s30181_s2 + $0x310] sm:$0xff]  }
  0x53   : > { %20546 = vmatpush3.bf16.msra.mxu1 %v21759_v3  ;;  %20525 = vmatprep.subr.bf16.mxu0 %v21760_v4  ;;  %v21819_v3 = vld [vmem:[%s30181_s2 + $0x390] sm:$0xff]   ;;  %v21820_v4 = vld [vmem:[%s30181_s2 + $0x348] sm:$0xff]  }
  0x54   : > { %20547 = vmatprep.subr.bf16.mxu1 %v21761_v5  ;;  %v21821_v5 = vld [vmem:[%s30181_s2 + $0x3c8] sm:$0xff]  }
  0x56   : > { %20526 = vmatpush3.bf16.msra.mxu0 %v21762_v6  ;;  %v21822_v6 = vld [vmem:[%s30181_s2 + $0x308] sm:$0xff]  }
  0x57   : > { %20548 = vmatpush3.bf16.msra.mxu1 %v21763_v7  ;;  %20555 = vmatprep.subr.bf16.mxu0 %v21764_v8  ;;  %v21823_v7 = vld [vmem:[%s30181_s2 + $0x388] sm:$0xff]   ;;  %v21824_v8 = vld [vmem:[%s30181_s2 + $0x340] sm:$0xff]  }
  0x58   : > { %20577 = vmatprep.subr.bf16.mxu1 %v21765_v9  ;;  %v21825_v9 = vld [vmem:[%s30181_s2 + $0x3c0] sm:$0xff]  }
  0x59   : > { %1378 = vmatmul.mubr.bf16.vlgmr.msra.gmra.mxu0 %v23778_v37 }
  0x5a   : > { %1418 = vmatmul.mubr.bf16.vlgmr.msra.gmra.mxu1 %v23781_v39  ;;  %20556 = vmatpush3.bf16.msra.mxu0 %v21766_v10  ;;  %v21826_v10 = vld [vmem:[%s30181_s2 + $0x300] sm:$0xff]  }
  0x5b   : > { %20578 = vmatpush3.bf16.msra.mxu1 %v21767_v11  ;;  %1649 = vmatprep.mubr.bf16.mxu0 %v23774_v35  ;;  %v21827_v11 = vld [vmem:[%s30181_s2 + $0x380] sm:$0xff]  }
  0x5c   : > { %20557 = vmatprep.subr.bf16.mxu0 %v21768_v12  ;;  %1689 = vmatprep.mubr.bf16.mxu1 %v23776_v36  ;;  %v21828_v12 = vld [vmem:[%s30181_s2 + $0x478] sm:$0xff]  }
  0x5d   : > { %20579 = vmatprep.subr.bf16.mxu1 %v21769_v13  ;;  %v21829_v13 = vld [vmem:[%s30181_s2 + $0x4f8] sm:$0xff]  }
  0x5e   : > { %20558 = vmatpush3.bf16.msra.mxu0 %v21770_v14  ;;  %v21830_v14 = vld [vmem:[%s30181_s2 + $0x438] sm:$0xff]  }
  0x5f   : > { %20580 = vmatpush3.bf16.msra.mxu1 %v21771_v15  ;;  %20559 = vmatprep.subr.bf16.mxu0 %v21772_v16  ;;  %v21831_v15 = vld [vmem:[%s30181_s2 + $0x4b8] sm:$0xff]   ;;  %v21832_v16 = vld [vmem:[%s30181_s2 + $0x470] sm:$0xff]  }
  0x60   : > { %20581 = vmatprep.subr.bf16.mxu1 %v21773_v17  ;;  %v21833_v17 = vld [vmem:[%s30181_s2 + $0x4f0] sm:$0xff]  }
  0x62   : > { %20560 = vmatpush3.bf16.msra.mxu0 %v21774_v18  ;;  %v21834_v18 = vld [vmem:[%s30181_s2 + $0x430] sm:$0xff]  }
  0x63   : > { %20582 = vmatpush3.bf16.msra.mxu1 %v21775_v19  ;;  %20561 = vmatprep.subr.bf16.mxu0 %v21776_v20  ;;  %v21835_v19 = vld [vmem:[%s30181_s2 + $0x4b0] sm:$0xff]   ;;  %v21836_v20 = vld [vmem:[%s30181_s2 + $0x468] sm:$0xff]  }
  0x64   : > { %20583 = vmatprep.subr.bf16.mxu1 %v21777_v21  ;;  %v21837_v21 = vld [vmem:[%s30181_s2 + $0x4e8] sm:$0xff]  }
  0x66   : > { %20562 = vmatpush3.bf16.msra.mxu0 %v21778_v22  ;;  %v21838_v22 = vld [vmem:[%s30181_s2 + $0x428] sm:$0xff]  }
  0x67   : > { %20584 = vmatpush3.bf16.msra.mxu1 %v21779_v23  ;;  %20563 = vmatprep.subr.bf16.mxu0 %v21780_v24  ;;  %v21839_v23 = vld [vmem:[%s30181_s2 + $0x4a8] sm:$0xff]   ;;  %v21840_v24 = vld [vmem:[%s30181_s2 + $0x460] sm:$0xff]  }
  0x68   : > { %20585 = vmatprep.subr.bf16.mxu1 %v21781_v25  ;;  %v21841_v25 = vld [vmem:[%s30181_s2 + $0x4e0] sm:$0xff]  }
  0x6a   : > { %20564 = vmatpush3.bf16.msra.mxu0 %v21782_v26  ;;  %v21842_v26 = vld [vmem:[%s30181_s2 + $0x420] sm:$0xff]  }
  0x6b   : > { %20586 = vmatpush3.bf16.msra.mxu1 %v21783_v27  ;;  %20565 = vmatprep.subr.bf16.mxu0 %v21784_v28  ;;  %v21843_v27 = vld [vmem:[%s30181_s2 + $0x4a0] sm:$0xff]   ;;  %v21844_v28 = vld [vmem:[%s30181_s2 + $0x458] sm:$0xff]  }
  0x6c   : > { %20587 = vmatprep.subr.bf16.mxu1 %v21785_v29  ;;  %v21845_v29 = vld [vmem:[%s30181_s2 + $0x4d8] sm:$0xff]  }
  0x6e   : > { %20566 = vmatpush3.bf16.msra.mxu0 %v21786_v30  ;;  %v21846_v30 = vld [vmem:[%s30181_s2 + $0x418] sm:$0xff]  }
  0x6f   : > { %20588 = vmatpush3.bf16.msra.mxu1 %v21787_v31  ;;  %20567 = vmatprep.subr.bf16.mxu0 %v21788_v32  ;;  %v21847_v31 = vld [vmem:[%s30181_s2 + $0x498] sm:$0xff]   ;;  %v21848_v32 = vld [vmem:[%s30181_s2 + $0x450] sm:$0xff]  }
  0x70   : > { %20589 = vmatprep.subr.bf16.mxu1 %v21789_v33  ;;  %v21849_v33 = vld [vmem:[%s30181_s2 + $0x4d0] sm:$0xff]  }
  0x72   : > { %20568 = vmatpush3.bf16.msra.mxu0 %v21790_v34  ;;  %v21850_v34 = vld [vmem:[%s30181_s2 + $0x410] sm:$0xff]  }
  0x73   : > { %20590 = vmatpush3.bf16.msra.mxu1 %v21791_v38  ;;  %20569 = vmatprep.subr.bf16.mxu0 %v21792_v40  ;;  %v21851_v38 = vld [vmem:[%s30181_s2 + $0x490] sm:$0xff]   ;;  %v21852_v40 = vld [vmem:[%s30181_s2 + $0x448] sm:$0xff]  }
  0x74   : > { %20591 = vmatprep.subr.bf16.mxu1 %v21793_v41  ;;  %v21853_v41 = vld [vmem:[%s30181_s2 + $0x4c8] sm:$0xff]  }
  0x76   : > { %20570 = vmatpush3.bf16.msra.mxu0 %v21794_v42  ;;  %v21854_v42 = vld [vmem:[%s30181_s2 + $0x408] sm:$0xff]  }
  0x77   : > { %20592 = vmatpush3.bf16.msra.mxu1 %v21795_v43  ;;  %20599 = vmatprep.subr.bf16.mxu0 %v21796_v44  ;;  %v21855_v43 = vld [vmem:[%s30181_s2 + $0x488] sm:$0xff]   ;;  %v21856_v44 = vld [vmem:[%s30181_s2 + $0x440] sm:$0xff]  }
  0x78   : > { %20621 = vmatprep.subr.bf16.mxu1 %v21797_v45  ;;  %v21857_v45 = vld [vmem:[%s30181_s2 + $0x4c0] sm:$0xff]  }
  0x79   : > { %1650 = vmatmul.mubr.bf16.vlgmr.msra.gmra.mxu0 %v23778_v37 }
  0x7a   : > { %1690 = vmatmul.mubr.bf16.vlgmr.msra.gmra.mxu1 %v23781_v39  ;;  %20600 = vmatpush3.bf16.msra.mxu0 %v21798_v46  ;;  %v21858_v46 = vld [vmem:[%s30181_s2 + $0x400] sm:$0xff]  }
  0x7b   : > { %20622 = vmatpush3.bf16.msra.mxu1 %v21799_v47  ;;  %1921 = vmatprep.mubr.bf16.mxu0 %v23774_v35  ;;  %v21859_v47 = vld [vmem:[%s30181_s2 + $0x480] sm:$0xff]  }
  0x7c   : > { %20601 = vmatprep.subr.bf16.mxu0 %v21800_v48  ;;  %1961 = vmatprep.mubr.bf16.mxu1 %v23776_v36  ;;  %v21860_v48 = vld [vmem:[%s30181_s2 + $0x578] sm:$0xff]  }
  0x7d   : > { %20623 = vmatprep.subr.bf16.mxu1 %v21801_v49  ;;  %v21861_v49 = vld [vmem:[%s30181_s2 + $0x5f8] sm:$0xff]  }
  0x7e   : > { %20602 = vmatpush3.bf16.msra.mxu0 %v21802_v50  ;;  %v21862_v50 = vld [vmem:[%s30181_s2 + $0x538] sm:$0xff]  }
  0x7f   : > { %20624 = vmatpush3.bf16.msra.mxu1 %v21803_v51  ;;  %20603 = vmatprep.subr.bf16.mxu0 %v21804_v52  ;;  %v21863_v51 = vld [vmem:[%s30181_s2 + $0x5b8] sm:$0xff]   ;;  %v21864_v52 = vld [vmem:[%s30181_s2 + $0x570] sm:$0xff]  }
  0x80   : > { %20625 = vmatprep.subr.bf16.mxu1 %v21805_v53  ;;  %v21865_v53 = vld [vmem:[%s30181_s2 + $0x5f0] sm:$0xff]  }
  0x82   : > { %20604 = vmatpush3.bf16.msra.mxu0 %v21806_v54  ;;  %v21866_v54 = vld [vmem:[%s30181_s2 + $0x530] sm:$0xff]  }
  0x83   : > { %20626 = vmatpush3.bf16.msra.mxu1 %v21807_v55  ;;  %20605 = vmatprep.subr.bf16.mxu0 %v21808_v56  ;;  %v21867_v55 = vld [vmem:[%s30181_s2 + $0x5b0] sm:$0xff]   ;;  %v21868_v56 = vld [vmem:[%s30181_s2 + $0x568] sm:$0xff]  }
  0x84   : > { %20627 = vmatprep.subr.bf16.mxu1 %v21809_v57  ;;  %v21869_v57 = vld [vmem:[%s30181_s2 + $0x5e8] sm:$0xff]  }
  0x86   : > { %20606 = vmatpush3.bf16.msra.mxu0 %v21810_v58  ;;  %v21870_v58 = vld [vmem:[%s30181_s2 + $0x528] sm:$0xff]  }
  0x87   : > { %20628 = vmatpush3.bf16.msra.mxu1 %v21811_v59  ;;  %20607 = vmatprep.subr.bf16.mxu0 %v21812_v60  ;;  %v21871_v59 = vld [vmem:[%s30181_s2 + $0x5a8] sm:$0xff]   ;;  %v21872_v60 = vld [vmem:[%s30181_s2 + $0x560] sm:$0xff]  }
  0x88   : > { %20629 = vmatprep.subr.bf16.mxu1 %v21813_v61  ;;  %v21873_v61 = vld [vmem:[%s30181_s2 + $0x5e0] sm:$0xff]  }
  0x8a   : > { %20608 = vmatpush3.bf16.msra.mxu0 %v21814_v62  ;;  %v21874_v62 = vld [vmem:[%s30181_s2 + $0x520] sm:$0xff]  }
  0x8b   : > { %20630 = vmatpush3.bf16.msra.mxu1 %v21815_v63  ;;  %20609 = vmatprep.subr.bf16.mxu0 %v21816_v0  ;;  %v21875_v63 = vld [vmem:[%s30181_s2 + $0x5a0] sm:$0xff]   ;;  %v21876_v0 = vld [vmem:[%s30181_s2 + $0x558] sm:$0xff]  }
  0x8c   : > { %20631 = vmatprep.subr.bf16.mxu1 %v21817_v1  ;;  %v21877_v1 = vld [vmem:[%s30181_s2 + $0x5d8] sm:$0xff]  }
  0x8e   : > { %20610 = vmatpush3.bf16.msra.mxu0 %v21818_v2  ;;  %v21878_v2 = vld [vmem:[%s30181_s2 + $0x518] sm:$0xff]  }
  0x8f   : > { %20632 = vmatpush3.bf16.msra.mxu1 %v21819_v3  ;;  %20611 = vmatprep.subr.bf16.mxu0 %v21820_v4  ;;  %v21879_v3 = vld [vmem:[%s30181_s2 + $0x598] sm:$0xff]   ;;  %v21880_v4 = vld [vmem:[%s30181_s2 + $0x550] sm:$0xff]  }
  0x90   : > { %20633 = vmatprep.subr.bf16.mxu1 %v21821_v5  ;;  %v21881_v5 = vld [vmem:[%s30181_s2 + $0x5d0] sm:$0xff]  }
  0x92   : > { %20612 = vmatpush3.bf16.msra.mxu0 %v21822_v6  ;;  %v21882_v6 = vld [vmem:[%s30181_s2 + $0x510] sm:$0xff]  }
  0x93   : > { %20634 = vmatpush3.bf16.msra.mxu1 %v21823_v7  ;;  %20613 = vmatprep.subr.bf16.mxu0 %v21824_v8  ;;  %v21883_v7 = vld [vmem:[%s30181_s2 + $0x590] sm:$0xff]   ;;  %v21884_v8 = vld [vmem:[%s30181_s2 + $0x548] sm:$0xff]  }
  0x94   : > { %20635 = vmatprep.subr.bf16.mxu1 %v21825_v9  ;;  %v21885_v9 = vld [vmem:[%s30181_s2 + $0x5c8] sm:$0xff]  }
  0x96   : > { %20614 = vmatpush3.bf16.msra.mxu0 %v21826_v10  ;;  %v21886_v10 = vld [vmem:[%s30181_s2 + $0x508] sm:$0xff]  }
  0x97   : > { %20636 = vmatpush3.bf16.msra.mxu1 %v21827_v11  ;;  %20643 = vmatprep.subr.bf16.mxu0 %v21828_v12  ;;  %v21887_v11 = vld [vmem:[%s30181_s2 + $0x588] sm:$0xff]   ;;  %v21888_v12 = vld [vmem:[%s30181_s2 + $0x540] sm:$0xff]  }
  0x98   : > { %20665 = vmatprep.subr.bf16.mxu1 %v21829_v13  ;;  %v21889_v13 = vld [vmem:[%s30181_s2 + $0x5c0] sm:$0xff]  }
  0x99   : > { %1922 = vmatmul.mubr.bf16.vlgmr.msra.gmra.mxu0 %v23778_v37 }
  0x9a   : > { %1962 = vmatmul.mubr.bf16.vlgmr.msra.gmra.mxu1 %v23781_v39  ;;  %20644 = vmatpush3.bf16.msra.mxu0 %v21830_v14  ;;  %v21890_v14 = vld [vmem:[%s30181_s2 + $0x500] sm:$0xff]  }
  0x9b   : > { %20666 = vmatpush3.bf16.msra.mxu1 %v21831_v15  ;;  %2193 = vmatprep.mubr.bf16.mxu0 %v23774_v35  ;;  %v21891_v15 = vld [vmem:[%s30181_s2 + $0x580] sm:$0xff]  }
  0x9c   : > { %20645 = vmatprep.subr.bf16.mxu0 %v21832_v16  ;;  %2233 = vmatprep.mubr.bf16.mxu1 %v23776_v36  ;;  %v21892_v16 = vld [vmem:[%s30181_s2 + $0x678] sm:$0xff]  }
  0x9d   : > { %20667 = vmatprep.subr.bf16.mxu1 %v21833_v17  ;;  %v21893_v17 = vld [vmem:[%s30181_s2 + $0x6f8] sm:$0xff]  }
  0x9e   : > { %20646 = vmatpush3.bf16.msra.mxu0 %v21834_v18  ;;  %v21894_v18 = vld [vmem:[%s30181_s2 + $0x638] sm:$0xff]  }
  0x9f   : > { %20668 = vmatpush3.bf16.msra.mxu1 %v21835_v19  ;;  %20647 = vmatprep.subr.bf16.mxu0 %v21836_v20  ;;  %v21895_v19 = vld [vmem:[%s30181_s2 + $0x6b8] sm:$0xff]   ;;  %v21896_v20 = vld [vmem:[%s30181_s2 + $0x670] sm:$0xff]  }
  0xa0   : > { %20669 = vmatprep.subr.bf16.mxu1 %v21837_v21  ;;  %v21897_v21 = vld [vmem:[%s30181_s2 + $0x6f0] sm:$0xff]  }
  0xa2   : > { %20648 = vmatpush3.bf16.msra.mxu0 %v21838_v22  ;;  %v21898_v22 = vld [vmem:[%s30181_s2 + $0x630] sm:$0xff]  }
  0xa3   : > { %20670 = vmatpush3.bf16.msra.mxu1 %v21839_v23  ;;  %20649 = vmatprep.subr.bf16.mxu0 %v21840_v24  ;;  %v21899_v23 = vld [vmem:[%s30181_s2 + $0x6b0] sm:$0xff]   ;;  %v21900_v24 = vld [vmem:[%s30181_s2 + $0x668] sm:$0xff]  }
  0xa4   : > { %20671 = vmatprep.subr.bf16.mxu1 %v21841_v25  ;;  %v21901_v25 = vld [vmem:[%s30181_s2 + $0x6e8] sm:$0xff]  }
  0xa6   : > { %20650 = vmatpush3.bf16.msra.mxu0 %v21842_v26  ;;  %v21902_v26 = vld [vmem:[%s30181_s2 + $0x628] sm:$0xff]  }
  0xa7   : > { %20672 = vmatpush3.bf16.msra.mxu1 %v21843_v27  ;;  %20651 = vmatprep.subr.bf16.mxu0 %v21844_v28  ;;  %v21903_v27 = vld [vmem:[%s30181_s2 + $0x6a8] sm:$0xff]   ;;  %v21904_v28 = vld [vmem:[%s30181_s2 + $0x660] sm:$0xff]  }
  0xa8   : > { %20673 = vmatprep.subr.bf16.mxu1 %v21845_v29  ;;  %v21905_v29 = vld [vmem:[%s30181_s2 + $0x6e0] sm:$0xff]  }
  0xaa   : > { %20652 = vmatpush3.bf16.msra.mxu0 %v21846_v30  ;;  %v21906_v30 = vld [vmem:[%s30181_s2 + $0x620] sm:$0xff]  }
  0xab   : > { %20674 = vmatpush3.bf16.msra.mxu1 %v21847_v31  ;;  %20653 = vmatprep.subr.bf16.mxu0 %v21848_v32  ;;  %v21907_v31 = vld [vmem:[%s30181_s2 + $0x6a0] sm:$0xff]   ;;  %v21908_v32 = vld [vmem:[%s30181_s2 + $0x658] sm:$0xff]  }
  0xac   : > { %20675 = vmatprep.subr.bf16.mxu1 %v21849_v33  ;;  %v21909_v33 = vld [vmem:[%s30181_s2 + $0x6d8] sm:$0xff]  }
  0xae   : > { %20654 = vmatpush3.bf16.msra.mxu0 %v21850_v34  ;;  %v21910_v34 = vld [vmem:[%s30181_s2 + $0x618] sm:$0xff]  }
  0xaf   : > { %20676 = vmatpush3.bf16.msra.mxu1 %v21851_v38  ;;  %20655 = vmatprep.subr.bf16.mxu0 %v21852_v40  ;;  %v21911_v38 = vld [vmem:[%s30181_s2 + $0x698] sm:$0xff]   ;;  %v21912_v40 = vld [vmem:[%s30181_s2 + $0x650] sm:$0xff]  }
  0xb0   : > { %20677 = vmatprep.subr.bf16.mxu1 %v21853_v41  ;;  %v21913_v41 = vld [vmem:[%s30181_s2 + $0x6d0] sm:$0xff]  }
  0xb2   : > { %20656 = vmatpush3.bf16.msra.mxu0 %v21854_v42  ;;  %v21914_v42 = vld [vmem:[%s30181_s2 + $0x610] sm:$0xff]  }
  0xb3   : > { %20678 = vmatpush3.bf16.msra.mxu1 %v21855_v43  ;;  %20657 = vmatprep.subr.bf16.mxu0 %v21856_v44  ;;  %v21915_v43 = vld [vmem:[%s30181_s2 + $0x690] sm:$0xff]   ;;  %v21916_v44 = vld [vmem:[%s30181_s2 + $0x648] sm:$0xff]  }
  0xb4   : > { %20679 = vmatprep.subr.bf16.mxu1 %v21857_v45  ;;  %v21917_v45 = vld [vmem:[%s30181_s2 + $0x6c8] sm:$0xff]  }
  0xb6   : > { %20658 = vmatpush3.bf16.msra.mxu0 %v21858_v46  ;;  %v21918_v46 = vld [vmem:[%s30181_s2 + $0x608] sm:$0xff]  }
  0xb7   : > { %20680 = vmatpush3.bf16.msra.mxu1 %v21859_v47  ;;  %20687 = vmatprep.subr.bf16.mxu0 %v21860_v48  ;;  %v21919_v47 = vld [vmem:[%s30181_s2 + $0x688] sm:$0xff]   ;;  %v21920_v48 = vld [vmem:[%s30181_s2 + $0x640] sm:$0xff]  }
  0xb8   : > { %20709 = vmatprep.subr.bf16.mxu1 %v21861_v49  ;;  %v21921_v49 = vld [vmem:[%s30181_s2 + $0x6c0] sm:$0xff]  }
  0xb9   : > { %2194 = vmatmul.mubr.bf16.vlgmr.msra.gmra.mxu0 %v23778_v37 }
  0xba   : > { %2234 = vmatmul.mubr.bf16.vlgmr.msra.gmra.mxu1 %v23781_v39  ;;  %20688 = vmatpush3.bf16.msra.mxu0 %v21862_v50  ;;  %v21922_v50 = vld [vmem:[%s30181_s2 + $0x600] sm:$0xff]  }
  0xbb   : > { %20710 = vmatpush3.bf16.msra.mxu1 %v21863_v51  ;;  %2465 = vmatprep.mubr.bf16.mxu0 %v23774_v35  ;;  %v21923_v51 = vld [vmem:[%s30181_s2 + $0x680] sm:$0xff]  }
  0xbc   : > { %20689 = vmatprep.subr.bf16.mxu0 %v21864_v52  ;;  %2505 = vmatprep.mubr.bf16.mxu1 %v23776_v36  ;;  %v21924_v52 = vld [vmem:[%s30181_s2 + $0x778] sm:$0xff]  }
  0xbd   : > { %20711 = vmatprep.subr.bf16.mxu1 %v21865_v53  ;;  %v21925_v53 = vld [vmem:[%s30181_s2 + $0x7f8] sm:$0xff]  }
  0xbe   : > { %20690 = vmatpush3.bf16.msra.mxu0 %v21866_v54 }
  0xbf   : > { %20712 = vmatpush3.bf16.msra.mxu1 %v21867_v55  ;;  %20691 = vmatprep.subr.bf16.mxu0 %v21868_v56  ;;  %v21926_v56 = vld [vmem:[%s30181_s2 + $0x738] sm:$0xff]  }
  0xc0   : > { %20713 = vmatprep.subr.bf16.mxu1 %v21869_v57  ;;  %v21927_v57 = vld [vmem:[%s30181_s2 + $0x7b8] sm:$0xff]  }
  0xc2   : > { %20692 = vmatpush3.bf16.msra.mxu0 %v21870_v58 }
  0xc3   : > { %20714 = vmatpush3.bf16.msra.mxu1 %v21871_v59  ;;  %20693 = vmatprep.subr.bf16.mxu0 %v21872_v60  ;;  %v21928_v60 = vld [vmem:[%s30181_s2 + $0x770] sm:$0xff]  }
  0xc4   : > { %20715 = vmatprep.subr.bf16.mxu1 %v21873_v61 }
  0xc6   : > { %20694 = vmatpush3.bf16.msra.mxu0 %v21874_v62 }
  0xc7   : > { %20716 = vmatpush3.bf16.msra.mxu1 %v21875_v63  ;;  %20695 = vmatprep.subr.bf16.mxu0 %v21876_v0  ;;  %v21929_v63 = vld [vmem:[%s30181_s2 + $0x7f0] sm:$0xff]  }
  0xc8   : > { %20717 = vmatprep.subr.bf16.mxu1 %v21877_v1  ;;  %v21930_v1 = vld [vmem:[%s30181_s2 + $0x730] sm:$0xff]  }
  0xca   : > { %20696 = vmatpush3.bf16.msra.mxu0 %v21878_v2 }
  0xcb   : > { %20718 = vmatpush3.bf16.msra.mxu1 %v21879_v3  ;;  %20697 = vmatprep.subr.bf16.mxu0 %v21880_v4  ;;  %v21931_v4 = vld [vmem:[%s30181_s2 + $0x7b0] sm:$0xff]  }
  0xcc   : > { %20719 = vmatprep.subr.bf16.mxu1 %v21881_v5 }
  0xce   : > { %20698 = vmatpush3.bf16.msra.mxu0 %v21882_v6  ;;  %v21932_v6 = vld [vmem:[%s30181_s2 + $0x768] sm:$0xff]  }
  0xcf   : > { %20720 = vmatpush3.bf16.msra.mxu1 %v21883_v7  ;;  %20699 = vmatprep.subr.bf16.mxu0 %v21884_v8  ;;  %v21933_v8 = vld [vmem:[%s30181_s2 + $0x7e8] sm:$0xff]  }
  0xd0   : > { %20721 = vmatprep.subr.bf16.mxu1 %v21885_v9  ;;  %v21934_v9 = vld [vmem:[%s30181_s2 + $0x728] sm:$0xff]  }
  0xd2   : > { %20700 = vmatpush3.bf16.msra.mxu0 %v21886_v10  ;;  %v21935_v10 = vld [vmem:[%s30181_s2 + $0x7a8] sm:$0xff]  }
  0xd3   : > { %20722 = vmatpush3.bf16.msra.mxu1 %v21887_v11  ;;  %20701 = vmatprep.subr.bf16.mxu0 %v21888_v12  ;;  %v21936_v11 = vld [vmem:[%s30181_s2 + $0x760] sm:$0xff]  }
  0xd4   : > { %20723 = vmatprep.subr.bf16.mxu1 %v21889_v13  ;;  %v21937_v12 = vld [vmem:[%s30181_s2 + $0x7e0] sm:$0xff]  }
  0xd5   : > { %v21938_v13 = vld [vmem:[%s30181_s2 + $0x720] sm:$0xff]  }
  0xd6   : > { %20702 = vmatpush3.bf16.msra.mxu0 %v21890_v14  ;;  %v21939_v14 = vld [vmem:[%s30181_s2 + $0x7a0] sm:$0xff]  }
  0xd7   : > { %20724 = vmatpush3.bf16.msra.mxu1 %v21891_v15  ;;  %20731 = vmatprep.subr.bf16.mxu0 %v21892_v16  ;;  %v21940_v15 = vld [vmem:[%s30181_s2 + $0x758] sm:$0xff]  }
  0xd8   : > { %20753 = vmatprep.subr.bf16.mxu1 %v21893_v17  ;;  %v21941_v16 = vld [vmem:[%s30181_s2 + $0x7d8] sm:$0xff]  }
  0xd9   : > { %2466 = vmatmul.mubr.bf16.vlgmr.msra.gmra.mxu0 %v23778_v37  ;;  %v21942_v17 = vld [vmem:[%s30181_s2 + $0x718] sm:$0xff]  }
  0xda   : > { %2506 = vmatmul.mubr.bf16.vlgmr.msra.gmra.mxu1 %v23781_v39  ;;  %20732 = vmatpush3.bf16.msra.mxu0 %v21894_v18  ;;  %v21943_v18 = vld [vmem:[%s30181_s2 + $0x798] sm:$0xff]  }
  0xdb   : > { %20754 = vmatpush3.bf16.msra.mxu1 %v21895_v19  ;;  %2737 = vmatprep.mubr.bf16.mxu0 %v23774_v35  ;;  %v21944_v19 = vld [vmem:[%s30181_s2 + $0x750] sm:$0xff]  }
  0xdc   : > { %20733 = vmatprep.subr.bf16.mxu0 %v21896_v20  ;;  %2777 = vmatprep.mubr.bf16.mxu1 %v23776_v36  ;;  %v21945_v20 = vld [vmem:[%s30181_s2 + $0x7d0] sm:$0xff]  }
  0xdd   : > { %20755 = vmatprep.subr.bf16.mxu1 %v21897_v21  ;;  %v21946_v21 = vld [vmem:[%s30181_s2 + $0x710] sm:$0xff]  }
  0xde   : > { %20734 = vmatpush3.bf16.msra.mxu0 %v21898_v22  ;;  %v21947_v22 = vld [vmem:[%s30181_s2 + $0x790] sm:$0xff]  }
  0xdf   : > { %20756 = vmatpush3.bf16.msra.mxu1 %v21899_v23  ;;  %20735 = vmatprep.subr.bf16.mxu0 %v21900_v24  ;;  %v21948_v23 = vld [vmem:[%s30181_s2 + $0x748] sm:$0xff]  }
  0xe0   : > { %20757 = vmatprep.subr.bf16.mxu1 %v21901_v25  ;;  %v21949_v24 = vld [vmem:[%s30181_s2 + $0x7c8] sm:$0xff]  }
  0xe1   : > { %v21950_v25 = vld [vmem:[%s30181_s2 + $0x708] sm:$0xff]  }
  0xe2   : > { %20736 = vmatpush3.bf16.msra.mxu0 %v21902_v26  ;;  %v21951_v26 = vld [vmem:[%s30181_s2 + $0x788] sm:$0xff]  }
  0xe3   : > { %20758 = vmatpush3.bf16.msra.mxu1 %v21903_v27  ;;  %20737 = vmatprep.subr.bf16.mxu0 %v21904_v28  ;;  %v21952_v27 = vld [vmem:[%s30181_s2 + $0x740] sm:$0xff]  }
  0xe4   : > { %20759 = vmatprep.subr.bf16.mxu1 %v21905_v29  ;;  %v21953_v28 = vld [vmem:[%s30181_s2 + $0x7c0] sm:$0xff]  }
  0xe5   : > { %v21954_v29 = vld [vmem:[%s30181_s2 + $0x700] sm:$0xff]  }
  0xe6   : > { %20738 = vmatpush3.bf16.msra.mxu0 %v21906_v30  ;;  %v21955_v30 = vld [vmem:[%s30181_s2 + $0x780] sm:$0xff]  }
  0xe7   : > { %20760 = vmatpush3.bf16.msra.mxu1 %v21907_v31  ;;  %20739 = vmatprep.subr.bf16.mxu0 %v21908_v32  ;;  %v21956_v31 = vld [vmem:[%s30182_s3 + $0x78] sm:$0xff]  }
  0xe8   : > { %20761 = vmatprep.subr.bf16.mxu1 %v21909_v33  ;;  %v21957_v32 = vld [vmem:[%s30182_s3 + $0xf8] sm:$0xff]  }
  0xe9   : > { %v21958_v33 = vld [vmem:[%s30182_s3 + $0x38] sm:$0xff]  }
  0xea   : > { %20740 = vmatpush3.bf16.msra.mxu0 %v21910_v34 }
  0xeb   : > { %20762 = vmatpush3.bf16.msra.mxu1 %v21911_v38  ;;  %20741 = vmatprep.subr.bf16.mxu0 %v21912_v40  ;;  %v21959_v38 = vld [vmem:[%s30182_s3 + $0xb8] sm:$0xff]  }
  0xec   : > { %20763 = vmatprep.subr.bf16.mxu1 %v21913_v41  ;;  %v21960_v41 = vld [vmem:[%s30182_s3 + $0x70] sm:$0xff]  }
  0xee   : > { %20742 = vmatpush3.bf16.msra.mxu0 %v21914_v42 }
  0xef   : > { %20764 = vmatpush3.bf16.msra.mxu1 %v21915_v43  ;;  %20743 = vmatprep.subr.bf16.mxu0 %v21916_v44  ;;  %v21961_v43 = vld [vmem:[%s30182_s3 + $0xf0] sm:$0xff]  }
  0xf0   : > { %20765 = vmatprep.subr.bf16.mxu1 %v21917_v45 }
  0xf2   : > { %20744 = vmatpush3.bf16.msra.mxu0 %v21918_v46  ;;  %v21962_v46 = vld [vmem:[%s30182_s3 + $0x30] sm:$0xff]  }
  0xf3   : > { %20766 = vmatpush3.bf16.msra.mxu1 %v21919_v47  ;;  %20745 = vmatprep.subr.bf16.mxu0 %v21920_v48 }
  0xf4   : > { %20767 = vmatprep.subr.bf16.mxu1 %v21921_v49  ;;  %v21963_v49 = vld [vmem:[%s30182_s3 + $0xb0] sm:$0xff]  }
  0xf6   : > { %20746 = vmatpush3.bf16.msra.mxu0 %v21922_v50  ;;  %v21964_v50 = vld [vmem:[%s30182_s3 + $0x68] sm:$0xff]  }
  0xf7   : > { %20768 = vmatpush3.bf16.msra.mxu1 %v21923_v51  ;;  %20775 = vmatprep.subr.bf16.mxu0 %v21924_v52 }
  0xf8   : > { %20797 = vmatprep.subr.bf16.mxu1 %v21925_v53 }
  0xf9   : > { %v20483_v54 = vpop.f32.mrf.mxu0  ;;  %2738 = vmatmul.mubr.bf16.vlgmr.msra.gmra.mxu0 %v23778_v37 }
  0xfa   : > { %v20505_v55 = vpop.f32.mrf.mxu1  ;;  %2778 = vmatmul.mubr.bf16.vlgmr.msra.gmra.mxu1 %v23781_v39  ;;  %20776 = vmatpush3.bf16.msra.mxu0 %v21926_v56 }
  0xfb   : > { %v20484_v58 = vpop.f32.mrf.mxu0  ;;  %20798 = vmatpush3.bf16.msra.mxu1 %v21927_v57  ;;  %3009 = vmatprep.mubr.bf16.mxu0 %v23774_v35  ;;  %v21967_v57 = vld [vmem:[%s30182_s3 + $0xa8] sm:$0xff]  }
  0xfc   : > { %v20506_v59 = vpop.f32.mrf.mxu1  ;;  %v20485_v61 = vadd.f32 %v20484_v58, %v20483_v54  ;;  %20777 = vmatprep.subr.bf16.mxu0 %v21928_v60  ;;  %3049 = vmatprep.mubr.bf16.mxu1 %v23776_v36  ;;  %v21965_v54 = vld [vmem:[%s30182_s3 + $0xe8] sm:$0xff]   ;;  %v21968_v58 = vld [vmem:[%s30182_s3 + $0x60] sm:$0xff]  }
  0xfd   : > { %v20507_v62 = vadd.f32 %v20506_v59, %v20505_v55  ;;  %v20486_v0 = vpop.f32.mrf.mxu0  ;;  %20799 = vmatprep.subr.bf16.mxu1 %v21929_v63  ;;  %v21966_v55 = vld [vmem:[%s30182_s3 + $0x28] sm:$0xff]   ;;  %v21969_v59 = vld [vmem:[%s30182_s3 + $0xe0] sm:$0xff]   ;;  %v21973_v63 = vld [vmem:[%s30182_s3 + $0xd8] sm:$0xff]  }
  0xfe   : > { %v20508_v2 = vpop.f32.mrf.mxu1  ;;  %20778 = vmatpush3.bf16.msra.mxu0 %v21930_v1  ;;  %v21970_v60 = vld [vmem:[%s30182_s3 + $0x20] sm:$0xff]   ;;  %v21974_v0 = vld [vmem:[%s30182_s3 + $0x18] sm:$0xff]  }
  0xff   : > { %v24410_v3 = vadd.f32 %v20507_v62, %v20485_v61  ;;  %v20487_v5 = vpop.f32.mrf.mxu0  ;;  %20800 = vmatpush3.bf16.msra.mxu1 %v21931_v4  ;;  %20779 = vmatprep.subr.bf16.mxu0 %v21932_v6  ;;  %v21971_v61 = vld [vmem:[%s30182_s3 + $0xa0] sm:$0xff]   ;;  %v21972_v62 = vld [vmem:[%s30182_s3 + $0x58] sm:$0xff]   ;;  %v21976_v2 = vld [vmem:[%s30182_s3 + $0x50] sm:$0xff]  }
 0x100   : > { %v20509_v7 = vpop.f32.mrf.mxu1  ;;  %20801 = vmatprep.subr.bf16.mxu1 %v21933_v8  ;;  %v21975_v1 = vld [vmem:[%s30182_s3 + $0x98] sm:$0xff]   ;;  %v21977_v4 = vld [vmem:[%s30182_s3 + $0xd0] sm:$0xff]   ;;  %v21981_v8 = vld [vmem:[%s30182_s3 + $0xc8] sm:$0xff]  }
 0x101   : > { %v21978_v5 = vld [vmem:[%s30182_s3 + $0x10] sm:$0xff]   ;;  %v21980_v7 = vld [vmem:[%s30182_s3 + $0x48] sm:$0xff]  }
 0x102   : > { %20780 = vmatpush3.bf16.msra.mxu0 %v21934_v9  ;;  %v21979_v6 = vld [vmem:[%s30182_s3 + $0x90] sm:$0xff]   ;;  %v21982_v9 = vld [vmem:[%s30182_s3 + $0x8] sm:$0xff]  }
 0x103   : > { %20802 = vmatpush3.bf16.msra.mxu1 %v21935_v10  ;;  %20781 = vmatprep.subr.bf16.mxu0 %v21936_v11  ;;  %v21983_v10 = vld [vmem:[%s30182_s3 + $0x88] sm:$0xff]   ;;  %v21984_v11 = vld [vmem:[%s30182_s3 + $0x40] sm:$0xff]  }
 0x104   : > { %20803 = vmatprep.subr.bf16.mxu1 %v21937_v12  ;;  %v21985_v12 = vld [vmem:[%s30182_s3 + $0xc0] sm:$0xff]  }
 0x106   : > { %20782 = vmatpush3.bf16.msra.mxu0 %v21938_v13  ;;  %v21986_v13 = vld [vmem:[%s30182_s3] sm:$0xff]  }
 0x107   : > { %20804 = vmatpush3.bf16.msra.mxu1 %v21939_v14  ;;  %20783 = vmatprep.subr.bf16.mxu0 %v21940_v15  ;;  %v21987_v14 = vld [vmem:[%s30182_s3 + $0x80] sm:$0xff]   ;;  %v21988_v15 = vld [vmem:[%s30182_s3 + $0x178] sm:$0xff]  }
 0x108   : > { %20805 = vmatprep.subr.bf16.mxu1 %v21941_v16  ;;  %v21989_v16 = vld [vmem:[%s30182_s3 + $0x1f8] sm:$0xff]  }
 0x10a   : > { %20784 = vmatpush3.bf16.msra.mxu0 %v21942_v17  ;;  %v21990_v17 = vld [vmem:[%s30182_s3 + $0x138] sm:$0xff]  }
 0x10b   : > { %20806 = vmatpush3.bf16.msra.mxu1 %v21943_v18  ;;  %20785 = vmatprep.subr.bf16.mxu0 %v21944_v19  ;;  %v21991_v19 = vld [vmem:[%s30182_s3 + $0x1b8] sm:$0xff]  }
 0x10c   : > { %20807 = vmatprep.subr.bf16.mxu1 %v21945_v20 }
 0x10e   : > { %20786 = vmatpush3.bf16.msra.mxu0 %v21946_v21  ;;  %v21992_v21 = vld [vmem:[%s30182_s3 + $0x170] sm:$0xff]  }
 0x10f   : > { %20808 = vmatpush3.bf16.msra.mxu1 %v21947_v22  ;;  %20787 = vmatprep.subr.bf16.mxu0 %v21948_v23  ;;  %v21993_v23 = vld [vmem:[%s30182_s3 + $0x1f0] sm:$0xff]  }
 0x110   : > { %20809 = vmatprep.subr.bf16.mxu1 %v21949_v24 }
 0x112   : > { %20788 = vmatpush3.bf16.msra.mxu0 %v21950_v25 }
 0x113   : > { %20810 = vmatpush3.bf16.msra.mxu1 %v21951_v26  ;;  %20789 = vmatprep.subr.bf16.mxu0 %v21952_v27  ;;  %v21994_v26 = vld [vmem:[%s30182_s3 + $0x130] sm:$0xff]  }
 0x114   : > { %20811 = vmatprep.subr.bf16.mxu1 %v21953_v28 }
 0x116   : > { %20790 = vmatpush3.bf16.msra.mxu0 %v21954_v29  ;;  %v21995_v29 = vld [vmem:[%s30182_s3 + $0x1b0] sm:$0xff]  }
 0x117   : > { %20812 = vmatpush3.bf16.msra.mxu1 %v21955_v30  ;;  %20819 = vmatprep.subr.bf16.mxu0 %v21956_v31  ;;  %v21996_v30 = vld [vmem:[%s30182_s3 + $0x168] sm:$0xff]  }
 0x118   : > { %20841 = vmatprep.subr.bf16.mxu1 %v21957_v32 }
 0x119   : > { %v20527_v34 = vpop.f32.mrf.mxu0  ;;  %3010 = vmatmul.mubr.bf16.vlgmr.msra.gmra.mxu0 %v23778_v37 }
 0x11a   : > { %v20549_v40 = vpop.f32.mrf.mxu1  ;;  %3050 = vmatmul.mubr.bf16.vlgmr.msra.gmra.mxu1 %v23781_v39  ;;  %20820 = vmatpush3.bf16.msra.mxu0 %v21958_v33 }
 0x11b   : > { %20842 = vmatpush3.bf16.msra.mxu1 %v21959_v38  ;;  %v20528_v42 = vpop.f32.mrf.mxu0  ;;  %3793 = vmatprep.mubr.bf16.mxu0 %v23774_v35  ;;  %v21998_v38 = vld [vmem:[%s30182_s3 + $0x128] sm:$0xff]  }
 0x11c   : > { %v20529_v44 = vadd.f32 %v20528_v42, %v20527_v34  ;;  %v20550_v45 = vpop.f32.mrf.mxu1  ;;  %20821 = vmatprep.subr.bf16.mxu0 %v21960_v41  ;;  %3833 = vmatprep.mubr.bf16.mxu1 %v23776_v36  ;;  %v21997_v34 = vld [vmem:[%s30182_s3 + $0x1e8] sm:$0xff]   ;;  %v22000_v42 = vld [vmem:[%s30182_s3 + $0x160] sm:$0xff]  }
 0x11d   : > { %v20551_v47 = vadd.f32 %v20550_v45, %v20549_v40  ;;  %v20530_v48 = vpop.f32.mrf.mxu0  ;;  %20843 = vmatprep.subr.bf16.mxu1 %v21961_v43  ;;  %v21999_v41 = vld [vmem:[%s30182_s3 + $0x1a8] sm:$0xff]   ;;  %v22001_v43 = vld [vmem:[%s30182_s3 + $0x1e0] sm:$0xff]  }
 0x11e   : > { %20822 = vmatpush3.bf16.msra.mxu0 %v21962_v46  ;;  %v20552_v51 = vpop.f32.mrf.mxu1  ;;  %v22003_v45 = vld [vmem:[%s30182_s3 + $0x1a0] sm:$0xff]   ;;  %v22004_v46 = vld [vmem:[%s30182_s3 + $0x158] sm:$0xff]  }
 0x11f   : > { %v24518_v52 = vadd.f32 %v20551_v47, %v20529_v44  ;;  %20844 = vmatpush3.bf16.msra.mxu1 %v21963_v49  ;;  %v20531_v53 = vpop.f32.mrf.mxu0  ;;  %20823 = vmatprep.subr.bf16.mxu0 %v21964_v50  ;;  %v22002_v44 = vld [vmem:[%s30182_s3 + $0x120] sm:$0xff]   ;;  %v22005_v47 = vld [vmem:[%s30182_s3 + $0x1d8] sm:$0xff]   ;;  %v22008_v50 = vld [vmem:[%s30182_s3 + $0x150] sm:$0xff]  }
 0x120   : > { %v20553_v56 = vpop.f32.mrf.mxu1  ;;  %20845 = vmatprep.subr.bf16.mxu1 %v21965_v54  ;;  %v22006_v48 = vld [vmem:[%s30182_s3 + $0x118] sm:$0xff]   ;;  %v22009_v51 = vld [vmem:[%s30182_s3 + $0x1d0] sm:$0xff]  }
 0x121   : > { %v22007_v49 = vld [vmem:[%s30182_s3 + $0x198] sm:$0xff]   ;;  %v22010_v53 = vld [vmem:[%s30182_s3 + $0x110] sm:$0xff]   ;;  %v22013_v56 = vld [vmem:[%s30182_s3 + $0x1c8] sm:$0xff]  }
 0x122   : > { %20824 = vmatpush3.bf16.msra.mxu0 %v21966_v55  ;;  %v22011_v54 = vld [vmem:[%s30182_s3 + $0x190] sm:$0xff]   ;;  %v22012_v55 = vld [vmem:[%s30182_s3 + $0x148] sm:$0xff]  }
 0x123   : > { %20846 = vmatpush3.bf16.msra.mxu1 %v21967_v57  ;;  %20825 = vmatprep.subr.bf16.mxu0 %v21968_v58  ;;  %v22014_v57 = vld [vmem:[%s30182_s3 + $0x108] sm:$0xff]  }
 0x124   : > { %20847 = vmatprep.subr.bf16.mxu1 %v21969_v59  ;;  %v22015_v58 = vld [vmem:[%s30182_s3 + $0x188] sm:$0xff]   ;;  %v22016_v59 = vld [vmem:[%s30182_s3 + $0x140] sm:$0xff]  }
 0x126   : > { %20826 = vmatpush3.bf16.msra.mxu0 %v21970_v60  ;;  %v22017_v60 = vld [vmem:[%s30182_s3 + $0x1c0] sm:$0xff]  }
 0x127   : > { %20848 = vmatpush3.bf16.msra.mxu1 %v21971_v61  ;;  %20827 = vmatprep.subr.bf16.mxu0 %v21972_v62  ;;  %v22018_v61 = vld [vmem:[%s30182_s3 + $0x100] sm:$0xff]  }
 0x128   : > { %20849 = vmatprep.subr.bf16.mxu1 %v21973_v63  ;;  %v22019_v62 = vld [vmem:[%s30182_s3 + $0x180] sm:$0xff]   ;;  %v22020_v63 = vld [vmem:[%s30182_s3 + $0x278] sm:$0xff]  }
 0x12a   : > { %20828 = vmatpush3.bf16.msra.mxu0 %v21974_v0  ;;  %v22021_v0 = vld [vmem:[%s30182_s3 + $0x2f8] sm:$0xff]  }
 0x12b   : > { %20850 = vmatpush3.bf16.msra.mxu1 %v21975_v1  ;;  %20829 = vmatprep.subr.bf16.mxu0 %v21976_v2  ;;  %v22022_v1 = vld [vmem:[%s30182_s3 + $0x238] sm:$0xff]  }
 0x12c   : > { %20851 = vmatprep.subr.bf16.mxu1 %v21977_v4  ;;  %v22023_v4 = vld [vmem:[%s30182_s3 + $0x2b8] sm:$0xff]  }
 0x12e   : > { %20830 = vmatpush3.bf16.msra.mxu0 %v21978_v5 }
 0x12f   : > { %20852 = vmatpush3.bf16.msra.mxu1 %v21979_v6  ;;  %20831 = vmatprep.subr.bf16.mxu0 %v21980_v7  ;;  %v22024_v6 = vld [vmem:[%s30182_s3 + $0x270] sm:$0xff]  }
 0x130   : > { %20853 = vmatprep.subr.bf16.mxu1 %v21981_v8  ;;  %v22025_v8 = vld [vmem:[%s30182_s3 + $0x2f0] sm:$0xff]  }
 0x132   : > { %20832 = vmatpush3.bf16.msra.mxu0 %v21982_v9 }
 0x133   : > { %20854 = vmatpush3.bf16.msra.mxu1 %v21983_v10  ;;  %20833 = vmatprep.subr.bf16.mxu0 %v21984_v11  ;;  %v22026_v11 = vld [vmem:[%s30182_s3 + $0x230] sm:$0xff]  }
 0x134   : > { %20855 = vmatprep.subr.bf16.mxu1 %v21985_v12 }
 0x136   : > { %20834 = vmatpush3.bf16.msra.mxu0 %v21986_v13 }
 0x137   : > { %20856 = vmatpush3.bf16.msra.mxu1 %v21987_v14  ;;  %20863 = vmatprep.subr.bf16.mxu0 %v21988_v15  ;;  %v22027_v14 = vld [vmem:[%s30182_s3 + $0x2b0] sm:$0xff]   ;;  %v22028_v15 = vld [vmem:[%s30182_s3 + $0x268] sm:$0xff]  }
 0x138   : > { %20885 = vmatprep.subr.bf16.mxu1 %v21989_v16 }
 0x139   : > { %v20571_v18 = vpop.f32.mrf.mxu0  ;;  %3794 = vmatmul.mubr.bf16.vlgmr.msra.gmra.mxu0 %v23778_v37 }
 0x13a   : > { %v20593_v20 = vpop.f32.mrf.mxu1  ;;  %3834 = vmatmul.mubr.bf16.vlgmr.msra.gmra.mxu1 %v23781_v39  ;;  %20864 = vmatpush3.bf16.msra.mxu0 %v21990_v17 }
 0x13b   : > { %20886 = vmatpush3.bf16.msra.mxu1 %v21991_v19  ;;  %v20572_v22 = vpop.f32.mrf.mxu0  ;;  %4065 = vmatprep.mubr.bf16.mxu0 %v23774_v35  ;;  %v22029_v19 = vld [vmem:[%s30182_s3 + $0x2e8] sm:$0xff]  }
 0x13c   : > { %v20573_v24 = vadd.f32 %v20572_v22, %v20571_v18  ;;  %v20594_v25 = vpop.f32.mrf.mxu1  ;;  %20865 = vmatprep.subr.bf16.mxu0 %v21992_v21  ;;  %4105 = vmatprep.mubr.bf16.mxu1 %v23776_v36  ;;  %v22031_v22 = vld [vmem:[%s30182_s3 + $0x2a8] sm:$0xff]  }
 0x13d   : > { %v20595_v27 = vadd.f32 %v20594_v25, %v20593_v20  ;;  %v20574_v28 = vpop.f32.mrf.mxu0  ;;  %20887 = vmatprep.subr.bf16.mxu1 %v21993_v23  ;;  %v22030_v20 = vld [vmem:[%s30182_s3 + $0x228] sm:$0xff]   ;;  %v22032_v23 = vld [vmem:[%s30182_s3 + $0x260] sm:$0xff]  }
 0x13e   : > { %20866 = vmatpush3.bf16.msra.mxu0 %v21994_v26  ;;  %v20596_v31 = vpop.f32.mrf.mxu1  ;;  %v22034_v25 = vld [vmem:[%s30182_s3 + $0x220] sm:$0xff]   ;;  %v22037_v28 = vld [vmem:[%s30182_s3 + $0x2d8] sm:$0xff]  }
 0x13f   : > { %v24620_v32 = vadd.f32 %v20595_v27, %v20573_v24  ;;  %20888 = vmatpush3.bf16.msra.mxu1 %v21995_v29  ;;  %v20575_v33 = vpop.f32.mrf.mxu0  ;;  %20867 = vmatprep.subr.bf16.mxu0 %v21996_v30  ;;  %v22033_v24 = vld [vmem:[%s30182_s3 + $0x2e0] sm:$0xff]   ;;  %v22036_v27 = vld [vmem:[%s30182_s3 + $0x258] sm:$0xff]   ;;  %v22040_v31 = vld [vmem:[%s30182_s3 + $0x250] sm:$0xff]  }
 0x140   : > { %v20597_v40 = vpop.f32.mrf.mxu1  ;;  %20889 = vmatprep.subr.bf16.mxu1 %v21997_v34  ;;  %v22035_v26 = vld [vmem:[%s30182_s3 + $0x2a0] sm:$0xff]   ;;  %v22038_v29 = vld [vmem:[%s30182_s3 + $0x218] sm:$0xff]   ;;  %v22041_v33 = vld [vmem:[%s30182_s3 + $0x2d0] sm:$0xff]  }
 0x141   : > { %v22039_v30 = vld [vmem:[%s30182_s3 + $0x298] sm:$0xff]   ;;  %v22042_v34 = vld [vmem:[%s30182_s3 + $0x210] sm:$0xff]   ;;  %v22044_v40 = vld [vmem:[%s30182_s3 + $0x248] sm:$0xff]  }
 0x142   : > { %20868 = vmatpush3.bf16.msra.mxu0 %v21998_v38  ;;  %v22043_v38 = vld [vmem:[%s30182_s3 + $0x290] sm:$0xff]  }
 0x143   : > { %20890 = vmatpush3.bf16.msra.mxu1 %v21999_v41  ;;  %20869 = vmatprep.subr.bf16.mxu0 %v22000_v42  ;;  %v22045_v41 = vld [vmem:[%s30182_s3 + $0x2c8] sm:$0xff]  }
 0x144   : > { %20891 = vmatprep.subr.bf16.mxu1 %v22001_v43  ;;  %v22046_v42 = vld [vmem:[%s30182_s3 + $0x208] sm:$0xff]  }
 0x145   : > { %v22047_v43 = vld [vmem:[%s30182_s3 + $0x288] sm:$0xff]  }
 0x146   : > { %20870 = vmatpush3.bf16.msra.mxu0 %v22002_v44  ;;  %v22048_v44 = vld [vmem:[%s30182_s3 + $0x240] sm:$0xff]  }
 0x147   : > { %20892 = vmatpush3.bf16.msra.mxu1 %v22003_v45  ;;  %20871 = vmatprep.subr.bf16.mxu0 %v22004_v46  ;;  %v22049_v45 = vld [vmem:[%s30182_s3 + $0x2c0] sm:$0xff]  }
 0x148   : > { %20893 = vmatprep.subr.bf16.mxu1 %v22005_v47  ;;  %v22050_v46 = vld [vmem:[%s30182_s3 + $0x200] sm:$0xff]  }
 0x149   : > { %v22051_v47 = vld [vmem:[%s30182_s3 + $0x280] sm:$0xff]  }
 0x14a   : > { %20872 = vmatpush3.bf16.msra.mxu0 %v22006_v48  ;;  %v22052_v48 = vld [vmem:[%s30182_s3 + $0x378] sm:$0xff]  }
 0x14b   : > { %20894 = vmatpush3.bf16.msra.mxu1 %v22007_v49  ;;  %20873 = vmatprep.subr.bf16.mxu0 %v22008_v50  ;;  %v22053_v49 = vld [vmem:[%s30182_s3 + $0x3f8] sm:$0xff]  }
 0x14c   : > { %20895 = vmatprep.subr.bf16.mxu1 %v22009_v51  ;;  %v22054_v50 = vld [vmem:[%s30182_s3 + $0x338] sm:$0xff]  }
 0x14e   : > { %20874 = vmatpush3.bf16.msra.mxu0 %v22010_v53  ;;  %v22055_v53 = vld [vmem:[%s30182_s3 + $0x3b8] sm:$0xff]  }
 0x14f   : > { %20896 = vmatpush3.bf16.msra.mxu1 %v22011_v54  ;;  %20875 = vmatprep.subr.bf16.mxu0 %v22012_v55  ;;  %v22056_v55 = vld [vmem:[%s30182_s3 + $0x370] sm:$0xff]  }
 0x150   : > { %20897 = vmatprep.subr.bf16.mxu1 %v22013_v56 }
 0x152   : > { %20876 = vmatpush3.bf16.msra.mxu0 %v22014_v57  ;;  %v22057_v57 = vld [vmem:[%s30182_s3 + $0x3f0] sm:$0xff]  }
 0x153   : > { %20898 = vmatpush3.bf16.msra.mxu1 %v22015_v58  ;;  %20877 = vmatprep.subr.bf16.mxu0 %v22016_v59 }
 0x154   : > { %20899 = vmatprep.subr.bf16.mxu1 %v22017_v60  ;;  %v22058_v60 = vld [vmem:[%s30182_s3 + $0x330] sm:$0xff]  }
 0x156   : > { %20878 = vmatpush3.bf16.msra.mxu0 %v22018_v61 }
 0x157   : > { %20900 = vmatpush3.bf16.msra.mxu1 %v22019_v62  ;;  %20907 = vmatprep.subr.bf16.mxu0 %v22020_v63  ;;  %v22059_v63 = vld [vmem:[%s30182_s3 + $0x3b0] sm:$0xff]  }
 0x158   : > { %20929 = vmatprep.subr.bf16.mxu1 %v22021_v0  ;;  %v22060_v0 = vld [vmem:[%s30182_s3 + $0x368] sm:$0xff]  }
 0x159   : > { %v20615_v2 = vpop.f32.mrf.mxu0  ;;  %4066 = vmatmul.mubr.bf16.vlgmr.msra.gmra.mxu0 %v23778_v37 }
 0x15a   : > { %v20637_v5 = vpop.f32.mrf.mxu1  ;;  %4106 = vmatmul.mubr.bf16.vlgmr.msra.gmra.mxu1 %v23781_v39  ;;  %20908 = vmatpush3.bf16.msra.mxu0 %v22022_v1 }
 0x15b   : > { %20930 = vmatpush3.bf16.msra.mxu1 %v22023_v4  ;;  %v20616_v7 = vpop.f32.mrf.mxu0  ;;  %4337 = vmatprep.mubr.bf16.mxu0 %v23774_v35 }
 0x15c   : > { %v20617_v9 = vadd.f32 %v20616_v7, %v20615_v2  ;;  %v20638_v10 = vpop.f32.mrf.mxu1  ;;  %20909 = vmatprep.subr.bf16.mxu0 %v22024_v6  ;;  %4377 = vmatprep.mubr.bf16.mxu1 %v23776_v36  ;;  %v22062_v6 = vld [vmem:[%s30182_s3 + $0x328] sm:$0xff]  }
 0x15d   : > { %v20639_v12 = vadd.f32 %v20638_v10, %v20637_v5  ;;  %v20618_v13 = vpop.f32.mrf.mxu0  ;;  %20931 = vmatprep.subr.bf16.mxu1 %v22025_v8  ;;  %v22061_v5 = vld [vmem:[%s30182_s3 + $0x3e8] sm:$0xff]   ;;  %v22065_v10 = vld [vmem:[%s30182_s3 + $0x3e0] sm:$0xff]  }
 0x15e   : > { %20910 = vmatpush3.bf16.msra.mxu0 %v22026_v11  ;;  %v20640_v16 = vpop.f32.mrf.mxu1  ;;  %v22063_v8 = vld [vmem:[%s30182_s3 + $0x3a8] sm:$0xff]   ;;  %v22066_v11 = vld [vmem:[%s30182_s3 + $0x320] sm:$0xff]   ;;  %v22068_v13 = vld [vmem:[%s30182_s3 + $0x358] sm:$0xff]  }
 0x15f   : > { %v24722_v17 = vadd.f32 %v20639_v12, %v20617_v9  ;;  %20932 = vmatpush3.bf16.msra.mxu1 %v22027_v14  ;;  %v20619_v18 = vpop.f32.mrf.mxu0  ;;  %20911 = vmatprep.subr.bf16.mxu0 %v22028_v15  ;;  %v22064_v9 = vld [vmem:[%s30182_s3 + $0x360] sm:$0xff]   ;;  %v22069_v14 = vld [vmem:[%s30182_s3 + $0x3d8] sm:$0xff]  }
 0x160   : > { %v20641_v21 = vpop.f32.mrf.mxu1  ;;  %20933 = vmatprep.subr.bf16.mxu1 %v22029_v19  ;;  %v22067_v12 = vld [vmem:[%s30182_s3 + $0x3a0] sm:$0xff]   ;;  %v22070_v15 = vld [vmem:[%s30182_s3 + $0x318] sm:$0xff]   ;;  %v22072_v18 = vld [vmem:[%s30182_s3 + $0x350] sm:$0xff]  }
 0x161   : > { %v22071_v16 = vld [vmem:[%s30182_s3 + $0x398] sm:$0xff]   ;;  %v22073_v19 = vld [vmem:[%s30182_s3 + $0x3d0] sm:$0xff]  }
 0x162   : > { %20912 = vmatpush3.bf16.msra.mxu0 %v22030_v20  ;;  %v22074_v20 = vld [vmem:[%s30182_s3 + $0x310] sm:$0xff]  }
 0x163   : > { %20934 = vmatpush3.bf16.msra.mxu1 %v22031_v22  ;;  %20913 = vmatprep.subr.bf16.mxu0 %v22032_v23  ;;  %v22075_v21 = vld [vmem:[%s30182_s3 + $0x390] sm:$0xff]   ;;  %v22076_v22 = vld [vmem:[%s30182_s3 + $0x348] sm:$0xff]  }
 0x164   : > { %20935 = vmatprep.subr.bf16.mxu1 %v22033_v24  ;;  %v22077_v23 = vld [vmem:[%s30182_s3 + $0x3c8] sm:$0xff]  }
 0x165   : > { %v22078_v24 = vld [vmem:[%s30182_s3 + $0x308] sm:$0xff]  }
 0x166   : > { %20914 = vmatpush3.bf16.msra.mxu0 %v22034_v25  ;;  %v22079_v25 = vld [vmem:[%s30182_s3 + $0x388] sm:$0xff]  }
 0x167   : > { %20936 = vmatpush3.bf16.msra.mxu1 %v22035_v26  ;;  %20915 = vmatprep.subr.bf16.mxu0 %v22036_v27  ;;  %v22080_v26 = vld [vmem:[%s30182_s3 + $0x340] sm:$0xff]  }
 0x168   : > { %20937 = vmatprep.subr.bf16.mxu1 %v22037_v28  ;;  %v22081_v27 = vld [vmem:[%s30182_s3 + $0x3c0] sm:$0xff]  }
 0x169   : > { %v22082_v28 = vld [vmem:[%s30182_s3 + $0x300] sm:$0xff]  }
 0x16a   : > { %20916 = vmatpush3.bf16.msra.mxu0 %v22038_v29  ;;  %v22083_v29 = vld [vmem:[%s30182_s3 + $0x380] sm:$0xff]  }
 0x16b   : > { %20938 = vmatpush3.bf16.msra.mxu1 %v22039_v30  ;;  %20917 = vmatprep.subr.bf16.mxu0 %v22040_v31  ;;  %v22084_v30 = vld [vmem:[%s30182_s3 + $0x478] sm:$0xff]  }
 0x16c   : > { %20939 = vmatprep.subr.bf16.mxu1 %v22041_v33  ;;  %v22085_v31 = vld [vmem:[%s30182_s3 + $0x4f8] sm:$0xff]  }
 0x16d   : > { %v22086_v33 = vld [vmem:[%s30182_s3 + $0x438] sm:$0xff]  }
 0x16e   : > { %20918 = vmatpush3.bf16.msra.mxu0 %v22042_v34 }
 0x16f   : > { %20940 = vmatpush3.bf16.msra.mxu1 %v22043_v38  ;;  %20919 = vmatprep.subr.bf16.mxu0 %v22044_v40  ;;  %v22087_v38 = vld [vmem:[%s30182_s3 + $0x4b8] sm:$0xff]  }
 0x170   : > { %20941 = vmatprep.subr.bf16.mxu1 %v22045_v41  ;;  %v22088_v41 = vld [vmem:[%s30182_s3 + $0x470] sm:$0xff]  }
 0x172   : > { %20920 = vmatpush3.bf16.msra.mxu0 %v22046_v42 }
 0x173   : > { %20942 = vmatpush3.bf16.msra.mxu1 %v22047_v43  ;;  %20921 = vmatprep.subr.bf16.mxu0 %v22048_v44  ;;  %v22089_v43 = vld [vmem:[%s30182_s3 + $0x4f0] sm:$0xff]  }
 0x174   : > { %20943 = vmatprep.subr.bf16.mxu1 %v22049_v45 }
 0x176   : > { %20922 = vmatpush3.bf16.msra.mxu0 %v22050_v46  ;;  %v22090_v46 = vld [vmem:[%s30182_s3 + $0x430] sm:$0xff]  }
 0x177   : > { %20944 = vmatpush3.bf16.msra.mxu1 %v22051_v47  ;;  %20951 = vmatprep.subr.bf16.mxu0 %v22052_v48 }
 0x178   : > { %20973 = vmatprep.subr.bf16.mxu1 %v22053_v49  ;;  %v22091_v49 = vld [vmem:[%s30182_s3 + $0x4b0] sm:$0xff]  }
 0x179   : > { %v20659_v51 = vpop.f32.mrf.mxu0  ;;  %4338 = vmatmul.mubr.bf16.vlgmr.msra.gmra.mxu0 %v23778_v37 }
 0x17a   : > { %v20681_v54 = vpop.f32.mrf.mxu1  ;;  %4378 = vmatmul.mubr.bf16.vlgmr.msra.gmra.mxu1 %v23781_v39  ;;  %20952 = vmatpush3.bf16.msra.mxu0 %v22054_v50  ;;  %v22092_v50 = vld [vmem:[%s30182_s3 + $0x468] sm:$0xff]  }
 0x17b   : > { %20974 = vmatpush3.bf16.msra.mxu1 %v22055_v53  ;;  %v20660_v56 = vpop.f32.mrf.mxu0  ;;  %4609 = vmatprep.mubr.bf16.mxu0 %v23774_v35 }
 0x17c   : > { %v20661_v58 = vadd.f32 %v20660_v56, %v20659_v51  ;;  %v20682_v59 = vpop.f32.mrf.mxu1  ;;  %20953 = vmatprep.subr.bf16.mxu0 %v22056_v55  ;;  %4649 = vmatprep.mubr.bf16.mxu1 %v23776_v36  ;;  %v22093_v55 = vld [vmem:[%s30182_s3 + $0x4e8] sm:$0xff]  }
 0x17d   : > { %v20683_v61 = vadd.f32 %v20682_v59, %v20681_v54  ;;  %v20662_v62 = vpop.f32.mrf.mxu0  ;;  %20975 = vmatprep.subr.bf16.mxu1 %v22057_v57  ;;  %v22094_v56 = vld [vmem:[%s30182_s3 + $0x428] sm:$0xff]   ;;  %v22096_v59 = vld [vmem:[%s30182_s3 + $0x460] sm:$0xff]  }
 0x17e   : > { %20954 = vmatpush3.bf16.msra.mxu0 %v22058_v60  ;;  %v20684_v1 = vpop.f32.mrf.mxu1  ;;  %v22097_v60 = vld [vmem:[%s30182_s3 + $0x4e0] sm:$0xff]  }
 0x17f   : > { %v24824_v2 = vadd.f32 %v20683_v61, %v20661_v58  ;;  %20976 = vmatpush3.bf16.msra.mxu1 %v22059_v63  ;;  %v20663_v4 = vpop.f32.mrf.mxu0  ;;  %20955 = vmatprep.subr.bf16.mxu0 %v22060_v0  ;;  %v22095_v58 = vld [vmem:[%s30182_s3 + $0x4a8] sm:$0xff]   ;;  %v22098_v61 = vld [vmem:[%s30182_s3 + $0x420] sm:$0xff]   ;;  %v22100_v63 = vld [vmem:[%s30182_s3 + $0x458] sm:$0xff]  }
 0x180   : > { %v20685_v7 = vpop.f32.mrf.mxu1  ;;  %20977 = vmatprep.subr.bf16.mxu1 %v22061_v5  ;;  %v22099_v62 = vld [vmem:[%s30182_s3 + $0x4a0] sm:$0xff]   ;;  %v22101_v0 = vld [vmem:[%s30182_s3 + $0x4d8] sm:$0xff]   ;;  %v22104_v5 = vld [vmem:[%s30182_s3 + $0x450] sm:$0xff]  }
 0x181   : > { %v22102_v1 = vld [vmem:[%s30182_s3 + $0x418] sm:$0xff]   ;;  %v22106_v7 = vld [vmem:[%s30182_s3 + $0x410] sm:$0xff]  }
 0x182   : > { %20956 = vmatpush3.bf16.msra.mxu0 %v22062_v6  ;;  %v22103_v4 = vld [vmem:[%s30182_s3 + $0x498] sm:$0xff]   ;;  %v22105_v6 = vld [vmem:[%s30182_s3 + $0x4d0] sm:$0xff]  }
 0x183   : > { %20978 = vmatpush3.bf16.msra.mxu1 %v22063_v8  ;;  %20957 = vmatprep.subr.bf16.mxu0 %v22064_v9  ;;  %v22107_v8 = vld [vmem:[%s30182_s3 + $0x490] sm:$0xff]   ;;  %v22108_v9 = vld [vmem:[%s30182_s3 + $0x448] sm:$0xff]  }
 0x184   : > { %20979 = vmatprep.subr.bf16.mxu1 %v22065_v10  ;;  %v22109_v10 = vld [vmem:[%s30182_s3 + $0x4c8] sm:$0xff]  }
 0x186   : > { %20958 = vmatpush3.bf16.msra.mxu0 %v22066_v11  ;;  %v22110_v11 = vld [vmem:[%s30182_s3 + $0x408] sm:$0xff]  }
 0x187   : > { %20980 = vmatpush3.bf16.msra.mxu1 %v22067_v12  ;;  %20959 = vmatprep.subr.bf16.mxu0 %v22068_v13  ;;  %v22111_v12 = vld [vmem:[%s30182_s3 + $0x488] sm:$0xff]   ;;  %v22112_v13 = vld [vmem:[%s30182_s3 + $0x440] sm:$0xff]  }
 0x188   : > { %20981 = vmatprep.subr.bf16.mxu1 %v22069_v14  ;;  %v22113_v14 = vld [vmem:[%s30182_s3 + $0x4c0] sm:$0xff]  }
 0x18a   : > { %20960 = vmatpush3.bf16.msra.mxu0 %v22070_v15  ;;  %v22114_v15 = vld [vmem:[%s30182_s3 + $0x400] sm:$0xff]  }
 0x18b   : > { %20982 = vmatpush3.bf16.msra.mxu1 %v22071_v16  ;;  %20961 = vmatprep.subr.bf16.mxu0 %v22072_v18  ;;  %v22115_v16 = vld [vmem:[%s30182_s3 + $0x480] sm:$0xff]   ;;  %v22116_v18 = vld [vmem:[%s30182_s3 + $0x578] sm:$0xff]  }
 0x18c   : > { %20983 = vmatprep.subr.bf16.mxu1 %v22073_v19  ;;  %v22117_v19 = vld [vmem:[%s30182_s3 + $0x5f8] sm:$0xff]  }
 0x18e   : > { %20962 = vmatpush3.bf16.msra.mxu0 %v22074_v20  ;;  %v22118_v20 = vld [vmem:[%s30182_s3 + $0x538] sm:$0xff]  }
 0x18f   : > { %20984 = vmatpush3.bf16.msra.mxu1 %v22075_v21  ;;  %20963 = vmatprep.subr.bf16.mxu0 %v22076_v22  ;;  %v22119_v22 = vld [vmem:[%s30182_s3 + $0x5b8] sm:$0xff]  }
 0x190   : > { %20985 = vmatprep.subr.bf16.mxu1 %v22077_v23 }
 0x192   : > { %20964 = vmatpush3.bf16.msra.mxu0 %v22078_v24  ;;  %v22120_v24 = vld [vmem:[%s30182_s3 + $0x570] sm:$0xff]  }
 0x193   : > { %20986 = vmatpush3.bf16.msra.mxu1 %v22079_v25  ;;  %20965 = vmatprep.subr.bf16.mxu0 %v22080_v26  ;;  %v22121_v26 = vld [vmem:[%s30182_s3 + $0x5f0] sm:$0xff]  }
 0x194   : > { %20987 = vmatprep.subr.bf16.mxu1 %v22081_v27 }
 0x196   : > { %20966 = vmatpush3.bf16.msra.mxu0 %v22082_v28 }
 0x197   : > { %20988 = vmatpush3.bf16.msra.mxu1 %v22083_v29  ;;  %20995 = vmatprep.subr.bf16.mxu0 %v22084_v30  ;;  %v22122_v29 = vld [vmem:[%s30182_s3 + $0x530] sm:$0xff]  }
 0x198   : > { %21017 = vmatprep.subr.bf16.mxu1 %v22085_v31 }
 0x199   : > { %v20703_v34 = vpop.f32.mrf.mxu0  ;;  %4610 = vmatmul.mubr.bf16.vlgmr.msra.gmra.mxu0 %v23778_v37 }
 0x19a   : > { %v20725_v40 = vpop.f32.mrf.mxu1  ;;  %4650 = vmatmul.mubr.bf16.vlgmr.msra.gmra.mxu1 %v23781_v39  ;;  %20996 = vmatpush3.bf16.msra.mxu0 %v22086_v33  ;;  %v22123_v33 = vld [vmem:[%s30182_s3 + $0x5b0] sm:$0xff]  }
 0x19b   : > { %21018 = vmatpush3.bf16.msra.mxu1 %v22087_v38  ;;  %v20704_v42 = vpop.f32.mrf.mxu0  ;;  %4881 = vmatprep.mubr.bf16.mxu0 %v23774_v35 }
 0x19c   : > { %v20705_v44 = vadd.f32 %v20704_v42, %v20703_v34  ;;  %v20726_v45 = vpop.f32.mrf.mxu1  ;;  %20997 = vmatprep.subr.bf16.mxu0 %v22088_v41  ;;  %4921 = vmatprep.mubr.bf16.mxu1 %v23776_v36  ;;  %v22124_v34 = vld [vmem:[%s30182_s3 + $0x568] sm:$0xff]  }
 0x19d   : > { %v20727_v47 = vadd.f32 %v20726_v45, %v20725_v40  ;;  %v20706_v48 = vpop.f32.mrf.mxu0  ;;  %21019 = vmatprep.subr.bf16.mxu1 %v22089_v43  ;;  %v22125_v42 = vld [vmem:[%s30182_s3 + $0x5e8] sm:$0xff]  }
 0x19e   : > { %20998 = vmatpush3.bf16.msra.mxu0 %v22090_v46  ;;  %v20728_v51 = vpop.f32.mrf.mxu1  ;;  %v22126_v43 = vld [vmem:[%s30182_s3 + $0x528] sm:$0xff]   ;;  %v22128_v46 = vld [vmem:[%s30182_s3 + $0x560] sm:$0xff]  }
 0x19f   : > { %v24926_v53 = vadd.f32 %v20727_v47, %v20705_v44  ;;  %21020 = vmatpush3.bf16.msra.mxu1 %v22091_v49  ;;  %v20707_v54 = vpop.f32.mrf.mxu0  ;;  %20999 = vmatprep.subr.bf16.mxu0 %v22092_v50  ;;  %v22127_v45 = vld [vmem:[%s30182_s3 + $0x5a8] sm:$0xff]   ;;  %v22129_v47 = vld [vmem:[%s30182_s3 + $0x5e0] sm:$0xff]   ;;  %v22132_v50 = vld [vmem:[%s30182_s3 + $0x558] sm:$0xff]  }
 0x1a0   : > { %v20729_v57 = vpop.f32.mrf.mxu1  ;;  %21021 = vmatprep.subr.bf16.mxu1 %v22093_v55  ;;  %v22130_v48 = vld [vmem:[%s30182_s3 + $0x520] sm:$0xff]   ;;  %v22133_v51 = vld [vmem:[%s30182_s3 + $0x5d8] sm:$0xff]  }
 0x1a1   : > { %v22131_v49 = vld [vmem:[%s30182_s3 + $0x5a0] sm:$0xff]   ;;  %v22134_v54 = vld [vmem:[%s30182_s3 + $0x518] sm:$0xff]   ;;  %v22137_v57 = vld [vmem:[%s30182_s3 + $0x5d0] sm:$0xff]  }
 0x1a2   : > { %21000 = vmatpush3.bf16.msra.mxu0 %v22094_v56  ;;  %v22135_v55 = vld [vmem:[%s30182_s3 + $0x598] sm:$0xff]   ;;  %v22136_v56 = vld [vmem:[%s30182_s3 + $0x550] sm:$0xff]  }
 0x1a3   : > { %21022 = vmatpush3.bf16.msra.mxu1 %v22095_v58  ;;  %21001 = vmatprep.subr.bf16.mxu0 %v22096_v59  ;;  %v22138_v58 = vld [vmem:[%s30182_s3 + $0x510] sm:$0xff]  }
 0x1a4   : > { %21023 = vmatprep.subr.bf16.mxu1 %v22097_v60  ;;  %v22139_v59 = vld [vmem:[%s30182_s3 + $0x590] sm:$0xff]   ;;  %v22140_v60 = vld [vmem:[%s30182_s3 + $0x548] sm:$0xff]  }
 0x1a6   : > { %21002 = vmatpush3.bf16.msra.mxu0 %v22098_v61  ;;  %v22141_v61 = vld [vmem:[%s30182_s3 + $0x5c8] sm:$0xff]  }
 0x1a7   : > { %21024 = vmatpush3.bf16.msra.mxu1 %v22099_v62  ;;  %21003 = vmatprep.subr.bf16.mxu0 %v22100_v63  ;;  %v22142_v62 = vld [vmem:[%s30182_s3 + $0x508] sm:$0xff]  }
 0x1a8   : > { %21025 = vmatprep.subr.bf16.mxu1 %v22101_v0  ;;  %v22143_v63 = vld [vmem:[%s30182_s3 + $0x588] sm:$0xff]   ;;  %v22144_v0 = vld [vmem:[%s30182_s3 + $0x540] sm:$0xff]  }
 0x1aa   : > { %21004 = vmatpush3.bf16.msra.mxu0 %v22102_v1  ;;  %v22145_v1 = vld [vmem:[%s30182_s3 + $0x5c0] sm:$0xff]  }
 0x1ab   : > { %21026 = vmatpush3.bf16.msra.mxu1 %v22103_v4  ;;  %21005 = vmatprep.subr.bf16.mxu0 %v22104_v5  ;;  %v22146_v4 = vld [vmem:[%s30182_s3 + $0x500] sm:$0xff]  }
 0x1ac   : > { %21027 = vmatprep.subr.bf16.mxu1 %v22105_v6  ;;  %v22147_v5 = vld [vmem:[%s30182_s3 + $0x580] sm:$0xff]   ;;  %v22148_v6 = vld [vmem:[%s30182_s3 + $0x678] sm:$0xff]  }
 0x1ae   : > { %21006 = vmatpush3.bf16.msra.mxu0 %v22106_v7  ;;  %v22149_v7 = vld [vmem:[%s30182_s3 + $0x6f8] sm:$0xff]  }
 0x1af   : > { %21028 = vmatpush3.bf16.msra.mxu1 %v22107_v8  ;;  %21007 = vmatprep.subr.bf16.mxu0 %v22108_v9  ;;  %v22150_v8 = vld [vmem:[%s30182_s3 + $0x638] sm:$0xff]  }
 0x1b0   : > { %21029 = vmatprep.subr.bf16.mxu1 %v22109_v10  ;;  %v22151_v10 = vld [vmem:[%s30182_s3 + $0x6b8] sm:$0xff]  }
 0x1b2   : > { %21008 = vmatpush3.bf16.msra.mxu0 %v22110_v11 }
 0x1b3   : > { %21030 = vmatpush3.bf16.msra.mxu1 %v22111_v12  ;;  %21009 = vmatprep.subr.bf16.mxu0 %v22112_v13  ;;  %v22152_v12 = vld [vmem:[%s30182_s3 + $0x670] sm:$0xff]  }
 0x1b4   : > { %21031 = vmatprep.subr.bf16.mxu1 %v22113_v14  ;;  %v22153_v14 = vld [vmem:[%s30182_s3 + $0x6f0] sm:$0xff]  }
 0x1b6   : > { %21010 = vmatpush3.bf16.msra.mxu0 %v22114_v15 }
 0x1b7   : > { %21032 = vmatpush3.bf16.msra.mxu1 %v22115_v16  ;;  %21039 = vmatprep.subr.bf16.mxu0 %v22116_v18  ;;  %v22154_v18 = vld [vmem:[%s30182_s3 + $0x630] sm:$0xff]  }
 0x1b8   : > { %21061 = vmatprep.subr.bf16.mxu1 %v22117_v19 }
 0x1b9   : > { %v20747_v21 = vpop.f32.mrf.mxu0  ;;  %4882 = vmatmul.mubr.bf16.vlgmr.msra.gmra.mxu0 %v23778_v37 }
 0x1ba   : > { %v20769_v23 = vpop.f32.mrf.mxu1  ;;  %4922 = vmatmul.mubr.bf16.vlgmr.msra.gmra.mxu1 %v23781_v39  ;;  %21040 = vmatpush3.bf16.msra.mxu0 %v22118_v20 }
 0x1bb   : > { %21062 = vmatpush3.bf16.msra.mxu1 %v22119_v22  ;;  %v20748_v25 = vpop.f32.mrf.mxu0  ;;  %5153 = vmatprep.mubr.bf16.mxu0 %v23774_v35  ;;  %v22156_v22 = vld [vmem:[%s30182_s3 + $0x668] sm:$0xff]  }
 0x1bc   : > { %v20749_v27 = vadd.f32 %v20748_v25, %v20747_v21  ;;  %v20770_v28 = vpop.f32.mrf.mxu1  ;;  %21041 = vmatprep.subr.bf16.mxu0 %v22120_v24  ;;  %5193 = vmatprep.mubr.bf16.mxu1 %v23776_v36  ;;  %v22155_v21 = vld [vmem:[%s30182_s3 + $0x6b0] sm:$0xff]  }
 0x1bd   : > { %v20771_v30 = vadd.f32 %v20770_v28, %v20769_v23  ;;  %v20750_v31 = vpop.f32.mrf.mxu0  ;;  %21063 = vmatprep.subr.bf16.mxu1 %v22121_v26  ;;  %v22157_v26 = vld [vmem:[%s30182_s3 + $0x6e8] sm:$0xff]  }
 0x1be   : > { %21042 = vmatpush3.bf16.msra.mxu0 %v22122_v29  ;;  %v20772_v38 = vpop.f32.mrf.mxu1  ;;  %v22159_v29 = vld [vmem:[%s30182_s3 + $0x6a8] sm:$0xff]   ;;  %v22161_v31 = vld [vmem:[%s30182_s3 + $0x6e0] sm:$0xff]  }
 0x1bf   : > { %v25028_v40 = vadd.f32 %v20771_v30, %v20749_v27  ;;  %21064 = vmatpush3.bf16.msra.mxu1 %v22123_v33  ;;  %v20751_v41 = vpop.f32.mrf.mxu0  ;;  %21043 = vmatprep.subr.bf16.mxu0 %v22124_v34  ;;  %v22158_v27 = vld [vmem:[%s30182_s3 + $0x628] sm:$0xff]   ;;  %v22160_v30 = vld [vmem:[%s30182_s3 + $0x660] sm:$0xff]   ;;  %v22164_v38 = vld [vmem:[%s30182_s3 + $0x658] sm:$0xff]  }
 0x1c0   : > { %v20773_v44 = vpop.f32.mrf.mxu1  ;;  %21065 = vmatprep.subr.bf16.mxu1 %v22125_v42  ;;  %v22162_v33 = vld [vmem:[%s30182_s3 + $0x620] sm:$0xff]   ;;  %v22165_v41 = vld [vmem:[%s30182_s3 + $0x6d8] sm:$0xff]  }
 0x1c1   : > { %v22163_v34 = vld [vmem:[%s30182_s3 + $0x6a0] sm:$0xff]   ;;  %v22166_v42 = vld [vmem:[%s30182_s3 + $0x618] sm:$0xff]   ;;  %v22168_v44 = vld [vmem:[%s30182_s3 + $0x650] sm:$0xff]  }
 0x1c2   : > { %21044 = vmatpush3.bf16.msra.mxu0 %v22126_v43  ;;  %v22167_v43 = vld [vmem:[%s30182_s3 + $0x698] sm:$0xff]  }
 0x1c3   : > { %21066 = vmatpush3.bf16.msra.mxu1 %v22127_v45  ;;  %21045 = vmatprep.subr.bf16.mxu0 %v22128_v46  ;;  %v22169_v45 = vld [vmem:[%s30182_s3 + $0x6d0] sm:$0xff]  }
 0x1c4   : > { %21067 = vmatprep.subr.bf16.mxu1 %v22129_v47  ;;  %v22170_v46 = vld [vmem:[%s30182_s3 + $0x610] sm:$0xff]  }
 0x1c5   : > { %v22171_v47 = vld [vmem:[%s30182_s3 + $0x690] sm:$0xff]  }
 0x1c6   : > { %21046 = vmatpush3.bf16.msra.mxu0 %v22130_v48  ;;  %v22172_v48 = vld [vmem:[%s30182_s3 + $0x648] sm:$0xff]  }
 0x1c7   : > { %21068 = vmatpush3.bf16.msra.mxu1 %v22131_v49  ;;  %21047 = vmatprep.subr.bf16.mxu0 %v22132_v50  ;;  %v22173_v49 = vld [vmem:[%s30182_s3 + $0x6c8] sm:$0xff]  }
 0x1c8   : > { %21069 = vmatprep.subr.bf16.mxu1 %v22133_v51  ;;  %v22174_v50 = vld [vmem:[%s30182_s3 + $0x608] sm:$0xff]  }
 0x1c9   : > { %v22175_v51 = vld [vmem:[%s30182_s3 + $0x688] sm:$0xff]  }
 0x1ca   : > { %21048 = vmatpush3.bf16.msra.mxu0 %v22134_v54  ;;  %v22176_v54 = vld [vmem:[%s30182_s3 + $0x640] sm:$0xff]  }
 0x1cb   : > { %21070 = vmatpush3.bf16.msra.mxu1 %v22135_v55  ;;  %21049 = vmatprep.subr.bf16.mxu0 %v22136_v56  ;;  %v22177_v55 = vld [vmem:[%s30182_s3 + $0x6c0] sm:$0xff]  }
 0x1cc   : > { %21071 = vmatprep.subr.bf16.mxu1 %v22137_v57  ;;  %v22178_v56 = vld [vmem:[%s30182_s3 + $0x600] sm:$0xff]  }
 0x1cd   : > { %v22179_v57 = vld [vmem:[%s30182_s3 + $0x680] sm:$0xff]  }
 0x1ce   : > { %21050 = vmatpush3.bf16.msra.mxu0 %v22138_v58  ;;  %v22180_v58 = vld [vmem:[%s30182_s3 + $0x778] sm:$0xff]  }
 0x1cf   : > { %21072 = vmatpush3.bf16.msra.mxu1 %v22139_v59  ;;  %21051 = vmatprep.subr.bf16.mxu0 %v22140_v60  ;;  %v22181_v59 = vld [vmem:[%s30182_s3 + $0x7f8] sm:$0xff]  }
 0x1d0   : > { %21073 = vmatprep.subr.bf16.mxu1 %v22141_v61  ;;  %v22182_v60 = vld [vmem:[%s30182_s3 + $0x738] sm:$0xff]  }
 0x1d2   : > { %21052 = vmatpush3.bf16.msra.mxu0 %v22142_v62  ;;  %v22183_v62 = vld [vmem:[%s30182_s3 + $0x7b8] sm:$0xff]  }
 0x1d3   : > { %21074 = vmatpush3.bf16.msra.mxu1 %v22143_v63  ;;  %21053 = vmatprep.subr.bf16.mxu0 %v22144_v0  ;;  %v22184_v0 = vld [vmem:[%s30182_s3 + $0x770] sm:$0xff]  }
 0x1d4   : > { %21075 = vmatprep.subr.bf16.mxu1 %v22145_v1 }
 0x1d6   : > { %21054 = vmatpush3.bf16.msra.mxu0 %v22146_v4  ;;  %v22185_v4 = vld [vmem:[%s30182_s3 + $0x7f0] sm:$0xff]  }
 0x1d7   : > { %21076 = vmatpush3.bf16.msra.mxu1 %v22147_v5  ;;  %21083 = vmatprep.subr.bf16.mxu0 %v22148_v6 }
 0x1d8   : > { %21105 = vmatprep.subr.bf16.mxu1 %v22149_v7  ;;  %v22186_v7 = vld [vmem:[%s30182_s3 + $0x730] sm:$0xff]  }
 0x1d9   : > { %v20791_v9 = vpop.f32.mrf.mxu0  ;;  %5154 = vmatmul.mubr.bf16.vlgmr.msra.gmra.mxu0 %v23778_v37 }
 0x1da   : > { %v20813_v11 = vpop.f32.mrf.mxu1  ;;  %5194 = vmatmul.mubr.bf16.vlgmr.msra.gmra.mxu1 %v23781_v39  ;;  %21084 = vmatpush3.bf16.msra.mxu0 %v22150_v8 }
 0x1db   : > { %21106 = vmatpush3.bf16.msra.mxu1 %v22151_v10  ;;  %v20792_v13 = vpop.f32.mrf.mxu0  ;;  %5425 = vmatprep.mubr.bf16.mxu0 %v23774_v35  ;;  %v22187_v10 = vld [vmem:[%s30182_s3 + $0x7b0] sm:$0xff]  }
 0x1dc   : > { %v20793_v15 = vadd.f32 %v20792_v13, %v20791_v9  ;;  %v20814_v16 = vpop.f32.mrf.mxu1  ;;  %21085 = vmatprep.subr.bf16.mxu0 %v22152_v12  ;;  %5465 = vmatprep.mubr.bf16.mxu1 %v23776_v36 }
 0x1dd   : > { %v20815_v19 = vadd.f32 %v20814_v16, %v20813_v11  ;;  %v20794_v20 = vpop.f32.mrf.mxu0  ;;  %21107 = vmatprep.subr.bf16.mxu1 %v22153_v14  ;;  %v22188_v11 = vld [vmem:[%s30182_s3 + $0x768] sm:$0xff]  }
 0x1de   : > { %21086 = vmatpush3.bf16.msra.mxu0 %v22154_v18  ;;  %v20816_v23 = vpop.f32.mrf.mxu1  ;;  %v22190_v16 = vld [vmem:[%s30182_s3 + $0x728] sm:$0xff]   ;;  %v22192_v20 = vld [vmem:[%s30182_s3 + $0x760] sm:$0xff]  }
 0x1df   : > { %v25130_v24 = vadd.f32 %v20815_v19, %v20793_v15  ;;  %21108 = vmatpush3.bf16.msra.mxu1 %v22155_v21  ;;  %v20795_v25 = vpop.f32.mrf.mxu0  ;;  %21087 = vmatprep.subr.bf16.mxu0 %v22156_v22  ;;  %v22189_v15 = vld [vmem:[%s30182_s3 + $0x7e8] sm:$0xff]   ;;  %v22193_v21 = vld [vmem:[%s30182_s3 + $0x7e0] sm:$0xff]  }
 0x1e0   : > { %v20817_v28 = vpop.f32.mrf.mxu1  ;;  %21109 = vmatprep.subr.bf16.mxu1 %v22157_v26  ;;  %v22191_v19 = vld [vmem:[%s30182_s3 + $0x7a8] sm:$0xff]   ;;  %v22194_v22 = vld [vmem:[%s30182_s3 + $0x720] sm:$0xff]   ;;  %v22196_v25 = vld [vmem:[%s30182_s3 + $0x758] sm:$0xff]  }
 0x1e1   : > { %v22195_v23 = vld [vmem:[%s30182_s3 + $0x7a0] sm:$0xff]   ;;  %v22197_v26 = vld [vmem:[%s30182_s3 + $0x7d8] sm:$0xff]  }
 0x1e2   : > { %21088 = vmatpush3.bf16.msra.mxu0 %v22158_v27  ;;  %v22198_v27 = vld [vmem:[%s30182_s3 + $0x718] sm:$0xff]  }
 0x1e3   : > { %21110 = vmatpush3.bf16.msra.mxu1 %v22159_v29  ;;  %21089 = vmatprep.subr.bf16.mxu0 %v22160_v30  ;;  %v22199_v28 = vld [vmem:[%s30182_s3 + $0x798] sm:$0xff]   ;;  %v22200_v29 = vld [vmem:[%s30182_s3 + $0x750] sm:$0xff]  }
 0x1e4   : > { %21111 = vmatprep.subr.bf16.mxu1 %v22161_v31  ;;  %v22201_v30 = vld [vmem:[%s30182_s3 + $0x7d0] sm:$0xff]  }
 0x1e5   : > { %v22202_v31 = vld [vmem:[%s30182_s3 + $0x710] sm:$0xff]  }
 0x1e6   : > { %21090 = vmatpush3.bf16.msra.mxu0 %v22162_v33  ;;  %v22203_v33 = vld [vmem:[%s30182_s3 + $0x790] sm:$0xff]  }
 0x1e7   : > { %21112 = vmatpush3.bf16.msra.mxu1 %v22163_v34  ;;  %21091 = vmatprep.subr.bf16.mxu0 %v22164_v38  ;;  %v22204_v34 = vld [vmem:[%s30182_s3 + $0x748] sm:$0xff]  }
 0x1e8   : > { %21113 = vmatprep.subr.bf16.mxu1 %v22165_v41  ;;  %v22205_v38 = vld [vmem:[%s30182_s3 + $0x7c8] sm:$0xff]  }
 0x1e9   : > { %v22206_v41 = vld [vmem:[%s30182_s3 + $0x708] sm:$0xff]  }
 0x1ea   : > { %21092 = vmatpush3.bf16.msra.mxu0 %v22166_v42  ;;  %v22207_v42 = vld [vmem:[%s30182_s3 + $0x788] sm:$0xff]  }
 0x1eb   : > { %21114 = vmatpush3.bf16.msra.mxu1 %v22167_v43  ;;  %21093 = vmatprep.subr.bf16.mxu0 %v22168_v44  ;;  %v22208_v43 = vld [vmem:[%s30182_s3 + $0x740] sm:$0xff]  }
 0x1ec   : > { %21115 = vmatprep.subr.bf16.mxu1 %v22169_v45  ;;  %v22209_v44 = vld [vmem:[%s30182_s3 + $0x7c0] sm:$0xff]  }
 0x1ed   : > { %v22210_v45 = vld [vmem:[%s30182_s3 + $0x700] sm:$0xff]  }
 0x1ee   : > { %21094 = vmatpush3.bf16.msra.mxu0 %v22170_v46  ;;  %v22211_v46 = vld [vmem:[%s30182_s3 + $0x780] sm:$0xff]  }
 0x1ef   : > { %21116 = vmatpush3.bf16.msra.mxu1 %v22171_v47  ;;  %21095 = vmatprep.subr.bf16.mxu0 %v22172_v48  ;;  %v22212_v47 = vld [vmem:[%s30183_s4 + $0x78] sm:$0xff]  }
 0x1f0   : > { %21117 = vmatprep.subr.bf16.mxu1 %v22173_v49  ;;  %v22213_v48 = vld [vmem:[%s30183_s4 + $0xf8] sm:$0xff]  }
 0x1f1   : > { %v22214_v49 = vld [vmem:[%s30183_s4 + $0x38] sm:$0xff]  }
 0x1f2   : > { %21096 = vmatpush3.bf16.msra.mxu0 %v22174_v50 }
 0x1f3   : > { %21118 = vmatpush3.bf16.msra.mxu1 %v22175_v51  ;;  %21097 = vmatprep.subr.bf16.mxu0 %v22176_v54  ;;  %v22215_v51 = vld [vmem:[%s30183_s4 + $0xb8] sm:$0xff]  }
 0x1f4   : > { %21119 = vmatprep.subr.bf16.mxu1 %v22177_v55  ;;  %v22216_v55 = vld [vmem:[%s30183_s4 + $0x70] sm:$0xff]  }
 0x1f6   : > { %21098 = vmatpush3.bf16.msra.mxu0 %v22178_v56 }
 0x1f7   : > { %21120 = vmatpush3.bf16.msra.mxu1 %v22179_v57  ;;  %21127 = vmatprep.subr.bf16.mxu0 %v22180_v58  ;;  %v22217_v57 = vld [vmem:[%s30183_s4 + $0xf0] sm:$0xff]  }
 0x1f8   : > { %21149 = vmatprep.subr.bf16.mxu1 %v22181_v59 }
 0x1f9   : > { %v20835_v61 = vpop.f32.mrf.mxu0  ;;  %5426 = vmatmul.mubr.bf16.vlgmr.msra.gmra.mxu0 %v23778_v37 }
 0x1fa   : > { %v20857_v63 = vpop.f32.mrf.mxu1  ;;  %5466 = vmatmul.mubr.bf16.vlgmr.msra.gmra.mxu1 %v23781_v39  ;;  %21128 = vmatpush3.bf16.msra.mxu0 %v22182_v60  ;;  %v22218_v60 = vld [vmem:[%s30183_s4 + $0x30] sm:$0xff]  }
 0x1fb   : > { %21150 = vmatpush3.bf16.msra.mxu1 %v22183_v62  ;;  %v20836_v1 = vpop.f32.mrf.mxu0  ;;  %5697 = vmatprep.mubr.bf16.mxu0 %v23774_v35 }
 0x1fc   : > { %v20837_v5 = vadd.f32 %v20836_v1, %v20835_v61  ;;  %v20858_v6 = vpop.f32.mrf.mxu1  ;;  %21129 = vmatprep.subr.bf16.mxu0 %v22184_v0  ;;  %5737 = vmatprep.mubr.bf16.mxu1 %v23776_v36  ;;  %v22220_v0 = vld [vmem:[%s30183_s4 + $0x68] sm:$0xff]  }
 0x1fd   : > { %v20859_v8 = vadd.f32 %v20858_v6, %v20857_v63  ;;  %v20838_v9 = vpop.f32.mrf.mxu0  ;;  %21151 = vmatprep.subr.bf16.mxu1 %v22185_v4  ;;  %v22219_v63 = vld [vmem:[%s30183_s4 + $0xb0] sm:$0xff]   ;;  %v22221_v6 = vld [vmem:[%s30183_s4 + $0xe8] sm:$0xff]  }
 0x1fe   : > { %21130 = vmatpush3.bf16.msra.mxu0 %v22186_v7  ;;  %v20860_v12 = vpop.f32.mrf.mxu1  ;;  %v22222_v7 = vld [vmem:[%s30183_s4 + $0x28] sm:$0xff]  }
 0x1ff   : > { %v25232_v13 = vadd.f32 %v20859_v8, %v20837_v5  ;;  %21152 = vmatpush3.bf16.msra.mxu1 %v22187_v10  ;;  %v20839_v14 = vpop.f32.mrf.mxu0  ;;  %21131 = vmatprep.subr.bf16.mxu0 %v22188_v11  ;;  %v22223_v9 = vld [vmem:[%s30183_s4 + $0xa8] sm:$0xff]   ;;  %v22224_v10 = vld [vmem:[%s30183_s4 + $0x60] sm:$0xff]  }
 0x200   : > { %v20861_v18 = vpop.f32.mrf.mxu1  ;;  %21153 = vmatprep.subr.bf16.mxu1 %v22189_v15  ;;  %v22225_v11 = vld [vmem:[%s30183_s4 + $0xe0] sm:$0xff]   ;;  %v22228_v15 = vld [vmem:[%s30183_s4 + $0x58] sm:$0xff]  }
 0x201   : > { %v22226_v12 = vld [vmem:[%s30183_s4 + $0x20] sm:$0xff]   ;;  %v22230_v18 = vld [vmem:[%s30183_s4 + $0x18] sm:$0xff]  }
 0x202   : > { %21132 = vmatpush3.bf16.msra.mxu0 %v22190_v16  ;;  %v22227_v14 = vld [vmem:[%s30183_s4 + $0xa0] sm:$0xff]   ;;  %v22229_v16 = vld [vmem:[%s30183_s4 + $0xd8] sm:$0xff]  }
 0x203   : > { %21154 = vmatpush3.bf16.msra.mxu1 %v22191_v19  ;;  %21133 = vmatprep.subr.bf16.mxu0 %v22192_v20  ;;  %v22231_v19 = vld [vmem:[%s30183_s4 + $0x98] sm:$0xff]   ;;  %v22232_v20 = vld [vmem:[%s30183_s4 + $0x50] sm:$0xff]  }
 0x204   : > { %21155 = vmatprep.subr.bf16.mxu1 %v22193_v21  ;;  %v22233_v21 = vld [vmem:[%s30183_s4 + $0xd0] sm:$0xff]  }
 0x206   : > { %21134 = vmatpush3.bf16.msra.mxu0 %v22194_v22  ;;  %v22234_v22 = vld [vmem:[%s30183_s4 + $0x10] sm:$0xff]  }
 0x207   : > { %21156 = vmatpush3.bf16.msra.mxu1 %v22195_v23  ;;  %21135 = vmatprep.subr.bf16.mxu0 %v22196_v25  ;;  %v22235_v23 = vld [vmem:[%s30183_s4 + $0x90] sm:$0xff]   ;;  %v22236_v25 = vld [vmem:[%s30183_s4 + $0x48] sm:$0xff]  }
 0x208   : > { %21157 = vmatprep.subr.bf16.mxu1 %v22197_v26  ;;  %v22237_v26 = vld [vmem:[%s30183_s4 + $0xc8] sm:$0xff]  }
 0x20a   : > { %21136 = vmatpush3.bf16.msra.mxu0 %v22198_v27  ;;  %v22238_v27 = vld [vmem:[%s30183_s4 + $0x8] sm:$0xff]  }
 0x20b   : > { %21158 = vmatpush3.bf16.msra.mxu1 %v22199_v28  ;;  %21137 = vmatprep.subr.bf16.mxu0 %v22200_v29  ;;  %v22239_v28 = vld [vmem:[%s30183_s4 + $0x88] sm:$0xff]   ;;  %v22240_v29 = vld [vmem:[%s30183_s4 + $0x40] sm:$0xff]  }
 0x20c   : > { %21159 = vmatprep.subr.bf16.mxu1 %v22201_v30  ;;  %v22241_v30 = vld [vmem:[%s30183_s4 + $0xc0] sm:$0xff]  }
 0x20e   : > { %21138 = vmatpush3.bf16.msra.mxu0 %v22202_v31  ;;  %v22242_v31 = vld [vmem:[%s30183_s4] sm:$0xff]  }
 0x20f   : > { %21160 = vmatpush3.bf16.msra.mxu1 %v22203_v33  ;;  %21139 = vmatprep.subr.bf16.mxu0 %v22204_v34  ;;  %v22243_v33 = vld [vmem:[%s30183_s4 + $0x80] sm:$0xff]   ;;  %v22244_v34 = vld [vmem:[%s30183_s4 + $0x178] sm:$0xff]  }
 0x210   : > { %21161 = vmatprep.subr.bf16.mxu1 %v22205_v38  ;;  %v22245_v38 = vld [vmem:[%s30183_s4 + $0x1f8] sm:$0xff]  }
 0x212   : > { %21140 = vmatpush3.bf16.msra.mxu0 %v22206_v41  ;;  %v22246_v41 = vld [vmem:[%s30183_s4 + $0x138] sm:$0xff]  }
 0x213   : > { %21162 = vmatpush3.bf16.msra.mxu1 %v22207_v42  ;;  %21141 = vmatprep.subr.bf16.mxu0 %v22208_v43  ;;  %v22247_v43 = vld [vmem:[%s30183_s4 + $0x1b8] sm:$0xff]  }
 0x214   : > { %21163 = vmatprep.subr.bf16.mxu1 %v22209_v44 }
 0x216   : > { %21142 = vmatpush3.bf16.msra.mxu0 %v22210_v45  ;;  %v22248_v45 = vld [vmem:[%s30183_s4 + $0x170] sm:$0xff]  }
 0x217   : > { %21164 = vmatpush3.bf16.msra.mxu1 %v22211_v46  ;;  %21171 = vmatprep.subr.bf16.mxu0 %v22212_v47  ;;  %v22249_v47 = vld [vmem:[%s30183_s4 + $0x1f0] sm:$0xff]  }
 0x218   : > { %21193 = vmatprep.subr.bf16.mxu1 %v22213_v48 }
 0x219   : > { %v20879_v50 = vpop.f32.mrf.mxu0  ;;  %5698 = vmatmul.mubr.bf16.vlgmr.msra.gmra.mxu0 %v23778_v37 }
 0x21a   : > { %v20901_v54 = vpop.f32.mrf.mxu1  ;;  %5738 = vmatmul.mubr.bf16.vlgmr.msra.gmra.mxu1 %v23781_v39  ;;  %21172 = vmatpush3.bf16.msra.mxu0 %v22214_v49 }
 0x21b   : > { %21194 = vmatpush3.bf16.msra.mxu1 %v22215_v51  ;;  %v20880_v56 = vpop.f32.mrf.mxu0  ;;  %6481 = vmatprep.mubr.bf16.mxu0 %v23774_v35 }
 0x21c   : > { %v20881_v58 = vadd.f32 %v20880_v56, %v20879_v50  ;;  %v20902_v59 = vpop.f32.mrf.mxu1  ;;  %21173 = vmatprep.subr.bf16.mxu0 %v22216_v55  ;;  %6521 = vmatprep.mubr.bf16.mxu1 %v23776_v36  ;;  %v22250_v50 = vld [vmem:[%s30183_s4 + $0x130] sm:$0xff]   ;;  %v22252_v56 = vld [vmem:[%s30183_s4 + $0x168] sm:$0xff]  }
 0x21d   : > { %v20903_v61 = vadd.f32 %v20902_v59, %v20901_v54  ;;  %v20882_v62 = vpop.f32.mrf.mxu0  ;;  %21195 = vmatprep.subr.bf16.mxu1 %v22217_v57  ;;  %v22251_v55 = vld [vmem:[%s30183_s4 + $0x1b0] sm:$0xff]  }
 0x21e   : > { %21174 = vmatpush3.bf16.msra.mxu0 %v22218_v60  ;;  %v20904_v1 = vpop.f32.mrf.mxu1  ;;  %v22253_v60 = vld [vmem:[%s30183_s4 + $0x1e8] sm:$0xff]  }
 0x21f   : > { %v25334_v4 = vadd.f32 %v20903_v61, %v20881_v58  ;;  %21196 = vmatpush3.bf16.msra.mxu1 %v22219_v63  ;;  %v20883_v5 = vpop.f32.mrf.mxu0  ;;  %21175 = vmatprep.subr.bf16.mxu0 %v22220_v0  ;;  %v22254_v61 = vld [vmem:[%s30183_s4 + $0x128] sm:$0xff]   ;;  %v22256_v0 = vld [vmem:[%s30183_s4 + $0x160] sm:$0xff]  }
 0x220   : > { %v20905_v8 = vpop.f32.mrf.mxu1  ;;  %21197 = vmatprep.subr.bf16.mxu1 %v22221_v6  ;;  %v22255_v63 = vld [vmem:[%s30183_s4 + $0x1a8] sm:$0xff]   ;;  %v22257_v1 = vld [vmem:[%s30183_s4 + $0x1e0] sm:$0xff]  }
 0x221   : > { %v22258_v5 = vld [vmem:[%s30183_s4 + $0x120] sm:$0xff]   ;;  %v22261_v8 = vld [vmem:[%s30183_s4 + $0x1d8] sm:$0xff]  }
 0x222   : > { %21176 = vmatpush3.bf16.msra.mxu0 %v22222_v7  ;;  %v22259_v6 = vld [vmem:[%s30183_s4 + $0x1a0] sm:$0xff]   ;;  %v22260_v7 = vld [vmem:[%s30183_s4 + $0x158] sm:$0xff]  }
 0x223   : > { %21198 = vmatpush3.bf16.msra.mxu1 %v22223_v9  ;;  %21177 = vmatprep.subr.bf16.mxu0 %v22224_v10  ;;  %v22262_v9 = vld [vmem:[%s30183_s4 + $0x118] sm:$0xff]  }
 0x224   : > { %21199 = vmatprep.subr.bf16.mxu1 %v22225_v11  ;;  %v22263_v10 = vld [vmem:[%s30183_s4 + $0x198] sm:$0xff]   ;;  %v22264_v11 = vld [vmem:[%s30183_s4 + $0x150] sm:$0xff]  }
 0x226   : > { %21178 = vmatpush3.bf16.msra.mxu0 %v22226_v12  ;;  %v22265_v12 = vld [vmem:[%s30183_s4 + $0x1d0] sm:$0xff]  }
 0x227   : > { %21200 = vmatpush3.bf16.msra.mxu1 %v22227_v14  ;;  %21179 = vmatprep.subr.bf16.mxu0 %v22228_v15  ;;  %v22266_v14 = vld [vmem:[%s30183_s4 + $0x110] sm:$0xff]  }
 0x228   : > { %21201 = vmatprep.subr.bf16.mxu1 %v22229_v16  ;;  %v22267_v15 = vld [vmem:[%s30183_s4 + $0x190] sm:$0xff]   ;;  %v22268_v16 = vld [vmem:[%s30183_s4 + $0x148] sm:$0xff]  }
 0x22a   : > { %21180 = vmatpush3.bf16.msra.mxu0 %v22230_v18  ;;  %v22269_v18 = vld [vmem:[%s30183_s4 + $0x1c8] sm:$0xff]  }
 0x22b   : > { %21202 = vmatpush3.bf16.msra.mxu1 %v22231_v19  ;;  %21181 = vmatprep.subr.bf16.mxu0 %v22232_v20  ;;  %v22270_v19 = vld [vmem:[%s30183_s4 + $0x108] sm:$0xff]  }
 0x22c   : > { %21203 = vmatprep.subr.bf16.mxu1 %v22233_v21  ;;  %v22271_v20 = vld [vmem:[%s30183_s4 + $0x188] sm:$0xff]   ;;  %v22272_v21 = vld [vmem:[%s30183_s4 + $0x140] sm:$0xff]  }
 0x22e   : > { %21182 = vmatpush3.bf16.msra.mxu0 %v22234_v22  ;;  %v22273_v22 = vld [vmem:[%s30183_s4 + $0x1c0] sm:$0xff]  }
 0x22f   : > { %21204 = vmatpush3.bf16.msra.mxu1 %v22235_v23  ;;  %21183 = vmatprep.subr.bf16.mxu0 %v22236_v25  ;;  %v22274_v23 = vld [vmem:[%s30183_s4 + $0x100] sm:$0xff]  }
 0x230   : > { %21205 = vmatprep.subr.bf16.mxu1 %v22237_v26  ;;  %v22275_v25 = vld [vmem:[%s30183_s4 + $0x180] sm:$0xff]   ;;  %v22276_v26 = vld [vmem:[%s30183_s4 + $0x278] sm:$0xff]  }
 0x232   : > { %21184 = vmatpush3.bf16.msra.mxu0 %v22238_v27  ;;  %v22277_v27 = vld [vmem:[%s30183_s4 + $0x2f8] sm:$0xff]  }
 0x233   : > { %21206 = vmatpush3.bf16.msra.mxu1 %v22239_v28  ;;  %21185 = vmatprep.subr.bf16.mxu0 %v22240_v29  ;;  %v22278_v28 = vld [vmem:[%s30183_s4 + $0x238] sm:$0xff]  }
 0x234   : > { %21207 = vmatprep.subr.bf16.mxu1 %v22241_v30  ;;  %v22279_v30 = vld [vmem:[%s30183_s4 + $0x2b8] sm:$0xff]  }
 0x236   : > { %21186 = vmatpush3.bf16.msra.mxu0 %v22242_v31 }
 0x237   : > { %21208 = vmatpush3.bf16.msra.mxu1 %v22243_v33  ;;  %21215 = vmatprep.subr.bf16.mxu0 %v22244_v34  ;;  %v22280_v33 = vld [vmem:[%s30183_s4 + $0x270] sm:$0xff]  }
 0x238   : > { %21237 = vmatprep.subr.bf16.mxu1 %v22245_v38  ;;  %v22281_v38 = vld [vmem:[%s30183_s4 + $0x2f0] sm:$0xff]  }
 0x239   : > { %v20923_v42 = vpop.f32.mrf.mxu0  ;;  %6482 = vmatmul.mubr.bf16.vlgmr.msra.gmra.mxu0 %v23778_v37 }
 0x23a   : > { %v20945_v44 = vpop.f32.mrf.mxu1  ;;  %6522 = vmatmul.mubr.bf16.vlgmr.msra.gmra.mxu1 %v23781_v39  ;;  %21216 = vmatpush3.bf16.msra.mxu0 %v22246_v41 }
 0x23b   : > { %21238 = vmatpush3.bf16.msra.mxu1 %v22247_v43  ;;  %v20924_v46 = vpop.f32.mrf.mxu0  ;;  %6753 = vmatprep.mubr.bf16.mxu0 %v23774_v35  ;;  %v22282_v43 = vld [vmem:[%s30183_s4 + $0x230] sm:$0xff]  }
 0x23c   : > { %v20925_v48 = vadd.f32 %v20924_v46, %v20923_v42  ;;  %v20946_v49 = vpop.f32.mrf.mxu1  ;;  %21217 = vmatprep.subr.bf16.mxu0 %v22248_v45  ;;  %6793 = vmatprep.mubr.bf16.mxu1 %v23776_v36  ;;  %v22283_v46 = vld [vmem:[%s30183_s4 + $0x2b0] sm:$0xff]  }
 0x23d   : > { %v20947_v51 = vadd.f32 %v20946_v49, %v20945_v44  ;;  %v20926_v54 = vpop.f32.mrf.mxu0  ;;  %21239 = vmatprep.subr.bf16.mxu1 %v22249_v47  ;;  %v22284_v47 = vld [vmem:[%s30183_s4 + $0x268] sm:$0xff]  }
 0x23e   : > { %21218 = vmatpush3.bf16.msra.mxu0 %v22250_v50  ;;  %v20948_v57 = vpop.f32.mrf.mxu1  ;;  %v22286_v54 = vld [vmem:[%s30183_s4 + $0x228] sm:$0xff]  }
 0x23f   : > { %v25436_v58 = vadd.f32 %v20947_v51, %v20925_v48  ;;  %21240 = vmatpush3.bf16.msra.mxu1 %v22251_v55  ;;  %v20927_v59 = vpop.f32.mrf.mxu0  ;;  %21219 = vmatprep.subr.bf16.mxu0 %v22252_v56  ;;  %v22285_v51 = vld [vmem:[%s30183_s4 + $0x2e8] sm:$0xff]   ;;  %v22288_v57 = vld [vmem:[%s30183_s4 + $0x260] sm:$0xff]  }
 0x240   : > { %v20949_v62 = vpop.f32.mrf.mxu1  ;;  %21241 = vmatprep.subr.bf16.mxu1 %v22253_v60  ;;  %v22287_v56 = vld [vmem:[%s30183_s4 + $0x2a8] sm:$0xff]   ;;  %v22289_v59 = vld [vmem:[%s30183_s4 + $0x2e0] sm:$0xff]  }
 0x241   : > { %v22290_v60 = vld [vmem:[%s30183_s4 + $0x220] sm:$0xff]   ;;  %v22292_v62 = vld [vmem:[%s30183_s4 + $0x258] sm:$0xff]  }
 0x242   : > { %21220 = vmatpush3.bf16.msra.mxu0 %v22254_v61  ;;  %v22291_v61 = vld [vmem:[%s30183_s4 + $0x2a0] sm:$0xff]  }
 0x243   : > { %21242 = vmatpush3.bf16.msra.mxu1 %v22255_v63  ;;  %21221 = vmatprep.subr.bf16.mxu0 %v22256_v0  ;;  %v22293_v63 = vld [vmem:[%s30183_s4 + $0x2d8] sm:$0xff]  }
 0x244   : > { %21243 = vmatprep.subr.bf16.mxu1 %v22257_v1  ;;  %v22294_v0 = vld [vmem:[%s30183_s4 + $0x218] sm:$0xff]  }
 0x245   : > { %v22295_v1 = vld [vmem:[%s30183_s4 + $0x298] sm:$0xff]  }
 0x246   : > { %21222 = vmatpush3.bf16.msra.mxu0 %v22258_v5  ;;  %v22296_v5 = vld [vmem:[%s30183_s4 + $0x250] sm:$0xff]  }
 0x247   : > { %21244 = vmatpush3.bf16.msra.mxu1 %v22259_v6  ;;  %21223 = vmatprep.subr.bf16.mxu0 %v22260_v7  ;;  %v22297_v6 = vld [vmem:[%s30183_s4 + $0x2d0] sm:$0xff]  }
 0x248   : > { %21245 = vmatprep.subr.bf16.mxu1 %v22261_v8  ;;  %v22298_v7 = vld [vmem:[%s30183_s4 + $0x210] sm:$0xff]  }
 0x249   : > { %v22299_v8 = vld [vmem:[%s30183_s4 + $0x290] sm:$0xff]  }
 0x24a   : > { %21224 = vmatpush3.bf16.msra.mxu0 %v22262_v9  ;;  %v22300_v9 = vld [vmem:[%s30183_s4 + $0x248] sm:$0xff]  }
 0x24b   : > { %21246 = vmatpush3.bf16.msra.mxu1 %v22263_v10  ;;  %21225 = vmatprep.subr.bf16.mxu0 %v22264_v11  ;;  %v22301_v10 = vld [vmem:[%s30183_s4 + $0x2c8] sm:$0xff]  }
 0x24c   : > { %21247 = vmatprep.subr.bf16.mxu1 %v22265_v12  ;;  %v22302_v11 = vld [vmem:[%s30183_s4 + $0x208] sm:$0xff]  }
 0x24d   : > { %v22303_v12 = vld [vmem:[%s30183_s4 + $0x288] sm:$0xff]  }
 0x24e   : > { %21226 = vmatpush3.bf16.msra.mxu0 %v22266_v14  ;;  %v22304_v14 = vld [vmem:[%s30183_s4 + $0x240] sm:$0xff]  }
 0x24f   : > { %21248 = vmatpush3.bf16.msra.mxu1 %v22267_v15  ;;  %21227 = vmatprep.subr.bf16.mxu0 %v22268_v16  ;;  %v22305_v15 = vld [vmem:[%s30183_s4 + $0x2c0] sm:$0xff]  }
 0x250   : > { %21249 = vmatprep.subr.bf16.mxu1 %v22269_v18  ;;  %v22306_v16 = vld [vmem:[%s30183_s4 + $0x200] sm:$0xff]  }
 0x251   : > { %v22307_v18 = vld [vmem:[%s30183_s4 + $0x280] sm:$0xff]  }
 0x252   : > { %21228 = vmatpush3.bf16.msra.mxu0 %v22270_v19  ;;  %v22308_v19 = vld [vmem:[%s30183_s4 + $0x378] sm:$0xff]  }
 0x253   : > { %21250 = vmatpush3.bf16.msra.mxu1 %v22271_v20  ;;  %21229 = vmatprep.subr.bf16.mxu0 %v22272_v21  ;;  %v22309_v20 = vld [vmem:[%s30183_s4 + $0x3f8] sm:$0xff]  }
 0x254   : > { %21251 = vmatprep.subr.bf16.mxu1 %v22273_v22  ;;  %v22310_v21 = vld [vmem:[%s30183_s4 + $0x338] sm:$0xff]  }
 0x256   : > { %21230 = vmatpush3.bf16.msra.mxu0 %v22274_v23  ;;  %v22311_v23 = vld [vmem:[%s30183_s4 + $0x3b8] sm:$0xff]  }
 0x257   : > { %21252 = vmatpush3.bf16.msra.mxu1 %v22275_v25  ;;  %21259 = vmatprep.subr.bf16.mxu0 %v22276_v26  ;;  %v22312_v26 = vld [vmem:[%s30183_s4 + $0x370] sm:$0xff]  }
 0x258   : > { %21281 = vmatprep.subr.bf16.mxu1 %v22277_v27 }
 0x259   : > { %v20967_v29 = vpop.f32.mrf.mxu0  ;;  %6754 = vmatmul.mubr.bf16.vlgmr.msra.gmra.mxu0 %v23778_v37 }
 0x25a   : > { %v20989_v31 = vpop.f32.mrf.mxu1  ;;  %6794 = vmatmul.mubr.bf16.vlgmr.msra.gmra.mxu1 %v23781_v39  ;;  %21260 = vmatpush3.bf16.msra.mxu0 %v22278_v28  ;;  %v22313_v28 = vld [vmem:[%s30183_s4 + $0x3f0] sm:$0xff]  }
 0x25b   : > { %21282 = vmatpush3.bf16.msra.mxu1 %v22279_v30  ;;  %v20968_v34 = vpop.f32.mrf.mxu0  ;;  %7025 = vmatprep.mubr.bf16.mxu0 %v23774_v35 }
 0x25c   : > { %v20969_v41 = vadd.f32 %v20968_v34, %v20967_v29  ;;  %v20990_v42 = vpop.f32.mrf.mxu1  ;;  %21261 = vmatprep.subr.bf16.mxu0 %v22280_v33  ;;  %7065 = vmatprep.mubr.bf16.mxu1 %v23776_v36 }
 0x25d   : > { %v20991_v44 = vadd.f32 %v20990_v42, %v20989_v31  ;;  %v20970_v45 = vpop.f32.mrf.mxu0  ;;  %21283 = vmatprep.subr.bf16.mxu1 %v22281_v38  ;;  %v22314_v31 = vld [vmem:[%s30183_s4 + $0x330] sm:$0xff]  }
 0x25e   : > { %21262 = vmatpush3.bf16.msra.mxu0 %v22282_v43  ;;  %v20992_v48 = vpop.f32.mrf.mxu1  ;;  %v22315_v38 = vld [vmem:[%s30183_s4 + $0x3b0] sm:$0xff]   ;;  %v22317_v45 = vld [vmem:[%s30183_s4 + $0x3e8] sm:$0xff]  }
 0x25f   : > { %v25538_v49 = vadd.f32 %v20991_v44, %v20969_v41  ;;  %21284 = vmatpush3.bf16.msra.mxu1 %v22283_v46  ;;  %v20971_v50 = vpop.f32.mrf.mxu0  ;;  %21263 = vmatprep.subr.bf16.mxu0 %v22284_v47  ;;  %v22316_v41 = vld [vmem:[%s30183_s4 + $0x368] sm:$0xff]  }
 0x260   : > { %v20993_v55 = vpop.f32.mrf.mxu1  ;;  %21285 = vmatprep.subr.bf16.mxu1 %v22285_v51  ;;  %v22318_v46 = vld [vmem:[%s30183_s4 + $0x328] sm:$0xff]   ;;  %v22320_v50 = vld [vmem:[%s30183_s4 + $0x360] sm:$0xff]  }
 0x261   : > { %v22319_v48 = vld [vmem:[%s30183_s4 + $0x3a8] sm:$0xff]   ;;  %v22321_v51 = vld [vmem:[%s30183_s4 + $0x3e0] sm:$0xff]  }
 0x262   : > { %21264 = vmatpush3.bf16.msra.mxu0 %v22286_v54  ;;  %v22322_v54 = vld [vmem:[%s30183_s4 + $0x320] sm:$0xff]  }
 0x263   : > { %21286 = vmatpush3.bf16.msra.mxu1 %v22287_v56  ;;  %21265 = vmatprep.subr.bf16.mxu0 %v22288_v57  ;;  %v22323_v55 = vld [vmem:[%s30183_s4 + $0x3a0] sm:$0xff]   ;;  %v22324_v56 = vld [vmem:[%s30183_s4 + $0x358] sm:$0xff]  }
 0x264   : > { %21287 = vmatprep.subr.bf16.mxu1 %v22289_v59  ;;  %v22325_v57 = vld [vmem:[%s30183_s4 + $0x3d8] sm:$0xff]  }
 0x265   : > { %v22326_v59 = vld [vmem:[%s30183_s4 + $0x318] sm:$0xff]  }
 0x266   : > { %21266 = vmatpush3.bf16.msra.mxu0 %v22290_v60  ;;  %v22327_v60 = vld [vmem:[%s30183_s4 + $0x398] sm:$0xff]  }
 0x267   : > { %21288 = vmatpush3.bf16.msra.mxu1 %v22291_v61  ;;  %21267 = vmatprep.subr.bf16.mxu0 %v22292_v62  ;;  %v22328_v61 = vld [vmem:[%s30183_s4 + $0x350] sm:$0xff]  }
 0x268   : > { %21289 = vmatprep.subr.bf16.mxu1 %v22293_v63  ;;  %v22329_v62 = vld [vmem:[%s30183_s4 + $0x3d0] sm:$0xff]  }
 0x269   : > { %v22330_v63 = vld [vmem:[%s30183_s4 + $0x310] sm:$0xff]  }
 0x26a   : > { %21268 = vmatpush3.bf16.msra.mxu0 %v22294_v0  ;;  %v22331_v0 = vld [vmem:[%s30183_s4 + $0x390] sm:$0xff]  }
 0x26b   : > { %21290 = vmatpush3.bf16.msra.mxu1 %v22295_v1  ;;  %21269 = vmatprep.subr.bf16.mxu0 %v22296_v5  ;;  %v22332_v1 = vld [vmem:[%s30183_s4 + $0x348] sm:$0xff]  }
 0x26c   : > { %21291 = vmatprep.subr.bf16.mxu1 %v22297_v6  ;;  %v22333_v5 = vld [vmem:[%s30183_s4 + $0x3c8] sm:$0xff]  }
 0x26d   : > { %v22334_v6 = vld [vmem:[%s30183_s4 + $0x308] sm:$0xff]  }
 0x26e   : > { %21270 = vmatpush3.bf16.msra.mxu0 %v22298_v7  ;;  %v22335_v7 = vld [vmem:[%s30183_s4 + $0x388] sm:$0xff]  }
 0x26f   : > { %21292 = vmatpush3.bf16.msra.mxu1 %v22299_v8  ;;  %21271 = vmatprep.subr.bf16.mxu0 %v22300_v9  ;;  %v22336_v8 = vld [vmem:[%s30183_s4 + $0x340] sm:$0xff]  }
 0x270   : > { %21293 = vmatprep.subr.bf16.mxu1 %v22301_v10  ;;  %v22337_v9 = vld [vmem:[%s30183_s4 + $0x3c0] sm:$0xff]  }
 0x271   : > { %v22338_v10 = vld [vmem:[%s30183_s4 + $0x300] sm:$0xff]  }
 0x272   : > { %21272 = vmatpush3.bf16.msra.mxu0 %v22302_v11  ;;  %v22339_v11 = vld [vmem:[%s30183_s4 + $0x380] sm:$0xff]  }
 0x273   : > { %21294 = vmatpush3.bf16.msra.mxu1 %v22303_v12  ;;  %21273 = vmatprep.subr.bf16.mxu0 %v22304_v14  ;;  %v22340_v12 = vld [vmem:[%s30183_s4 + $0x478] sm:$0xff]  }
 0x274   : > { %21295 = vmatprep.subr.bf16.mxu1 %v22305_v15  ;;  %v22341_v14 = vld [vmem:[%s30183_s4 + $0x4f8] sm:$0xff]  }
 0x275   : > { %v22342_v15 = vld [vmem:[%s30183_s4 + $0x438] sm:$0xff]  }
 0x276   : > { %21274 = vmatpush3.bf16.msra.mxu0 %v22306_v16 }
 0x277   : > { %21296 = vmatpush3.bf16.msra.mxu1 %v22307_v18  ;;  %21303 = vmatprep.subr.bf16.mxu0 %v22308_v19  ;;  %v22343_v18 = vld [vmem:[%s30183_s4 + $0x4b8] sm:$0xff]  }
 0x278   : > { %21325 = vmatprep.subr.bf16.mxu1 %v22309_v20  ;;  %v22344_v20 = vld [vmem:[%s30183_s4 + $0x470] sm:$0xff]  }
 0x279   : > { %v21011_v22 = vpop.f32.mrf.mxu0  ;;  %7026 = vmatmul.mubr.bf16.vlgmr.msra.gmra.mxu0 %v23778_v37 }
 0x27a   : > { %v21033_v25 = vpop.f32.mrf.mxu1  ;;  %7066 = vmatmul.mubr.bf16.vlgmr.msra.gmra.mxu1 %v23781_v39  ;;  %21304 = vmatpush3.bf16.msra.mxu0 %v22310_v21 }
 0x27b   : > { %21326 = vmatpush3.bf16.msra.mxu1 %v22311_v23  ;;  %v21012_v27 = vpop.f32.mrf.mxu0  ;;  %7297 = vmatprep.mubr.bf16.mxu0 %v23774_v35 }
 0x27c   : > { %v21013_v29 = vadd.f32 %v21012_v27, %v21011_v22  ;;  %v21034_v30 = vpop.f32.mrf.mxu1  ;;  %21305 = vmatprep.subr.bf16.mxu0 %v22312_v26  ;;  %7337 = vmatprep.mubr.bf16.mxu1 %v23776_v36  ;;  %v22345_v22 = vld [vmem:[%s30183_s4 + $0x4f0] sm:$0xff]  }
 0x27d   : > { %v21035_v33 = vadd.f32 %v21034_v30, %v21033_v25  ;;  %v21014_v34 = vpop.f32.mrf.mxu0  ;;  %21327 = vmatprep.subr.bf16.mxu1 %v22313_v28  ;;  %v22346_v26 = vld [vmem:[%s30183_s4 + $0x430] sm:$0xff]   ;;  %v22348_v30 = vld [vmem:[%s30183_s4 + $0x468] sm:$0xff]  }
 0x27e   : > { %21306 = vmatpush3.bf16.msra.mxu0 %v22314_v31  ;;  %v21036_v42 = vpop.f32.mrf.mxu1 }
 0x27f   : > { %v25640_v43 = vadd.f32 %v21035_v33, %v21013_v29  ;;  %21328 = vmatpush3.bf16.msra.mxu1 %v22315_v38  ;;  %v21015_v44 = vpop.f32.mrf.mxu0  ;;  %21307 = vmatprep.subr.bf16.mxu0 %v22316_v41  ;;  %v22347_v29 = vld [vmem:[%s30183_s4 + $0x4b0] sm:$0xff]   ;;  %v22349_v38 = vld [vmem:[%s30183_s4 + $0x4e8] sm:$0xff]  }
 0x280   : > { %v21037_v47 = vpop.f32.mrf.mxu1  ;;  %21329 = vmatprep.subr.bf16.mxu1 %v22317_v45  ;;  %v22350_v41 = vld [vmem:[%s30183_s4 + $0x428] sm:$0xff]   ;;  %v22352_v45 = vld [vmem:[%s30183_s4 + $0x460] sm:$0xff]  }
 0x281   : > { %v22351_v44 = vld [vmem:[%s30183_s4 + $0x4a8] sm:$0xff]   ;;  %v22354_v47 = vld [vmem:[%s30183_s4 + $0x420] sm:$0xff]  }
 0x282   : > { %21308 = vmatpush3.bf16.msra.mxu0 %v22318_v46  ;;  %v22353_v46 = vld [vmem:[%s30183_s4 + $0x4e0] sm:$0xff]  }
 0x283   : > { %21330 = vmatpush3.bf16.msra.mxu1 %v22319_v48  ;;  %21309 = vmatprep.subr.bf16.mxu0 %v22320_v50  ;;  %v22355_v48 = vld [vmem:[%s30183_s4 + $0x4a0] sm:$0xff]   ;;  %v22356_v50 = vld [vmem:[%s30183_s4 + $0x458] sm:$0xff]  }
 0x284   : > { %21331 = vmatprep.subr.bf16.mxu1 %v22321_v51  ;;  %v22357_v51 = vld [vmem:[%s30183_s4 + $0x4d8] sm:$0xff]  }
 0x286   : > { %21310 = vmatpush3.bf16.msra.mxu0 %v22322_v54  ;;  %v22358_v54 = vld [vmem:[%s30183_s4 + $0x418] sm:$0xff]  }
 0x287   : > { %21332 = vmatpush3.bf16.msra.mxu1 %v22323_v55  ;;  %21311 = vmatprep.subr.bf16.mxu0 %v22324_v56  ;;  %v22359_v55 = vld [vmem:[%s30183_s4 + $0x498] sm:$0xff]   ;;  %v22360_v56 = vld [vmem:[%s30183_s4 + $0x450] sm:$0xff]  }
 0x288   : > { %21333 = vmatprep.subr.bf16.mxu1 %v22325_v57  ;;  %v22361_v57 = vld [vmem:[%s30183_s4 + $0x4d0] sm:$0xff]  }
 0x28a   : > { %21312 = vmatpush3.bf16.msra.mxu0 %v22326_v59  ;;  %v22362_v59 = vld [vmem:[%s30183_s4 + $0x410] sm:$0xff]  }
 0x28b   : > { %21334 = vmatpush3.bf16.msra.mxu1 %v22327_v60  ;;  %21313 = vmatprep.subr.bf16.mxu0 %v22328_v61  ;;  %v22363_v60 = vld [vmem:[%s30183_s4 + $0x490] sm:$0xff]   ;;  %v22364_v61 = vld [vmem:[%s30183_s4 + $0x448] sm:$0xff]  }
 0x28c   : > { %21335 = vmatprep.subr.bf16.mxu1 %v22329_v62  ;;  %v22365_v62 = vld [vmem:[%s30183_s4 + $0x4c8] sm:$0xff]  }
 0x28e   : > { %21314 = vmatpush3.bf16.msra.mxu0 %v22330_v63  ;;  %v22366_v63 = vld [vmem:[%s30183_s4 + $0x408] sm:$0xff]  }
 0x28f   : > { %21336 = vmatpush3.bf16.msra.mxu1 %v22331_v0  ;;  %21315 = vmatprep.subr.bf16.mxu0 %v22332_v1  ;;  %v22367_v0 = vld [vmem:[%s30183_s4 + $0x488] sm:$0xff]   ;;  %v22368_v1 = vld [vmem:[%s30183_s4 + $0x440] sm:$0xff]  }
 0x290   : > { %21337 = vmatprep.subr.bf16.mxu1 %v22333_v5  ;;  %v22369_v5 = vld [vmem:[%s30183_s4 + $0x4c0] sm:$0xff]  }
 0x292   : > { %21316 = vmatpush3.bf16.msra.mxu0 %v22334_v6  ;;  %v22370_v6 = vld [vmem:[%s30183_s4 + $0x400] sm:$0xff]  }
 0x293   : > { %21338 = vmatpush3.bf16.msra.mxu1 %v22335_v7  ;;  %21317 = vmatprep.subr.bf16.mxu0 %v22336_v8  ;;  %v22371_v7 = vld [vmem:[%s30183_s4 + $0x480] sm:$0xff]   ;;  %v22372_v8 = vld [vmem:[%s30183_s4 + $0x578] sm:$0xff]  }
 0x294   : > { %21339 = vmatprep.subr.bf16.mxu1 %v22337_v9  ;;  %v22373_v9 = vld [vmem:[%s30183_s4 + $0x5f8] sm:$0xff]  }
 0x296   : > { %21318 = vmatpush3.bf16.msra.mxu0 %v22338_v10  ;;  %v22374_v10 = vld [vmem:[%s30183_s4 + $0x538] sm:$0xff]  }
 0x297   : > { %21340 = vmatpush3.bf16.msra.mxu1 %v22339_v11  ;;  %21347 = vmatprep.subr.bf16.mxu0 %v22340_v12  ;;  %v22375_v12 = vld [vmem:[%s30183_s4 + $0x5b8] sm:$0xff]  }
 0x298   : > { %21369 = vmatprep.subr.bf16.mxu1 %v22341_v14 }
 0x299   : > { %v21055_v16 = vpop.f32.mrf.mxu0  ;;  %7298 = vmatmul.mubr.bf16.vlgmr.msra.gmra.mxu0 %v23778_v37 }
 0x29a   : > { %v21077_v19 = vpop.f32.mrf.mxu1  ;;  %7338 = vmatmul.mubr.bf16.vlgmr.msra.gmra.mxu1 %v23781_v39  ;;  %21348 = vmatpush3.bf16.msra.mxu0 %v22342_v15  ;;  %v22376_v15 = vld [vmem:[%s30183_s4 + $0x570] sm:$0xff]  }
 0x29b   : > { %21370 = vmatpush3.bf16.msra.mxu1 %v22343_v18  ;;  %v21056_v21 = vpop.f32.mrf.mxu0  ;;  %7569 = vmatprep.mubr.bf16.mxu0 %v23774_v35  ;;  %v22377_v18 = vld [vmem:[%s30183_s4 + $0x5f0] sm:$0xff]  }
 0x29c   : > { %v21057_v23 = vadd.f32 %v21056_v21, %v21055_v16  ;;  %v21078_v25 = vpop.f32.mrf.mxu1  ;;  %21349 = vmatprep.subr.bf16.mxu0 %v22344_v20  ;;  %7609 = vmatprep.mubr.bf16.mxu1 %v23776_v36  ;;  %v22378_v21 = vld [vmem:[%s30183_s4 + $0x530] sm:$0xff]  }
 0x29d   : > { %v21079_v27 = vadd.f32 %v21078_v25, %v21077_v19  ;;  %v21058_v28 = vpop.f32.mrf.mxu0  ;;  %21371 = vmatprep.subr.bf16.mxu1 %v22345_v22  ;;  %v22379_v25 = vld [vmem:[%s30183_s4 + $0x5b0] sm:$0xff]  }
 0x29e   : > { %21350 = vmatpush3.bf16.msra.mxu0 %v22346_v26  ;;  %v21080_v31 = vpop.f32.mrf.mxu1  ;;  %v22380_v26 = vld [vmem:[%s30183_s4 + $0x568] sm:$0xff]  }
 0x29f   : > { %v25742_v33 = vadd.f32 %v21079_v27, %v21057_v23  ;;  %21372 = vmatpush3.bf16.msra.mxu1 %v22347_v29  ;;  %v21059_v34 = vpop.f32.mrf.mxu0  ;;  %21351 = vmatprep.subr.bf16.mxu0 %v22348_v30  ;;  %v22381_v30 = vld [vmem:[%s30183_s4 + $0x5e8] sm:$0xff]  }
 0x2a0   : > { %v21081_v42 = vpop.f32.mrf.mxu1  ;;  %21373 = vmatprep.subr.bf16.mxu1 %v22349_v38  ;;  %v22382_v31 = vld [vmem:[%s30183_s4 + $0x528] sm:$0xff]  }
 0x2a1   : > { %v22383_v38 = vld [vmem:[%s30183_s4 + $0x5a8] sm:$0xff]   ;;  %v22385_v42 = vld [vmem:[%s30183_s4 + $0x5e0] sm:$0xff]  }
 0x2a2   : > { %21352 = vmatpush3.bf16.msra.mxu0 %v22350_v41  ;;  %v22384_v41 = vld [vmem:[%s30183_s4 + $0x560] sm:$0xff]  }
 0x2a3   : > { %21374 = vmatpush3.bf16.msra.mxu1 %v22351_v44  ;;  %21353 = vmatprep.subr.bf16.mxu0 %v22352_v45  ;;  %v22386_v44 = vld [vmem:[%s30183_s4 + $0x520] sm:$0xff]  }
 0x2a4   : > { %21375 = vmatprep.subr.bf16.mxu1 %v22353_v46  ;;  %v22387_v45 = vld [vmem:[%s30183_s4 + $0x5a0] sm:$0xff]   ;;  %v22388_v46 = vld [vmem:[%s30183_s4 + $0x558] sm:$0xff]  }
 0x2a6   : > { %21354 = vmatpush3.bf16.msra.mxu0 %v22354_v47  ;;  %v22389_v47 = vld [vmem:[%s30183_s4 + $0x5d8] sm:$0xff]  }
 0x2a7   : > { %21376 = vmatpush3.bf16.msra.mxu1 %v22355_v48  ;;  %21355 = vmatprep.subr.bf16.mxu0 %v22356_v50  ;;  %v22390_v48 = vld [vmem:[%s30183_s4 + $0x518] sm:$0xff]  }
 0x2a8   : > { %21377 = vmatprep.subr.bf16.mxu1 %v22357_v51  ;;  %v22391_v50 = vld [vmem:[%s30183_s4 + $0x598] sm:$0xff]   ;;  %v22392_v51 = vld [vmem:[%s30183_s4 + $0x550] sm:$0xff]  }
 0x2aa   : > { %21356 = vmatpush3.bf16.msra.mxu0 %v22358_v54  ;;  %v22393_v54 = vld [vmem:[%s30183_s4 + $0x5d0] sm:$0xff]  }
 0x2ab   : > { %21378 = vmatpush3.bf16.msra.mxu1 %v22359_v55  ;;  %21357 = vmatprep.subr.bf16.mxu0 %v22360_v56  ;;  %v22394_v55 = vld [vmem:[%s30183_s4 + $0x510] sm:$0xff]  }
 0x2ac   : > { %21379 = vmatprep.subr.bf16.mxu1 %v22361_v57  ;;  %v22395_v56 = vld [vmem:[%s30183_s4 + $0x590] sm:$0xff]   ;;  %v22396_v57 = vld [vmem:[%s30183_s4 + $0x548] sm:$0xff]  }
 0x2ae   : > { %21358 = vmatpush3.bf16.msra.mxu0 %v22362_v59  ;;  %v22397_v59 = vld [vmem:[%s30183_s4 + $0x5c8] sm:$0xff]  }
 0x2af   : > { %21380 = vmatpush3.bf16.msra.mxu1 %v22363_v60  ;;  %21359 = vmatprep.subr.bf16.mxu0 %v22364_v61  ;;  %v22398_v60 = vld [vmem:[%s30183_s4 + $0x508] sm:$0xff]  }
 0x2b0   : > { %21381 = vmatprep.subr.bf16.mxu1 %v22365_v62  ;;  %v22399_v61 = vld [vmem:[%s30183_s4 + $0x588] sm:$0xff]   ;;  %v22400_v62 = vld [vmem:[%s30183_s4 + $0x540] sm:$0xff]  }
 0x2b2   : > { %21360 = vmatpush3.bf16.msra.mxu0 %v22366_v63  ;;  %v22401_v63 = vld [vmem:[%s30183_s4 + $0x5c0] sm:$0xff]  }
 0x2b3   : > { %21382 = vmatpush3.bf16.msra.mxu1 %v22367_v0  ;;  %21361 = vmatprep.subr.bf16.mxu0 %v22368_v1  ;;  %v22402_v0 = vld [vmem:[%s30183_s4 + $0x500] sm:$0xff]  }
 0x2b4   : > { %21383 = vmatprep.subr.bf16.mxu1 %v22369_v5  ;;  %v22403_v1 = vld [vmem:[%s30183_s4 + $0x580] sm:$0xff]   ;;  %v22404_v5 = vld [vmem:[%s30183_s4 + $0x678] sm:$0xff]  }
 0x2b6   : > { %21362 = vmatpush3.bf16.msra.mxu0 %v22370_v6  ;;  %v22405_v6 = vld [vmem:[%s30183_s4 + $0x6f8] sm:$0xff]  }
 0x2b7   : > { %21384 = vmatpush3.bf16.msra.mxu1 %v22371_v7  ;;  %21391 = vmatprep.subr.bf16.mxu0 %v22372_v8  ;;  %v22406_v7 = vld [vmem:[%s30183_s4 + $0x638] sm:$0xff]  }
 0x2b8   : > { %21413 = vmatprep.subr.bf16.mxu1 %v22373_v9  ;;  %v22407_v9 = vld [vmem:[%s30183_s4 + $0x6b8] sm:$0xff]  }
 0x2b9   : > { %v21099_v11 = vpop.f32.mrf.mxu0  ;;  %7570 = vmatmul.mubr.bf16.vlgmr.msra.gmra.mxu0 %v23778_v37 }
 0x2ba   : > { %v21121_v14 = vpop.f32.mrf.mxu1  ;;  %7610 = vmatmul.mubr.bf16.vlgmr.msra.gmra.mxu1 %v23781_v39  ;;  %21392 = vmatpush3.bf16.msra.mxu0 %v22374_v10 }
 0x2bb   : > { %21414 = vmatpush3.bf16.msra.mxu1 %v22375_v12  ;;  %v21100_v16 = vpop.f32.mrf.mxu0  ;;  %7841 = vmatprep.mubr.bf16.mxu0 %v23774_v35 }
 0x2bc   : > { %v21101_v19 = vadd.f32 %v21100_v16, %v21099_v11  ;;  %v21122_v20 = vpop.f32.mrf.mxu1  ;;  %21393 = vmatprep.subr.bf16.mxu0 %v22376_v15  ;;  %7881 = vmatprep.mubr.bf16.mxu1 %v23776_v36  ;;  %v22408_v11 = vld [vmem:[%s30183_s4 + $0x670] sm:$0xff]  }
 0x2bd   : > { %v21123_v22 = vadd.f32 %v21122_v20, %v21121_v14  ;;  %v21102_v23 = vpop.f32.mrf.mxu0  ;;  %21415 = vmatprep.subr.bf16.mxu1 %v22377_v18  ;;  %v22409_v14 = vld [vmem:[%s30183_s4 + $0x6f0] sm:$0xff]  }
 0x2be   : > { %21394 = vmatpush3.bf16.msra.mxu0 %v22378_v21  ;;  %v21124_v27 = vpop.f32.mrf.mxu1  ;;  %v22410_v18 = vld [vmem:[%s30183_s4 + $0x630] sm:$0xff]  }
 0x2bf   : > { %v25844_v28 = vadd.f32 %v21123_v22, %v21101_v19  ;;  %21416 = vmatpush3.bf16.msra.mxu1 %v22379_v25  ;;  %v21103_v29 = vpop.f32.mrf.mxu0  ;;  %21395 = vmatprep.subr.bf16.mxu0 %v22380_v26  ;;  %v22411_v21 = vld [vmem:[%s30183_s4 + $0x6b0] sm:$0xff]   ;;  %v22412_v22 = vld [vmem:[%s30183_s4 + $0x668] sm:$0xff]  }
 0x2c0   : > { %v21125_v34 = vpop.f32.mrf.mxu1  ;;  %21417 = vmatprep.subr.bf16.mxu1 %v22381_v30  ;;  %v22413_v27 = vld [vmem:[%s30183_s4 + $0x6e8] sm:$0xff]  }
 0x2c1   : > { %v22414_v29 = vld [vmem:[%s30183_s4 + $0x628] sm:$0xff]   ;;  %v22416_v34 = vld [vmem:[%s30183_s4 + $0x660] sm:$0xff]  }
 0x2c2   : > { %21396 = vmatpush3.bf16.msra.mxu0 %v22382_v31  ;;  %v22415_v31 = vld [vmem:[%s30183_s4 + $0x6a8] sm:$0xff]  }
 0x2c3   : > { %21418 = vmatpush3.bf16.msra.mxu1 %v22383_v38  ;;  %21397 = vmatprep.subr.bf16.mxu0 %v22384_v41  ;;  %v22417_v38 = vld [vmem:[%s30183_s4 + $0x6e0] sm:$0xff]  }
 0x2c4   : > { %21419 = vmatprep.subr.bf16.mxu1 %v22385_v42  ;;  %v22418_v41 = vld [vmem:[%s30183_s4 + $0x620] sm:$0xff]  }
 0x2c5   : > { %v22419_v42 = vld [vmem:[%s30183_s4 + $0x6a0] sm:$0xff]  }
 0x2c6   : > { %21398 = vmatpush3.bf16.msra.mxu0 %v22386_v44  ;;  %v22420_v44 = vld [vmem:[%s30183_s4 + $0x658] sm:$0xff]  }
 0x2c7   : > { %21420 = vmatpush3.bf16.msra.mxu1 %v22387_v45  ;;  %21399 = vmatprep.subr.bf16.mxu0 %v22388_v46  ;;  %v22421_v45 = vld [vmem:[%s30183_s4 + $0x6d8] sm:$0xff]  }
 0x2c8   : > { %21421 = vmatprep.subr.bf16.mxu1 %v22389_v47  ;;  %v22422_v46 = vld [vmem:[%s30183_s4 + $0x618] sm:$0xff]  }
 0x2c9   : > { %v22423_v47 = vld [vmem:[%s30183_s4 + $0x698] sm:$0xff]  }
 0x2ca   : > { %21400 = vmatpush3.bf16.msra.mxu0 %v22390_v48  ;;  %v22424_v48 = vld [vmem:[%s30183_s4 + $0x650] sm:$0xff]  }
 0x2cb   : > { %21422 = vmatpush3.bf16.msra.mxu1 %v22391_v50  ;;  %21401 = vmatprep.subr.bf16.mxu0 %v22392_v51  ;;  %v22425_v50 = vld [vmem:[%s30183_s4 + $0x6d0] sm:$0xff]  }
 0x2cc   : > { %21423 = vmatprep.subr.bf16.mxu1 %v22393_v54  ;;  %v22426_v51 = vld [vmem:[%s30183_s4 + $0x610] sm:$0xff]  }
 0x2cd   : > { %v22427_v54 = vld [vmem:[%s30183_s4 + $0x690] sm:$0xff]  }
 0x2ce   : > { %21402 = vmatpush3.bf16.msra.mxu0 %v22394_v55  ;;  %v22428_v55 = vld [vmem:[%s30183_s4 + $0x648] sm:$0xff]  }
 0x2cf   : > { %21424 = vmatpush3.bf16.msra.mxu1 %v22395_v56  ;;  %21403 = vmatprep.subr.bf16.mxu0 %v22396_v57  ;;  %v22429_v56 = vld [vmem:[%s30183_s4 + $0x6c8] sm:$0xff]  }
 0x2d0   : > { %21425 = vmatprep.subr.bf16.mxu1 %v22397_v59  ;;  %v22430_v57 = vld [vmem:[%s30183_s4 + $0x608] sm:$0xff]  }
 0x2d1   : > { %v22431_v59 = vld [vmem:[%s30183_s4 + $0x688] sm:$0xff]  }
 0x2d2   : > { %21404 = vmatpush3.bf16.msra.mxu0 %v22398_v60  ;;  %v22432_v60 = vld [vmem:[%s30183_s4 + $0x640] sm:$0xff]  }
 0x2d3   : > { %21426 = vmatpush3.bf16.msra.mxu1 %v22399_v61  ;;  %21405 = vmatprep.subr.bf16.mxu0 %v22400_v62  ;;  %v22433_v61 = vld [vmem:[%s30183_s4 + $0x6c0] sm:$0xff]  }
 0x2d4   : > { %21427 = vmatprep.subr.bf16.mxu1 %v22401_v63  ;;  %v22434_v62 = vld [vmem:[%s30183_s4 + $0x600] sm:$0xff]  }
 0x2d5   : > { %v22435_v63 = vld [vmem:[%s30183_s4 + $0x680] sm:$0xff]  }
 0x2d6   : > { %21406 = vmatpush3.bf16.msra.mxu0 %v22402_v0  ;;  %v22436_v0 = vld [vmem:[%s30183_s4 + $0x778] sm:$0xff]  }
 0x2d7   : > { %21428 = vmatpush3.bf16.msra.mxu1 %v22403_v1  ;;  %21435 = vmatprep.subr.bf16.mxu0 %v22404_v5  ;;  %v22437_v1 = vld [vmem:[%s30183_s4 + $0x7f8] sm:$0xff]  }
 0x2d8   : > { %21457 = vmatprep.subr.bf16.mxu1 %v22405_v6  ;;  %v22438_v5 = vld [vmem:[%s30183_s4 + $0x738] sm:$0xff]  }
 0x2d9   : > { %v21143_v8 = vpop.f32.mrf.mxu0  ;;  %7842 = vmatmul.mubr.bf16.vlgmr.msra.gmra.mxu0 %v23778_v37 }
 0x2da   : > { %v21165_v10 = vpop.f32.mrf.mxu1  ;;  %7882 = vmatmul.mubr.bf16.vlgmr.msra.gmra.mxu1 %v23781_v39  ;;  %21436 = vmatpush3.bf16.msra.mxu0 %v22406_v7  ;;  %v22439_v7 = vld [vmem:[%s30183_s4 + $0x7b8] sm:$0xff]  }
 0x2db   : > { %21458 = vmatpush3.bf16.msra.mxu1 %v22407_v9  ;;  %v21144_v12 = vpop.f32.mrf.mxu0  ;;  %8113 = vmatprep.mubr.bf16.mxu0 %v23774_v35  ;;  %v22440_v9 = vld [vmem:[%s30183_s4 + $0x770] sm:$0xff]  }
 0x2dc   : > { %v21145_v15 = vadd.f32 %v21144_v12, %v21143_v8  ;;  %v21166_v16 = vpop.f32.mrf.mxu1  ;;  %21437 = vmatprep.subr.bf16.mxu0 %v22408_v11  ;;  %8153 = vmatprep.mubr.bf16.mxu1 %v23776_v36  ;;  %v22441_v11 = vld [vmem:[%s30183_s4 + $0x7f0] sm:$0xff]  }
 0x2dd   : > { %v21167_v19 = vadd.f32 %v21166_v16, %v21165_v10  ;;  %v21146_v20 = vpop.f32.mrf.mxu0  ;;  %21459 = vmatprep.subr.bf16.mxu1 %v22409_v14  ;;  %v22442_v14 = vld [vmem:[%s30183_s4 + $0x730] sm:$0xff]  }
 0x2de   : > { %21438 = vmatpush3.bf16.msra.mxu0 %v22410_v18  ;;  %v21168_v23 = vpop.f32.mrf.mxu1  ;;  %v22443_v16 = vld [vmem:[%s30183_s4 + $0x7b0] sm:$0xff]   ;;  %v22445_v20 = vld [vmem:[%s30183_s4 + $0x7e8] sm:$0xff]  }
 0x2df   : > { %v25946_v25 = vadd.f32 %v21167_v19, %v21145_v15  ;;  %21460 = vmatpush3.bf16.msra.mxu1 %v22411_v21  ;;  %v21147_v26 = vpop.f32.mrf.mxu0  ;;  %21439 = vmatprep.subr.bf16.mxu0 %v22412_v22  ;;  %v22447_v22 = vld [vmem:[%s30183_s4 + $0x7a8] sm:$0xff]   ;;  %v22448_v23 = vld [vmem:[%s30183_s4 + $0x760] sm:$0xff]  }
 0x2e0   : > { %v21169_v30 = vpop.f32.mrf.mxu1  ;;  %21461 = vmatprep.subr.bf16.mxu1 %v22413_v27  ;;  %v22449_v26 = vld [vmem:[%s30183_s4 + $0x7e0] sm:$0xff]  }
 0x2e1   : > { %v22450_v27 = vld [vmem:[%s30183_s4 + $0x720] sm:$0xff]   ;;  %v22452_v30 = vld [vmem:[%s30183_s4 + $0x758] sm:$0xff]  }
 0x2e2   : > { %21440 = vmatpush3.bf16.msra.mxu0 %v22414_v29  ;;  %v22451_v29 = vld [vmem:[%s30183_s4 + $0x7a0] sm:$0xff]  }
 0x2e3   : > { %21462 = vmatpush3.bf16.msra.mxu1 %v22415_v31  ;;  %21441 = vmatprep.subr.bf16.mxu0 %v22416_v34  ;;  %v22453_v31 = vld [vmem:[%s30183_s4 + $0x7d8] sm:$0xff]  }
 0x2e4   : > { %21463 = vmatprep.subr.bf16.mxu1 %v22417_v38  ;;  %v22454_v34 = vld [vmem:[%s30183_s4 + $0x718] sm:$0xff]  }
 0x2e5   : > { %v22455_v38 = vld [vmem:[%s30183_s4 + $0x798] sm:$0xff]  }
 0x2e6   : > { %21442 = vmatpush3.bf16.msra.mxu0 %v22418_v41  ;;  %v22456_v41 = vld [vmem:[%s30183_s4 + $0x750] sm:$0xff]  }
 0x2e7   : > { %21464 = vmatpush3.bf16.msra.mxu1 %v22419_v42  ;;  %21443 = vmatprep.subr.bf16.mxu0 %v22420_v44  ;;  %v22457_v42 = vld [vmem:[%s30183_s4 + $0x7d0] sm:$0xff]  }
 0x2e8   : > { %21465 = vmatprep.subr.bf16.mxu1 %v22421_v45  ;;  %v22458_v44 = vld [vmem:[%s30183_s4 + $0x710] sm:$0xff]  }
 0x2e9   : > { %v22459_v45 = vld [vmem:[%s30183_s4 + $0x790] sm:$0xff]  }
 0x2ea   : > { %21444 = vmatpush3.bf16.msra.mxu0 %v22422_v46  ;;  %v22460_v46 = vld [vmem:[%s30183_s4 + $0x748] sm:$0xff]  }
 0x2eb   : > { %21466 = vmatpush3.bf16.msra.mxu1 %v22423_v47  ;;  %21445 = vmatprep.subr.bf16.mxu0 %v22424_v48  ;;  %v22461_v47 = vld [vmem:[%s30183_s4 + $0x7c8] sm:$0xff]  }
 0x2ec   : > { %21467 = vmatprep.subr.bf16.mxu1 %v22425_v50  ;;  %v22462_v48 = vld [vmem:[%s30183_s4 + $0x708] sm:$0xff]  }
 0x2ed   : > { %v22463_v50 = vld [vmem:[%s30183_s4 + $0x788] sm:$0xff]  }
 0x2ee   : > { %21446 = vmatpush3.bf16.msra.mxu0 %v22426_v51  ;;  %v22464_v51 = vld [vmem:[%s30183_s4 + $0x740] sm:$0xff]  }
 0x2ef   : > { %21468 = vmatpush3.bf16.msra.mxu1 %v22427_v54  ;;  %21447 = vmatprep.subr.bf16.mxu0 %v22428_v55  ;;  %v22465_v54 = vld [vmem:[%s30183_s4 + $0x7c0] sm:$0xff]  }
 0x2f0   : > { %21469 = vmatprep.subr.bf16.mxu1 %v22429_v56  ;;  %v22466_v55 = vld [vmem:[%s30183_s4 + $0x700] sm:$0xff]   ;;  %v8441_v56 = vpack.c.bf16 %v25232_v13, %v25232_v13 }
 0x2f2   : > { %21448 = vmatpush3.bf16.msra.mxu0 %v22430_v57  ;;  %v22467_v57 = vld [vmem:[%s30183_s4 + $0x780] sm:$0xff]   ;;  %v8454_v13 = vsel %vm8449_vm0, %v8441_v56, 0 }
 0x2f3   : > { %21470 = vmatpush3.bf16.msra.mxu1 %v22431_v59  ;;  %21449 = vmatprep.subr.bf16.mxu0 %v22432_v60  ;;  %v8442_v59 = vpack.c.bf16 %v25334_v4, %v25334_v4  ;;  %v23560_v60 = vmov 0.0  }
 0x2f4   : > { %21471 = vmatprep.subr.bf16.mxu1 %v22433_v61 }
 0x2f6   : > { %21450 = vmatpush3.bf16.msra.mxu0 %v22434_v62 }
 0x2f7   : > { %21472 = vmatpush3.bf16.msra.mxu1 %v22435_v63  ;;  %21479 = vmatprep.subr.bf16.mxu0 %v22436_v0  ;;  %v8500_v63 = vsel %vm8449_vm0, %v8442_v59, 0 }
 0x2f8   : > { %21501 = vmatprep.subr.bf16.mxu1 %v22437_v1 }
 0x2f9   : > { %v26026_v6 = vpop.f32.mrf.mxu0  ;;  %8114 = vmatmul.mubr.bf16.vlgmr.msra.gmra.mxu0 %v23778_v37 }
 0x2fa   : > { %v26032_v8 = vpop.f32.mrf.mxu1  ;;  %8154 = vmatmul.mubr.bf16.vlgmr.msra.gmra.mxu1 %v23781_v39  ;;  %21480 = vmatpush3.bf16.msra.mxu0 %v22438_v5 }
 0x2fb   : > { %21502 = vmatpush3.bf16.msra.mxu1 %v22439_v7  ;;  %v26038_v10 = vpop.f32.mrf.mxu0  ;;  %8385 = vmatprep.mubr.bf16.mxu0 %v23774_v35  ;;  %v22444_v35 = vld [vmem:[%s30183_s4 + $0x768] sm:$0xff]   ;;  %v8433_v7 = vpack.c.bf16 %v24410_v3, %v24410_v3  ;;  %v8445_v3 = vpack.c.bf16 %v25640_v43, %v25640_v43 }
 0x2fc   : > { %v26044_v12 = vpop.f32.mrf.mxu1  ;;  %21481 = vmatprep.subr.bf16.mxu0 %v22440_v9  ;;  %8425 = vmatprep.mubr.bf16.mxu1 %v23776_v36  ;;  %v22446_v36 = vld [vmem:[%s30183_s4 + $0x728] sm:$0xff]  }
 0x2fd   : > { %v21190_v15 = vpop.f32.mrf.mxu0  ;;  %21503 = vmatprep.subr.bf16.mxu1 %v22441_v11  ;;  %v8434_v11 = vpack.c.bf16 %v24518_v52, %v24518_v52  ;;  %v8446_v52 = vpack.c.bf16 %v25742_v33, %v25742_v33  ;;  %v21211_v33 = vadd.f32 %v26044_v12, %v26032_v8  ;;  %v8440_v12 = vpack.c.bf16 %v25130_v24, %v25130_v24 }
 0x2fe   : > { %21482 = vmatpush3.bf16.msra.mxu0 %v22442_v14  ;;  %v21212_v18 = vpop.f32.mrf.mxu1 }
 0x2ff   : > { %21504 = vmatpush3.bf16.msra.mxu1 %v22443_v16  ;;  %v21191_v19 = vpop.f32.mrf.mxu0  ;;  %21483 = vmatprep.subr.bf16.mxu0 %v22444_v35  ;;  %v8436_v16 = vpack.c.bf16 %v24722_v17, %v24722_v17  ;;  %v8638_v35 = vsel %vm8449_vm0, %v8445_v3, 0  ;;  %v8684_v43 = vsel %vm8449_vm0, %v8446_v52, 0  ;;  %v21189_v17 = vadd.f32 %v26038_v10, %v26026_v6 }
 0x300   : > { %v21213_v21 = vpop.f32.mrf.mxu1  ;;  %21505 = vmatprep.subr.bf16.mxu1 %v22445_v20  ;;  %v8448_v18 = vpack.c.bf16 %v25946_v25, %v25946_v25  ;;  %v8439_v25 = vpack.c.bf16 %v25028_v40, %v25028_v40 }
 0x301   : > { %v8438_v21 = vpack.c.bf16 %v24926_v53, %v24926_v53 }
 0x302   : > { %21484 = vmatpush3.bf16.msra.mxu0 %v22446_v36  ;;  %v8437_v36 = vpack.c.bf16 %v24824_v2, %v24824_v2  ;;  %v8776_v8 = vsel %vm8449_vm0, %v8448_v18, 0 }
 0x303   : > { %21506 = vmatpush3.bf16.msra.mxu1 %v22447_v22  ;;  %21485 = vmatprep.subr.bf16.mxu0 %v22448_v23 }
 0x304   : > { %21507 = vmatprep.subr.bf16.mxu1 %v22449_v26 }
 0x306   : > { %21486 = vmatpush3.bf16.msra.mxu0 %v22450_v27 }
 0x307   : > { %21508 = vmatpush3.bf16.msra.mxu1 %v22451_v29  ;;  %21487 = vmatprep.subr.bf16.mxu0 %v22452_v30 }
 0x308   : > { %21509 = vmatprep.subr.bf16.mxu1 %v22453_v31 }
 0x30a   : > { %21488 = vmatpush3.bf16.msra.mxu0 %v22454_v34 }
 0x30b   : > { %21510 = vmatpush3.bf16.msra.mxu1 %v22455_v38  ;;  %21489 = vmatprep.subr.bf16.mxu0 %v22456_v41 }
 0x30c   : > { %21511 = vmatprep.subr.bf16.mxu1 %v22457_v42 }
 0x30e   : > { %21490 = vmatpush3.bf16.msra.mxu0 %v22458_v44 }
 0x30f   : > { %21512 = vmatpush3.bf16.msra.mxu1 %v22459_v45  ;;  %21491 = vmatprep.subr.bf16.mxu0 %v22460_v46 }
 0x310   : > { %21513 = vmatprep.subr.bf16.mxu1 %v22461_v47 }
 0x312   : > { %21492 = vmatpush3.bf16.msra.mxu0 %v22462_v48 }
 0x313   : > { %21514 = vmatpush3.bf16.msra.mxu1 %v22463_v50  ;;  %21493 = vmatprep.subr.bf16.mxu0 %v22464_v51 }
 0x314   : > { %21515 = vmatprep.subr.bf16.mxu1 %v22465_v54 }
 0x316   : > { %21494 = vmatpush3.bf16.msra.mxu0 %v22466_v55 }
 0x317   : > { %21516 = vmatpush3.bf16.msra.mxu1 %v22467_v57  ;;  %21555 = vmatprep.subr.bf16.mxu0 %v23560_v60 }
 0x318   : > { %21561 = vmatprep.subr.bf16.mxu1 %v23560_v60 }
 0x319   : > { %v21231_v61 = vpop.f32.mrf.mxu0  ;;  %8386 = vmatmul.mubr.bf16.vlgmr.msra.gmra.mxu0 %v23778_v37  ;;  %v8443_v37 = vpack.c.bf16 %v25436_v58, %v25436_v58 }
 0x31a   : > { %v21253_v62 = vpop.f32.mrf.mxu1  ;;  %8426 = vmatmul.mubr.bf16.vlgmr.msra.gmra.mxu1 %v23781_v39  ;;  %21556 = vmatpush3.bf16.xpose.msra.mxu0 %v8454_v13  ;;  %v8444_v39 = vpack.c.bf16 %v25538_v49, %v25538_v49  ;;  %v8435_v49 = vpack.c.bf16 %v24620_v32, %v24620_v32  ;;  %v8447_v32 = vpack.c.bf16 %v25844_v28, %v25844_v28 }
 0x31b   : > { %21562 = vmatpush3.bf16.xpose.msra.mxu1 %v8500_v63  ;;  %v21232_v4 = vpop.f32.mrf.mxu0  ;;  %21557 = vmatprep.mubr.msk.bf16.mxu0 %vm23561_vm1, %v23560_v60  ;;  %v8546_v15 = vsel %vm8449_vm0, %v8443_v37, 0  ;;  %v6524_v28 = vadd.f32 %v21211_v33, %v21189_v17 }
 0x31c   : > { %v21254_v0 = vpop.f32.mrf.mxu1  ;;  %21563 = vmatprep.mubr.msk.bf16.mxu1 %vm23561_vm1, %v23560_v60  ;;  %21567 = vmatprep.subr.bf16.mxu0 %v23560_v60  ;;  %v8592_v58 = vsel %vm8449_vm0, %v8444_v39, 0  ;;  %v21233_v19 = vadd.f32 %v21232_v4, %v21231_v61  ;;  %v8730_v6 = vsel %vm8449_vm0, %v8447_v32, 0 }
 0x31d   : > { %v21234_v1 = vpop.f32.mrf.mxu0  ;;  %21573 = vmatprep.subr.bf16.mxu1 %v23560_v60  ;;  %v21255_v20 = vadd.f32 %v21254_v0, %v21253_v62  ;;  %v8942_v2 = vpack.c.bf16 %v6524_v28, %v6524_v28 }
 0x31e   : > { %v21256_v5 = vpop.f32.mrf.mxu1 }
 0x31f   : > { %v21235_v9 = vpop.f32.mrf.mxu0  ;;  %v6796_v10 = vadd.f32 %v21255_v20, %v21233_v19  ;;  %v8955_v23 = vsel %vm8953_vm2, %v8942_v2, 0 }
 0x320   : > { %v21257_v14 = vpop.f32.mrf.mxu1 }
 0x321   : > { %21558 = vmatmul.mubr.msk.bf16.vlgmr.msra.gmra.mxu0 %vm8449_vm0, %v8433_v7  ;;  %v8943_v53 = vpack.c.bf16 %v6796_v10, %v6796_v10 }
 0x322   : > { %21564 = vmatmul.mubr.msk.bf16.vlgmr.msra.gmra.mxu1 %vm8449_vm0, %v8434_v11  ;;  %21568 = vmatpush3.bf16.xpose.msra.mxu0 %v8546_v15 }
 0x323   : > { %21574 = vmatpush3.bf16.xpose.msra.mxu1 %v8592_v58  ;;  %21569 = vmatprep.mubr.msk.bf16.mxu0 %vm23561_vm1, %v23560_v60  ;;  %v9001_v27 = vsel %vm8953_vm2, %v8943_v53, 0 }
 0x324   : > { %21575 = vmatprep.mubr.msk.bf16.mxu1 %vm23561_vm1, %v23560_v60  ;;  %21579 = vmatprep.subr.bf16.mxu0 %v23560_v60 }
 0x325   : > { %21585 = vmatprep.subr.bf16.mxu1 %v23560_v60 }
 0x329   : > { %21570 = vmatmul.mubr.msk.bf16.vlgmr.msra.gmra.mxu0 %vm8449_vm0, %v8435_v49 }
 0x32a   : > { %21576 = vmatmul.mubr.msk.bf16.vlgmr.msra.gmra.mxu1 %vm8449_vm0, %v8436_v16  ;;  %21580 = vmatpush3.bf16.xpose.msra.mxu0 %v8638_v35 }
 0x32b   : > { %21586 = vmatpush3.bf16.xpose.msra.mxu1 %v8684_v43  ;;  %21581 = vmatprep.mubr.msk.bf16.mxu0 %vm23561_vm1, %v23560_v60 }
 0x32c   : > { %21587 = vmatprep.mubr.msk.bf16.mxu1 %vm23561_vm1, %v23560_v60  ;;  %21591 = vmatprep.subr.bf16.mxu0 %v23560_v60 }
 0x32d   : > { %21597 = vmatprep.subr.bf16.mxu1 %v23560_v60 }
 0x331   : > { %21582 = vmatmul.mubr.msk.bf16.vlgmr.msra.gmra.mxu0 %vm8449_vm0, %v8437_v36 }
 0x332   : > { %21588 = vmatmul.mubr.msk.bf16.vlgmr.msra.gmra.mxu1 %vm8449_vm0, %v8438_v21  ;;  %21592 = vmatpush3.bf16.xpose.msra.mxu0 %v8730_v6 }
 0x333   : > { %21598 = vmatpush3.bf16.xpose.msra.mxu1 %v8776_v8  ;;  %21593 = vmatprep.mubr.msk.bf16.mxu0 %vm23561_vm1, %v23560_v60 }
 0x334   : > { %21599 = vmatprep.mubr.msk.bf16.mxu1 %vm23561_vm1, %v23560_v60  ;;  %21603 = vmatprep.subr.bf16.mxu0 %v23560_v60 }
 0x335   : > { %21609 = vmatprep.subr.bf16.mxu1 %v23560_v60 }
 0x339   : > { %v21275_v22 = vpop.f32.mrf.mxu0  ;;  %21594 = vmatmul.mubr.msk.bf16.vlgmr.msra.gmra.mxu0 %vm8449_vm0, %v8439_v25 }
 0x33a   : > { %v21297_v26 = vpop.f32.mrf.mxu1  ;;  %21600 = vmatmul.mubr.msk.bf16.vlgmr.msra.gmra.mxu1 %vm8449_vm0, %v8440_v12  ;;  %21604 = vmatpush3.bf16.msra.mxu0 %v8955_v23  ;;  %v26227_v12 = vld [vmem:[%s358_s25] sm:$0xff] }
 0x33b   : > { %21610 = vmatpush3.bf16.msra.mxu1 %v9001_v27  ;;  %v21276_v29 = vpop.f32.mrf.mxu0  ;;  %21605 = vmatprep.mubr.msk.bf16.mxu0 %vm23561_vm1, %v23560_v60  ;;  %vm8826_vm3 = vcmp.gt.f32.partialorder %v26227_v12, 0.0 }
 0x33c   : > { %v21277_v40 = vadd.f32 %v21276_v29, %v21275_v22  ;;  %v21298_v30 = vpop.f32.mrf.mxu1  ;;  %21615 = vmatprep.subr.bf16.mxu0 %v23560_v60  ;;  %21611 = vmatprep.mubr.msk.bf16.mxu1 %vm23561_vm1, %v23560_v60 }
 0x33d   : > { %v21299_v24 = vadd.f32 %v21298_v30, %v21297_v26  ;;  %v21278_v31 = vpop.f32.mrf.mxu0  ;;  %21621 = vmatprep.subr.bf16.mxu1 %v23560_v60 }
 0x33e   : > { %v21300_v34 = vpop.f32.mrf.mxu1 }
 0x33f   : > { %v26213_v38 = vadd.f32 %v21299_v24, %v21277_v40  ;;  %v21279_v41 = vpop.f32.mrf.mxu0 }
 0x340   : > { %v21301_v42 = vpop.f32.mrf.mxu1 }
 0x359   : > { %v21319_v44 = vpop.f32.mrf.mxu0 }
 0x35a   : > { %v21341_v45 = vpop.f32.mrf.mxu1 }
 0x35b   : > { %v21320_v46 = vpop.f32.mrf.mxu0 }
 0x35c   : > { %v21321_v47 = vadd.f32 %v21320_v46, %v21319_v44  ;;  %v21342_v48 = vpop.f32.mrf.mxu1 }
 0x35d   : > { %v21343_v50 = vadd.f32 %v21342_v48, %v21341_v45  ;;  %v21322_v51 = vpop.f32.mrf.mxu0 }
 0x35e   : > { %v21344_v54 = vpop.f32.mrf.mxu1 }
 0x35f   : > { %v26215_v55 = vadd.f32 %v21343_v50, %v21321_v47  ;;  %v21323_v56 = vpop.f32.mrf.mxu0 }
 0x360   : > { %v21345_v57 = vpop.f32.mrf.mxu1 }
 0x379   : > { %v21363_v59 = vpop.f32.mrf.mxu0 }
 0x37a   : > { %v21385_v61 = vpop.f32.mrf.mxu1 }
 0x37b   : > { %v21364_v13 = vpop.f32.mrf.mxu0 }
 0x37c   : > { %v21365_v62 = vadd.f32 %v21364_v13, %v21363_v59  ;;  %v21386_v63 = vpop.f32.mrf.mxu1 }
 0x37d   : > { %v21387_v4 = vadd.f32 %v21386_v63, %v21385_v61  ;;  %v21366_v0 = vpop.f32.mrf.mxu0 }
 0x37e   : > { %v21388_v37 = vpop.f32.mrf.mxu1 }
 0x37f   : > { %v26217_v1 = vadd.f32 %v21387_v4, %v21365_v62  ;;  %v21367_v39 = vpop.f32.mrf.mxu0 }
 0x380   : > { %v21389_v5 = vpop.f32.mrf.mxu1 }
 0x399   : > { %v21407_v7 = vpop.f32.mrf.mxu0 }
 0x39a   : > { %v21429_v9 = vpop.f32.mrf.mxu1 }
 0x39b   : > { %v21408_v11 = vpop.f32.mrf.mxu0 }
 0x39c   : > { %v21409_v14 = vadd.f32 %v21408_v11, %v21407_v7  ;;  %v21430_v15 = vpop.f32.mrf.mxu1 }
 0x39d   : > { %v21431_v58 = vadd.f32 %v21430_v15, %v21429_v9  ;;  %v21410_v3 = vpop.f32.mrf.mxu0 }
 0x39e   : > { %v21432_v52 = vpop.f32.mrf.mxu1 }
 0x39f   : > { %v26219_v49 = vadd.f32 %v21431_v58, %v21409_v14  ;;  %v21411_v16 = vpop.f32.mrf.mxu0 }
 0x3a0   : > { %v21433_v35 = vpop.f32.mrf.mxu1 }
 0x3b9   : > { %v21451_v43 = vpop.f32.mrf.mxu0 }
 0x3ba   : > { %v21473_v32 = vpop.f32.mrf.mxu1 }
 0x3bb   : > { %v21452_v17 = vpop.f32.mrf.mxu0 }
 0x3bc   : > { %v21453_v33 = vadd.f32 %v21452_v17, %v21451_v43  ;;  %v21474_v18 = vpop.f32.mrf.mxu1 }
 0x3bd   : > { %v21475_v19 = vadd.f32 %v21474_v18, %v21473_v32  ;;  %v21454_v20 = vpop.f32.mrf.mxu0 }
 0x3be   : > { %v21476_v36 = vpop.f32.mrf.mxu1 }
 0x3bf   : > { %v26221_v21 = vadd.f32 %v21475_v19, %v21453_v33  ;;  %v21455_v28 = vpop.f32.mrf.mxu0 }
 0x3c0   : > { %v21477_v6 = vpop.f32.mrf.mxu1 }
 0x3d9   : > { %v21495_v10 = vpop.f32.mrf.mxu0 }
 0x3da   : > { %v21517_v8 = vpop.f32.mrf.mxu1 }
 0x3db   : > { %v21496_v2 = vpop.f32.mrf.mxu0 }
 0x3dc   : > { %v21497_v53 = vadd.f32 %v21496_v2, %v21495_v10  ;;  %v21518_v25 = vpop.f32.mrf.mxu1 }
 0x3dd   : > { %v21519_v22 = vadd.f32 %v21518_v25, %v21517_v8  ;;  %v21498_v23 = vpop.f32.mrf.mxu0 }
 0x3de   : > { %v21520_v26 = vpop.f32.mrf.mxu1 }
 0x3df   : > { %v26229_v27 = vadd.f32 %v21519_v22, %v21497_v53  ;;  %v21499_v29 = vpop.f32.mrf.mxu0 }
 0x3e0   : > { %v21521_v40 = vpop.f32.mrf.mxu1 }
 0x3e1   : > { %v8490_v30 = vpop.f32.mrf.mxu0 }
 0x3e2   : > { %v8818_v24 = vmul.f32 0.125, %v8490_v30  ;;  %v8536_v31 = vpop.f32.mrf.mxu1 }
 0x3e3   : > { %v8819_v34 = vmul.f32 0.125, %v8536_v31  ;;  %v21559_v41 = vpop.f32.mrf.mxu0 }
 0x3e4   : > { %v21565_v42 = vpop.f32.mrf.mxu1  ;;  %v8829_v44 = vsel %vm8826_vm3, -1e+09, %v8818_v24 }
 0x3e5   : > { %v8493_v45 = vpop.f32.mrf.mxu0  ;;  %v8838_v46 = vsel %vm8837_vm4, %v8829_v44, -inf  ;;  %v8830_v48 = vsel %vm8826_vm3, -1e+09, %v8819_v34 }
 0x3e6   : > { %v8539_v47 = vpop.f32.mrf.mxu1  ;;  %8839 = vmax.xlane.f32.xlu0 %v8838_v46  ;;  %v8841_v56 = vsel %vm8837_vm4, %v8830_v48, -inf }
 0x3e7   : > { %v21560_v50 = vpop.f32.mrf.mxu0 }
 0x3e8   : > { %v21566_v51 = vpop.f32.mrf.mxu1 }
 0x3e9   : > { %v8582_v54 = vpop.f32.mrf.mxu0 }
 0x3ea   : > { %v8820_v57 = vmul.f32 0.125, %v8582_v54  ;;  %v8628_v59 = vpop.f32.mrf.mxu1  ;;  %8842 = vmax.xlane.f32.xlu0 %v8841_v56 }
 0x3eb   : > { %v8821_v61 = vmul.f32 0.125, %v8628_v59  ;;  %v21571_v13 = vpop.f32.mrf.mxu0 }
 0x3ec   : > { %v21577_v62 = vpop.f32.mrf.mxu1  ;;  %v8831_v63 = vsel %vm8826_vm3, -1e+09, %v8820_v57 }
 0x3ed   : > { %v8585_v4 = vpop.f32.mrf.mxu0  ;;  %v8844_v0 = vsel %vm8837_vm4, %v8831_v63, -inf  ;;  %v8832_v39 = vsel %vm8826_vm3, -1e+09, %v8821_v61 }
 0x3ee   : > { %v8631_v37 = vpop.f32.mrf.mxu1  ;;  %8845 = vmax.xlane.f32.xlu1 %v8844_v0  ;;  %v8847_v11 = vsel %vm8837_vm4, %v8832_v39, -inf }
 0x3ef   : > { %v21572_v5 = vpop.f32.mrf.mxu0 }
 0x3f0   : > { %v21578_v7 = vpop.f32.mrf.mxu1 }
 0x3f1   : > { %v8674_v9 = vpop.f32.mrf.mxu0 }
 0x3f2   : > { %v8822_v14 = vmul.f32 0.125, %v8674_v9  ;;  %v8720_v15 = vpop.f32.mrf.mxu1  ;;  %8848 = vmax.xlane.f32.xlu1 %v8847_v11 }
 0x3f3   : > { %v8823_v58 = vmul.f32 0.125, %v8720_v15  ;;  %v21583_v3 = vpop.f32.mrf.mxu0 }
 0x3f4   : > { %v21589_v52 = vpop.f32.mrf.mxu1  ;;  %v8833_v16 = vsel %vm8826_vm3, -1e+09, %v8822_v14 }
 0x3f5   : > { %v8677_v35 = vpop.f32.mrf.mxu0  ;;  %v8834_v43 = vsel %vm8826_vm3, -1e+09, %v8823_v58  ;;  %v8850_v32 = vsel %vm8837_vm4, %v8833_v16, -inf }
 0x3f6   : > { %v8723_v17 = vpop.f32.mrf.mxu1  ;;  %v8853_v33 = vsel %vm8837_vm4, %v8834_v43, -inf  ;;  %8851 = vmax.xlane.f32.xlu0 %v8850_v32 }
 0x3f7   : > { %8854 = vmax.xlane.f32.xlu1 %v8853_v33  ;;  %v21584_v18 = vpop.f32.mrf.mxu0 }
 0x3f8   : > { %v21590_v19 = vpop.f32.mrf.mxu1 }
 0x3f9   : > { %v8766_v20 = vpop.f32.mrf.mxu0 }
 0x3fa   : > { %v8824_v36 = vmul.f32 0.125, %v8766_v20  ;;  %v8812_v28 = vpop.f32.mrf.mxu1 }
 0x3fb   : > { %v8825_v6 = vmul.f32 0.125, %v8812_v28  ;;  %v21595_v10 = vpop.f32.mrf.mxu0  ;;  %v8944_v28 = vpack.c.bf16 %v26213_v38, %v26213_v38 }
 0x3fc   : > { %v21601_v8 = vpop.f32.mrf.mxu1  ;;  %v8835_v2 = vsel %vm8826_vm3, -1e+09, %v8824_v36 }
 0x3fd   : > { %v8769_v53 = vpop.f32.mrf.mxu0  ;;  %v8856_v25 = vsel %vm8837_vm4, %v8835_v2, -inf  ;;  %v8836_v23 = vsel %vm8826_vm3, -1e+09, %v8825_v6  ;;  %v9047_v38 = vsel %vm8953_vm2, %v8944_v28, 0 }
 0x3fe   : > { %v8815_v22 = vpop.f32.mrf.mxu1  ;;  %8857 = vmax.xlane.f32.xlu1 %v8856_v25  ;;  %v8859_v40 = vsel %vm8837_vm4, %v8836_v23, -inf  ;;  %v8945_v25 = vpack.c.bf16 %v26215_v55, %v26215_v55 }
 0x3ff   : > { %v21596_v26 = vpop.f32.mrf.mxu0 }
 0x400   : > { %v21602_v29 = vpop.f32.mrf.mxu1 }
 0x401   : > { %v8946_v29 = vpack.c.bf16 %v26217_v1, %v26217_v1  ;;  %v8947_v1 = vpack.c.bf16 %v26219_v49, %v26219_v49 }
 0x402   : > { %8860 = vmax.xlane.f32.xlu1 %v8859_v40  ;;  %v9093_v40 = vsel %vm8953_vm2, %v8945_v25, 0  ;;  %v22509_v25 = vld [vmem:[%s30184_s5 + $0xac] ss:$16 sps:$4 sm:$0xff]  }
 0x46f   : > { %v8840_v30 = vpop.xlane.xlu0 %8839 }
 0x470   : > { %v8862_v24 = vsub.f32 %v8829_v44, %v8840_v30 }
 0x472   : > { %v8870_v31 = vmul.f32 1.442695, %v8862_v24 }
 0x473   : > { %v8843_v34 = vpop.xlane.xlu0 %8842 }
 0x474   : > { %23428 = vpow2.f32 %v8870_v31  ;;  %v8863_v41 = vsub.f32 %v8830_v48, %v8843_v34 }
 0x476   : > { %v8872_v42 = vmul.f32 1.442695, %v8863_v41  ;;  %v9139_v41 = vsel %vm8953_vm2, %v8946_v29, 0  ;;  %v22504_v29 = vld [vmem:[%s30184_s5 + $0xa0] ss:$16 sps:$4 sm:$0xff]  }
 0x477   : > { %v8846_v45 = vpop.xlane.xlu1 %8845 }
 0x478   : > { %23430 = vpow2.f32 %v8872_v42  ;;  %v8864_v46 = vsub.f32 %v8831_v63, %v8846_v45 }
 0x47a   : > { %v8874_v47 = vmul.f32 1.442695, %v8864_v46 }
 0x47b   : > { %v8849_v50 = vpop.xlane.xlu1 %8848 }
 0x47c   : > { %23432 = vpow2.f32 %v8874_v47  ;;  %v8865_v12 = vsub.f32 %v8832_v39, %v8849_v50  ;;  %v8948_v47 = vpack.c.bf16 %v26221_v21, %v26221_v21  ;;  %v8949_v21 = vpack.c.bf16 %v26229_v27, %v26229_v27 }
 0x47e   : > { %v8876_v51 = vmul.f32 1.442695, %v8865_v12  ;;  %v9185_v12 = vsel %vm8953_vm2, %v8947_v1, 0  ;;  %v9277_v27 = vsel %vm8953_vm2, %v8949_v21, 0  ;;  %v22524_v21 = vld [vmem:[%s30184_s5 + $0x144] ss:$16 sps:$4 sm:$0xff]  }
 0x47f   : > { %v8852_v54 = vpop.xlane.xlu0 %8851 }
 0x480   : > { %23434 = vpow2.f32 %v8876_v51  ;;  %v8855_v56 = vpop.xlane.xlu1 %8854  ;;  %v8866_v57 = vsub.f32 %v8833_v16, %v8852_v54 }
 0x481   : > { %v23429_v59 = vpop.eup %23428  ;;  %v8867_v61 = vsub.f32 %v8834_v43, %v8855_v56  ;;  %v22470_v56 = vld [vmem:[%s30184_s5 + $0x64] ss:$16 sps:$4 sm:$0xff]  }
 0x482   : > { %v8878_v44 = vmul.f32 1.442695, %v8866_v57  ;;  %v8886_v13 = vsel %vm8837_vm4, %v23429_v59, 0.0  ;;  %v9231_v57 = vsel %vm8953_vm2, %v8948_v47, 0 }
 0x483   : > { %v8880_v62 = vmul.f32 1.442695, %v8867_v61  ;;  %8887 = vadd.xlane.f32.xlu0 %v8886_v13  ;;  %v22473_v61 = vld [vmem:[%s30184_s5 + $0x6c] ss:$16 sps:$4 sm:$0xff]  }
 0x484   : > { %23436 = vpow2.f32 %v8878_v44 }
 0x485   : > { %v23431_v48 = vpop.eup %23430  ;;  %23438 = vpow2.f32 %v8880_v62  ;;  %v22468_v62 = vld [vmem:[%s30184_s5 + $0x60] ss:$16 sps:$4 sm:$0xff]  }
 0x486   : > { %v8889_v63 = vsel %vm8837_vm4, %v23431_v48, 0.0 }
 0x487   : > { %8890 = vadd.xlane.f32.xlu0 %v8889_v63  ;;  %v8858_v4 = vpop.xlane.xlu1 %8857  ;;  %v22476_v63 = vld [vmem:[%s30184_s5 + $0x44] ss:$16 sps:$4 sm:$0xff]  }
 0x488   : > { %v8868_v0 = vsub.f32 %v8835_v2, %v8858_v4 }
 0x489   : > { %v23433_v37 = vpop.eup %23432 }
 0x48a   : > { %v8882_v39 = vmul.f32 1.442695, %v8868_v0  ;;  %v8892_v5 = vsel %vm8837_vm4, %v23433_v37, 0.0 }
 0x48b   : > { %8893 = vadd.xlane.f32.xlu0 %v8892_v5  ;;  %v8861_v7 = vpop.xlane.xlu1 %8860  ;;  %v22479_v5 = vld [vmem:[%s30184_s5 + $0x4c] ss:$16 sps:$4 sm:$0xff]  }
 0x48c   : > { %23440 = vpow2.f32 %v8882_v39  ;;  %v8869_v9 = vsub.f32 %v8836_v23, %v8861_v7  ;;  %v22482_v7 = vld [vmem:[%s30184_s5 + $0x24] ss:$16 sps:$4 sm:$0xff]  }
 0x48d   : > { %v23435_v11 = vpop.eup %23434 }
 0x48e   : > { %v8884_v14 = vmul.f32 1.442695, %v8869_v9  ;;  %v8895_v15 = vsel %vm8837_vm4, %v23435_v11, 0.0  ;;  %v22477_v9 = vld [vmem:[%s30184_s5 + $0x48] ss:$16 sps:$4 sm:$0xff]  }
 0x48f   : > { %8896 = vadd.xlane.f32.xlu1 %v8895_v15  ;;  %v22488_v15 = vld [vmem:[%s30184_s5 + $0x4] ss:$16 sps:$4 sm:$0xff]  }
 0x490   : > { %23442 = vpow2.f32 %v8884_v14  ;;  %v22485_v14 = vld [vmem:[%s30184_s5 + $0x2c] ss:$16 sps:$4 sm:$0xff]  }
 0x491   : > { %v26260_v58 = vpop.eup %23436 }
 0x492   : > { %v26262_v3 = vpop.eup %23438  ;;  %v8898_v52 = vsel %vm8837_vm4, %v26260_v58, 0.0 }
 0x493   : > { %8899 = vadd.xlane.f32.xlu0 %v8898_v52  ;;  %v8901_v16 = vsel %vm8837_vm4, %v26262_v3, 0.0  ;;  %v22491_v52 = vld [vmem:[%s30184_s5 + $0xc] ss:$16 sps:$4 sm:$0xff]  }
 0x494   : > { %8902 = vadd.xlane.f32.xlu1 %v8901_v16  ;;  %v22489_v16 = vld [vmem:[%s30184_s5 + $0x8] ss:$16 sps:$4 sm:$0xff]  }
 0x499   : > { %v26268_v35 = vpop.eup %23440 }
 0x49a   : > { %v8904_v43 = vsel %vm8837_vm4, %v26268_v35, 0.0 }
 0x49b   : > { %8905 = vadd.xlane.f32.xlu0 %v8904_v43  ;;  %v22497_v43 = vld [vmem:[%s30184_s5 + $0xec] ss:$16 sps:$4 sm:$0xff]  }
 0x49d   : > { %v26272_v32 = vpop.eup %23442 }
 0x49e   : > { %v8907_v17 = vsel %vm8837_vm4, %v26272_v32, 0.0 }
 0x49f   : > { %8908 = vadd.xlane.f32.xlu1 %v8907_v17 }
 0x50c   : > { %v8888_v33 = vpop.xlane.xlu0 %8887 }
 0x50d   : > { %23444 = vrcp.f32 %v8888_v33  ;;  %v22492_v33 = vld [vmem:[%s30184_s5 + $0xe0] ss:$16 sps:$4 sm:$0xff]  }
 0x510   : > { %v8891_v18 = vpop.xlane.xlu0 %8890 }
 0x511   : > { %23446 = vrcp.f32 %v8891_v18  ;;  %v22495_v18 = vld [vmem:[%s30184_s5 + $0xe8] ss:$16 sps:$4 sm:$0xff]  }
 0x514   : > { %v8894_v19 = vpop.xlane.xlu0 %8893 }
 0x515   : > { %23448 = vrcp.f32 %v8894_v19 }
 0x518   : > { %v8897_v20 = vpop.xlane.xlu1 %8896 }
 0x519   : > { %23450 = vrcp.f32 %v8897_v20  ;;  %v22500_v20 = vld [vmem:[%s30184_s5 + $0xc4] ss:$16 sps:$4 sm:$0xff]  }
 0x51a   : > { %v23445_v36 = vpop.eup %23444 }
 0x51b   : > { %v8918_v6 = vmul.f32 %v23445_v36, %v23429_v59  ;;  %v22503_v36 = vld [vmem:[%s30184_s5 + $0xcc] ss:$16 sps:$4 sm:$0xff]  }
 0x51c   : > { %v8900_v10 = vpop.xlane.xlu0 %8899 }
 0x51d   : > { %v8934_v8 = vpack.c.bf16 %v8918_v6, %v8918_v6  ;;  %23452 = vrcp.f32 %v8900_v10  ;;  %v8903_v2 = vpop.xlane.xlu1 %8902  ;;  %8926 = vst.msk [vmem:[%s26282_s29] sm:$0xff] %vm8837_vm4, %v8918_v6 }
 0x51e   : > { %v23447_v53 = vpop.eup %23446  ;;  %23454 = vrcp.f32 %v8903_v2  ;;  %v22501_v2 = vld [vmem:[%s30184_s5 + $0xc8] ss:$16 sps:$4 sm:$0xff]  }
 0x51f   : > { %v8919_v22 = vmul.f32 %v23447_v53, %v23431_v48  ;;  %21606 = vmatmul.mubr.msk.bf16.vlgmr.msra.gmra.mxu0 %vm8837_vm4, %v8934_v8  ;;  %v22498_v8 = vld [vmem:[%s30184_s5 + $0xc0] ss:$16 sps:$4 sm:$0xff]   ;;  %v22506_v53 = vld [vmem:[%s30184_s5 + $0xa4] ss:$16 sps:$4 sm:$0xff]  }
 0x520   : > { %21616 = vmatpush3.bf16.msra.mxu0 %v9047_v38  ;;  %21617 = vmatprep.mubr.msk.bf16.mxu0 %vm23561_vm1, %v23560_v60 }
 0x521   : > { %v8935_v23 = vpack.c.bf16 %v8919_v22, %v8919_v22  ;;  %21627 = vmatprep.subr.bf16.mxu0 %v23560_v60  ;;  %8927 = vst.msk [vmem:[%s26282_s29 + $0x8] sm:$0xff] %vm8837_vm4, %v8919_v22 }
 0x522   : > { %v23449_v26 = vpop.eup %23448 }
 0x523   : > { %v8920_v55 = vmul.f32 %v23449_v26, %v23433_v37  ;;  %21612 = vmatmul.mubr.msk.bf16.vlgmr.msra.gmra.mxu1 %vm8837_vm4, %v8935_v23  ;;  %v22474_v37 = vld [vmem:[%s30184_s5 + $0x40] ss:$16 sps:$4 sm:$0xff]  }
 0x524   : > { %21622 = vmatpush3.bf16.msra.mxu1 %v9093_v40  ;;  %v8906_v30 = vpop.xlane.xlu0 %8905  ;;  %21623 = vmatprep.mubr.msk.bf16.mxu1 %vm23561_vm1, %v23560_v60  ;;  %v22512_v40 = vld [vmem:[%s30184_s5 + $0x84] ss:$16 sps:$4 sm:$0xff]  }
 0x525   : > { %v8936_v24 = vpack.c.bf16 %v8920_v55, %v8920_v55  ;;  %23456 = vrcp.f32 %v8906_v30  ;;  %21633 = vmatprep.subr.bf16.mxu1 %v23560_v60  ;;  %8928 = vst.msk [vmem:[%s26282_s29 + $0x10] sm:$0xff] %vm8837_vm4, %v8920_v55  ;;  %v22507_v55 = vld [vmem:[%s30184_s5 + $0xa8] ss:$16 sps:$4 sm:$0xff]   ;;  %v22515_v30 = vld [vmem:[%s30184_s5 + $0x8c] ss:$16 sps:$4 sm:$0xff]  }
 0x526   : > { %v23451_v31 = vpop.eup %23450 }
 0x527   : > { %v8921_v34 = vmul.f32 %v23451_v31, %v23435_v11  ;;  %21618 = vmatmul.mubr.msk.bf16.vlgmr.msra.gmra.mxu0 %vm8837_vm4, %v8936_v24  ;;  %v22480_v11 = vld [vmem:[%s30184_s5 + $0x20] ss:$16 sps:$4 sm:$0xff]  }
 0x528   : > { %21628 = vmatpush3.bf16.msra.mxu0 %v9139_v41  ;;  %v8909_v42 = vpop.xlane.xlu1 %8908  ;;  %21629 = vmatprep.mubr.msk.bf16.mxu0 %vm23561_vm1, %v23560_v60  ;;  %v22510_v41 = vld [vmem:[%s30184_s5 + $0x80] ss:$16 sps:$4 sm:$0xff]  }
 0x529   : > { %v8937_v45 = vpack.c.bf16 %v8921_v34, %v8921_v34  ;;  %23458 = vrcp.f32 %v8909_v42  ;;  %21639 = vmatprep.subr.bf16.mxu0 %v23560_v60  ;;  %8929 = vst.msk [vmem:[%s26282_s29 + $0x18] sm:$0xff] %vm8837_vm4, %v8921_v34  ;;  %v22513_v42 = vld [vmem:[%s30184_s5 + $0x88] ss:$16 sps:$4 sm:$0xff]  }
 0x52a   : > { %v23453_v46 = vpop.eup %23452 }
 0x52b   : > { %v23455_v49 = vpop.eup %23454  ;;  %v8922_v50 = vmul.f32 %v23453_v46, %v26260_v58  ;;  %21624 = vmatmul.mubr.msk.bf16.vlgmr.msra.gmra.mxu1 %vm8837_vm4, %v8937_v45  ;;  %v22483_v58 = vld [vmem:[%s30184_s5 + $0x28] ss:$16 sps:$4 sm:$0xff]   ;;  %v22518_v45 = vld [vmem:[%s30184_s5 + $0x164] ss:$16 sps:$4 sm:$0xff]   ;;  %v22521_v46 = vld [vmem:[%s30184_s5 + $0x16c] ss:$16 sps:$4 sm:$0xff]  }
 0x52c   : > { %v8923_v51 = vmul.f32 %v23455_v49, %v26262_v3  ;;  %21634 = vmatpush3.bf16.msra.mxu1 %v9185_v12  ;;  %21635 = vmatprep.mubr.msk.bf16.mxu1 %vm23561_vm1, %v23560_v60  ;;  %v22486_v3 = vld [vmem:[%s30184_s5] ss:$16 sps:$4 sm:$0xff]  }
 0x52d   : > { %v8938_v54 = vpack.c.bf16 %v8922_v50, %v8922_v50  ;;  %21645 = vmatprep.subr.bf16.mxu1 %v23560_v60  ;;  %8930 = vst.msk [vmem:[%s26282_s29 + $0x20] sm:$0xff] %vm8837_vm4, %v8922_v50 }
 0x52e   : > { %8931 = vst.msk [vmem:[%s26282_s29 + $0x28] sm:$0xff] %vm8837_vm4, %v8923_v51  ;;  %v8939_v59 = vpack.c.bf16 %v8923_v51, %v8923_v51  ;;  %v22516_v51 = vld [vmem:[%s30184_s5 + $0x160] ss:$16 sps:$4 sm:$0xff]  }
 0x52f   : > { %21630 = vmatmul.mubr.msk.bf16.vlgmr.msra.gmra.mxu0 %vm8837_vm4, %v8938_v54  ;;  %v22519_v54 = vld [vmem:[%s30184_s5 + $0x168] ss:$16 sps:$4 sm:$0xff]  }
 0x530   : > { %21640 = vmatpush3.bf16.msra.mxu0 %v9231_v57  ;;  %21641 = vmatprep.mubr.msk.bf16.mxu0 %vm23561_vm1, %v23560_v60  ;;  %v22527_v57 = vld [vmem:[%s30184_s5 + $0x14c] ss:$16 sps:$4 sm:$0xff]  }
 0x531   : > { %9546 = vmatprep.subr.bf16.mxu0 %v22470_v56 }
 0x532   : > { %v23457_v44 = vpop.eup %23456 }
 0x533   : > { %v8924_v13 = vmul.f32 %v23457_v44, %v26268_v35  ;;  %21636 = vmatmul.mubr.msk.bf16.vlgmr.msra.gmra.mxu1 %vm8837_vm4, %v8939_v59  ;;  %v22494_v35 = vld [vmem:[%s30184_s5 + $0xe4] ss:$16 sps:$4 sm:$0xff]  }
 0x534   : > { %21646 = vmatpush3.bf16.msra.mxu1 %v9277_v27  ;;  %21647 = vmatprep.mubr.msk.bf16.mxu1 %vm23561_vm1, %v23560_v60  ;;  %v22471_v60 = vld [vmem:[%s30184_s5 + $0x68] ss:$16 sps:$4 sm:$0xff]   ;;  %v22522_v27 = vld [vmem:[%s30184_s5 + $0x140] ss:$16 sps:$4 sm:$0xff]  }
 0x535   : > { %v8940_v48 = vpack.c.bf16 %v8924_v13, %v8924_v13  ;;  %9587 = vmatprep.subr.bf16.mxu1 %v22473_v61  ;;  %8932 = vst.msk [vmem:[%s26282_s29 + $0x30] sm:$0xff] %vm8837_vm4, %v8924_v13 }
 0x536   : > { %v23459_v4 = vpop.eup %23458 }
 0x537   : > { %v8925_v0 = vmul.f32 %v23459_v4, %v26272_v32  ;;  %21642 = vmatmul.mubr.msk.bf16.vlgmr.msra.gmra.mxu0 %vm8837_vm4, %v8940_v48  ;;  %v23562_v32 = vmov 0   ;;  %v22530_v48 = vld [vmem:[%s30184_s5 + $0x124] ss:$16 sps:$4 sm:$0xff]  }
 0x538   : > { %9547 = vmatpush1.bf16.msra.mxu0 %v22468_v62  ;;  %9570 = vmatprep.mubr.bf16.mxu0 %v23562_v32  ;;  %v22525_v62 = vld [vmem:[%s30184_s5 + $0x148] ss:$16 sps:$4 sm:$0xff]  }
 0x539   : > { %v8941_v39 = vpack.c.bf16 %v8925_v0, %v8925_v0  ;;  %9548 = vmatprep.subr.bf16.mxu0 %v22476_v63  ;;  %8933 = vst.msk [vmem:[%s26282_s29 + $0x38] sm:$0xff] %vm8837_vm4, %v8925_v0  ;;  %v22533_v63 = vld [vmem:[%s30184_s5 + $0x12c] ss:$16 sps:$4 sm:$0xff]   ;;  %s23474_s29 = scalar_lea.vmem %s23473_s24, 2048 }
 0x53a   : > { %p23476_p1 = scmp.lt.s32.totalorder %s23474_s29, %s23468_s22 }
 0x53b   : > { %21648 = vmatmul.mubr.msk.bf16.vlgmr.msra.gmra.mxu1 %vm8837_vm4, %v8941_v39  ;;  %v22528_v39 = vld [vmem:[%s30184_s5 + $0x120] ss:$16 sps:$4 sm:$0xff]  }
 0x53c   : > { %9588 = vmatpush1.bf16.msra.mxu1 %v22471_v60  ;;  %9549 = vmatpush1.bf16.msra.mxu0 %v22474_v37  ;;  %p23477_p2 = por %p23476_p1, %p23475_p0 }
 0x53d   : > { %9589 = vmatprep.subr.bf16.mxu1 %v22479_v5  ;;  %9550 = vmatprep.subr.bf16.mxu0 %v22482_v7  ;;  %v22531_v5 = vld [vmem:[%s30184_s5 + $0x128] ss:$16 sps:$4 sm:$0xff]   ;;  %v22536_v7 = vld [vmem:[%s30184_s5 + $0x104] ss:$16 sps:$4 sm:$0xff]  }
 0x53e   : > { %9611 = vmatprep.mubr.bf16.mxu1 %v23562_v32  ;;  %p23478_p3 = pnand %p23477_p2, %p23471_p13 }
 0x540   : > { %9590 = vmatpush1.bf16.msra.mxu1 %v22477_v9  ;;  %9551 = vmatpush1.bf16.msra.mxu0 %v22480_v11  ;;  %v22539_v9 = vld [vmem:[%s30184_s5 + $0x10c] ss:$16 sps:$4 sm:$0xff]  }
 0x541   : > { %9591 = vmatprep.subr.bf16.mxu1 %v22485_v14  ;;  %9552 = vmatprep.subr.bf16.mxu0 %v22488_v15 }
 0x544   : > { %9592 = vmatpush1.bf16.msra.mxu1 %v22483_v58  ;;  %9553 = vmatpush1.bf16.msra.mxu0 %v22486_v3  ;;  %v22534_v3 = vld [vmem:[%s30184_s5 + $0x100] ss:$16 sps:$4 sm:$0xff]  }
 0x545   : > { %9593 = vmatprep.subr.bf16.mxu1 %v22491_v52  ;;  %9711 = vmatprep.subr.bf16.mxu0 %v22494_v35  ;;  %v22537_v52 = vld [vmem:[%s30184_s5 + $0x108] ss:$16 sps:$4 sm:$0xff]   ;;  %v22545_v35 = vld [vmem:[%s30184_s5 + $0x1ec] ss:$16 sps:$4 sm:$0xff]  }
 0x548   : > { %9594 = vmatpush1.bf16.msra.mxu1 %v22489_v16  ;;  %v22542_v16 = vld [vmem:[%s30184_s5 + $0x1e4] ss:$16 sps:$4 sm:$0xff]  }
 0x549   : > { %9752 = vmatprep.subr.bf16.mxu1 %v22497_v43 }
 0x5df   : > { %v8991_v17 = vpop.f32.mrf.mxu0 }
 0x5e0   : > { %v9319_v19 = vpack.c.bf16 %v8991_v17, %v8991_v17 }
 0x5e1   : > { %v21607_v28 = vpop.f32.mrf.mxu0 }
 0x5e2   : > { %19304 = vmatmul.mubr.msk.bf16.vlgmr.msra.gmra.mxu0 %vm8449_vm0, %v9319_v19  ;;  %19305 = vmatmul.mubr.msk.bf16.vlgmr.msra.gmra.mxu1 %vm8449_vm0, %v9319_v19  ;;  %v22543_v19 = vld [vmem:[%s30184_s5 + $0x1e8] ss:$16 sps:$4 sm:$0xff]   ;;  %v22551_v28 = vld [vmem:[%s30184_s5 + $0x1cc] ss:$16 sps:$4 sm:$0xff]  }
 0x5e3   : > { %9712 = vmatpush1.bf16.msra.mxu0 %v22492_v33  ;;  %9753 = vmatpush1.bf16.msra.mxu1 %v22495_v18  ;;  %v8994_v6 = vpop.f32.mrf.mxu0  ;;  %v9037_v10 = vpop.f32.mrf.mxu1  ;;  %v22540_v18 = vld [vmem:[%s30184_s5 + $0x1e0] ss:$16 sps:$4 sm:$0xff]  }
 0x5e4   : > { %9713 = vmatprep.subr.bf16.mxu0 %v22500_v20  ;;  %9754 = vmatprep.subr.bf16.mxu1 %v22503_v36  ;;  %v9320_v56 = vpack.c.bf16 %v9037_v10, %v9037_v10  ;;  %v22548_v36 = vld [vmem:[%s30184_s5 + $0x1c4] ss:$16 sps:$4 sm:$0xff]   ;;  %v22546_v10 = vld [vmem:[%s30184_s5 + $0x1c0] ss:$16 sps:$4 sm:$0xff]  }
 0x5e5   : > { %v21608_v22 = vpop.f32.mrf.mxu0  ;;  %v21613_v38 = vpop.f32.mrf.mxu1  ;;  %9735 = vmatprep.mubr.bf16.mxu0 %v23562_v32  ;;  %9776 = vmatprep.mubr.bf16.mxu1 %v23562_v32 }
 0x5e6   : > { %v22555_v22 = vld [vmem:[%s30184_s5 + $0x1a8] ss:$16 sps:$4 sm:$0xff]   ;;  %v22560_v38 = vld [vmem:[%s30184_s5 + $0x184] ss:$16 sps:$4 sm:$0xff]  }
 0x5e7   : > { %9714 = vmatpush1.bf16.msra.mxu0 %v22498_v8  ;;  %9755 = vmatpush1.bf16.msra.mxu1 %v22501_v2  ;;  %v9040_v23 = vpop.f32.mrf.mxu1  ;;  %v26428_v26 = vpop.f32.mrf.mxu0  ;;  %v22549_v8 = vld [vmem:[%s30184_s5 + $0x1c8] ss:$16 sps:$4 sm:$0xff]   ;;  %v22554_v2 = vld [vmem:[%s30184_s5 + $0x1a4] ss:$16 sps:$4 sm:$0xff]  }
 0x5e8   : > { %9715 = vmatprep.subr.bf16.mxu0 %v22506_v53  ;;  %9756 = vmatprep.subr.bf16.mxu1 %v22509_v25  ;;  %v9321_v20 = vpack.c.bf16 %v26428_v26, %v26428_v26  ;;  %v22557_v53 = vld [vmem:[%s30184_s5 + $0x1ac] ss:$16 sps:$4 sm:$0xff]   ;;  %v22552_v25 = vld [vmem:[%s30184_s5 + $0x1a0] ss:$16 sps:$4 sm:$0xff]  }
 0x5e9   : > { %v21614_v24 = vpop.f32.mrf.mxu1  ;;  %v21619_v31 = vpop.f32.mrf.mxu0  ;;  %v22563_v23 = vld [vmem:[%s30184_s5 + $0x18c] ss:$16 sps:$4 sm:$0xff]   ;;  %v22558_v26 = vld [vmem:[%s30184_s5 + $0x180] ss:$16 sps:$4 sm:$0xff]  }
 0x5ea   : > { %v22567_v24 = vld [vmem:[%s30184_s5 + $0x268] ss:$16 sps:$4 sm:$0xff]  }
 0x5eb   : > { %9716 = vmatpush1.bf16.msra.mxu0 %v22504_v29  ;;  %9757 = vmatpush1.bf16.msra.mxu1 %v22507_v55  ;;  %v9086_v1 = vpop.f32.mrf.mxu0  ;;  %v26442_v34 = vpop.f32.mrf.mxu1  ;;  %v22561_v29 = vld [vmem:[%s30184_s5 + $0x188] ss:$16 sps:$4 sm:$0xff]   ;;  %v22566_v55 = vld [vmem:[%s30184_s5 + $0x264] ss:$16 sps:$4 sm:$0xff]  }
 0x5ec   : > { %9717 = vmatprep.subr.bf16.mxu0 %v22512_v40  ;;  %9758 = vmatprep.subr.bf16.mxu1 %v22515_v30  ;;  %v22569_v40 = vld [vmem:[%s30184_s5 + $0x26c] ss:$16 sps:$4 sm:$0xff]   ;;  %v22564_v30 = vld [vmem:[%s30184_s5 + $0x260] ss:$16 sps:$4 sm:$0xff]   ;;  %v9322_v31 = vpack.c.bf16 %v26442_v34, %v26442_v34  ;;  %v22572_v1 = vld [vmem:[%s30184_s5 + $0x244] ss:$16 sps:$4 sm:$0xff]  }
 0x5ed   : > { %v21620_v49 = vpop.f32.mrf.mxu0  ;;  %v21625_v47 = vpop.f32.mrf.mxu1  ;;  %v22570_v34 = vld [vmem:[%s30184_s5 + $0x240] ss:$16 sps:$4 sm:$0xff]  }
 0x5ee   : > { %v22576_v49 = vld [vmem:[%s30184_s5 + $0x220] ss:$16 sps:$4 sm:$0xff]   ;;  %v22579_v47 = vld [vmem:[%s30184_s5 + $0x228] ss:$16 sps:$4 sm:$0xff]  }
 0x5ef   : > { %9718 = vmatpush1.bf16.msra.mxu0 %v22510_v41  ;;  %9759 = vmatpush1.bf16.msra.mxu1 %v22513_v42  ;;  %v9132_v50 = vpop.f32.mrf.mxu1  ;;  %v26456_v12 = vpop.f32.mrf.mxu0  ;;  %v22575_v41 = vld [vmem:[%s30184_s5 + $0x24c] ss:$16 sps:$4 sm:$0xff]   ;;  %v22573_v42 = vld [vmem:[%s30184_s5 + $0x248] ss:$16 sps:$4 sm:$0xff]  }
 0x5f0   : > { %9876 = vmatprep.subr.bf16.mxu0 %v22518_v45  ;;  %9917 = vmatprep.subr.bf16.mxu1 %v22521_v46  ;;  %v22578_v45 = vld [vmem:[%s30184_s5 + $0x224] ss:$16 sps:$4 sm:$0xff]   ;;  %v22581_v46 = vld [vmem:[%s30184_s5 + $0x22c] ss:$16 sps:$4 sm:$0xff]  }
 0x5f1   : > { %v21626_v59 = vpop.f32.mrf.mxu1  ;;  %v21631_v61 = vpop.f32.mrf.mxu0  ;;  %v22584_v50 = vld [vmem:[%s30184_s5 + $0x204] ss:$16 sps:$4 sm:$0xff]  }
 0x5f2   : > { %19322 = vmatmul.mubr.msk.bf16.vlgmr.msra.gmra.mxu0 %vm8449_vm0, %v9320_v56  ;;  %19323 = vmatmul.mubr.msk.bf16.vlgmr.msra.gmra.mxu1 %vm8449_vm0, %v9320_v56  ;;  %v22585_v56 = vld [vmem:[%s30184_s5 + $0x208] ss:$16 sps:$4 sm:$0xff]   ;;  %v22588_v59 = vld [vmem:[%s30184_s5 + $0x2e0] ss:$16 sps:$4 sm:$0xff]  }
 0x5f3   : > { %9877 = vmatpush1.bf16.msra.mxu0 %v22516_v51  ;;  %9918 = vmatpush1.bf16.msra.mxu1 %v22519_v54  ;;  %v9178_v44 = vpop.f32.mrf.mxu0  ;;  %v26472_v13 = vpop.f32.mrf.mxu1  ;;  %v22587_v51 = vld [vmem:[%s30184_s5 + $0x20c] ss:$16 sps:$4 sm:$0xff]   ;;  %v22582_v54 = vld [vmem:[%s30184_s5 + $0x200] ss:$16 sps:$4 sm:$0xff]   ;;  %v22591_v61 = vld [vmem:[%s30184_s5 + $0x2e8] ss:$16 sps:$4 sm:$0xff]  }
 0x5f4   : > { %9878 = vmatprep.subr.bf16.mxu0 %v22524_v21  ;;  %9919 = vmatprep.subr.bf16.mxu1 %v22527_v57  ;;  %v22590_v21 = vld [vmem:[%s30184_s5 + $0x2e4] ss:$16 sps:$4 sm:$0xff]   ;;  %v22593_v57 = vld [vmem:[%s30184_s5 + $0x2ec] ss:$16 sps:$4 sm:$0xff]   ;;  %v9323_v44 = vpack.c.bf16 %v26456_v12, %v26456_v12  ;;  %v22594_v12 = vld [vmem:[%s30184_s5 + $0x2c0] ss:$16 sps:$4 sm:$0xff]  }
 0x5f5   : > { %v21632_v4 = vpop.f32.mrf.mxu0  ;;  %v21637_v0 = vpop.f32.mrf.mxu1  ;;  %9900 = vmatprep.mubr.bf16.mxu0 %v23562_v32  ;;  %9941 = vmatprep.mubr.bf16.mxu1 %v23562_v32 }
 0x5f6   : > { %v22605_v4 = vld [vmem:[%s30184_s5 + $0x2ac] ss:$16 sps:$4 sm:$0xff]   ;;  %v22600_v0 = vld [vmem:[%s30184_s5 + $0x2a0] ss:$16 sps:$4 sm:$0xff]  }
 0x5f7   : > { %9879 = vmatpush1.bf16.msra.mxu0 %v22522_v27  ;;  %9920 = vmatpush1.bf16.msra.mxu1 %v22525_v62  ;;  %v9224_v60 = vpop.f32.mrf.mxu1  ;;  %v26488_v37 = vpop.f32.mrf.mxu0  ;;  %v22596_v27 = vld [vmem:[%s30184_s5 + $0x2c4] ss:$16 sps:$4 sm:$0xff]   ;;  %v22599_v62 = vld [vmem:[%s30184_s5 + $0x2cc] ss:$16 sps:$4 sm:$0xff]  }
 0x5f8   : > { %9880 = vmatprep.subr.bf16.mxu0 %v22530_v48  ;;  %9921 = vmatprep.subr.bf16.mxu1 %v22533_v63  ;;  %v22597_v48 = vld [vmem:[%s30184_s5 + $0x2c8] ss:$16 sps:$4 sm:$0xff]   ;;  %v22602_v63 = vld [vmem:[%s30184_s5 + $0x2a4] ss:$16 sps:$4 sm:$0xff]  }
 0x5f9   : > { %v21638_v11 = vpop.f32.mrf.mxu1  ;;  %v21643_v14 = vpop.f32.mrf.mxu0  ;;  %v22603_v60 = vld [vmem:[%s30184_s5 + $0x2a8] ss:$16 sps:$4 sm:$0xff]  }
 0x5fa   : > { %v22614_v11 = vld [vmem:[%s30184_s5 + $0x364] ss:$16 sps:$4 sm:$0xff]   ;;  %v22617_v14 = vld [vmem:[%s30184_s5 + $0x36c] ss:$16 sps:$4 sm:$0xff]  }
 0x5fb   : > { %9881 = vmatpush1.bf16.msra.mxu0 %v22528_v39  ;;  %9922 = vmatpush1.bf16.msra.mxu1 %v22531_v5  ;;  %v9270_v15 = vpop.f32.mrf.mxu0  ;;  %v26502_v58 = vpop.f32.mrf.mxu1  ;;  %v22608_v39 = vld [vmem:[%s30184_s5 + $0x284] ss:$16 sps:$4 sm:$0xff]   ;;  %v22611_v5 = vld [vmem:[%s30184_s5 + $0x28c] ss:$16 sps:$4 sm:$0xff]  }
 0x5fc   : > { %9882 = vmatprep.subr.bf16.mxu0 %v22536_v7  ;;  %9923 = vmatprep.subr.bf16.mxu1 %v22539_v9  ;;  %v22606_v7 = vld [vmem:[%s30184_s5 + $0x280] ss:$16 sps:$4 sm:$0xff]   ;;  %v22609_v9 = vld [vmem:[%s30184_s5 + $0x288] ss:$16 sps:$4 sm:$0xff]  }
 0x5fd   : > { %v21644_v43 = vpop.f32.mrf.mxu0  ;;  %v21649_v17 = vpop.f32.mrf.mxu1  ;;  %v22612_v15 = vld [vmem:[%s30184_s5 + $0x360] ss:$16 sps:$4 sm:$0xff]  }
 0x5fe   : > { %v22621_v43 = vld [vmem:[%s30184_s5 + $0x348] ss:$16 sps:$4 sm:$0xff]   ;;  %v22626_v17 = vld [vmem:[%s30184_s5 + $0x324] ss:$16 sps:$4 sm:$0xff]  }
 0x5ff   : > { %9883 = vmatpush1.bf16.msra.mxu0 %v22534_v3  ;;  %9924 = vmatpush1.bf16.msra.mxu1 %v22537_v52  ;;  %v9316_v33 = vpop.f32.mrf.mxu1  ;;  %v22615_v3 = vld [vmem:[%s30184_s5 + $0x368] ss:$16 sps:$4 sm:$0xff]   ;;  %v9324_v52 = vpack.c.bf16 %v26472_v13, %v26472_v13  ;;  %v22618_v13 = vld [vmem:[%s30184_s5 + $0x340] ss:$16 sps:$4 sm:$0xff]  }
 0x600   : > { %10041 = vmatprep.subr.bf16.mxu0 %v22542_v16  ;;  %10082 = vmatprep.subr.bf16.mxu1 %v22545_v35  ;;  %v22620_v16 = vld [vmem:[%s30184_s5 + $0x344] ss:$16 sps:$4 sm:$0xff]   ;;  %v22623_v35 = vld [vmem:[%s30184_s5 + $0x34c] ss:$16 sps:$4 sm:$0xff]  }
 0x601   : > { %v21650_v6 = vpop.f32.mrf.mxu1  ;;  %v22629_v33 = vld [vmem:[%s30184_s5 + $0x32c] ss:$16 sps:$4 sm:$0xff]  }
 0x602   : > { %19340 = vmatmul.mubr.msk.bf16.vlgmr.msra.gmra.mxu0 %vm8449_vm0, %v9321_v20  ;;  %19341 = vmatmul.mubr.msk.bf16.vlgmr.msra.gmra.mxu1 %vm8449_vm0, %v9321_v20  ;;  %v22632_v20 = vld [vmem:[%s30184_s5 + $0x304] ss:$16 sps:$4 sm:$0xff]   ;;  %v22633_v6 = vld [vmem:[%s30184_s5 + $0x308] ss:$16 sps:$4 sm:$0xff]  }
 0x603   : > { %10042 = vmatpush1.bf16.msra.mxu0 %v22540_v18  ;;  %10083 = vmatpush1.bf16.msra.mxu1 %v22543_v19  ;;  %v22624_v18 = vld [vmem:[%s30184_s5 + $0x320] ss:$16 sps:$4 sm:$0xff]   ;;  %v22627_v19 = vld [vmem:[%s30184_s5 + $0x328] ss:$16 sps:$4 sm:$0xff]  }
 0x604   : > { %10043 = vmatprep.subr.bf16.mxu0 %v22548_v36  ;;  %10084 = vmatprep.subr.bf16.mxu1 %v22551_v28  ;;  %v22635_v36 = vld [vmem:[%s30184_s5 + $0x30c] ss:$16 sps:$4 sm:$0xff]   ;;  %v22630_v28 = vld [vmem:[%s30184_s5 + $0x300] ss:$16 sps:$4 sm:$0xff]  }
 0x605   : > { %10065 = vmatprep.mubr.bf16.mxu0 %v23562_v32  ;;  %10106 = vmatprep.mubr.bf16.mxu1 %v23562_v32 }
 0x607   : > { %10044 = vmatpush1.bf16.msra.mxu0 %v22546_v10  ;;  %10085 = vmatpush1.bf16.msra.mxu1 %v22549_v8  ;;  %v22638_v10 = vld [vmem:[%s30184_s5 + $0x3e4] ss:$16 sps:$4 sm:$0xff]   ;;  %v22641_v8 = vld [vmem:[%s30184_s5 + $0x3ec] ss:$16 sps:$4 sm:$0xff]  }
 0x608   : > { %10045 = vmatprep.subr.bf16.mxu0 %v22554_v2  ;;  %10086 = vmatprep.subr.bf16.mxu1 %v22557_v53  ;;  %v22636_v2 = vld [vmem:[%s30184_s5 + $0x3e0] ss:$16 sps:$4 sm:$0xff]   ;;  %v22639_v53 = vld [vmem:[%s30184_s5 + $0x3e8] ss:$16 sps:$4 sm:$0xff]  }
 0x60b   : > { %10046 = vmatpush1.bf16.msra.mxu0 %v22552_v25  ;;  %10087 = vmatpush1.bf16.msra.mxu1 %v22555_v22  ;;  %v9325_v25 = vpack.c.bf16 %v26488_v37, %v26488_v37  ;;  %v22644_v22 = vld [vmem:[%s30184_s5 + $0x3c4] ss:$16 sps:$4 sm:$0xff]   ;;  %v22642_v37 = vld [vmem:[%s30184_s5 + $0x3c0] ss:$16 sps:$4 sm:$0xff]  }
 0x60c   : > { %10047 = vmatprep.subr.bf16.mxu0 %v22560_v38  ;;  %10088 = vmatprep.subr.bf16.mxu1 %v22563_v23  ;;  %v22647_v38 = vld [vmem:[%s30184_s5 + $0x3cc] ss:$16 sps:$4 sm:$0xff]   ;;  %v22645_v23 = vld [vmem:[%s30184_s5 + $0x3c8] ss:$16 sps:$4 sm:$0xff]  }
 0x60f   : > { %10048 = vmatpush1.bf16.msra.mxu0 %v22558_v26  ;;  %10089 = vmatpush1.bf16.msra.mxu1 %v22561_v29  ;;  %v22650_v26 = vld [vmem:[%s30184_s5 + $0x3a4] ss:$16 sps:$4 sm:$0xff]   ;;  %v22653_v29 = vld [vmem:[%s30184_s5 + $0x3ac] ss:$16 sps:$4 sm:$0xff]  }
 0x610   : > { %10206 = vmatprep.subr.bf16.mxu0 %v22566_v55  ;;  %10247 = vmatprep.subr.bf16.mxu1 %v22569_v40  ;;  %v22648_v55 = vld [vmem:[%s30184_s5 + $0x3a0] ss:$16 sps:$4 sm:$0xff]   ;;  %v22651_v40 = vld [vmem:[%s30184_s5 + $0x3a8] ss:$16 sps:$4 sm:$0xff]  }
 0x612   : > { %19358 = vmatmul.mubr.msk.bf16.vlgmr.msra.gmra.mxu0 %vm8449_vm0, %v9322_v31  ;;  %19359 = vmatmul.mubr.msk.bf16.vlgmr.msra.gmra.mxu1 %vm8449_vm0, %v9322_v31  ;;  %v22657_v31 = vld [vmem:[%s30184_s5 + $0x388] ss:$16 sps:$4 sm:$0xff]  }
 0x613   : > { %10207 = vmatpush1.bf16.msra.mxu0 %v22564_v30  ;;  %10248 = vmatpush1.bf16.msra.mxu1 %v22567_v24  ;;  %v22656_v30 = vld [vmem:[%s30184_s5 + $0x384] ss:$16 sps:$4 sm:$0xff]   ;;  %v22654_v24 = vld [vmem:[%s30184_s5 + $0x380] ss:$16 sps:$4 sm:$0xff]  }
 0x614   : > { %10208 = vmatprep.subr.bf16.mxu0 %v22572_v1  ;;  %10249 = vmatprep.subr.bf16.mxu1 %v22575_v41  ;;  %v9326_v1 = vpack.c.bf16 %v26502_v58, %v26502_v58 }
 0x615   : > { %10230 = vmatprep.mubr.bf16.mxu0 %v23562_v32  ;;  %10271 = vmatprep.mubr.bf16.mxu1 %v23562_v32 }
 0x617   : > { %10209 = vmatpush1.bf16.msra.mxu0 %v22570_v34  ;;  %10250 = vmatpush1.bf16.msra.mxu1 %v22573_v42 }
 0x618   : > { %10210 = vmatprep.subr.bf16.mxu0 %v22578_v45  ;;  %10251 = vmatprep.subr.bf16.mxu1 %v22581_v46 }
 0x61b   : > { %10211 = vmatpush1.bf16.msra.mxu0 %v22576_v49  ;;  %10252 = vmatpush1.bf16.msra.mxu1 %v22579_v47 }
 0x61c   : > { %10212 = vmatprep.subr.bf16.mxu0 %v22584_v50  ;;  %10253 = vmatprep.subr.bf16.mxu1 %v22587_v51 }
 0x61f   : > { %10213 = vmatpush1.bf16.msra.mxu0 %v22582_v54  ;;  %10254 = vmatpush1.bf16.msra.mxu1 %v22585_v56 }
 0x620   : > { %10371 = vmatprep.subr.bf16.mxu0 %v22590_v21  ;;  %10412 = vmatprep.subr.bf16.mxu1 %v22593_v57 }
 0x622   : > { %19376 = vmatmul.mubr.msk.bf16.vlgmr.msra.gmra.mxu0 %vm8449_vm0, %v9323_v44  ;;  %19377 = vmatmul.mubr.msk.bf16.vlgmr.msra.gmra.mxu1 %vm8449_vm0, %v9323_v44 }
 0x623   : > { %10372 = vmatpush1.bf16.msra.mxu0 %v22588_v59  ;;  %10413 = vmatpush1.bf16.msra.mxu1 %v22591_v61 }
 0x624   : > { %10373 = vmatprep.subr.bf16.mxu0 %v22596_v27  ;;  %10414 = vmatprep.subr.bf16.mxu1 %v22599_v62 }
 0x625   : > { %10395 = vmatprep.mubr.bf16.mxu0 %v23562_v32  ;;  %10436 = vmatprep.mubr.bf16.mxu1 %v23562_v32 }
 0x627   : > { %10374 = vmatpush1.bf16.msra.mxu0 %v22594_v12  ;;  %10415 = vmatpush1.bf16.msra.mxu1 %v22597_v48 }
 0x628   : > { %10375 = vmatprep.subr.bf16.mxu0 %v22602_v63  ;;  %10416 = vmatprep.subr.bf16.mxu1 %v22605_v4 }
 0x62b   : > { %10376 = vmatpush1.bf16.msra.mxu0 %v22600_v0  ;;  %10417 = vmatpush1.bf16.msra.mxu1 %v22603_v60 }
 0x62c   : > { %10377 = vmatprep.subr.bf16.mxu0 %v22608_v39  ;;  %10418 = vmatprep.subr.bf16.mxu1 %v22611_v5 }
 0x62f   : > { %10378 = vmatpush1.bf16.msra.mxu0 %v22606_v7  ;;  %10419 = vmatpush1.bf16.msra.mxu1 %v22609_v9 }
 0x630   : > { %10536 = vmatprep.subr.bf16.mxu0 %v22614_v11  ;;  %10577 = vmatprep.subr.bf16.mxu1 %v22617_v14 }
 0x632   : > { %19394 = vmatmul.mubr.msk.bf16.vlgmr.msra.gmra.mxu0 %vm8449_vm0, %v9324_v52  ;;  %19395 = vmatmul.mubr.msk.bf16.vlgmr.msra.gmra.mxu1 %vm8449_vm0, %v9324_v52 }
 0x633   : > { %10537 = vmatpush1.bf16.msra.mxu0 %v22612_v15  ;;  %10578 = vmatpush1.bf16.msra.mxu1 %v22615_v3 }
 0x634   : > { %10538 = vmatprep.subr.bf16.mxu0 %v22620_v16  ;;  %10579 = vmatprep.subr.bf16.mxu1 %v22623_v35 }
 0x635   : > { %10560 = vmatprep.mubr.bf16.mxu0 %v23562_v32  ;;  %10601 = vmatprep.mubr.bf16.mxu1 %v23562_v32 }
 0x637   : > { %10539 = vmatpush1.bf16.msra.mxu0 %v22618_v13  ;;  %10580 = vmatpush1.bf16.msra.mxu1 %v22621_v43 }
 0x638   : > { %10540 = vmatprep.subr.bf16.mxu0 %v22626_v17  ;;  %10581 = vmatprep.subr.bf16.mxu1 %v22629_v33 }
 0x63b   : > { %10541 = vmatpush1.bf16.msra.mxu0 %v22624_v18  ;;  %10582 = vmatpush1.bf16.msra.mxu1 %v22627_v19 }
 0x63c   : > { %10542 = vmatprep.subr.bf16.mxu0 %v22632_v20  ;;  %10583 = vmatprep.subr.bf16.mxu1 %v22635_v36 }
 0x63f   : > { %10543 = vmatpush1.bf16.msra.mxu0 %v22630_v28  ;;  %10584 = vmatpush1.bf16.msra.mxu1 %v22633_v6 }
 0x640   : > { %10701 = vmatprep.subr.bf16.mxu0 %v22638_v10  ;;  %10742 = vmatprep.subr.bf16.mxu1 %v22641_v8 }
 0x642   : > { %19412 = vmatmul.mubr.msk.bf16.vlgmr.msra.gmra.mxu0 %vm8449_vm0, %v9325_v25  ;;  %19413 = vmatmul.mubr.msk.bf16.vlgmr.msra.gmra.mxu1 %vm8449_vm0, %v9325_v25 }
 0x643   : > { %10702 = vmatpush1.bf16.msra.mxu0 %v22636_v2  ;;  %10743 = vmatpush1.bf16.msra.mxu1 %v22639_v53 }
 0x644   : > { %10703 = vmatprep.subr.bf16.mxu0 %v22644_v22  ;;  %10744 = vmatprep.subr.bf16.mxu1 %v22647_v38 }
 0x645   : > { %10725 = vmatprep.mubr.bf16.mxu0 %v23562_v32  ;;  %10766 = vmatprep.mubr.bf16.mxu1 %v23562_v32  ;;  %v22659_v32 = vld [vmem:[%s30184_s5 + $0x38c] ss:$16 sps:$4 sm:$0xff]  }
 0x647   : > { %10704 = vmatpush1.bf16.msra.mxu0 %v22642_v37  ;;  %10745 = vmatpush1.bf16.msra.mxu1 %v22645_v23 }
 0x648   : > { %10705 = vmatprep.subr.bf16.mxu0 %v22650_v26  ;;  %10746 = vmatprep.subr.bf16.mxu1 %v22653_v29 }
 0x64b   : > { %10706 = vmatpush1.bf16.msra.mxu0 %v22648_v55  ;;  %10747 = vmatpush1.bf16.msra.mxu1 %v22651_v40 }
 0x64c   : > { %10707 = vmatprep.subr.bf16.mxu0 %v22656_v30  ;;  %10748 = vmatprep.subr.bf16.mxu1 %v22659_v32 }
 0x64f   : > { %10708 = vmatpush1.bf16.msra.mxu0 %v22654_v24  ;;  %10749 = vmatpush1.bf16.msra.mxu1 %v22657_v31 }
 0x652   : > { %19430 = vmatmul.mubr.msk.bf16.vlgmr.msra.gmra.mxu0 %vm8449_vm0, %v9326_v1  ;;  %19431 = vmatmul.mubr.msk.bf16.vlgmr.msra.gmra.mxu1 %vm8449_vm0, %v9326_v1 }
 0x6a2   : > { %v9572_v41 = vpop.f32.mrf.mxu0  ;;  %v9613_v34 = vpop.f32.mrf.mxu1 }
 0x6a4   : > { %v9574_v42 = vpop.f32.mrf.mxu0  ;;  %v9615_v45 = vpop.f32.mrf.mxu1 }
 0x6a6   : > { %v9576_v46 = vpop.f32.mrf.mxu0  ;;  %v9617_v49 = vpop.f32.mrf.mxu1 }
 0x6a8   : > { %v9577_v47 = vpop.f32.mrf.mxu0  ;;  %v9618_v50 = vpop.f32.mrf.mxu1 }
 0x6b2   : > { %v9737_v51 = vpop.f32.mrf.mxu0  ;;  %v9778_v54 = vpop.f32.mrf.mxu1 }
 0x6b3   : > { %v10775_v56 = vadd.f32 %v9737_v51, %v9572_v41  ;;  %v10789_v21 = vadd.f32 %v9778_v54, %v9613_v34 }
 0x6b4   : > { %v9739_v57 = vpop.f32.mrf.mxu0  ;;  %v9780_v59 = vpop.f32.mrf.mxu1 }
 0x6b5   : > { %v10782_v61 = vadd.f32 %v9739_v57, %v9574_v42  ;;  %v10796_v58 = vadd.f32 %v9780_v59, %v9615_v45 }
 0x6b6   : > { %v9741_v44 = vpop.f32.mrf.mxu0  ;;  %v9782_v27 = vpop.f32.mrf.mxu1 }
 0x6b8   : > { %v9742_v62 = vpop.f32.mrf.mxu0  ;;  %v9783_v12 = vpop.f32.mrf.mxu1 }
 0x6c2   : > { %v9902_v48 = vpop.f32.mrf.mxu0  ;;  %v9943_v63 = vpop.f32.mrf.mxu1 }
 0x6c3   : > { %v10776_v4 = vadd.f32 %v10775_v56, %v9902_v48  ;;  %v10790_v0 = vadd.f32 %v10789_v21, %v9943_v63 }
 0x6c4   : > { %v9904_v60 = vpop.f32.mrf.mxu0  ;;  %v9945_v39 = vpop.f32.mrf.mxu1 }
 0x6c5   : > { %v10783_v5 = vadd.f32 %v10782_v61, %v9904_v60  ;;  %v10797_v7 = vadd.f32 %v10796_v58, %v9945_v39  ;;  %v23464_v39 = vld [vmem:[%s23763_s26] sm:$0xff] }
 0x6c6   : > { %v9906_v9 = vpop.f32.mrf.mxu0  ;;  %v9947_v11 = vpop.f32.mrf.mxu1 }
 0x6c8   : > { %v9907_v14 = vpop.f32.mrf.mxu0  ;;  %v9948_v15 = vpop.f32.mrf.mxu1 }
 0x6d2   : > { %v10067_v3 = vpop.f32.mrf.mxu0  ;;  %v10108_v52 = vpop.f32.mrf.mxu1 }
 0x6d3   : > { %v10777_v41 = vadd.f32 %v10776_v4, %v10067_v3  ;;  %v10791_v34 = vadd.f32 %v10790_v0, %v10108_v52  ;;  %v23466_v3 = vld [vmem:[%s23763_s26 + $0x10] sm:$0xff] }
 0x6d4   : > { %v10069_v16 = vpop.f32.mrf.mxu0  ;;  %v10110_v35 = vpop.f32.mrf.mxu1 }
 0x6d5   : > { %v10784_v42 = vadd.f32 %v10783_v5, %v10069_v16  ;;  %v10798_v46 = vadd.f32 %v10797_v7, %v10110_v35  ;;  %v23465_v7 = vld [vmem:[%s23763_s26 + $0x8] sm:$0xff]  ;;  %v23467_v35 = vld [vmem:[%s23763_s26 + $0x18] sm:$0xff]  ;;  %s30107_s26 = scalar_lea.hbm %s30188_s9, %s20466_s17 }
 0x6d6   : > { %v10071_v13 = vpop.f32.mrf.mxu0  ;;  %v10112_v43 = vpop.f32.mrf.mxu1 }
 0x6d8   : > { %v10072_v17 = vpop.f32.mrf.mxu0  ;;  %v10113_v33 = vpop.f32.mrf.mxu1 }
 0x6d9   : > { %v10950_v33 = vld [vmem:[%s30185_s6 + $0x380] sm:$0xff] }
 0x6e2   : > { %v10232_v18 = vpop.f32.mrf.mxu0  ;;  %v10273_v19 = vpop.f32.mrf.mxu1 }
 0x6e3   : > { %v10778_v45 = vadd.f32 %v10777_v41, %v10232_v18  ;;  %v10792_v49 = vadd.f32 %v10791_v34, %v10273_v19  ;;  %v10958_v18 = vld [vmem:[%s30185_s6 + $0x3c0] sm:$0xff] }
 0x6e4   : > { %v10234_v20 = vpop.f32.mrf.mxu0  ;;  %v10275_v36 = vpop.f32.mrf.mxu1  ;;  %v11206_v19 = vld [vmem:[%s30185_s6 + $0xb80] sm:$0xff] }
 0x6e5   : > { %v10785_v47 = vadd.f32 %v10784_v42, %v10234_v20  ;;  %v10799_v51 = vadd.f32 %v10798_v46, %v10275_v36  ;;  %v19544_v20 = vcombine.low %v10950_v33, %v10958_v18  ;;  %v19545_v36 = vcombine.high %v10950_v33, %v10958_v18  ;;  %v11166_v41 = vld [vmem:[%s30185_s6 + $0xa40] sm:$0xff] }
 0x6e6   : > { %v10236_v28 = vpop.f32.mrf.mxu0  ;;  %v10277_v6 = vpop.f32.mrf.mxu1 }
 0x6e7   : > { %v11214_v28 = vld [vmem:[%s30185_s6 + $0xbc0] sm:$0xff]  ;;  %13910 = vmatprep.subr.bf16.mxu0 %v19545_v36 }
 0x6e8   : > { %v10237_v10 = vpop.f32.mrf.mxu0  ;;  %v10278_v8 = vpop.f32.mrf.mxu1  ;;  %v10934_v6 = vld [vmem:[%s30185_s6 + $0x300] sm:$0xff]  ;;  %13911 = vmatpush1.bf16.msra.mxu0 %v19544_v20 }
 0x6e9   : > { %v10942_v10 = vld [vmem:[%s30185_s6 + $0x340] sm:$0xff]  ;;  %v19800_v8 = vcombine.low %v11206_v19, %v11214_v28 }
 0x6ea   : > { %v11086_v20 = vld [vmem:[%s30185_s6 + $0x7c0] sm:$0xff] }
 0x6eb   : > { %v11334_v36 = vld [vmem:[%s30185_s6 + $0xf80] sm:$0xff] }
 0x6f2   : > { %v10397_v2 = vpop.f32.mrf.mxu0  ;;  %v10438_v53 = vpop.f32.mrf.mxu1 }
 0x6f3   : > { %v10779_v50 = vadd.f32 %v10778_v45, %v10397_v2  ;;  %v10793_v54 = vadd.f32 %v10792_v49, %v10438_v53  ;;  %v19801_v2 = vcombine.high %v11206_v19, %v11214_v28  ;;  %v19529_v53 = vcombine.high %v10934_v6, %v10942_v10  ;;  %v10886_v49 = vld [vmem:[%s30185_s6 + $0x180] sm:$0xff] }
 0x6f4   : > { %v10399_v25 = vpop.f32.mrf.mxu0  ;;  %v10440_v22 = vpop.f32.mrf.mxu1  ;;  %v11078_v19 = vld [vmem:[%s30185_s6 + $0x780] sm:$0xff] }
 0x6f5   : > { %v10786_v56 = vadd.f32 %v10785_v47, %v10399_v25  ;;  %v10800_v61 = vadd.f32 %v10799_v51, %v10440_v22  ;;  %v11190_v25 = vld [vmem:[%s30185_s6 + $0xb00] sm:$0xff]  ;;  %13951 = vmatprep.subr.bf16.mxu1 %v19801_v2  ;;  %13912 = vmatprep.subr.bf16.mxu0 %v19529_v53 }
 0x6f6   : > { %v10401_v38 = vpop.f32.mrf.mxu0  ;;  %v10442_v37 = vpop.f32.mrf.mxu1  ;;  %v11198_v22 = vld [vmem:[%s30185_s6 + $0xb40] sm:$0xff]  ;;  %13952 = vmatpush1.bf16.msra.mxu1 %v19800_v8  ;;  %v19673_v8 = vcombine.high %v11078_v19, %v11086_v20 }
 0x6f7   : > { %v10918_v38 = vld [vmem:[%s30185_s6 + $0x280] sm:$0xff]  ;;  %v19785_v37 = vcombine.high %v11190_v25, %v11198_v22 }
 0x6f8   : > { %v10402_v23 = vpop.f32.mrf.mxu0  ;;  %v10443_v26 = vpop.f32.mrf.mxu1  ;;  %v10894_v47 = vld [vmem:[%s30185_s6 + $0x1c0] sm:$0xff] }
 0x6f9   : > { %v10926_v23 = vld [vmem:[%s30185_s6 + $0x2c0] sm:$0xff]  ;;  %13953 = vmatprep.subr.bf16.mxu1 %v19785_v37  ;;  %v19672_v37 = vcombine.low %v11078_v19, %v11086_v20 }
 0x6fa   : > { %v11174_v26 = vld [vmem:[%s30185_s6 + $0xa80] sm:$0xff]  ;;  %v19512_v34 = vcombine.low %v10918_v38, %v10926_v23 }
 0x6fb   : > { %v11150_v51 = vld [vmem:[%s30185_s6 + $0x9c0] sm:$0xff] }
 0x6fc   : > { %v11342_v28 = vld [vmem:[%s30185_s6 + $0xfc0] sm:$0xff] }
 0x6fd   : > { %v19929_v2 = vcombine.high %v11334_v36, %v11342_v28  ;;  %v11062_v53 = vld [vmem:[%s30185_s6 + $0x700] sm:$0xff] }
 0x6fe   : > { %v11246_v19 = vld [vmem:[%s30185_s6 + $0xcc0] sm:$0xff] }
 0x702   : > { %v10562_v29 = vpop.f32.mrf.mxu0  ;;  %v10603_v55 = vpop.f32.mrf.mxu1 }
 0x703   : > { %v10780_v21 = vadd.f32 %v10779_v50, %v10562_v29  ;;  %v10794_v58 = vadd.f32 %v10793_v54, %v10603_v55  ;;  %v11182_v29 = vld [vmem:[%s30185_s6 + $0xac0] sm:$0xff]  ;;  %v19528_v55 = vcombine.low %v10934_v6, %v10942_v10 }
 0x704   : > { %v10564_v40 = vpop.f32.mrf.mxu0  ;;  %v10605_v30 = vpop.f32.mrf.mxu1  ;;  %v19768_v42 = vcombine.low %v11174_v26, %v11182_v29  ;;  %v11142_v50 = vld [vmem:[%s30185_s6 + $0x980] sm:$0xff] }
 0x705   : > { %v10787_v44 = vadd.f32 %v10786_v56, %v10564_v40  ;;  %v10801_v48 = vadd.f32 %v10800_v61, %v10605_v30  ;;  %v19784_v40 = vcombine.low %v11190_v25, %v11198_v22  ;;  %v19513_v30 = vcombine.high %v10918_v38, %v10926_v23  ;;  %13913 = vmatpush1.bf16.msra.mxu0 %v19528_v55  ;;  %v10878_v61 = vld [vmem:[%s30185_s6 + $0x140] sm:$0xff] }
 0x706   : > { %v10566_v32 = vpop.f32.mrf.mxu0  ;;  %v10607_v24 = vpop.f32.mrf.mxu1  ;;  %v11070_v25 = vld [vmem:[%s30185_s6 + $0x740] sm:$0xff]  ;;  %v19928_v23 = vcombine.low %v11334_v36, %v11342_v28 }
 0x707   : > { %v19769_v32 = vcombine.high %v11174_v26, %v11182_v29  ;;  %v10902_v24 = vld [vmem:[%s30185_s6 + $0x200] sm:$0xff]  ;;  %13954 = vmatpush1.bf16.msra.mxu1 %v19784_v40  ;;  %13914 = vmatprep.subr.bf16.mxu0 %v19513_v30  ;;  %v19657_v26 = vcombine.high %v11062_v53, %v11070_v25 }
 0x708   : > { %v10567_v31 = vpop.f32.mrf.mxu0  ;;  %v10608_v1 = vpop.f32.mrf.mxu1  ;;  %v11318_v22 = vld [vmem:[%s30185_s6 + $0xf00] sm:$0xff] }
 0x709   : > { %v10910_v31 = vld [vmem:[%s30185_s6 + $0x240] sm:$0xff]  ;;  %13955 = vmatprep.subr.bf16.mxu1 %v19769_v32  ;;  %13915 = vmatpush1.bf16.msra.mxu0 %v19512_v34 }
 0x70a   : > { %v11158_v1 = vld [vmem:[%s30185_s6 + $0xa00] sm:$0xff]  ;;  %v19497_v45 = vcombine.high %v10902_v24, %v10910_v31  ;;  %v19496_v54 = vcombine.low %v10902_v24, %v10910_v31  ;;  %v19656_v24 = vcombine.low %v11062_v53, %v11070_v25 }
 0x70b   : > { %v19753_v46 = vcombine.high %v11158_v1, %v11166_v41  ;;  %13956 = vmatpush1.bf16.msra.mxu1 %v19768_v42  ;;  %v19752_v56 = vcombine.low %v11158_v1, %v11166_v41  ;;  %v11326_v38 = vld [vmem:[%s30185_s6 + $0xf40] sm:$0xff] }
 0x70c   : > { %13916 = vmatprep.subr.bf16.mxu0 %v19497_v45  ;;  %v19913_v29 = vcombine.high %v11318_v22, %v11326_v38  ;;  %v11046_v55 = vld [vmem:[%s30185_s6 + $0x680] sm:$0xff]  ;;  %v19912_v31 = vcombine.low %v11318_v22, %v11326_v38 }
 0x70d   : > { %13957 = vmatprep.subr.bf16.mxu1 %v19753_v46  ;;  %13917 = vmatpush1.bf16.msra.mxu0 %v19496_v54  ;;  %v11054_v40 = vld [vmem:[%s30185_s6 + $0x6c0] sm:$0xff] }
 0x70e   : > { %v11302_v30 = vld [vmem:[%s30185_s6 + $0xe80] sm:$0xff]  ;;  %v19641_v1 = vcombine.high %v11046_v55, %v11054_v40  ;;  %v19640_v34 = vcombine.low %v11046_v55, %v11054_v40  ;;  %v10959_v55 = vld [vmem:[%s30185_s6 + $0x3c8] sm:$0xff] }
 0x70f   : > { %13958 = vmatpush1.bf16.msra.mxu1 %v19752_v56  ;;  %v11310_v32 = vld [vmem:[%s30185_s6 + $0xec0] sm:$0xff]  ;;  %v11207_v40 = vld [vmem:[%s30185_s6 + $0xb88] sm:$0xff] }
 0x710   : > { %v19897_v41 = vcombine.high %v11302_v30, %v11310_v32  ;;  %v19896_v42 = vcombine.low %v11302_v30, %v11310_v32  ;;  %v11230_v53 = vld [vmem:[%s30185_s6 + $0xc40] sm:$0xff]  ;;  %v11215_v32 = vld [vmem:[%s30185_s6 + $0xbc8] sm:$0xff] }
 0x712   : > { %v10727_v57 = vpop.f32.mrf.mxu0  ;;  %v10768_v59 = vpop.f32.mrf.mxu1 }
 0x713   : > { %v10781_v27 = vadd.f32 %v10780_v21, %v10727_v57  ;;  %v10795_v63 = vadd.f32 %v10794_v58, %v10768_v59  ;;  %v19481_v21 = vcombine.high %v10886_v49, %v10894_v47  ;;  %v19737_v57 = vcombine.high %v11142_v50, %v11150_v51  ;;  %v10870_v59 = vld [vmem:[%s30185_s6 + $0x100] sm:$0xff] }
 0x714   : > { %v10729_v62 = vpop.f32.mrf.mxu0  ;;  %v10770_v12 = vpop.f32.mrf.mxu1  ;;  %v11126_v58 = vld [vmem:[%s30185_s6 + $0x900] sm:$0xff] }
 0x715   : > { %v10788_v4 = vadd.f32 %v10787_v44, %v10729_v62  ;;  %v26785_v5 = vadd.f32 %v23464_v39, %v10781_v27  ;;  %v10802_v11 = vadd.f32 %v10801_v48, %v10770_v12  ;;  %v26791_v52 = vadd.f32 %v23466_v3, %v10795_v63  ;;  %v11134_v44 = vld [vmem:[%s30185_s6 + $0x940] sm:$0xff]  ;;  %13918 = vmatprep.subr.bf16.mxu0 %v19481_v21 }
 0x716   : > { %v10731_v0 = vpop.f32.mrf.mxu0  ;;  %v10772_v60 = vpop.f32.mrf.mxu1  ;;  %v19480_v27 = vcombine.low %v10886_v49, %v10894_v47  ;;  %v19736_v62 = vcombine.low %v11142_v50, %v11150_v51  ;;  %v19465_v12 = vcombine.high %v10870_v59, %v10878_v61  ;;  %13959 = vmatprep.subr.bf16.mxu1 %v19737_v57  ;;  %v19721_v48 = vcombine.high %v11126_v58, %v11134_v44  ;;  %v10854_v63 = vld [vmem:[%s30185_s6 + $0x80] sm:$0xff] }
 0x717   : > { %v26788_v9 = vadd.f32 %v23465_v7, %v10788_v4  ;;  %v26796_v13 = vadd.f32 %v23467_v35, %v10802_v11  ;;  %v10862_v4 = vld [vmem:[%s30185_s6 + $0xc0] sm:$0xff]  ;;  %v19464_v39 = vcombine.low %v10870_v59, %v10878_v61  ;;  %v19720_v7 = vcombine.low %v11126_v58, %v11134_v44 }
 0x718   : > { %v10732_v14 = vpop.f32.mrf.mxu0  ;;  %v10773_v15 = vpop.f32.mrf.mxu1  ;;  %v11110_v0 = vld [vmem:[%s30185_s6 + $0x880] sm:$0xff]  ;;  %13919 = vmatpush1.bf16.msra.mxu0 %v19480_v27  ;;  %13960 = vmatpush1.bf16.msra.mxu1 %v19736_v62  ;;  %v19449_v11 = vcombine.high %v10854_v63, %v10862_v4 }
 0x719   : > { %v10807_v16 = vadd.f32 %v26788_v9, %v26785_v5  ;;  %v11118_v60 = vld [vmem:[%s30185_s6 + $0x8c0] sm:$0xff]  ;;  %13920 = vmatprep.subr.bf16.mxu0 %v19465_v12  ;;  %13961 = vmatprep.subr.bf16.mxu1 %v19721_v48 }
 0x71a   : > { %v19705_v14 = vcombine.high %v11110_v0, %v11118_v60  ;;  %v10838_v15 = vld [vmem:[%s30185_s6] sm:$0xff] }
 0x71b   : > { %v10808_v43 = vadd.f32 %v10807_v16, %v26791_v52  ;;  %v10846_v3 = vld [vmem:[%s30185_s6 + $0x40] sm:$0xff] }
 0x71c   : > { %v11094_v16 = vld [vmem:[%s30185_s6 + $0x800] sm:$0xff]  ;;  %13921 = vmatpush1.bf16.msra.mxu0 %v19464_v39  ;;  %13962 = vmatpush1.bf16.msra.mxu1 %v19720_v7  ;;  %v19433_v33 = vcombine.high %v10838_v15, %v10846_v3  ;;  %v19432_v6 = vcombine.low %v10838_v15, %v10846_v3 }
 0x71d   : > { %v10809_v17 = vadd.f32 %v10808_v43, %v26796_v13  ;;  %v11102_v35 = vld [vmem:[%s30185_s6 + $0x840] sm:$0xff]  ;;  %v19448_v43 = vcombine.low %v10854_v63, %v10862_v4  ;;  %13922 = vmatprep.subr.bf16.mxu0 %v19449_v11  ;;  %13963 = vmatprep.subr.bf16.mxu1 %v19705_v14 }
 0x71e   : > { %v19689_v18 = vcombine.high %v11094_v16, %v11102_v35  ;;  %v19688_v10 = vcombine.low %v11094_v16, %v11102_v35  ;;  %v11286_v61 = vld [vmem:[%s30185_s6 + $0xe00] sm:$0xff] }
 0x71f   : > { %10810 = vadd.xlane.f32.xlu0 %v10809_v17  ;;  %v19704_v17 = vcombine.low %v11110_v0, %v11118_v60  ;;  %v11294_v44 = vld [vmem:[%s30185_s6 + $0xe40] sm:$0xff] }
 0x720   : > { %13923 = vmatpush1.bf16.msra.mxu0 %v19448_v43  ;;  %v19880_v62 = vcombine.low %v11286_v61, %v11294_v44  ;;  %v19881_v12 = vcombine.high %v11286_v61, %v11294_v44  ;;  %v11014_v48 = vld [vmem:[%s30185_s6 + $0x580] sm:$0xff]  ;;  %v11175_v44 = vld [vmem:[%s30185_s6 + $0xa88] sm:$0xff] }
 0x721   : > { %13964 = vmatpush1.bf16.msra.mxu1 %v19704_v17  ;;  %13924 = vmatprep.subr.bf16.mxu0 %v19433_v33  ;;  %v11022_v63 = vld [vmem:[%s30185_s6 + $0x5c0] sm:$0xff] }
 0x722   : > { %13965 = vmatprep.subr.bf16.mxu1 %v19689_v18  ;;  %v11270_v4 = vld [vmem:[%s30185_s6 + $0xd80] sm:$0xff]  ;;  %v19608_v0 = vcombine.low %v11014_v48, %v11022_v63  ;;  %v19609_v60 = vcombine.high %v11014_v48, %v11022_v63 }
 0x723   : > { %v11278_v39 = vld [vmem:[%s30185_s6 + $0xdc0] sm:$0xff] }
 0x724   : > { %13925 = vmatpush1.bf16.msra.mxu0 %v19432_v6  ;;  %v10998_v7 = vld [vmem:[%s30185_s6 + $0x500] sm:$0xff]  ;;  %v19864_v14 = vcombine.low %v11270_v4, %v11278_v39  ;;  %v19865_v15 = vcombine.high %v11270_v4, %v11278_v39  ;;  %v10903_v4 = vld [vmem:[%s30185_s6 + $0x208] sm:$0xff] }
 0x725   : > { %13966 = vmatpush1.bf16.msra.mxu1 %v19688_v10  ;;  %13926 = vmatprep.subr.bf16.mxu0 %v19673_v8  ;;  %v11006_v11 = vld [vmem:[%s30185_s6 + $0x540] sm:$0xff]  ;;  %v11167_v39 = vld [vmem:[%s30185_s6 + $0xa48] sm:$0xff] }
 0x726   : > { %13967 = vmatprep.subr.bf16.mxu1 %v19929_v2  ;;  %v19593_v3 = vcombine.high %v10998_v7, %v11006_v11  ;;  %v11254_v16 = vld [vmem:[%s30185_s6 + $0xd00] sm:$0xff]  ;;  %v19592_v20 = vcombine.low %v10998_v7, %v11006_v11 }
 0x727   : > { %v11262_v35 = vld [vmem:[%s30185_s6 + $0xd40] sm:$0xff] }
 0x728   : > { %13927 = vmatpush2.bf16.msra.mxu0 %v19672_v37  ;;  %v10982_v43 = vld [vmem:[%s30185_s6 + $0x480] sm:$0xff]  ;;  %v19849_v17 = vcombine.high %v11254_v16, %v11262_v35  ;;  %v19848_v36 = vcombine.low %v11254_v16, %v11262_v35  ;;  %v10895_v16 = vld [vmem:[%s30185_s6 + $0x1c8] sm:$0xff] }
 0x729   : > { %13968 = vmatpush2.bf16.msra.mxu1 %v19928_v23  ;;  %13928 = vmatprep.subr.bf16.mxu0 %v19657_v26  ;;  %v10990_v33 = vld [vmem:[%s30185_s6 + $0x4c0] sm:$0xff]  ;;  %v11143_v35 = vld [vmem:[%s30185_s6 + $0x988] sm:$0xff] }
 0x72a   : > { %13969 = vmatprep.subr.bf16.mxu1 %v19913_v29  ;;  %v11238_v18 = vld [vmem:[%s30185_s6 + $0xc80] sm:$0xff]  ;;  %v19577_v28 = vcombine.high %v10982_v43, %v10990_v33  ;;  %v19576_v25 = vcombine.low %v10982_v43, %v10990_v33  ;;  %v10951_v29 = vld [vmem:[%s30185_s6 + $0x388] sm:$0xff] }
 0x72b   : > { %v19833_v6 = vcombine.high %v11238_v18, %v11246_v19  ;;  %v10966_v10 = vld [vmem:[%s30185_s6 + $0x400] sm:$0xff]  ;;  %v19832_v22 = vcombine.low %v11238_v18, %v11246_v19  ;;  %v19547_v30 = vcombine.high %v10951_v29, %v10959_v55  ;;  %v11151_v43 = vld [vmem:[%s30185_s6 + $0x9c8] sm:$0xff] }
 0x72c   : > { %13929 = vmatpush2.bf16.msra.mxu0 %v19656_v24  ;;  %v10974_v8 = vld [vmem:[%s30185_s6 + $0x440] sm:$0xff]  ;;  %v19546_v24 = vcombine.low %v10951_v29, %v10959_v55  ;;  %v19739_v19 = vcombine.high %v11143_v35, %v11151_v43 }
 0x72d   : > { %13970 = vmatpush2.bf16.msra.mxu1 %v19912_v31  ;;  %13930 = vmatprep.subr.bf16.mxu0 %v19641_v1  ;;  %v11222_v2 = vld [vmem:[%s30185_s6 + $0xc00] sm:$0xff]  ;;  %v19561_v38 = vcombine.high %v10966_v10, %v10974_v8  ;;  %v19560_v23 = vcombine.low %v10966_v10, %v10974_v8  ;;  %v19802_v31 = vcombine.low %v11207_v40, %v11215_v32 }
 0x72e   : > { %13971 = vmatprep.subr.bf16.mxu1 %v19897_v41  ;;  %v19817_v37 = vcombine.high %v11222_v2, %v11230_v53  ;;  %v19816_v26 = vcombine.low %v11222_v2, %v11230_v53  ;;  %v19803_v1 = vcombine.high %v11207_v40, %v11215_v32  ;;  %v19738_v8 = vcombine.low %v11143_v35, %v11151_v43  ;;  %v10839_v40 = vld [vmem:[%s30185_s6 + $0x8] sm:$0xff] }
 0x72f   : > { %v11095_v32 = vld [vmem:[%s30185_s6 + $0x808] sm:$0xff] }
 0x730   : > { %13931 = vmatpush2.bf16.msra.mxu0 %v19640_v34  ;;  %v11287_v35 = vld [vmem:[%s30185_s6 + $0xe08] sm:$0xff] }
 0x731   : > { %13972 = vmatpush2.bf16.msra.mxu1 %v19896_v42  ;;  %v11295_v43 = vld [vmem:[%s30185_s6 + $0xe48] sm:$0xff] }
 0x732   : > { %13973 = vmatprep.subr.bf16.mxu1 %v19881_v12 }
 0x735   : > { %13974 = vmatpush2.bf16.msra.mxu1 %v19880_v62 }
 0x736   : > { %13975 = vmatprep.subr.bf16.mxu1 %v19865_v15 }
 0x739   : > { %13976 = vmatpush2.bf16.msra.mxu1 %v19864_v14 }
 0x73a   : > { %13977 = vmatprep.subr.bf16.mxu1 %v19849_v17 }
 0x73d   : > { %13978 = vmatpush2.bf16.msra.mxu1 %v19848_v36  ;;  %v10879_v36 = vld [vmem:[%s30185_s6 + $0x148] sm:$0xff] }
 0x73e   : > { %13979 = vmatprep.subr.bf16.mxu1 %v19833_v6  ;;  %v11135_v6 = vld [vmem:[%s30185_s6 + $0x948] sm:$0xff] }
 0x741   : > { %13980 = vmatpush2.bf16.msra.mxu1 %v19832_v22  ;;  %v10863_v22 = vld [vmem:[%s30185_s6 + $0xc8] sm:$0xff] }
 0x742   : > { %13981 = vmatprep.subr.bf16.mxu1 %v19817_v37  ;;  %v11119_v37 = vld [vmem:[%s30185_s6 + $0x8c8] sm:$0xff] }
 0x745   : > { %13982 = vmatpush2.bf16.msra.mxu1 %v19816_v26 }
 0x746   : > { %14033 = vmatprep.subr.bf16.mxu1 %v19803_v1 }
 0x7a8   : > { %v10811_v45 = vpop.xlane.xlu0 %10810 }
 0x7a9   : > { %v10813_v46 = vmul.f32 0.001953125, %v10811_v45 }
 0x7ab   : > { %v26933_v49 = vsub.f32 %v26785_v5, %v10813_v46  ;;  %v26936_v47 = vsub.f32 %v26788_v9, %v10813_v46  ;;  %v26939_v50 = vsub.f32 %v26791_v52, %v10813_v46  ;;  %v26942_v51 = vsub.f32 %v26796_v13, %v10813_v46  ;;  %v11030_v52 = vld [vmem:[%s30185_s6 + $0x600] sm:$0xff] }
 0x7ac   : > { %v11038_v13 = vld [vmem:[%s30185_s6 + $0x640] sm:$0xff] }
 0x7ad   : > { %v10818_v54 = vmul.f32 %v26933_v49, %v26933_v49  ;;  %v10819_v56 = vmul.f32 %v26936_v47, %v26936_v47  ;;  %v10820_v21 = vmul.f32 %v26939_v50, %v26939_v50  ;;  %v10821_v9 = vmul.f32 %v26942_v51, %v26942_v51 }
 0x7ae   : > { %v19625_v58 = vcombine.high %v11030_v52, %v11038_v13  ;;  %v19624_v27 = vcombine.low %v11030_v52, %v11038_v13  ;;  %v10919_v52 = vld [vmem:[%s30185_s6 + $0x288] sm:$0xff] }
 0x7af   : > { %v10822_v5 = vadd.f32 %v10819_v56, %v10818_v54 }
 0x7b0   : > { %13932 = vmatprep.subr.bf16.mxu0 %v19625_v58  ;;  %v10927_v58 = vld [vmem:[%s30185_s6 + $0x2c8] sm:$0xff] }
 0x7b1   : > { %v10823_v57 = vadd.f32 %v10822_v5, %v10820_v21  ;;  %13933 = vmatpush2.bf16.msra.mxu0 %v19624_v27  ;;  %v10935_v5 = vld [vmem:[%s30185_s6 + $0x308] sm:$0xff]  ;;  %v19515_v48 = vcombine.high %v10919_v52, %v10927_v58  ;;  %v19514_v7 = vcombine.low %v10919_v52, %v10927_v58 }
 0x7b2   : > { %13934 = vmatprep.subr.bf16.mxu0 %v19609_v60  ;;  %v11183_v27 = vld [vmem:[%s30185_s6 + $0xac8] sm:$0xff] }
 0x7b3   : > { %v10824_v59 = vadd.f32 %v10823_v57, %v10821_v9  ;;  %v10943_v9 = vld [vmem:[%s30185_s6 + $0x348] sm:$0xff]  ;;  %v19771_v63 = vcombine.high %v11175_v44, %v11183_v27  ;;  %v19770_v11 = vcombine.low %v11175_v44, %v11183_v27 }
 0x7b4   : > { %v19531_v13 = vcombine.high %v10935_v5, %v10943_v9  ;;  %v19530_v62 = vcombine.low %v10935_v5, %v10943_v9  ;;  %v11159_v60 = vld [vmem:[%s30185_s6 + $0xa08] sm:$0xff] }
 0x7b5   : > { %10825 = vadd.xlane.f32.xlu1 %v10824_v59  ;;  %13935 = vmatpush2.bf16.msra.mxu0 %v19608_v0  ;;  %v10911_v0 = vld [vmem:[%s30185_s6 + $0x248] sm:$0xff]  ;;  %v19755_v15 = vcombine.high %v11159_v60, %v11167_v39  ;;  %v19754_v33 = vcombine.low %v11159_v60, %v11167_v39 }
 0x7b6   : > { %13936 = vmatprep.subr.bf16.mxu0 %v19593_v3  ;;  %v19499_v14 = vcombine.high %v10903_v4, %v10911_v0  ;;  %v10887_v3 = vld [vmem:[%s30185_s6 + $0x188] sm:$0xff]  ;;  %v19498_v17 = vcombine.low %v10903_v4, %v10911_v0 }
 0x7b7   : > { %v19483_v18 = vcombine.high %v10887_v3, %v10895_v16  ;;  %v19482_v10 = vcombine.low %v10887_v3, %v10895_v16  ;;  %v11335_v5 = vld [vmem:[%s30185_s6 + $0xf88] sm:$0xff] }
 0x7b8   : > { %v11343_v9 = vld [vmem:[%s30185_s6 + $0xfc8] sm:$0xff] }
 0x7b9   : > { %13937 = vmatpush2.bf16.msra.mxu0 %v19592_v20  ;;  %v10871_v20 = vld [vmem:[%s30185_s6 + $0x108] sm:$0xff] }
 0x7ba   : > { %13938 = vmatprep.subr.bf16.mxu0 %v19577_v28  ;;  %v11127_v28 = vld [vmem:[%s30185_s6 + $0x908] sm:$0xff]  ;;  %v19467_v2 = vcombine.high %v10871_v20, %v10879_v36 }
 0x7bb   : > { %v19723_v53 = vcombine.high %v11127_v28, %v11135_v6  ;;  %v19722_v26 = vcombine.low %v11127_v28, %v11135_v6  ;;  %v11071_v58 = vld [vmem:[%s30185_s6 + $0x748] sm:$0xff] }
 0x7bc   : > { %v11319_v44 = vld [vmem:[%s30185_s6 + $0xf08] sm:$0xff] }
 0x7bd   : > { %13939 = vmatpush2.bf16.msra.mxu0 %v19576_v25  ;;  %v10855_v25 = vld [vmem:[%s30185_s6 + $0x88] sm:$0xff] }
 0x7be   : > { %13940 = vmatprep.subr.bf16.mxu0 %v19561_v38  ;;  %v11111_v38 = vld [vmem:[%s30185_s6 + $0x888] sm:$0xff]  ;;  %v19451_v29 = vcombine.high %v10855_v25, %v10863_v22 }
 0x7bf   : > { %v19707_v55 = vcombine.high %v11111_v38, %v11119_v37  ;;  %v19706_v1 = vcombine.low %v11111_v38, %v11119_v37  ;;  %v11327_v27 = vld [vmem:[%s30185_s6 + $0xf48] sm:$0xff] }
 0x7c0   : > { %v11047_v4 = vld [vmem:[%s30185_s6 + $0x688] sm:$0xff] }
 0x7c1   : > { %13941 = vmatpush2.bf16.msra.mxu0 %v19560_v23  ;;  %v19466_v23 = vcombine.low %v10871_v20, %v10879_v36  ;;  %v11055_v0 = vld [vmem:[%s30185_s6 + $0x6c8] sm:$0xff] }
 0x7c2   : > { %13992 = vmatprep.subr.bf16.mxu0 %v19547_v30  ;;  %v10847_v30 = vld [vmem:[%s30185_s6 + $0x48] sm:$0xff] }
 0x7c3   : > { %v11303_v60 = vld [vmem:[%s30185_s6 + $0xe88] sm:$0xff] }
 0x7c4   : > { %v11311_v39 = vld [vmem:[%s30185_s6 + $0xec8] sm:$0xff] }
 0x7c5   : > { %v11031_v3 = vld [vmem:[%s30185_s6 + $0x608] sm:$0xff] }
 0x7c6   : > { %v11039_v16 = vld [vmem:[%s30185_s6 + $0x648] sm:$0xff] }
 0x7c7   : > { %v11015_v20 = vld [vmem:[%s30185_s6 + $0x588] sm:$0xff] }
 0x7c8   : > { %v11023_v36 = vld [vmem:[%s30185_s6 + $0x5c8] sm:$0xff] }
 0x7c9   : > { %v11271_v28 = vld [vmem:[%s30185_s6 + $0xd88] sm:$0xff] }
 0x7ca   : > { %v11279_v6 = vld [vmem:[%s30185_s6 + $0xdc8] sm:$0xff] }
 0x7cb   : > { %v11255_v38 = vld [vmem:[%s30185_s6 + $0xd08] sm:$0xff] }
 0x7cc   : > { %v11263_v37 = vld [vmem:[%s30185_s6 + $0xd48] sm:$0xff] }
 0x83e   : > { %v10826_v41 = vpop.xlane.xlu1 %10825 }
 0x83f   : > { %v10827_v34 = vmul.f32 0.001953125, %v10826_v41  ;;  %v19435_v41 = vcombine.high %v10839_v40, %v10847_v30 }
 0x841   : > { %v10828_v42 = vadd.f32 1e-05, %v10827_v34 }
 0x843   : > { %23460 = vrsqrt.f32 %v10828_v42  ;;  %v11079_v42 = vld [vmem:[%s30185_s6 + $0x788] sm:$0xff] }
 0x850   : > { %v23461_v45 = vpop.eup %23460 }
 0x851   : > { %v27025_v46 = vmul.f32 %v23461_v45, %v26936_v47  ;;  %v27028_v54 = vmul.f32 %v23461_v45, %v26942_v51  ;;  %v27031_v56 = vmul.f32 %v23461_v45, %v26933_v49  ;;  %v27034_v21 = vmul.f32 %v23461_v45, %v26939_v50  ;;  %v11191_v47 = vld [vmem:[%s30185_s6 + $0xb08] sm:$0xff] }
 0x852   : > { %v11199_v49 = vld [vmem:[%s30185_s6 + $0xb48] sm:$0xff] }
 0x853   : > { %v27050_v50 = vpack.c.bf16 %v27025_v46, %v27025_v46  ;;  %v27054_v51 = vpack.c.bf16 %v27028_v54, %v27028_v54  ;;  %v27058_v57 = vpack.c.bf16 %v27031_v56, %v27031_v56  ;;  %v27062_v59 = vpack.c.bf16 %v27034_v21, %v27034_v21  ;;  %v11087_v45 = vld [vmem:[%s30185_s6 + $0x7c8] sm:$0xff] }
 0x854   : > { %v19787_v61 = vcombine.high %v11191_v47, %v11199_v49  ;;  %v19786_v12 = vcombine.low %v11191_v47, %v11199_v49  ;;  %v19434_v47 = vcombine.low %v10839_v40, %v10847_v30  ;;  %v19675_v52 = vcombine.high %v11079_v42, %v11087_v45  ;;  %v10983_v40 = vld [vmem:[%s30185_s6 + $0x488] sm:$0xff] }
 0x855   : > { %13942 = vmatprep.mubr.bf16.mxu0 %v27050_v50  ;;  %13983 = vmatprep.mubr.bf16.mxu1 %v27054_v51  ;;  %v10991_v30 = vld [vmem:[%s30185_s6 + $0x4c8] sm:$0xff] }
 0x856   : > { %13943 = vmatmul.mubr.bf16.vlgmr.msra.gmra.mxu0 %v27058_v57  ;;  %13984 = vmatmul.mubr.bf16.vlgmr.msra.gmra.mxu1 %v27062_v59 }
 0x857   : > { %13993 = vmatpush1.bf16.msra.mxu0 %v19546_v24  ;;  %14034 = vmatpush1.bf16.msra.mxu1 %v19802_v31  ;;  %v11103_v24 = vld [vmem:[%s30185_s6 + $0x848] sm:$0xff]  ;;  %v19450_v31 = vcombine.low %v10855_v25, %v10863_v22 }
 0x858   : > { %14024 = vmatprep.mubr.bf16.mxu0 %v27050_v50  ;;  %14065 = vmatprep.mubr.bf16.mxu1 %v27054_v51  ;;  %v19691_v34 = vcombine.high %v11095_v32, %v11103_v24  ;;  %v19690_v49 = vcombine.low %v11095_v32, %v11103_v24  ;;  %v10999_v25 = vld [vmem:[%s30185_s6 + $0x508] sm:$0xff] }
 0x859   : > { %13994 = vmatprep.subr.bf16.mxu0 %v19531_v13  ;;  %14035 = vmatprep.subr.bf16.mxu1 %v19787_v61  ;;  %v19931_v13 = vcombine.high %v11335_v5, %v11343_v9  ;;  %v11063_v61 = vld [vmem:[%s30185_s6 + $0x708] sm:$0xff] }
 0x85a   : > { %v11007_v22 = vld [vmem:[%s30185_s6 + $0x548] sm:$0xff] }
 0x85b   : > { %13995 = vmatpush1.bf16.msra.mxu0 %v19530_v62  ;;  %14036 = vmatpush1.bf16.msra.mxu1 %v19786_v12  ;;  %v19674_v62 = vcombine.low %v11079_v42, %v11087_v45  ;;  %v19930_v12 = vcombine.low %v11335_v5, %v11343_v9  ;;  %v11239_v32 = vld [vmem:[%s30185_s6 + $0xc88] sm:$0xff] }
 0x85c   : > { %13996 = vmatprep.subr.bf16.mxu0 %v19515_v48  ;;  %14037 = vmatprep.subr.bf16.mxu1 %v19771_v63  ;;  %v19659_v48 = vcombine.high %v11063_v61, %v11071_v58  ;;  %v19915_v63 = vcombine.high %v11319_v44, %v11327_v27  ;;  %v11247_v24 = vld [vmem:[%s30185_s6 + $0xcc8] sm:$0xff] }
 0x85d   : > { %v10967_v42 = vld [vmem:[%s30185_s6 + $0x408] sm:$0xff] }
 0x85e   : > { %v10975_v45 = vld [vmem:[%s30185_s6 + $0x448] sm:$0xff] }
 0x85f   : > { %13997 = vmatpush1.bf16.msra.mxu0 %v19514_v7  ;;  %14038 = vmatpush1.bf16.msra.mxu1 %v19770_v11  ;;  %v19658_v7 = vcombine.low %v11063_v61, %v11071_v58  ;;  %v19914_v11 = vcombine.low %v11319_v44, %v11327_v27  ;;  %v11223_v5 = vld [vmem:[%s30185_s6 + $0xc08] sm:$0xff]  ;;  %v10952_v61 = vld [vmem:[%s30185_s6 + $0x390] sm:$0xff] }
 0x860   : > { %13998 = vmatprep.subr.bf16.mxu0 %v19499_v14  ;;  %14039 = vmatprep.subr.bf16.mxu1 %v19755_v15  ;;  %v19643_v14 = vcombine.high %v11047_v4, %v11055_v0  ;;  %v19899_v15 = vcombine.high %v11303_v60, %v11311_v39  ;;  %v11231_v9 = vld [vmem:[%s30185_s6 + $0xc48] sm:$0xff]  ;;  %v10960_v58 = vld [vmem:[%s30185_s6 + $0x3d0] sm:$0xff] }
 0x861   : > { %v11208_v44 = vld [vmem:[%s30185_s6 + $0xb90] sm:$0xff] }
 0x862   : > { %v11216_v27 = vld [vmem:[%s30185_s6 + $0xbd0] sm:$0xff] }
 0x863   : > { %13999 = vmatpush1.bf16.msra.mxu0 %v19498_v17  ;;  %14040 = vmatpush1.bf16.msra.mxu1 %v19754_v33  ;;  %v19642_v17 = vcombine.low %v11047_v4, %v11055_v0  ;;  %v19898_v33 = vcombine.low %v11303_v60, %v11311_v39  ;;  %v10936_v4 = vld [vmem:[%s30185_s6 + $0x310] sm:$0xff] }
 0x864   : > { %14000 = vmatprep.subr.bf16.mxu0 %v19483_v18  ;;  %14041 = vmatprep.subr.bf16.mxu1 %v19739_v19  ;;  %v19627_v18 = vcombine.high %v11031_v3, %v11039_v16  ;;  %v19883_v19 = vcombine.high %v11287_v35, %v11295_v43  ;;  %v10944_v0 = vld [vmem:[%s30185_s6 + $0x350] sm:$0xff] }
 0x865   : > { %v11192_v60 = vld [vmem:[%s30185_s6 + $0xb10] sm:$0xff] }
 0x866   : > { %v11200_v39 = vld [vmem:[%s30185_s6 + $0xb50] sm:$0xff] }
 0x867   : > { %14001 = vmatpush1.bf16.msra.mxu0 %v19482_v10  ;;  %14042 = vmatpush1.bf16.msra.mxu1 %v19738_v8  ;;  %v19626_v10 = vcombine.low %v11031_v3, %v11039_v16  ;;  %v19882_v8 = vcombine.low %v11287_v35, %v11295_v43  ;;  %v10920_v3 = vld [vmem:[%s30185_s6 + $0x290] sm:$0xff] }
 0x868   : > { %14002 = vmatprep.subr.bf16.mxu0 %v19467_v2  ;;  %14043 = vmatprep.subr.bf16.mxu1 %v19723_v53  ;;  %v19611_v2 = vcombine.high %v11015_v20, %v11023_v36  ;;  %v19867_v53 = vcombine.high %v11271_v28, %v11279_v6  ;;  %v10928_v16 = vld [vmem:[%s30185_s6 + $0x2d0] sm:$0xff] }
 0x869   : > { %v11176_v35 = vld [vmem:[%s30185_s6 + $0xa90] sm:$0xff] }
 0x86a   : > { %v11184_v43 = vld [vmem:[%s30185_s6 + $0xad0] sm:$0xff] }
 0x86b   : > { %14003 = vmatpush1.bf16.msra.mxu0 %v19466_v23  ;;  %14044 = vmatpush1.bf16.msra.mxu1 %v19722_v26  ;;  %v19610_v23 = vcombine.low %v11015_v20, %v11023_v36  ;;  %v19866_v26 = vcombine.low %v11271_v28, %v11279_v6  ;;  %v10904_v20 = vld [vmem:[%s30185_s6 + $0x210] sm:$0xff] }
 0x86c   : > { %14004 = vmatprep.subr.bf16.mxu0 %v19451_v29  ;;  %14045 = vmatprep.subr.bf16.mxu1 %v19707_v55  ;;  %v19595_v29 = vcombine.high %v10999_v25, %v11007_v22  ;;  %v19851_v55 = vcombine.high %v11255_v38, %v11263_v37  ;;  %v10912_v36 = vld [vmem:[%s30185_s6 + $0x250] sm:$0xff] }
 0x86d   : > { %v11160_v28 = vld [vmem:[%s30185_s6 + $0xa10] sm:$0xff] }
 0x86e   : > { %v11168_v6 = vld [vmem:[%s30185_s6 + $0xa50] sm:$0xff] }
 0x86f   : > { %14005 = vmatpush1.bf16.msra.mxu0 %v19450_v31  ;;  %14046 = vmatpush1.bf16.msra.mxu1 %v19706_v1  ;;  %v19594_v31 = vcombine.low %v10999_v25, %v11007_v22  ;;  %v19850_v1 = vcombine.low %v11255_v38, %v11263_v37  ;;  %v10888_v25 = vld [vmem:[%s30185_s6 + $0x190] sm:$0xff] }
 0x870   : > { %14006 = vmatprep.subr.bf16.mxu0 %v19435_v41  ;;  %14047 = vmatprep.subr.bf16.mxu1 %v19691_v34  ;;  %v19579_v41 = vcombine.high %v10983_v40, %v10991_v30  ;;  %v19835_v34 = vcombine.high %v11239_v32, %v11247_v24  ;;  %v10896_v22 = vld [vmem:[%s30185_s6 + $0x1d0] sm:$0xff] }
 0x871   : > { %v11144_v38 = vld [vmem:[%s30185_s6 + $0x990] sm:$0xff] }
 0x872   : > { %v11152_v37 = vld [vmem:[%s30185_s6 + $0x9d0] sm:$0xff] }
 0x873   : > { %14007 = vmatpush1.bf16.msra.mxu0 %v19434_v47  ;;  %14048 = vmatpush1.bf16.msra.mxu1 %v19690_v49  ;;  %v19578_v47 = vcombine.low %v10983_v40, %v10991_v30  ;;  %v19834_v49 = vcombine.low %v11239_v32, %v11247_v24  ;;  %v10872_v40 = vld [vmem:[%s30185_s6 + $0x110] sm:$0xff] }
 0x874   : > { %14008 = vmatprep.subr.bf16.mxu0 %v19675_v52  ;;  %14049 = vmatprep.subr.bf16.mxu1 %v19931_v13  ;;  %v19563_v52 = vcombine.high %v10967_v42, %v10975_v45  ;;  %v19819_v13 = vcombine.high %v11223_v5, %v11231_v9  ;;  %v10880_v30 = vld [vmem:[%s30185_s6 + $0x150] sm:$0xff] }
 0x875   : > { %v11128_v32 = vld [vmem:[%s30185_s6 + $0x910] sm:$0xff] }
 0x876   : > { %v11136_v24 = vld [vmem:[%s30185_s6 + $0x950] sm:$0xff] }
 0x877   : > { %14009 = vmatpush2.bf16.msra.mxu0 %v19674_v62  ;;  %14050 = vmatpush2.bf16.msra.mxu1 %v19930_v12  ;;  %v19562_v62 = vcombine.low %v10967_v42, %v10975_v45  ;;  %v19818_v12 = vcombine.low %v11223_v5, %v11231_v9  ;;  %v10856_v42 = vld [vmem:[%s30185_s6 + $0x90] sm:$0xff] }
 0x878   : > { %14010 = vmatprep.subr.bf16.mxu0 %v19659_v48  ;;  %14051 = vmatprep.subr.bf16.mxu1 %v19915_v63  ;;  %v19549_v48 = vcombine.high %v10952_v61, %v10960_v58  ;;  %v19805_v63 = vcombine.high %v11208_v44, %v11216_v27  ;;  %v10864_v45 = vld [vmem:[%s30185_s6 + $0xd0] sm:$0xff] }
 0x879   : > { %v11112_v5 = vld [vmem:[%s30185_s6 + $0x890] sm:$0xff] }
 0x87a   : > { %v11120_v9 = vld [vmem:[%s30185_s6 + $0x8d0] sm:$0xff] }
 0x87b   : > { %14011 = vmatpush2.bf16.msra.mxu0 %v19658_v7  ;;  %14052 = vmatpush2.bf16.msra.mxu1 %v19914_v11  ;;  %v19548_v7 = vcombine.low %v10952_v61, %v10960_v58  ;;  %v19804_v11 = vcombine.low %v11208_v44, %v11216_v27  ;;  %v10840_v61 = vld [vmem:[%s30185_s6 + $0x10] sm:$0xff] }
 0x87c   : > { %14012 = vmatprep.subr.bf16.mxu0 %v19643_v14  ;;  %14053 = vmatprep.subr.bf16.mxu1 %v19899_v15  ;;  %v19533_v14 = vcombine.high %v10936_v4, %v10944_v0  ;;  %v19789_v15 = vcombine.high %v11192_v60, %v11200_v39  ;;  %v10848_v58 = vld [vmem:[%s30185_s6 + $0x50] sm:$0xff] }
 0x87d   : > { %v11096_v44 = vld [vmem:[%s30185_s6 + $0x810] sm:$0xff] }
 0x87e   : > { %v11104_v27 = vld [vmem:[%s30185_s6 + $0x850] sm:$0xff] }
 0x87f   : > { %14013 = vmatpush2.bf16.msra.mxu0 %v19642_v17  ;;  %14054 = vmatpush2.bf16.msra.mxu1 %v19898_v33  ;;  %v19532_v17 = vcombine.low %v10936_v4, %v10944_v0  ;;  %v19788_v33 = vcombine.low %v11192_v60, %v11200_v39  ;;  %v11080_v4 = vld [vmem:[%s30185_s6 + $0x790] sm:$0xff] }
 0x880   : > { %14014 = vmatprep.subr.bf16.mxu0 %v19627_v18  ;;  %14055 = vmatprep.subr.bf16.mxu1 %v19883_v19  ;;  %v19517_v18 = vcombine.high %v10920_v3, %v10928_v16  ;;  %v19773_v19 = vcombine.high %v11176_v35, %v11184_v43  ;;  %v11088_v0 = vld [vmem:[%s30185_s6 + $0x7d0] sm:$0xff] }
 0x881   : > { %v11336_v60 = vld [vmem:[%s30185_s6 + $0xf90] sm:$0xff] }
 0x882   : > { %v11344_v39 = vld [vmem:[%s30185_s6 + $0xfd0] sm:$0xff] }
 0x883   : > { %14015 = vmatpush2.bf16.msra.mxu0 %v19626_v10  ;;  %14056 = vmatpush2.bf16.msra.mxu1 %v19882_v8  ;;  %v19516_v10 = vcombine.low %v10920_v3, %v10928_v16  ;;  %v19772_v8 = vcombine.low %v11176_v35, %v11184_v43  ;;  %v11064_v3 = vld [vmem:[%s30185_s6 + $0x710] sm:$0xff] }
 0x884   : > { %14016 = vmatprep.subr.bf16.mxu0 %v19611_v2  ;;  %14057 = vmatprep.subr.bf16.mxu1 %v19867_v53  ;;  %v19501_v2 = vcombine.high %v10904_v20, %v10912_v36  ;;  %v19757_v53 = vcombine.high %v11160_v28, %v11168_v6  ;;  %v11072_v16 = vld [vmem:[%s30185_s6 + $0x750] sm:$0xff] }
 0x885   : > { %v11320_v35 = vld [vmem:[%s30185_s6 + $0xf10] sm:$0xff] }
 0x886   : > { %v11328_v43 = vld [vmem:[%s30185_s6 + $0xf50] sm:$0xff] }
 0x887   : > { %14017 = vmatpush2.bf16.msra.mxu0 %v19610_v23  ;;  %14058 = vmatpush2.bf16.msra.mxu1 %v19866_v26  ;;  %v19500_v23 = vcombine.low %v10904_v20, %v10912_v36  ;;  %v19756_v26 = vcombine.low %v11160_v28, %v11168_v6  ;;  %v11048_v20 = vld [vmem:[%s30185_s6 + $0x690] sm:$0xff] }
 0x888   : > { %14018 = vmatprep.subr.bf16.mxu0 %v19595_v29  ;;  %14059 = vmatprep.subr.bf16.mxu1 %v19851_v55  ;;  %v19485_v29 = vcombine.high %v10888_v25, %v10896_v22  ;;  %v19741_v55 = vcombine.high %v11144_v38, %v11152_v37  ;;  %v11056_v36 = vld [vmem:[%s30185_s6 + $0x6d0] sm:$0xff] }
 0x889   : > { %v11304_v28 = vld [vmem:[%s30185_s6 + $0xe90] sm:$0xff] }
 0x88a   : > { %v11312_v6 = vld [vmem:[%s30185_s6 + $0xed0] sm:$0xff] }
 0x88b   : > { %14019 = vmatpush2.bf16.msra.mxu0 %v19594_v31  ;;  %14060 = vmatpush2.bf16.msra.mxu1 %v19850_v1  ;;  %v19484_v31 = vcombine.low %v10888_v25, %v10896_v22  ;;  %v19740_v1 = vcombine.low %v11144_v38, %v11152_v37  ;;  %v11032_v25 = vld [vmem:[%s30185_s6 + $0x610] sm:$0xff] }
 0x88c   : > { %14020 = vmatprep.subr.bf16.mxu0 %v19579_v41  ;;  %14061 = vmatprep.subr.bf16.mxu1 %v19835_v34  ;;  %v19469_v41 = vcombine.high %v10872_v40, %v10880_v30  ;;  %v19725_v34 = vcombine.high %v11128_v32, %v11136_v24  ;;  %v11040_v22 = vld [vmem:[%s30185_s6 + $0x650] sm:$0xff] }
 0x88d   : > { %v11288_v38 = vld [vmem:[%s30185_s6 + $0xe10] sm:$0xff] }
 0x88e   : > { %v11296_v37 = vld [vmem:[%s30185_s6 + $0xe50] sm:$0xff] }
 0x88f   : > { %14021 = vmatpush2.bf16.msra.mxu0 %v19578_v47  ;;  %14062 = vmatpush2.bf16.msra.mxu1 %v19834_v49  ;;  %v19468_v47 = vcombine.low %v10872_v40, %v10880_v30  ;;  %v19724_v49 = vcombine.low %v11128_v32, %v11136_v24  ;;  %v11016_v40 = vld [vmem:[%s30185_s6 + $0x590] sm:$0xff] }
 0x890   : > { %14022 = vmatprep.subr.bf16.mxu0 %v19563_v52  ;;  %14063 = vmatprep.subr.bf16.mxu1 %v19819_v13  ;;  %v19453_v52 = vcombine.high %v10856_v42, %v10864_v45  ;;  %v19709_v13 = vcombine.high %v11112_v5, %v11120_v9  ;;  %v11024_v30 = vld [vmem:[%s30185_s6 + $0x5d0] sm:$0xff] }
 0x891   : > { %v11272_v32 = vld [vmem:[%s30185_s6 + $0xd90] sm:$0xff] }
 0x892   : > { %v11280_v24 = vld [vmem:[%s30185_s6 + $0xdd0] sm:$0xff] }
 0x893   : > { %14023 = vmatpush2.bf16.msra.mxu0 %v19562_v62  ;;  %14064 = vmatpush2.bf16.msra.mxu1 %v19818_v12  ;;  %v19452_v62 = vcombine.low %v10856_v42, %v10864_v45  ;;  %v19708_v12 = vcombine.low %v11112_v5, %v11120_v9  ;;  %v11000_v42 = vld [vmem:[%s30185_s6 + $0x510] sm:$0xff] }
 0x894   : > { %14074 = vmatprep.subr.bf16.mxu0 %v19549_v48  ;;  %14115 = vmatprep.subr.bf16.mxu1 %v19805_v63  ;;  %v19437_v48 = vcombine.high %v10840_v61, %v10848_v58  ;;  %v19693_v63 = vcombine.high %v11096_v44, %v11104_v27  ;;  %v11008_v45 = vld [vmem:[%s30185_s6 + $0x550] sm:$0xff] }
 0x895   : > { %v11256_v5 = vld [vmem:[%s30185_s6 + $0xd10] sm:$0xff] }
 0x896   : > { %14025 = vmatmul.mubr.bf16.vlgmr.msra.gmra.mxu0 %v27058_v57  ;;  %14066 = vmatmul.mubr.bf16.vlgmr.msra.gmra.mxu1 %v27062_v59  ;;  %v11264_v9 = vld [vmem:[%s30185_s6 + $0xd50] sm:$0xff] }
 0x897   : > { %14075 = vmatpush1.bf16.msra.mxu0 %v19548_v7  ;;  %14106 = vmatprep.mubr.bf16.mxu0 %v27050_v50  ;;  %v19436_v7 = vcombine.low %v10840_v61, %v10848_v58  ;;  %v10984_v61 = vld [vmem:[%s30185_s6 + $0x490] sm:$0xff] }
 0x898   : > { %14116 = vmatpush1.bf16.msra.mxu1 %v19804_v11  ;;  %14147 = vmatprep.mubr.bf16.mxu1 %v27054_v51  ;;  %v19692_v11 = vcombine.low %v11096_v44, %v11104_v27  ;;  %v10992_v58 = vld [vmem:[%s30185_s6 + $0x4d0] sm:$0xff] }
 0x899   : > { %14076 = vmatprep.subr.bf16.mxu0 %v19533_v14  ;;  %14117 = vmatprep.subr.bf16.mxu1 %v19789_v15  ;;  %v19677_v14 = vcombine.high %v11080_v4, %v11088_v0  ;;  %v19933_v15 = vcombine.high %v11336_v60, %v11344_v39  ;;  %v11240_v44 = vld [vmem:[%s30185_s6 + $0xc90] sm:$0xff] }
 0x89a   : > { %v11248_v27 = vld [vmem:[%s30185_s6 + $0xcd0] sm:$0xff] }
 0x89b   : > { %14077 = vmatpush1.bf16.msra.mxu0 %v19532_v17  ;;  %v19676_v17 = vcombine.low %v11080_v4, %v11088_v0  ;;  %v10968_v4 = vld [vmem:[%s30185_s6 + $0x410] sm:$0xff] }
 0x89c   : > { %14118 = vmatpush1.bf16.msra.mxu1 %v19788_v33  ;;  %14078 = vmatprep.subr.bf16.mxu0 %v19517_v18  ;;  %v19932_v33 = vcombine.low %v11336_v60, %v11344_v39  ;;  %v19661_v18 = vcombine.high %v11064_v3, %v11072_v16  ;;  %v10976_v0 = vld [vmem:[%s30185_s6 + $0x450] sm:$0xff] }
 0x89d   : > { %14119 = vmatprep.subr.bf16.mxu1 %v19773_v19  ;;  %v19917_v19 = vcombine.high %v11320_v35, %v11328_v43  ;;  %v11224_v60 = vld [vmem:[%s30185_s6 + $0xc10] sm:$0xff] }
 0x89e   : > { %v11232_v39 = vld [vmem:[%s30185_s6 + $0xc50] sm:$0xff] }
 0x89f   : > { %14079 = vmatpush1.bf16.msra.mxu0 %v19516_v10  ;;  %v19660_v10 = vcombine.low %v11064_v3, %v11072_v16  ;;  %v10953_v3 = vld [vmem:[%s30185_s6 + $0x398] sm:$0xff] }
 0x8a0   : > { %14120 = vmatpush1.bf16.msra.mxu1 %v19772_v8  ;;  %14080 = vmatprep.subr.bf16.mxu0 %v19501_v2  ;;  %v19916_v8 = vcombine.low %v11320_v35, %v11328_v43  ;;  %v19645_v2 = vcombine.high %v11048_v20, %v11056_v36  ;;  %v10961_v16 = vld [vmem:[%s30185_s6 + $0x3d8] sm:$0xff] }
 0x8a1   : > { %14121 = vmatprep.subr.bf16.mxu1 %v19757_v53  ;;  %v19901_v53 = vcombine.high %v11304_v28, %v11312_v6  ;;  %v11209_v35 = vld [vmem:[%s30185_s6 + $0xb98] sm:$0xff] }
 0x8a2   : > { %v11217_v43 = vld [vmem:[%s30185_s6 + $0xbd8] sm:$0xff] }
 0x8a3   : > { %14081 = vmatpush1.bf16.msra.mxu0 %v19500_v23  ;;  %v19644_v23 = vcombine.low %v11048_v20, %v11056_v36  ;;  %v10937_v20 = vld [vmem:[%s30185_s6 + $0x318] sm:$0xff] }
 0x8a4   : > { %14122 = vmatpush1.bf16.msra.mxu1 %v19756_v26  ;;  %14082 = vmatprep.subr.bf16.mxu0 %v19485_v29  ;;  %v19900_v26 = vcombine.low %v11304_v28, %v11312_v6  ;;  %v19629_v29 = vcombine.high %v11032_v25, %v11040_v22  ;;  %v10945_v36 = vld [vmem:[%s30185_s6 + $0x358] sm:$0xff]  ;;  %v19550_v28 = vcombine.low %v10953_v3, %v10961_v16 }
 0x8a5   : > { %14123 = vmatprep.subr.bf16.mxu1 %v19741_v55  ;;  %v19885_v55 = vcombine.high %v11288_v38, %v11296_v37  ;;  %v11193_v6 = vld [vmem:[%s30185_s6 + $0xb18] sm:$0xff] }
 0x8a7   : > { %14083 = vmatpush1.bf16.msra.mxu0 %v19484_v31  ;;  %v19628_v31 = vcombine.low %v11032_v25, %v11040_v22  ;;  %v10929_v25 = vld [vmem:[%s30185_s6 + $0x2d8] sm:$0xff] }
 0x8a8   : > { %14124 = vmatpush1.bf16.msra.mxu1 %v19740_v1  ;;  %14084 = vmatprep.subr.bf16.mxu0 %v19469_v41  ;;  %v19884_v1 = vcombine.low %v11288_v38, %v11296_v37  ;;  %v19613_v41 = vcombine.high %v11016_v40, %v11024_v30  ;;  %v11177_v38 = vld [vmem:[%s30185_s6 + $0xa98] sm:$0xff] }
 0x8a9   : > { %14125 = vmatprep.subr.bf16.mxu1 %v19725_v34  ;;  %v19869_v34 = vcombine.high %v11272_v32, %v11280_v24  ;;  %v11185_v37 = vld [vmem:[%s30185_s6 + $0xad8] sm:$0xff] }
 0x8ab   : > { %14085 = vmatpush1.bf16.msra.mxu0 %v19468_v47  ;;  %v19612_v47 = vcombine.low %v11016_v40, %v11024_v30  ;;  %v10905_v40 = vld [vmem:[%s30185_s6 + $0x218] sm:$0xff] }
 0x8ac   : > { %14126 = vmatpush1.bf16.msra.mxu1 %v19724_v49  ;;  %14086 = vmatprep.subr.bf16.mxu0 %v19453_v52  ;;  %v19868_v49 = vcombine.low %v11272_v32, %v11280_v24  ;;  %v19597_v52 = vcombine.high %v11000_v42, %v11008_v45  ;;  %v10913_v30 = vld [vmem:[%s30185_s6 + $0x258] sm:$0xff] }
 0x8ad   : > { %14127 = vmatprep.subr.bf16.mxu1 %v19709_v13  ;;  %v19853_v13 = vcombine.high %v11256_v5, %v11264_v9  ;;  %v11161_v32 = vld [vmem:[%s30185_s6 + $0xa18] sm:$0xff] }
 0x8ae   : > { %v11169_v24 = vld [vmem:[%s30185_s6 + $0xa58] sm:$0xff] }
 0x8af   : > { %14087 = vmatpush1.bf16.msra.mxu0 %v19452_v62  ;;  %v19596_v62 = vcombine.low %v11000_v42, %v11008_v45  ;;  %v10889_v42 = vld [vmem:[%s30185_s6 + $0x198] sm:$0xff] }
 0x8b0   : > { %14128 = vmatpush1.bf16.msra.mxu1 %v19708_v12  ;;  %14088 = vmatprep.subr.bf16.mxu0 %v19437_v48  ;;  %v19852_v12 = vcombine.low %v11256_v5, %v11264_v9  ;;  %v19581_v48 = vcombine.high %v10984_v61, %v10992_v58  ;;  %v10897_v45 = vld [vmem:[%s30185_s6 + $0x1d8] sm:$0xff] }
 0x8b1   : > { %14129 = vmatprep.subr.bf16.mxu1 %v19693_v63  ;;  %v19837_v63 = vcombine.high %v11240_v44, %v11248_v27  ;;  %v11145_v5 = vld [vmem:[%s30185_s6 + $0x998] sm:$0xff] }
 0x8b2   : > { %v11153_v9 = vld [vmem:[%s30185_s6 + $0x9d8] sm:$0xff] }
 0x8b3   : > { %14089 = vmatpush1.bf16.msra.mxu0 %v19436_v7  ;;  %v19580_v7 = vcombine.low %v10984_v61, %v10992_v58  ;;  %v10873_v61 = vld [vmem:[%s30185_s6 + $0x118] sm:$0xff] }
 0x8b4   : > { %14130 = vmatpush1.bf16.msra.mxu1 %v19692_v11  ;;  %14090 = vmatprep.subr.bf16.mxu0 %v19677_v14  ;;  %v19836_v11 = vcombine.low %v11240_v44, %v11248_v27  ;;  %v19565_v14 = vcombine.high %v10968_v4, %v10976_v0  ;;  %v10881_v58 = vld [vmem:[%s30185_s6 + $0x158] sm:$0xff] }
 0x8b5   : > { %14131 = vmatprep.subr.bf16.mxu1 %v19933_v15  ;;  %v19821_v15 = vcombine.high %v11224_v60, %v11232_v39  ;;  %v11129_v44 = vld [vmem:[%s30185_s6 + $0x918] sm:$0xff] }
 0x8b6   : > { %v11137_v27 = vld [vmem:[%s30185_s6 + $0x958] sm:$0xff] }
 0x8b7   : > { %14091 = vmatpush2.bf16.msra.mxu0 %v19676_v17  ;;  %v19564_v17 = vcombine.low %v10968_v4, %v10976_v0  ;;  %v10857_v4 = vld [vmem:[%s30185_s6 + $0x98] sm:$0xff] }
 0x8b8   : > { %14132 = vmatpush2.bf16.msra.mxu1 %v19932_v33  ;;  %14092 = vmatprep.subr.bf16.mxu0 %v19661_v18  ;;  %v19820_v33 = vcombine.low %v11224_v60, %v11232_v39  ;;  %v19551_v18 = vcombine.high %v10953_v3, %v10961_v16  ;;  %v10865_v0 = vld [vmem:[%s30185_s6 + $0xd8] sm:$0xff] }
 0x8b9   : > { %14133 = vmatprep.subr.bf16.mxu1 %v19917_v19  ;;  %v19807_v19 = vcombine.high %v11209_v35, %v11217_v43  ;;  %v11113_v60 = vld [vmem:[%s30185_s6 + $0x898] sm:$0xff] }
 0x8ba   : > { %v11121_v39 = vld [vmem:[%s30185_s6 + $0x8d8] sm:$0xff] }
 0x8bb   : > { %14093 = vmatpush2.bf16.msra.mxu0 %v19660_v10  ;;  %v11201_v10 = vld [vmem:[%s30185_s6 + $0xb58] sm:$0xff] }
 0x8bc   : > { %14134 = vmatpush2.bf16.msra.mxu1 %v19916_v8  ;;  %14094 = vmatprep.subr.bf16.mxu0 %v19645_v2  ;;  %v19806_v8 = vcombine.low %v11209_v35, %v11217_v43  ;;  %v19535_v2 = vcombine.high %v10937_v20, %v10945_v36  ;;  %v19791_v22 = vcombine.high %v11193_v6, %v11201_v10  ;;  %v10841_v3 = vld [vmem:[%s30185_s6 + $0x18] sm:$0xff] }
 0x8bd   : > { %14135 = vmatprep.subr.bf16.mxu1 %v19901_v53  ;;  %v10921_v53 = vld [vmem:[%s30185_s6 + $0x298] sm:$0xff] }
 0x8be   : > { %v10849_v16 = vld [vmem:[%s30185_s6 + $0x58] sm:$0xff] }
 0x8bf   : > { %14095 = vmatpush2.bf16.msra.mxu0 %v19644_v23  ;;  %v19534_v23 = vcombine.low %v10937_v20, %v10945_v36  ;;  %v11097_v35 = vld [vmem:[%s30185_s6 + $0x818] sm:$0xff] }
 0x8c0   : > { %14136 = vmatpush2.bf16.msra.mxu1 %v19900_v26  ;;  %14096 = vmatprep.subr.bf16.mxu0 %v19629_v29  ;;  %v19790_v26 = vcombine.low %v11193_v6, %v11201_v10  ;;  %v19519_v29 = vcombine.high %v10921_v53, %v10929_v25  ;;  %v11105_v43 = vld [vmem:[%s30185_s6 + $0x858] sm:$0xff]  ;;  %v19438_v10 = vcombine.low %v10841_v3, %v10849_v16 }
 0x8c1   : > { %14137 = vmatprep.subr.bf16.mxu1 %v19885_v55  ;;  %v19775_v55 = vcombine.high %v11177_v38, %v11185_v37  ;;  %v11081_v20 = vld [vmem:[%s30185_s6 + $0x798] sm:$0xff] }
 0x8c2   : > { %v11089_v36 = vld [vmem:[%s30185_s6 + $0x7d8] sm:$0xff] }
 0x8c3   : > { %14097 = vmatpush2.bf16.msra.mxu0 %v19628_v31  ;;  %v19518_v31 = vcombine.low %v10921_v53, %v10929_v25  ;;  %v11345_v6 = vld [vmem:[%s30185_s6 + $0xfd8] sm:$0xff] }
 0x8c4   : > { %14138 = vmatpush2.bf16.msra.mxu1 %v19884_v1  ;;  %14098 = vmatprep.subr.bf16.mxu0 %v19613_v41  ;;  %v19774_v1 = vcombine.low %v11177_v38, %v11185_v37  ;;  %v19503_v41 = vcombine.high %v10905_v40, %v10913_v30  ;;  %v11065_v25 = vld [vmem:[%s30185_s6 + $0x718] sm:$0xff] }
 0x8c5   : > { %14139 = vmatprep.subr.bf16.mxu1 %v19869_v34  ;;  %v19759_v34 = vcombine.high %v11161_v32, %v11169_v24  ;;  %v11321_v38 = vld [vmem:[%s30185_s6 + $0xf18] sm:$0xff] }
 0x8c6   : > { %v11329_v37 = vld [vmem:[%s30185_s6 + $0xf58] sm:$0xff] }
 0x8c7   : > { %14099 = vmatpush2.bf16.msra.mxu0 %v19612_v47  ;;  %v19502_v47 = vcombine.low %v10905_v40, %v10913_v30  ;;  %v11049_v40 = vld [vmem:[%s30185_s6 + $0x698] sm:$0xff] }
 0x8c8   : > { %14140 = vmatpush2.bf16.msra.mxu1 %v19868_v49  ;;  %14100 = vmatprep.subr.bf16.mxu0 %v19597_v52  ;;  %v19758_v49 = vcombine.low %v11161_v32, %v11169_v24  ;;  %v19487_v52 = vcombine.high %v10889_v42, %v10897_v45  ;;  %v11057_v30 = vld [vmem:[%s30185_s6 + $0x6d8] sm:$0xff] }
 0x8c9   : > { %14141 = vmatprep.subr.bf16.mxu1 %v19853_v13  ;;  %v19743_v13 = vcombine.high %v11145_v5, %v11153_v9  ;;  %v11305_v32 = vld [vmem:[%s30185_s6 + $0xe98] sm:$0xff] }
 0x8ca   : > { %v11313_v24 = vld [vmem:[%s30185_s6 + $0xed8] sm:$0xff] }
 0x8cb   : > { %14101 = vmatpush2.bf16.msra.mxu0 %v19596_v62  ;;  %v19486_v62 = vcombine.low %v10889_v42, %v10897_v45  ;;  %v11033_v42 = vld [vmem:[%s30185_s6 + $0x618] sm:$0xff] }
 0x8cc   : > { %14142 = vmatpush2.bf16.msra.mxu1 %v19852_v12  ;;  %14102 = vmatprep.subr.bf16.mxu0 %v19581_v48  ;;  %v19742_v12 = vcombine.low %v11145_v5, %v11153_v9  ;;  %v19471_v48 = vcombine.high %v10873_v61, %v10881_v58  ;;  %v11041_v45 = vld [vmem:[%s30185_s6 + $0x658] sm:$0xff] }
 0x8cd   : > { %14143 = vmatprep.subr.bf16.mxu1 %v19837_v63  ;;  %v19727_v63 = vcombine.high %v11129_v44, %v11137_v27  ;;  %v11289_v5 = vld [vmem:[%s30185_s6 + $0xe18] sm:$0xff] }
 0x8ce   : > { %v11297_v9 = vld [vmem:[%s30185_s6 + $0xe58] sm:$0xff] }
 0x8cf   : > { %14103 = vmatpush2.bf16.msra.mxu0 %v19580_v7  ;;  %v19470_v7 = vcombine.low %v10873_v61, %v10881_v58  ;;  %v11017_v61 = vld [vmem:[%s30185_s6 + $0x598] sm:$0xff] }
 0x8d0   : > { %14144 = vmatpush2.bf16.msra.mxu1 %v19836_v11  ;;  %14104 = vmatprep.subr.bf16.mxu0 %v19565_v14  ;;  %v19726_v11 = vcombine.low %v11129_v44, %v11137_v27  ;;  %v19455_v14 = vcombine.high %v10857_v4, %v10865_v0  ;;  %v11025_v58 = vld [vmem:[%s30185_s6 + $0x5d8] sm:$0xff] }
 0x8d1   : > { %14145 = vmatprep.subr.bf16.mxu1 %v19821_v15  ;;  %v19711_v15 = vcombine.high %v11113_v60, %v11121_v39  ;;  %v11273_v44 = vld [vmem:[%s30185_s6 + $0xd98] sm:$0xff] }
 0x8d2   : > { %v11281_v27 = vld [vmem:[%s30185_s6 + $0xdd8] sm:$0xff] }
 0x8d3   : > { %14105 = vmatpush2.bf16.msra.mxu0 %v19564_v17  ;;  %v19454_v17 = vcombine.low %v10857_v4, %v10865_v0  ;;  %v11001_v4 = vld [vmem:[%s30185_s6 + $0x518] sm:$0xff] }
 0x8d4   : > { %14146 = vmatpush2.bf16.msra.mxu1 %v19820_v33  ;;  %14156 = vmatprep.subr.bf16.mxu0 %v19551_v18  ;;  %v19710_v33 = vcombine.low %v11113_v60, %v11121_v39  ;;  %v19439_v18 = vcombine.high %v10841_v3, %v10849_v16  ;;  %v11009_v0 = vld [vmem:[%s30185_s6 + $0x558] sm:$0xff] }
 0x8d5   : > { %14197 = vmatprep.subr.bf16.mxu1 %v19807_v19  ;;  %v19695_v19 = vcombine.high %v11097_v35, %v11105_v43  ;;  %v11257_v60 = vld [vmem:[%s30185_s6 + $0xd18] sm:$0xff] }
 0x8d6   : > { %14107 = vmatmul.mubr.bf16.vlgmr.msra.gmra.mxu0 %v27058_v57  ;;  %v11265_v39 = vld [vmem:[%s30185_s6 + $0xd58] sm:$0xff] }
 0x8d7   : > { %14148 = vmatmul.mubr.bf16.vlgmr.msra.gmra.mxu1 %v27062_v59  ;;  %14157 = vmatpush1.bf16.msra.mxu0 %v19550_v28  ;;  %v11337_v28 = vld [vmem:[%s30185_s6 + $0xf98] sm:$0xff] }
 0x8d8   : > { %14188 = vmatprep.mubr.bf16.mxu0 %v27050_v50  ;;  %14198 = vmatpush1.bf16.msra.mxu1 %v19806_v8  ;;  %v19694_v8 = vcombine.low %v11097_v35, %v11105_v43  ;;  %v19935_v53 = vcombine.high %v11337_v28, %v11345_v6  ;;  %v10985_v3 = vld [vmem:[%s30185_s6 + $0x498] sm:$0xff] }
 0x8d9   : > { %14229 = vmatprep.mubr.bf16.mxu1 %v27054_v51  ;;  %14158 = vmatprep.subr.bf16.mxu0 %v19535_v2  ;;  %v19679_v2 = vcombine.high %v11081_v20, %v11089_v36  ;;  %v10993_v16 = vld [vmem:[%s30185_s6 + $0x4d8] sm:$0xff] }
 0x8da   : > { %14199 = vmatprep.subr.bf16.mxu1 %v19791_v22  ;;  %v11073_v22 = vld [vmem:[%s30185_s6 + $0x758] sm:$0xff] }
 0x8db   : > { %14159 = vmatpush1.bf16.msra.mxu0 %v19534_v23  ;;  %v19678_v23 = vcombine.low %v11081_v20, %v11089_v36  ;;  %v11241_v35 = vld [vmem:[%s30185_s6 + $0xc98] sm:$0xff] }
 0x8dc   : > { %14200 = vmatpush1.bf16.msra.mxu1 %v19790_v26  ;;  %14160 = vmatprep.subr.bf16.mxu0 %v19519_v29  ;;  %v19934_v26 = vcombine.low %v11337_v28, %v11345_v6  ;;  %v19663_v29 = vcombine.high %v11065_v25, %v11073_v22  ;;  %v11249_v43 = vld [vmem:[%s30185_s6 + $0xcd8] sm:$0xff] }
 0x8dd   : > { %14201 = vmatprep.subr.bf16.mxu1 %v19775_v55  ;;  %v19919_v55 = vcombine.high %v11321_v38, %v11329_v37  ;;  %v10969_v20 = vld [vmem:[%s30185_s6 + $0x418] sm:$0xff] }
 0x8de   : > { %v10977_v36 = vld [vmem:[%s30185_s6 + $0x458] sm:$0xff] }
 0x8df   : > { %14161 = vmatpush1.bf16.msra.mxu0 %v19518_v31  ;;  %v19662_v31 = vcombine.low %v11065_v25, %v11073_v22  ;;  %v11225_v28 = vld [vmem:[%s30185_s6 + $0xc18] sm:$0xff]  ;;  %v10954_v25 = vld [vmem:[%s30185_s6 + $0x3a0] sm:$0xff] }
 0x8e0   : > { %14202 = vmatpush1.bf16.msra.mxu1 %v19774_v1  ;;  %14162 = vmatprep.subr.bf16.mxu0 %v19503_v41  ;;  %v19918_v1 = vcombine.low %v11321_v38, %v11329_v37  ;;  %v19647_v41 = vcombine.high %v11049_v40, %v11057_v30  ;;  %v11233_v6 = vld [vmem:[%s30185_s6 + $0xc58] sm:$0xff]  ;;  %v10962_v22 = vld [vmem:[%s30185_s6 + $0x3e0] sm:$0xff] }
 0x8e1   : > { %14203 = vmatprep.subr.bf16.mxu1 %v19759_v34  ;;  %v19903_v34 = vcombine.high %v11305_v32, %v11313_v24  ;;  %v11210_v38 = vld [vmem:[%s30185_s6 + $0xba0] sm:$0xff] }
 0x8e2   : > { %v11218_v37 = vld [vmem:[%s30185_s6 + $0xbe0] sm:$0xff] }
 0x8e3   : > { %14163 = vmatpush1.bf16.msra.mxu0 %v19502_v47  ;;  %v19646_v47 = vcombine.low %v11049_v40, %v11057_v30  ;;  %v10938_v40 = vld [vmem:[%s30185_s6 + $0x320] sm:$0xff] }
 0x8e4   : > { %14204 = vmatpush1.bf16.msra.mxu1 %v19758_v49  ;;  %14164 = vmatprep.subr.bf16.mxu0 %v19487_v52  ;;  %v19902_v49 = vcombine.low %v11305_v32, %v11313_v24  ;;  %v19631_v52 = vcombine.high %v11033_v42, %v11041_v45  ;;  %v10946_v30 = vld [vmem:[%s30185_s6 + $0x360] sm:$0xff]  ;;  %v19552_v32 = vcombine.low %v10954_v25, %v10962_v22 }
 0x8e5   : > { %14205 = vmatprep.subr.bf16.mxu1 %v19743_v13  ;;  %v19887_v13 = vcombine.high %v11289_v5, %v11297_v9  ;;  %v11194_v24 = vld [vmem:[%s30185_s6 + $0xb20] sm:$0xff] }
 0x8e7   : > { %14165 = vmatpush1.bf16.msra.mxu0 %v19486_v62  ;;  %v19630_v62 = vcombine.low %v11033_v42, %v11041_v45  ;;  %v10930_v42 = vld [vmem:[%s30185_s6 + $0x2e0] sm:$0xff] }
 0x8e8   : > { %14206 = vmatpush1.bf16.msra.mxu1 %v19742_v12  ;;  %14166 = vmatprep.subr.bf16.mxu0 %v19471_v48  ;;  %v19886_v12 = vcombine.low %v11289_v5, %v11297_v9  ;;  %v19615_v48 = vcombine.high %v11017_v61, %v11025_v58 }
 0x8e9   : > { %14207 = vmatprep.subr.bf16.mxu1 %v19727_v63  ;;  %v19871_v63 = vcombine.high %v11273_v44, %v11281_v27 }
 0x8eb   : > { %14167 = vmatpush1.bf16.msra.mxu0 %v19470_v7  ;;  %v19614_v7 = vcombine.low %v11017_v61, %v11025_v58 }
 0x8ec   : > { %14208 = vmatpush1.bf16.msra.mxu1 %v19726_v11  ;;  %14168 = vmatprep.subr.bf16.mxu0 %v19455_v14  ;;  %v19870_v11 = vcombine.low %v11273_v44, %v11281_v27  ;;  %v19599_v14 = vcombine.high %v11001_v4, %v11009_v0 }
 0x8ed   : > { %14209 = vmatprep.subr.bf16.mxu1 %v19711_v15  ;;  %v19855_v15 = vcombine.high %v11257_v60, %v11265_v39 }
 0x8ef   : > { %14169 = vmatpush1.bf16.msra.mxu0 %v19454_v17  ;;  %v19598_v17 = vcombine.low %v11001_v4, %v11009_v0 }
 0x8f0   : > { %14210 = vmatpush1.bf16.msra.mxu1 %v19710_v33  ;;  %14170 = vmatprep.subr.bf16.mxu0 %v19439_v18  ;;  %v19854_v33 = vcombine.low %v11257_v60, %v11265_v39  ;;  %v19583_v18 = vcombine.high %v10985_v3, %v10993_v16  ;;  %v11162_v60 = vld [vmem:[%s30185_s6 + $0xa20] sm:$0xff] }
 0x8f1   : > { %14211 = vmatprep.subr.bf16.mxu1 %v19695_v19  ;;  %v19839_v19 = vcombine.high %v11241_v35, %v11249_v43  ;;  %v11170_v39 = vld [vmem:[%s30185_s6 + $0xa60] sm:$0xff] }
 0x8f3   : > { %14171 = vmatpush1.bf16.msra.mxu0 %v19438_v10  ;;  %v19582_v10 = vcombine.low %v10985_v3, %v10993_v16  ;;  %v19761_v16 = vcombine.high %v11162_v60, %v11170_v39 }
 0x8f4   : > { %14212 = vmatpush1.bf16.msra.mxu1 %v19694_v8  ;;  %14172 = vmatprep.subr.bf16.mxu0 %v19679_v2  ;;  %v19838_v8 = vcombine.low %v11241_v35, %v11249_v43  ;;  %v19567_v2 = vcombine.high %v10969_v20, %v10977_v36  ;;  %v10890_v35 = vld [vmem:[%s30185_s6 + $0x1a0] sm:$0xff] }
 0x8f5   : > { %14213 = vmatprep.subr.bf16.mxu1 %v19935_v53  ;;  %v19823_v53 = vcombine.high %v11225_v28, %v11233_v6  ;;  %v10898_v43 = vld [vmem:[%s30185_s6 + $0x1e0] sm:$0xff] }
 0x8f7   : > { %14173 = vmatpush2.bf16.msra.mxu0 %v19678_v23  ;;  %v19566_v23 = vcombine.low %v10969_v20, %v10977_v36  ;;  %v19489_v20 = vcombine.high %v10890_v35, %v10898_v43 }
 0x8f8   : > { %14214 = vmatpush2.bf16.msra.mxu1 %v19934_v26  ;;  %14174 = vmatprep.subr.bf16.mxu0 %v19663_v29  ;;  %v19822_v26 = vcombine.low %v11225_v28, %v11233_v6  ;;  %v19553_v29 = vcombine.high %v10954_v25, %v10962_v22  ;;  %v10874_v28 = vld [vmem:[%s30185_s6 + $0x120] sm:$0xff] }
 0x8f9   : > { %14215 = vmatprep.subr.bf16.mxu1 %v19919_v55  ;;  %v19809_v55 = vcombine.high %v11210_v38, %v11218_v37  ;;  %v10882_v6 = vld [vmem:[%s30185_s6 + $0x160] sm:$0xff] }
 0x8fa   : > { %v19473_v25 = vcombine.high %v10874_v28, %v10882_v6 }
 0x8fb   : > { %14175 = vmatpush2.bf16.msra.mxu0 %v19662_v31  ;;  %v11202_v31 = vld [vmem:[%s30185_s6 + $0xb60] sm:$0xff] }
 0x8fc   : > { %14216 = vmatpush2.bf16.msra.mxu1 %v19918_v1  ;;  %14176 = vmatprep.subr.bf16.mxu0 %v19647_v41  ;;  %v19808_v1 = vcombine.low %v11210_v38, %v11218_v37  ;;  %v19537_v41 = vcombine.high %v10938_v40, %v10946_v30  ;;  %v19793_v9 = vcombine.high %v11194_v24, %v11202_v31  ;;  %v10858_v38 = vld [vmem:[%s30185_s6 + $0xa0] sm:$0xff] }
 0x8fd   : > { %14217 = vmatprep.subr.bf16.mxu1 %v19903_v34  ;;  %v10922_v34 = vld [vmem:[%s30185_s6 + $0x2a0] sm:$0xff]  ;;  %v19792_v44 = vcombine.low %v11194_v24, %v11202_v31 }
 0x8fe   : > { %v19521_v27 = vcombine.high %v10922_v34, %v10930_v42  ;;  %v10866_v37 = vld [vmem:[%s30185_s6 + $0xe0] sm:$0xff] }
 0x8ff   : > { %14177 = vmatpush2.bf16.msra.mxu0 %v19646_v47  ;;  %v11178_v47 = vld [vmem:[%s30185_s6 + $0xaa0] sm:$0xff] }
 0x900   : > { %14218 = vmatpush2.bf16.msra.mxu1 %v19902_v49  ;;  %14178 = vmatprep.subr.bf16.mxu0 %v19631_v52  ;;  %v11186_v49 = vld [vmem:[%s30185_s6 + $0xae0] sm:$0xff] }
 0x901   : > { %14219 = vmatprep.subr.bf16.mxu1 %v19887_v13  ;;  %v19536_v13 = vcombine.low %v10938_v40, %v10946_v30  ;;  %v19457_v40 = vcombine.high %v10858_v38, %v10866_v37  ;;  %v10850_v24 = vld [vmem:[%s30185_s6 + $0x60] sm:$0xff] }
 0x902   : > { %v11098_v31 = vld [vmem:[%s30185_s6 + $0x820] sm:$0xff] }
 0x903   : > { %14179 = vmatpush2.bf16.msra.mxu0 %v19630_v62 }
 0x904   : > { %14220 = vmatpush2.bf16.msra.mxu1 %v19886_v12  ;;  %14180 = vmatprep.subr.bf16.mxu0 %v19615_v48  ;;  %v19777_v12 = vcombine.high %v11178_v47, %v11186_v49  ;;  %v10906_v48 = vld [vmem:[%s30185_s6 + $0x220] sm:$0xff] }
 0x905   : > { %14221 = vmatprep.subr.bf16.mxu1 %v19871_v63  ;;  %v10914_v63 = vld [vmem:[%s30185_s6 + $0x260] sm:$0xff] }
 0x906   : > { %v19505_v3 = vcombine.high %v10906_v48, %v10914_v63 }
 0x907   : > { %14181 = vmatpush2.bf16.msra.mxu0 %v19614_v7  ;;  %v19520_v7 = vcombine.low %v10922_v34, %v10930_v42 }
 0x908   : > { %14222 = vmatpush2.bf16.msra.mxu1 %v19870_v11  ;;  %14182 = vmatprep.subr.bf16.mxu0 %v19599_v14 }
 0x909   : > { %14223 = vmatprep.subr.bf16.mxu1 %v19855_v15  ;;  %v19776_v15 = vcombine.low %v11178_v47, %v11186_v49  ;;  %v11338_v47 = vld [vmem:[%s30185_s6 + $0xfa0] sm:$0xff] }
 0x90a   : > { %v11346_v49 = vld [vmem:[%s30185_s6 + $0xfe0] sm:$0xff] }
 0x90b   : > { %14183 = vmatpush2.bf16.msra.mxu0 %v19598_v17  ;;  %v11146_v17 = vld [vmem:[%s30185_s6 + $0x9a0] sm:$0xff] }
 0x90c   : > { %14224 = vmatpush2.bf16.msra.mxu1 %v19854_v33  ;;  %14184 = vmatprep.subr.bf16.mxu0 %v19583_v18  ;;  %v11154_v33 = vld [vmem:[%s30185_s6 + $0x9e0] sm:$0xff]  ;;  %v19504_v18 = vcombine.low %v10906_v48, %v10914_v63 }
 0x90d   : > { %14225 = vmatprep.subr.bf16.mxu1 %v19839_v19  ;;  %v19760_v19 = vcombine.low %v11162_v60, %v11170_v39  ;;  %v19745_v36 = vcombine.high %v11146_v17, %v11154_v33  ;;  %v11322_v48 = vld [vmem:[%s30185_s6 + $0xf20] sm:$0xff] }
 0x90e   : > { %v11330_v63 = vld [vmem:[%s30185_s6 + $0xf60] sm:$0xff] }
 0x90f   : > { %14185 = vmatpush2.bf16.msra.mxu0 %v19582_v10  ;;  %v11130_v10 = vld [vmem:[%s30185_s6 + $0x920] sm:$0xff]  ;;  %v19921_v39 = vcombine.high %v11322_v48, %v11330_v63 }
 0x910   : > { %14226 = vmatpush2.bf16.msra.mxu1 %v19838_v8  ;;  %14186 = vmatprep.subr.bf16.mxu0 %v19567_v2  ;;  %v11138_v8 = vld [vmem:[%s30185_s6 + $0x960] sm:$0xff]  ;;  %v19488_v2 = vcombine.low %v10890_v35, %v10898_v43 }
 0x911   : > { %14227 = vmatprep.subr.bf16.mxu1 %v19823_v53  ;;  %v19744_v53 = vcombine.low %v11146_v17, %v11154_v33  ;;  %v19729_v22 = vcombine.high %v11130_v10, %v11138_v8  ;;  %v11034_v17 = vld [vmem:[%s30185_s6 + $0x620] sm:$0xff] }
 0x912   : > { %v11042_v33 = vld [vmem:[%s30185_s6 + $0x660] sm:$0xff] }
 0x913   : > { %14187 = vmatpush2.bf16.msra.mxu0 %v19566_v23  ;;  %v11114_v23 = vld [vmem:[%s30185_s6 + $0x8a0] sm:$0xff] }
 0x914   : > { %14228 = vmatpush2.bf16.msra.mxu1 %v19822_v26  ;;  %14238 = vmatprep.subr.bf16.mxu0 %v19553_v29  ;;  %v11122_v26 = vld [vmem:[%s30185_s6 + $0x8e0] sm:$0xff]  ;;  %v19472_v29 = vcombine.low %v10874_v28, %v10882_v6  ;;  %v19633_v28 = vcombine.high %v11034_v17, %v11042_v33 }
 0x915   : > { %14279 = vmatprep.subr.bf16.mxu1 %v19809_v55  ;;  %v19728_v55 = vcombine.low %v11130_v10, %v11138_v8  ;;  %v19713_v30 = vcombine.high %v11114_v23, %v11122_v26  ;;  %v19712_v34 = vcombine.low %v11114_v23, %v11122_v26  ;;  %v11018_v10 = vld [vmem:[%s30185_s6 + $0x5a0] sm:$0xff] }
 0x916   : > { %14189 = vmatmul.mubr.bf16.vlgmr.msra.gmra.mxu0 %v27058_v57  ;;  %v13944_v45 = vpop.f32.mrf.mxu0  ;;  %v13985_v5 = vpop.f32.mrf.mxu1  ;;  %v11026_v8 = vld [vmem:[%s30185_s6 + $0x5e0] sm:$0xff] }
 0x917   : > { %14230 = vmatmul.mubr.bf16.vlgmr.msra.gmra.mxu1 %v27062_v59  ;;  %v27668_v52 = vadd.f32 %v13985_v5, %v13944_v45  ;;  %14239 = vmatpush1.bf16.msra.mxu0 %v19552_v32  ;;  %v10842_v32 = vld [vmem:[%s30185_s6 + $0x20] sm:$0xff] }
 0x918   : > { %14270 = vmatprep.mubr.bf16.mxu0 %v27050_v50  ;;  %14280 = vmatpush1.bf16.msra.mxu1 %v19808_v1  ;;  %v13946_v61 = vpop.f32.mrf.mxu0  ;;  %v13987_v58 = vpop.f32.mrf.mxu1  ;;  %v11106_v1 = vld [vmem:[%s30185_s6 + $0x860] sm:$0xff]  ;;  %v19441_v42 = vcombine.high %v10842_v32, %v10850_v24 }
 0x919   : > { %14311 = vmatprep.mubr.bf16.mxu1 %v27054_v51  ;;  %v27672_v62 = vadd.f32 %v13987_v58, %v13946_v61  ;;  %14240 = vmatprep.subr.bf16.mxu0 %v19537_v41  ;;  %v19456_v41 = vcombine.low %v10858_v38, %v10866_v37  ;;  %v19697_v45 = vcombine.high %v11098_v31, %v11106_v1  ;;  %v11082_v5 = vld [vmem:[%s30185_s6 + $0x7a0] sm:$0xff] }
 0x91a   : > { %14281 = vmatprep.subr.bf16.mxu1 %v19793_v9  ;;  %v13948_v4 = vpop.f32.mrf.mxu0  ;;  %v13989_v0 = vpop.f32.mrf.mxu1  ;;  %v11090_v9 = vld [vmem:[%s30185_s6 + $0x7e0] sm:$0xff]  ;;  %v19696_v61 = vcombine.low %v11098_v31, %v11106_v1  ;;  %v19617_v38 = vcombine.high %v11018_v10, %v11026_v8 }
 0x91b   : > { %14241 = vmatpush1.bf16.msra.mxu0 %v19536_v13  ;;  %v19440_v13 = vcombine.low %v10842_v32, %v10850_v24  ;;  %v19681_v58 = vcombine.high %v11082_v5, %v11090_v9  ;;  %v19680_v4 = vcombine.low %v11082_v5, %v11090_v9  ;;  %v19936_v0 = vcombine.low %v11338_v47, %v11346_v49  ;;  %v11002_v23 = vld [vmem:[%s30185_s6 + $0x520] sm:$0xff] }
 0x91c   : > { %14282 = vmatpush1.bf16.msra.mxu1 %v19792_v44  ;;  %v13949_v11 = vpop.f32.mrf.mxu0  ;;  %v13990_v14 = vpop.f32.mrf.mxu1  ;;  %14242 = vmatprep.subr.bf16.mxu0 %v19521_v27  ;;  %v19937_v44 = vcombine.high %v11338_v47, %v11346_v49  ;;  %v11066_v27 = vld [vmem:[%s30185_s6 + $0x720] sm:$0xff] }
 0x91d   : > { %14283 = vmatprep.subr.bf16.mxu1 %v19777_v12  ;;  %v11074_v12 = vld [vmem:[%s30185_s6 + $0x760] sm:$0xff] }
 0x91e   : > { %v19665_v60 = vcombine.high %v11066_v27, %v11074_v12  ;;  %v11058_v11 = vld [vmem:[%s30185_s6 + $0x6e0] sm:$0xff] }
 0x91f   : > { %14243 = vmatpush1.bf16.msra.mxu0 %v19520_v7  ;;  %v11050_v7 = vld [vmem:[%s30185_s6 + $0x6a0] sm:$0xff] }
 0x920   : > { %14284 = vmatpush1.bf16.msra.mxu1 %v19776_v15  ;;  %14244 = vmatprep.subr.bf16.mxu0 %v19505_v3  ;;  %v11306_v14 = vld [vmem:[%s30185_s6 + $0xea0] sm:$0xff]  ;;  %v19664_v3 = vcombine.low %v11066_v27, %v11074_v12  ;;  %v19649_v35 = vcombine.high %v11050_v7, %v11058_v11 }
 0x921   : > { %14285 = vmatprep.subr.bf16.mxu1 %v19761_v16  ;;  %v11314_v15 = vld [vmem:[%s30185_s6 + $0xee0] sm:$0xff]  ;;  %v19920_v16 = vcombine.low %v11322_v48, %v11330_v63  ;;  %v10955_v48 = vld [vmem:[%s30185_s6 + $0x3a8] sm:$0xff] }
 0x922   : > { %v19905_v43 = vcombine.high %v11306_v14, %v11314_v15  ;;  %v11010_v26 = vld [vmem:[%s30185_s6 + $0x560] sm:$0xff]  ;;  %v10963_v63 = vld [vmem:[%s30185_s6 + $0x3e8] sm:$0xff] }
 0x923   : > { %14245 = vmatpush1.bf16.msra.mxu0 %v19504_v18  ;;  %v11290_v18 = vld [vmem:[%s30185_s6 + $0xe20] sm:$0xff]  ;;  %v19601_v32 = vcombine.high %v11002_v23, %v11010_v26 }
 0x924   : > { %14286 = vmatpush1.bf16.msra.mxu1 %v19760_v19  ;;  %14246 = vmatprep.subr.bf16.mxu0 %v19489_v20  ;;  %v11298_v19 = vld [vmem:[%s30185_s6 + $0xe60] sm:$0xff]  ;;  %v19648_v20 = vcombine.low %v11050_v7, %v11058_v11  ;;  %v19555_v7 = vcombine.high %v10955_v48, %v10963_v63 }
 0x925   : > { %14287 = vmatprep.subr.bf16.mxu1 %v19745_v36  ;;  %v19904_v36 = vcombine.low %v11306_v14, %v11314_v15  ;;  %v19889_v6 = vcombine.high %v11290_v18, %v11298_v19  ;;  %v10986_v31 = vld [vmem:[%s30185_s6 + $0x4a0] sm:$0xff]  ;;  %v10939_v14 = vld [vmem:[%s30185_s6 + $0x328] sm:$0xff] }
 0x926   : > { %v10994_v1 = vld [vmem:[%s30185_s6 + $0x4e0] sm:$0xff]  ;;  %v10947_v15 = vld [vmem:[%s30185_s6 + $0x368] sm:$0xff] }
 0x927   : > { %14247 = vmatpush1.bf16.msra.mxu0 %v19488_v2  ;;  %v11274_v2 = vld [vmem:[%s30185_s6 + $0xda0] sm:$0xff]  ;;  %v19585_v5 = vcombine.high %v10986_v31, %v10994_v1 }
 0x928   : > { %14288 = vmatpush1.bf16.msra.mxu1 %v19744_v53  ;;  %14248 = vmatprep.subr.bf16.mxu0 %v19473_v25  ;;  %v11282_v53 = vld [vmem:[%s30185_s6 + $0xde0] sm:$0xff]  ;;  %v19632_v25 = vcombine.low %v11034_v17, %v11042_v33  ;;  %v19539_v17 = vcombine.high %v10939_v14, %v10947_v15  ;;  %v10923_v33 = vld [vmem:[%s30185_s6 + $0x2a8] sm:$0xff] }
 0x929   : > { %14289 = vmatprep.subr.bf16.mxu1 %v19729_v22  ;;  %v19888_v22 = vcombine.low %v11290_v18, %v11298_v19  ;;  %v19873_v37 = vcombine.high %v11274_v2, %v11282_v53  ;;  %v10970_v47 = vld [vmem:[%s30185_s6 + $0x420] sm:$0xff]  ;;  %v10931_v18 = vld [vmem:[%s30185_s6 + $0x2e8] sm:$0xff] }
 0x92a   : > { %v10978_v49 = vld [vmem:[%s30185_s6 + $0x460] sm:$0xff] }
 0x92b   : > { %14249 = vmatpush1.bf16.msra.mxu0 %v19472_v29  ;;  %v11258_v29 = vld [vmem:[%s30185_s6 + $0xd20] sm:$0xff]  ;;  %v19569_v27 = vcombine.high %v10970_v47, %v10978_v49 }
 0x92c   : > { %14290 = vmatpush1.bf16.msra.mxu1 %v19728_v55  ;;  %14250 = vmatprep.subr.bf16.mxu0 %v19457_v40  ;;  %v11266_v55 = vld [vmem:[%s30185_s6 + $0xd60] sm:$0xff]  ;;  %v19616_v40 = vcombine.low %v11018_v10, %v11026_v8  ;;  %v19538_v8 = vcombine.low %v10939_v14, %v10947_v15 }
 0x92d   : > { %14291 = vmatprep.subr.bf16.mxu1 %v19713_v30  ;;  %v19872_v30 = vcombine.low %v11274_v2, %v11282_v53  ;;  %v19857_v24 = vcombine.high %v11258_v29, %v11266_v55 }
 0x92f   : > { %14251 = vmatpush1.bf16.msra.mxu0 %v19456_v41  ;;  %v11242_v41 = vld [vmem:[%s30185_s6 + $0xca0] sm:$0xff] }
 0x930   : > { %14292 = vmatpush1.bf16.msra.mxu1 %v19712_v34  ;;  %14252 = vmatprep.subr.bf16.mxu0 %v19441_v42  ;;  %v11250_v34 = vld [vmem:[%s30185_s6 + $0xce0] sm:$0xff]  ;;  %v19600_v42 = vcombine.low %v11002_v23, %v11010_v26  ;;  %v10907_v23 = vld [vmem:[%s30185_s6 + $0x228] sm:$0xff] }
 0x931   : > { %14293 = vmatprep.subr.bf16.mxu1 %v19697_v45  ;;  %v19856_v45 = vcombine.low %v11258_v29, %v11266_v55  ;;  %v19841_v9 = vcombine.high %v11242_v41, %v11250_v34  ;;  %v10915_v26 = vld [vmem:[%s30185_s6 + $0x268] sm:$0xff] }
 0x933   : > { %14253 = vmatpush1.bf16.msra.mxu0 %v19440_v13  ;;  %v11226_v13 = vld [vmem:[%s30185_s6 + $0xc20] sm:$0xff] }
 0x934   : > { %14294 = vmatpush1.bf16.msra.mxu1 %v19696_v61  ;;  %14254 = vmatprep.subr.bf16.mxu0 %v19681_v58  ;;  %v11234_v61 = vld [vmem:[%s30185_s6 + $0xc60] sm:$0xff]  ;;  %v19584_v58 = vcombine.low %v10986_v31, %v10994_v1 }
 0x935   : > { %14295 = vmatprep.subr.bf16.mxu1 %v19937_v44  ;;  %v19840_v44 = vcombine.low %v11242_v41, %v11250_v34  ;;  %v19825_v12 = vcombine.high %v11226_v13, %v11234_v61  ;;  %v19507_v41 = vcombine.high %v10907_v23, %v10915_v26 }
 0x937   : > { %14255 = vmatpush2.bf16.msra.mxu0 %v19680_v4  ;;  %v11211_v4 = vld [vmem:[%s30185_s6 + $0xba8] sm:$0xff] }
 0x938   : > { %14296 = vmatpush2.bf16.msra.mxu1 %v19936_v0  ;;  %14256 = vmatprep.subr.bf16.mxu0 %v19665_v60  ;;  %v11219_v0 = vld [vmem:[%s30185_s6 + $0xbe8] sm:$0xff]  ;;  %v19568_v60 = vcombine.low %v10970_v47, %v10978_v49  ;;  %v19506_v47 = vcombine.low %v10907_v23, %v10915_v26 }
 0x939   : > { %14297 = vmatprep.subr.bf16.mxu1 %v19921_v39  ;;  %v19824_v39 = vcombine.low %v11226_v13, %v11234_v61  ;;  %v19811_v11 = vcombine.high %v11211_v4, %v11219_v0  ;;  %v11067_v23 = vld [vmem:[%s30185_s6 + $0x728] sm:$0xff] }
 0x93a   : > { %v11075_v26 = vld [vmem:[%s30185_s6 + $0x768] sm:$0xff] }
 0x93b   : > { %14257 = vmatpush2.bf16.msra.mxu0 %v19664_v3  ;;  %v19554_v3 = vcombine.low %v10955_v48, %v10963_v63 }
 0x93c   : > { %14298 = vmatpush2.bf16.msra.mxu1 %v19920_v16  ;;  %14258 = vmatprep.subr.bf16.mxu0 %v19649_v35  ;;  %v11195_v16 = vld [vmem:[%s30185_s6 + $0xb28] sm:$0xff] }
 0x93d   : > { %14299 = vmatprep.subr.bf16.mxu1 %v19905_v43  ;;  %v11203_v35 = vld [vmem:[%s30185_s6 + $0xb68] sm:$0xff]  ;;  %v19810_v43 = vcombine.low %v11211_v4, %v11219_v0 }
 0x93f   : > { %14259 = vmatpush2.bf16.msra.mxu0 %v19648_v20 }
 0x940   : > { %14300 = vmatpush2.bf16.msra.mxu1 %v19904_v36  ;;  %14260 = vmatprep.subr.bf16.mxu0 %v19633_v28  ;;  %v19795_v36 = vcombine.high %v11195_v16, %v11203_v35  ;;  %v11179_v28 = vld [vmem:[%s30185_s6 + $0xaa8] sm:$0xff] }
 0x941   : > { %14301 = vmatprep.subr.bf16.mxu1 %v19889_v6  ;;  %v11187_v6 = vld [vmem:[%s30185_s6 + $0xae8] sm:$0xff] }
 0x942   : > { %v19778_v1 = vcombine.low %v11179_v28, %v11187_v6 }
 0x943   : > { %14261 = vmatpush2.bf16.msra.mxu0 %v19632_v25  ;;  %v19794_v25 = vcombine.low %v11195_v16, %v11203_v35  ;;  %v10843_v35 = vld [vmem:[%s30185_s6 + $0x28] sm:$0xff] }
 0x944   : > { %14302 = vmatpush2.bf16.msra.mxu1 %v19888_v22  ;;  %14262 = vmatprep.subr.bf16.mxu0 %v19617_v38  ;;  %v19523_v22 = vcombine.high %v10923_v33, %v10931_v18 }
 0x945   : > { %14303 = vmatprep.subr.bf16.mxu1 %v19873_v37  ;;  %v19779_v37 = vcombine.high %v11179_v28, %v11187_v6  ;;  %v11083_v28 = vld [vmem:[%s30185_s6 + $0x7a8] sm:$0xff] }
 0x946   : > { %v11091_v6 = vld [vmem:[%s30185_s6 + $0x7e8] sm:$0xff] }
 0x947   : > { %14263 = vmatpush2.bf16.msra.mxu0 %v19616_v40  ;;  %v11163_v40 = vld [vmem:[%s30185_s6 + $0xa28] sm:$0xff] }
 0x948   : > { %14304 = vmatpush2.bf16.msra.mxu1 %v19872_v30  ;;  %14264 = vmatprep.subr.bf16.mxu0 %v19601_v32  ;;  %v11171_v30 = vld [vmem:[%s30185_s6 + $0xa68] sm:$0xff]  ;;  %v19522_v32 = vcombine.low %v10923_v33, %v10931_v18 }
 0x949   : > { %14305 = vmatprep.subr.bf16.mxu1 %v19857_v24  ;;  %v19763_v34 = vcombine.high %v11163_v40, %v11171_v30  ;;  %v19762_v49 = vcombine.low %v11163_v40, %v11171_v30  ;;  %v11107_v33 = vld [vmem:[%s30185_s6 + $0x868] sm:$0xff]  ;;  %v19682_v40 = vcombine.low %v11083_v28, %v11091_v6 }
 0x94b   : > { %14265 = vmatpush2.bf16.msra.mxu0 %v19600_v42  ;;  %v10891_v42 = vld [vmem:[%s30185_s6 + $0x1a8] sm:$0xff] }
 0x94c   : > { %14306 = vmatpush2.bf16.msra.mxu1 %v19856_v45  ;;  %14266 = vmatprep.subr.bf16.mxu0 %v19585_v5  ;;  %v10899_v45 = vld [vmem:[%s30185_s6 + $0x1e8] sm:$0xff] }
 0x94d   : > { %14307 = vmatprep.subr.bf16.mxu1 %v19841_v9  ;;  %v11147_v5 = vld [vmem:[%s30185_s6 + $0x9a8] sm:$0xff]  ;;  %v19491_v13 = vcombine.high %v10891_v42, %v10899_v45  ;;  %v19490_v48 = vcombine.low %v10891_v42, %v10899_v45  ;;  %v19666_v42 = vcombine.low %v11067_v23, %v11075_v26 }
 0x94e   : > { %v11155_v9 = vld [vmem:[%s30185_s6 + $0x9e8] sm:$0xff] }
 0x94f   : > { %14267 = vmatpush2.bf16.msra.mxu0 %v19584_v58  ;;  %v19747_v61 = vcombine.high %v11147_v5, %v11155_v9  ;;  %v10875_v58 = vld [vmem:[%s30185_s6 + $0x128] sm:$0xff]  ;;  %v19746_v63 = vcombine.low %v11147_v5, %v11155_v9 }
 0x950   : > { %14308 = vmatpush2.bf16.msra.mxu1 %v19840_v44  ;;  %14268 = vmatprep.subr.bf16.mxu0 %v19569_v27  ;;  %v10883_v44 = vld [vmem:[%s30185_s6 + $0x168] sm:$0xff] }
 0x951   : > { %14309 = vmatprep.subr.bf16.mxu1 %v19825_v12  ;;  %v11131_v27 = vld [vmem:[%s30185_s6 + $0x928] sm:$0xff]  ;;  %v19475_v4 = vcombine.high %v10875_v58, %v10883_v44  ;;  %v19474_v14 = vcombine.low %v10875_v58, %v10883_v44 }
 0x952   : > { %v11139_v12 = vld [vmem:[%s30185_s6 + $0x968] sm:$0xff] }
 0x953   : > { %14269 = vmatpush2.bf16.msra.mxu0 %v19568_v60  ;;  %v19731_v0 = vcombine.high %v11131_v27, %v11139_v12  ;;  %v10859_v60 = vld [vmem:[%s30185_s6 + $0xa8] sm:$0xff]  ;;  %v19730_v15 = vcombine.low %v11131_v27, %v11139_v12 }
 0x954   : > { %14310 = vmatpush2.bf16.msra.mxu1 %v19824_v39  ;;  %14320 = vmatprep.subr.bf16.mxu0 %v19555_v7  ;;  %v10867_v39 = vld [vmem:[%s30185_s6 + $0xe8] sm:$0xff] }
 0x955   : > { %14361 = vmatprep.subr.bf16.mxu1 %v19811_v11  ;;  %v11115_v7 = vld [vmem:[%s30185_s6 + $0x8a8] sm:$0xff]  ;;  %v19458_v18 = vcombine.low %v10859_v60, %v10867_v39 }
 0x956   : > { %v14026_v19 = vpop.f32.mrf.mxu0  ;;  %v14067_v20 = vpop.f32.mrf.mxu1  ;;  %14271 = vmatmul.mubr.bf16.vlgmr.msra.gmra.mxu0 %v27058_v57  ;;  %v11123_v11 = vld [vmem:[%s30185_s6 + $0x8e8] sm:$0xff] }
 0x957   : > { %v27867_v10 = vadd.f32 %v14067_v20, %v14026_v19  ;;  %14312 = vmatmul.mubr.bf16.vlgmr.msra.gmra.mxu1 %v27062_v59  ;;  %14321 = vmatpush1.bf16.msra.mxu0 %v19554_v3  ;;  %v19459_v3 = vcombine.high %v10859_v60, %v10867_v39  ;;  %v19715_v16 = vcombine.high %v11115_v7, %v11123_v11 }
 0x958   : > { %14352 = vmatprep.mubr.bf16.mxu0 %v27050_v50  ;;  %14362 = vmatpush1.bf16.msra.mxu1 %v19810_v43  ;;  %v14028_v2 = vpop.f32.mrf.mxu0  ;;  %v14069_v53 = vpop.f32.mrf.mxu1  ;;  %v10851_v43 = vld [vmem:[%s30185_s6 + $0x68] sm:$0xff]  ;;  %v19714_v19 = vcombine.low %v11115_v7, %v11123_v11 }
 0x959   : > { %14393 = vmatprep.mubr.bf16.mxu1 %v27054_v51  ;;  %v27872_v38 = vadd.f32 %v14069_v53, %v14028_v2  ;;  %14322 = vmatprep.subr.bf16.mxu0 %v19539_v17  ;;  %v11099_v17 = vld [vmem:[%s30185_s6 + $0x828] sm:$0xff]  ;;  %v19443_v20 = vcombine.high %v10843_v35, %v10851_v43  ;;  %v19442_v53 = vcombine.low %v10843_v35, %v10851_v43 }
 0x95a   : > { %v14030_v29 = vpop.f32.mrf.mxu0  ;;  %v14071_v55 = vpop.f32.mrf.mxu1  ;;  %14363 = vmatprep.subr.bf16.mxu1 %v19795_v36  ;;  %v19699_v36 = vcombine.high %v11099_v17, %v11107_v33  ;;  %v11347_v2 = vld [vmem:[%s30185_s6 + $0xfe8] sm:$0xff] }
 0x95b   : > { %14323 = vmatpush1.bf16.msra.mxu0 %v19538_v8  ;;  %v11339_v8 = vld [vmem:[%s30185_s6 + $0xfa8] sm:$0xff] }
 0x95c   : > { %14364 = vmatpush1.bf16.msra.mxu1 %v19794_v25  ;;  %v14031_v24 = vpop.f32.mrf.mxu0  ;;  %v14072_v31 = vpop.f32.mrf.mxu1  ;;  %14324 = vmatprep.subr.bf16.mxu0 %v19523_v22  ;;  %v19698_v25 = vcombine.low %v11099_v17, %v11107_v33  ;;  %v19683_v22 = vcombine.high %v11083_v28, %v11091_v6  ;;  %v11323_v29 = vld [vmem:[%s30185_s6 + $0xf28] sm:$0xff]  ;;  %v19938_v30 = vcombine.low %v11339_v8, %v11347_v2 }
 0x95d   : > { %14365 = vmatprep.subr.bf16.mxu1 %v19779_v37  ;;  %v19939_v37 = vcombine.high %v11339_v8, %v11347_v2  ;;  %v11331_v55 = vld [vmem:[%s30185_s6 + $0xf68] sm:$0xff] }
 0x95e   : > { %v19923_v24 = vcombine.high %v11323_v29, %v11331_v55  ;;  %v11051_v31 = vld [vmem:[%s30185_s6 + $0x6a8] sm:$0xff]  ;;  %v19922_v45 = vcombine.low %v11323_v29, %v11331_v55 }
 0x95f   : > { %14325 = vmatpush1.bf16.msra.mxu0 %v19522_v32  ;;  %v19667_v32 = vcombine.high %v11067_v23, %v11075_v26 }
 0x960   : > { %14366 = vmatpush1.bf16.msra.mxu1 %v19778_v1  ;;  %14326 = vmatprep.subr.bf16.mxu0 %v19507_v41  ;;  %v11059_v1 = vld [vmem:[%s30185_s6 + $0x6e8] sm:$0xff] }
 0x961   : > { %14367 = vmatprep.subr.bf16.mxu1 %v19763_v34  ;;  %v11307_v41 = vld [vmem:[%s30185_s6 + $0xea8] sm:$0xff]  ;;  %v19651_v5 = vcombine.high %v11051_v31, %v11059_v1  ;;  %v19650_v58 = vcombine.low %v11051_v31, %v11059_v1 }
 0x962   : > { %v11315_v34 = vld [vmem:[%s30185_s6 + $0xee8] sm:$0xff] }
 0x963   : > { %14327 = vmatpush1.bf16.msra.mxu0 %v19506_v47  ;;  %v19907_v9 = vcombine.high %v11307_v41, %v11315_v34  ;;  %v11035_v47 = vld [vmem:[%s30185_s6 + $0x628] sm:$0xff]  ;;  %v19906_v44 = vcombine.low %v11307_v41, %v11315_v34 }
 0x964   : > { %14368 = vmatpush1.bf16.msra.mxu1 %v19762_v49  ;;  %14328 = vmatprep.subr.bf16.mxu0 %v19491_v13  ;;  %v11043_v49 = vld [vmem:[%s30185_s6 + $0x668] sm:$0xff] }
 0x965   : > { %14369 = vmatprep.subr.bf16.mxu1 %v19747_v61  ;;  %v11291_v13 = vld [vmem:[%s30185_s6 + $0xe28] sm:$0xff]  ;;  %v19635_v27 = vcombine.high %v11035_v47, %v11043_v49  ;;  %v19634_v60 = vcombine.low %v11035_v47, %v11043_v49  ;;  %v11204_v47 = vld [vmem:[%s30185_s6 + $0xb70] sm:$0xff] }
 0x966   : > { %v11299_v61 = vld [vmem:[%s30185_s6 + $0xe68] sm:$0xff] }
 0x967   : > { %14329 = vmatpush1.bf16.msra.mxu0 %v19490_v48  ;;  %v19891_v12 = vcombine.high %v11291_v13, %v11299_v61  ;;  %v11019_v48 = vld [vmem:[%s30185_s6 + $0x5a8] sm:$0xff]  ;;  %v19890_v39 = vcombine.low %v11291_v13, %v11299_v61  ;;  %v10924_v61 = vld [vmem:[%s30185_s6 + $0x2b0] sm:$0xff] }
 0x968   : > { %14370 = vmatpush1.bf16.msra.mxu1 %v19746_v63  ;;  %14330 = vmatprep.subr.bf16.mxu0 %v19475_v4  ;;  %v11027_v63 = vld [vmem:[%s30185_s6 + $0x5e8] sm:$0xff] }
 0x969   : > { %14371 = vmatprep.subr.bf16.mxu1 %v19731_v0  ;;  %v11275_v4 = vld [vmem:[%s30185_s6 + $0xda8] sm:$0xff]  ;;  %v19619_v7 = vcombine.high %v11019_v48, %v11027_v63  ;;  %v19618_v35 = vcombine.low %v11019_v48, %v11027_v63  ;;  %v11188_v48 = vld [vmem:[%s30185_s6 + $0xaf0] sm:$0xff] }
 0x96a   : > { %v11283_v0 = vld [vmem:[%s30185_s6 + $0xde8] sm:$0xff] }
 0x96b   : > { %14331 = vmatpush1.bf16.msra.mxu0 %v19474_v14  ;;  %v19875_v11 = vcombine.high %v11275_v4, %v11283_v0  ;;  %v11003_v14 = vld [vmem:[%s30185_s6 + $0x528] sm:$0xff]  ;;  %v19874_v43 = vcombine.low %v11275_v4, %v11283_v0 }
 0x96c   : > { %14372 = vmatpush1.bf16.msra.mxu1 %v19730_v15  ;;  %14332 = vmatprep.subr.bf16.mxu0 %v19459_v3  ;;  %v11011_v15 = vld [vmem:[%s30185_s6 + $0x568] sm:$0xff] }
 0x96d   : > { %14373 = vmatprep.subr.bf16.mxu1 %v19715_v16  ;;  %v11259_v3 = vld [vmem:[%s30185_s6 + $0xd28] sm:$0xff]  ;;  %v19603_v17 = vcombine.high %v11003_v14, %v11011_v15  ;;  %v19602_v28 = vcombine.low %v11003_v14, %v11011_v15  ;;  %v10908_v15 = vld [vmem:[%s30185_s6 + $0x230] sm:$0xff] }
 0x96e   : > { %v11267_v16 = vld [vmem:[%s30185_s6 + $0xd68] sm:$0xff] }
 0x96f   : > { %14333 = vmatpush1.bf16.msra.mxu0 %v19458_v18  ;;  %v19859_v33 = vcombine.high %v11259_v3, %v11267_v16  ;;  %v10987_v18 = vld [vmem:[%s30185_s6 + $0x4a8] sm:$0xff]  ;;  %v19858_v6 = vcombine.low %v11259_v3, %v11267_v16  ;;  %v10916_v3 = vld [vmem:[%s30185_s6 + $0x270] sm:$0xff] }
 0x970   : > { %14374 = vmatpush1.bf16.msra.mxu1 %v19714_v19  ;;  %14334 = vmatprep.subr.bf16.mxu0 %v19443_v20  ;;  %v10995_v19 = vld [vmem:[%s30185_s6 + $0x4e8] sm:$0xff] }
 0x971   : > { %14375 = vmatprep.subr.bf16.mxu1 %v19699_v36  ;;  %v11243_v20 = vld [vmem:[%s30185_s6 + $0xca8] sm:$0xff]  ;;  %v19587_v8 = vcombine.high %v10987_v18, %v10995_v19  ;;  %v19586_v23 = vcombine.low %v10987_v18, %v10995_v19 }
 0x972   : > { %v11251_v36 = vld [vmem:[%s30185_s6 + $0xce8] sm:$0xff] }
 0x973   : > { %14335 = vmatpush1.bf16.msra.mxu0 %v19442_v53  ;;  %v19843_v2 = vcombine.high %v11243_v20, %v11251_v36  ;;  %v10971_v53 = vld [vmem:[%s30185_s6 + $0x428] sm:$0xff]  ;;  %v19842_v26 = vcombine.low %v11243_v20, %v11251_v36  ;;  %v19509_v36 = vcombine.high %v10908_v15, %v10916_v3 }
 0x974   : > { %14376 = vmatpush1.bf16.msra.mxu1 %v19698_v25  ;;  %14336 = vmatprep.subr.bf16.mxu0 %v19683_v22  ;;  %v10979_v25 = vld [vmem:[%s30185_s6 + $0x468] sm:$0xff] }
 0x975   : > { %14377 = vmatprep.subr.bf16.mxu1 %v19939_v37  ;;  %v11227_v22 = vld [vmem:[%s30185_s6 + $0xc28] sm:$0xff]  ;;  %v19571_v29 = vcombine.high %v10971_v53, %v10979_v25  ;;  %v19570_v31 = vcombine.low %v10971_v53, %v10979_v25  ;;  %v11148_v53 = vld [vmem:[%s30185_s6 + $0x9b0] sm:$0xff] }
 0x976   : > { %v11235_v37 = vld [vmem:[%s30185_s6 + $0xc68] sm:$0xff]  ;;  %v11156_v25 = vld [vmem:[%s30185_s6 + $0x9f0] sm:$0xff] }
 0x977   : > { %14337 = vmatpush2.bf16.msra.mxu0 %v19682_v40  ;;  %v19827_v55 = vcombine.high %v11227_v22, %v11235_v37  ;;  %v10956_v40 = vld [vmem:[%s30185_s6 + $0x3b0] sm:$0xff]  ;;  %v19826_v1 = vcombine.low %v11227_v22, %v11235_v37  ;;  %v19508_v22 = vcombine.low %v10908_v15, %v10916_v3 }
 0x978   : > { %14378 = vmatpush2.bf16.msra.mxu1 %v19938_v30  ;;  %14338 = vmatprep.subr.bf16.mxu0 %v19667_v32  ;;  %v10964_v30 = vld [vmem:[%s30185_s6 + $0x3f0] sm:$0xff] }
 0x979   : > { %14379 = vmatprep.subr.bf16.mxu1 %v19923_v24  ;;  %v11212_v32 = vld [vmem:[%s30185_s6 + $0xbb0] sm:$0xff]  ;;  %v19557_v41 = vcombine.high %v10956_v40, %v10964_v30 }
 0x97a   : > { %v11220_v24 = vld [vmem:[%s30185_s6 + $0xbf0] sm:$0xff] }
 0x97b   : > { %14339 = vmatpush2.bf16.msra.mxu0 %v19666_v42  ;;  %v19813_v34 = vcombine.high %v11212_v32, %v11220_v24  ;;  %v10940_v42 = vld [vmem:[%s30185_s6 + $0x330] sm:$0xff]  ;;  %v19812_v49 = vcombine.low %v11212_v32, %v11220_v24  ;;  %v19748_v24 = vcombine.low %v11148_v53, %v11156_v25 }
 0x97c   : > { %14380 = vmatpush2.bf16.msra.mxu1 %v19922_v45  ;;  %14340 = vmatprep.subr.bf16.mxu0 %v19651_v5  ;;  %v10948_v45 = vld [vmem:[%s30185_s6 + $0x370] sm:$0xff]  ;;  %v19556_v5 = vcombine.low %v10956_v40, %v10964_v30 }
 0x97d   : > { %14381 = vmatprep.subr.bf16.mxu1 %v19907_v9  ;;  %v11196_v9 = vld [vmem:[%s30185_s6 + $0xb30] sm:$0xff]  ;;  %v19541_v13 = vcombine.high %v10940_v42, %v10948_v45  ;;  %v19540_v4 = vcombine.low %v10940_v42, %v10948_v45 }
 0x97e   : > { %v11132_v40 = vld [vmem:[%s30185_s6 + $0x930] sm:$0xff] }
 0x97f   : > { %14341 = vmatpush2.bf16.msra.mxu0 %v19650_v58  ;;  %v10932_v58 = vld [vmem:[%s30185_s6 + $0x2f0] sm:$0xff] }
 0x980   : > { %14382 = vmatpush2.bf16.msra.mxu1 %v19906_v44  ;;  %14342 = vmatprep.subr.bf16.mxu0 %v19635_v27  ;;  %v19797_v27 = vcombine.high %v11196_v9, %v11204_v47  ;;  %v19524_v18 = vcombine.low %v10924_v61, %v10932_v58  ;;  %v11140_v30 = vld [vmem:[%s30185_s6 + $0x970] sm:$0xff] }
 0x981   : > { %14383 = vmatprep.subr.bf16.mxu1 %v19891_v12  ;;  %v11180_v12 = vld [vmem:[%s30185_s6 + $0xab0] sm:$0xff] }
 0x982   : > { %v19781_v14 = vcombine.high %v11180_v12, %v11188_v48  ;;  %v19780_v20 = vcombine.low %v11180_v12, %v11188_v48  ;;  %v11116_v42 = vld [vmem:[%s30185_s6 + $0x8b0] sm:$0xff] }
 0x983   : > { %14343 = vmatpush2.bf16.msra.mxu0 %v19634_v60  ;;  %v11124_v45 = vld [vmem:[%s30185_s6 + $0x8f0] sm:$0xff] }
 0x984   : > { %14384 = vmatpush2.bf16.msra.mxu1 %v19890_v39  ;;  %14344 = vmatprep.subr.bf16.mxu0 %v19619_v7  ;;  %v19796_v39 = vcombine.low %v11196_v9, %v11204_v47  ;;  %v19525_v7 = vcombine.high %v10924_v61, %v10932_v58  ;;  %v19732_v9 = vcombine.low %v11132_v40, %v11140_v30  ;;  %v10852_v61 = vld [vmem:[%s30185_s6 + $0x70] sm:$0xff] }
 0x985   : > { %14385 = vmatprep.subr.bf16.mxu1 %v19875_v11  ;;  %v11100_v58 = vld [vmem:[%s30185_s6 + $0x830] sm:$0xff]  ;;  %v19716_v12 = vcombine.low %v11116_v42, %v11124_v45 }
 0x987   : > { %14345 = vmatpush2.bf16.msra.mxu0 %v19618_v35 }
 0x988   : > { %14386 = vmatpush2.bf16.msra.mxu1 %v19874_v43  ;;  %14346 = vmatprep.subr.bf16.mxu0 %v19603_v17  ;;  %v11164_v43 = vld [vmem:[%s30185_s6 + $0xa30] sm:$0xff] }
 0x989   : > { %14387 = vmatprep.subr.bf16.mxu1 %v19859_v33  ;;  %v11172_v17 = vld [vmem:[%s30185_s6 + $0xa70] sm:$0xff] }
 0x98a   : > { %v19764_v37 = vcombine.low %v11164_v43, %v11172_v17 }
 0x98b   : > { %14347 = vmatpush2.bf16.msra.mxu0 %v19602_v28 }
 0x98c   : > { %14388 = vmatpush2.bf16.msra.mxu1 %v19858_v6  ;;  %14348 = vmatprep.subr.bf16.mxu0 %v19587_v8  ;;  %v19765_v6 = vcombine.high %v11164_v43, %v11172_v17  ;;  %v10892_v8 = vld [vmem:[%s30185_s6 + $0x1b0] sm:$0xff] }
 0x98d   : > { %14389 = vmatprep.subr.bf16.mxu1 %v19843_v2  ;;  %v10900_v2 = vld [vmem:[%s30185_s6 + $0x1f0] sm:$0xff] }
 0x98e   : > { %v19492_v32 = vcombine.low %v10892_v8, %v10900_v2  ;;  %v11076_v43 = vld [vmem:[%s30185_s6 + $0x770] sm:$0xff] }
 0x98f   : > { %14349 = vmatpush2.bf16.msra.mxu0 %v19586_v23  ;;  %v19493_v23 = vcombine.high %v10892_v8, %v10900_v2  ;;  %v11324_v17 = vld [vmem:[%s30185_s6 + $0xf30] sm:$0xff] }
 0x990   : > { %14390 = vmatpush2.bf16.msra.mxu1 %v19842_v26  ;;  %14350 = vmatprep.subr.bf16.mxu0 %v19571_v29  ;;  %v19749_v26 = vcombine.high %v11148_v53, %v11156_v25  ;;  %v10876_v29 = vld [vmem:[%s30185_s6 + $0x130] sm:$0xff] }
 0x991   : > { %14391 = vmatprep.subr.bf16.mxu1 %v19827_v55  ;;  %v10884_v55 = vld [vmem:[%s30185_s6 + $0x170] sm:$0xff] }
 0x992   : > { %v11308_v8 = vld [vmem:[%s30185_s6 + $0xeb0] sm:$0xff] }
 0x993   : > { %14351 = vmatpush2.bf16.msra.mxu0 %v19570_v31  ;;  %v19477_v31 = vcombine.high %v10876_v29, %v10884_v55  ;;  %v11316_v2 = vld [vmem:[%s30185_s6 + $0xef0] sm:$0xff] }
 0x994   : > { %14392 = vmatpush2.bf16.msra.mxu1 %v19826_v1  ;;  %14402 = vmatprep.subr.bf16.mxu0 %v19557_v41  ;;  %v19733_v1 = vcombine.high %v11132_v40, %v11140_v30  ;;  %v10860_v41 = vld [vmem:[%s30185_s6 + $0xb0] sm:$0xff]  ;;  %v19908_v30 = vcombine.low %v11308_v8, %v11316_v2 }
 0x995   : > { %14443 = vmatprep.subr.bf16.mxu1 %v19813_v34  ;;  %v10868_v34 = vld [vmem:[%s30185_s6 + $0xf0] sm:$0xff] }
 0x996   : > { %v14108_v44 = vpop.f32.mrf.mxu0  ;;  %14353 = vmatmul.mubr.bf16.vlgmr.msra.gmra.mxu0 %v27058_v57  ;;  %v19461_v47 = vcombine.high %v10860_v41, %v10868_v34 }
 0x997   : > { %v14149_v63 = vpop.f32.mrf.mxu1  ;;  %14394 = vmatmul.mubr.bf16.vlgmr.msra.gmra.mxu1 %v27062_v59  ;;  %14403 = vmatpush1.bf16.msra.mxu0 %v19556_v5  ;;  %v19476_v5 = vcombine.low %v10876_v29, %v10884_v55  ;;  %v11292_v29 = vld [vmem:[%s30185_s6 + $0xe30] sm:$0xff] }
 0x998   : > { %v28068_v0 = vadd.f32 %v14149_v63, %v14108_v44  ;;  %14434 = vmatprep.mubr.bf16.mxu0 %v27050_v50  ;;  %14444 = vmatpush1.bf16.msra.mxu1 %v19812_v49  ;;  %v14110_v60 = vpop.f32.mrf.mxu0  ;;  %v19717_v49 = vcombine.high %v11116_v42, %v11124_v45  ;;  %v11108_v44 = vld [vmem:[%s30185_s6 + $0x870] sm:$0xff] }
 0x999   : > { %14475 = vmatprep.mubr.bf16.mxu1 %v27054_v51  ;;  %v14151_v11 = vpop.f32.mrf.mxu1  ;;  %14404 = vmatprep.subr.bf16.mxu0 %v19541_v13  ;;  %v10844_v13 = vld [vmem:[%s30185_s6 + $0x30] sm:$0xff]  ;;  %v19701_v63 = vcombine.high %v11100_v58, %v11108_v44 }
 0x99a   : > { %v28078_v16 = vadd.f32 %v14151_v11, %v14110_v60  ;;  %v14112_v35 = vpop.f32.mrf.mxu0  ;;  %14445 = vmatprep.subr.bf16.mxu1 %v19797_v27  ;;  %v19460_v27 = vcombine.low %v10860_v41, %v10868_v34  ;;  %v19445_v48 = vcombine.high %v10844_v13, %v10852_v61  ;;  %v11092_v60 = vld [vmem:[%s30185_s6 + $0x7f0] sm:$0xff]  ;;  %v19444_v11 = vcombine.low %v10844_v13, %v10852_v61 }
 0x99b   : > { %v14153_v33 = vpop.f32.mrf.mxu1  ;;  %14405 = vmatpush1.bf16.msra.mxu0 %v19540_v4  ;;  %v11084_v4 = vld [vmem:[%s30185_s6 + $0x7b0] sm:$0xff] }
 0x99c   : > { %14446 = vmatpush1.bf16.msra.mxu1 %v19796_v39  ;;  %v14113_v19 = vpop.f32.mrf.mxu0  ;;  %14406 = vmatprep.subr.bf16.mxu0 %v19525_v7  ;;  %v11340_v39 = vld [vmem:[%s30185_s6 + $0xfb0] sm:$0xff]  ;;  %v19685_v15 = vcombine.high %v11084_v4, %v11092_v60 }
 0x99d   : > { %v14154_v28 = vpop.f32.mrf.mxu1  ;;  %14447 = vmatprep.subr.bf16.mxu1 %v19781_v14  ;;  %v11348_v7 = vld [vmem:[%s30185_s6 + $0xff0] sm:$0xff]  ;;  %v19700_v14 = vcombine.low %v11100_v58, %v11108_v44 }
 0x99e   : > { %v19941_v3 = vcombine.high %v11340_v39, %v11348_v7  ;;  %v11068_v35 = vld [vmem:[%s30185_s6 + $0x730] sm:$0xff]  ;;  %v19940_v19 = vcombine.low %v11340_v39, %v11348_v7 }
 0x99f   : > { %14407 = vmatpush1.bf16.msra.mxu0 %v19524_v18  ;;  %v11332_v33 = vld [vmem:[%s30185_s6 + $0xf70] sm:$0xff]  ;;  %v19684_v18 = vcombine.low %v11084_v4, %v11092_v60  ;;  %v19668_v53 = vcombine.low %v11068_v35, %v11076_v43 }
 0x9a0   : > { %14448 = vmatpush1.bf16.msra.mxu1 %v19780_v20  ;;  %14408 = vmatprep.subr.bf16.mxu0 %v19509_v36  ;;  %v19669_v20 = vcombine.high %v11068_v35, %v11076_v43  ;;  %v19925_v36 = vcombine.high %v11324_v17, %v11332_v33  ;;  %v11052_v28 = vld [vmem:[%s30185_s6 + $0x6b0] sm:$0xff]  ;;  %v19924_v25 = vcombine.low %v11324_v17, %v11332_v33 }
 0x9a1   : > { %14449 = vmatprep.subr.bf16.mxu1 %v19765_v6  ;;  %v11060_v6 = vld [vmem:[%s30185_s6 + $0x6f0] sm:$0xff] }
 0x9a2   : > { %v11300_v55 = vld [vmem:[%s30185_s6 + $0xe70] sm:$0xff]  ;;  %v19652_v40 = vcombine.low %v11052_v28, %v11060_v6 }
 0x9a3   : > { %14409 = vmatpush1.bf16.msra.mxu0 %v19508_v22  ;;  %v19653_v22 = vcombine.high %v11052_v28, %v11060_v6  ;;  %v11276_v41 = vld [vmem:[%s30185_s6 + $0xdb0] sm:$0xff]  ;;  %v19892_v45 = vcombine.low %v11292_v29, %v11300_v55  ;;  %v11213_v28 = vld [vmem:[%s30185_s6 + $0xbb8] sm:$0xff] }
 0x9a4   : > { %14450 = vmatpush1.bf16.msra.mxu1 %v19764_v37  ;;  %14410 = vmatprep.subr.bf16.mxu0 %v19493_v23  ;;  %v19909_v37 = vcombine.high %v11308_v8, %v11316_v2  ;;  %v11036_v23 = vld [vmem:[%s30185_s6 + $0x630] sm:$0xff]  ;;  %v11221_v6 = vld [vmem:[%s30185_s6 + $0xbf8] sm:$0xff] }
 0x9a5   : > { %14451 = vmatprep.subr.bf16.mxu1 %v19749_v26  ;;  %v11044_v26 = vld [vmem:[%s30185_s6 + $0x670] sm:$0xff] }
 0x9a6   : > { %v11284_v34 = vld [vmem:[%s30185_s6 + $0xdf0] sm:$0xff]  ;;  %v19636_v42 = vcombine.low %v11036_v23, %v11044_v26 }
 0x9a7   : > { %14411 = vmatpush1.bf16.msra.mxu0 %v19492_v32  ;;  %v19637_v32 = vcombine.high %v11036_v23, %v11044_v26  ;;  %v11260_v13 = vld [vmem:[%s30185_s6 + $0xd30] sm:$0xff]  ;;  %v19876_v44 = vcombine.low %v11276_v41, %v11284_v34  ;;  %v11197_v26 = vld [vmem:[%s30185_s6 + $0xb38] sm:$0xff] }
 0x9a8   : > { %14452 = vmatpush1.bf16.msra.mxu1 %v19748_v24  ;;  %14412 = vmatprep.subr.bf16.mxu0 %v19477_v31  ;;  %v19893_v24 = vcombine.high %v11292_v29, %v11300_v55  ;;  %v11020_v31 = vld [vmem:[%s30185_s6 + $0x5b0] sm:$0xff]  ;;  %v11205_v29 = vld [vmem:[%s30185_s6 + $0xb78] sm:$0xff]  ;;  %v19814_v55 = vcombine.low %v11213_v28, %v11221_v6 }
 0x9a9   : > { %14453 = vmatprep.subr.bf16.mxu1 %v19733_v1  ;;  %v11028_v1 = vld [vmem:[%s30185_s6 + $0x5f0] sm:$0xff] }
 0x9aa   : > { %v11268_v61 = vld [vmem:[%s30185_s6 + $0xd70] sm:$0xff]  ;;  %v19620_v58 = vcombine.low %v11020_v31, %v11028_v1 }
 0x9ab   : > { %14413 = vmatpush1.bf16.msra.mxu0 %v19476_v5  ;;  %v19621_v5 = vcombine.high %v11020_v31, %v11028_v1  ;;  %v11244_v4 = vld [vmem:[%s30185_s6 + $0xcb0] sm:$0xff]  ;;  %v19860_v7 = vcombine.low %v11260_v13, %v11268_v61  ;;  %v19799_v31 = vcombine.high %v11197_v26, %v11205_v29  ;;  %v11181_v1 = vld [vmem:[%s30185_s6 + $0xab8] sm:$0xff] }
 0x9ac   : > { %14454 = vmatpush1.bf16.msra.mxu1 %v19732_v9  ;;  %14414 = vmatprep.subr.bf16.mxu0 %v19461_v47  ;;  %v19877_v9 = vcombine.high %v11276_v41, %v11284_v34  ;;  %v11004_v47 = vld [vmem:[%s30185_s6 + $0x530] sm:$0xff]  ;;  %v11189_v41 = vld [vmem:[%s30185_s6 + $0xaf8] sm:$0xff] }
 0x9ad   : > { %14455 = vmatprep.subr.bf16.mxu1 %v19717_v49  ;;  %v11012_v49 = vld [vmem:[%s30185_s6 + $0x570] sm:$0xff] }
 0x9ae   : > { %v11252_v60 = vld [vmem:[%s30185_s6 + $0xcf0] sm:$0xff]  ;;  %v19604_v39 = vcombine.low %v11004_v47, %v11012_v49 }
 0x9af   : > { %14415 = vmatpush1.bf16.msra.mxu0 %v19460_v27  ;;  %v19605_v27 = vcombine.high %v11004_v47, %v11012_v49  ;;  %v11228_v35 = vld [vmem:[%s30185_s6 + $0xc30] sm:$0xff]  ;;  %v19844_v33 = vcombine.low %v11244_v4, %v11252_v60 }
 0x9b0   : > { %14456 = vmatpush1.bf16.msra.mxu1 %v19716_v12  ;;  %14416 = vmatprep.subr.bf16.mxu0 %v19445_v48  ;;  %v19861_v12 = vcombine.high %v11260_v13, %v11268_v61  ;;  %v10988_v48 = vld [vmem:[%s30185_s6 + $0x4b0] sm:$0xff]  ;;  %v19783_v13 = vcombine.high %v11181_v1, %v11189_v41  ;;  %v10909_v61 = vld [vmem:[%s30185_s6 + $0x238] sm:$0xff] }
 0x9b1   : > { %14457 = vmatprep.subr.bf16.mxu1 %v19701_v63  ;;  %v10996_v63 = vld [vmem:[%s30185_s6 + $0x4f0] sm:$0xff] }
 0x9b2   : > { %v11236_v43 = vld [vmem:[%s30185_s6 + $0xc70] sm:$0xff]  ;;  %v19588_v17 = vcombine.low %v10988_v48, %v10996_v63 }
 0x9b3   : > { %14417 = vmatpush1.bf16.msra.mxu0 %v19444_v11  ;;  %v19589_v11 = vcombine.high %v10988_v48, %v10996_v63  ;;  %v19828_v2 = vcombine.low %v11228_v35, %v11236_v43 }
 0x9b4   : > { %14458 = vmatpush1.bf16.msra.mxu1 %v19700_v14  ;;  %14418 = vmatprep.subr.bf16.mxu0 %v19685_v15  ;;  %v19845_v14 = vcombine.high %v11244_v4, %v11252_v60  ;;  %v10972_v15 = vld [vmem:[%s30185_s6 + $0x430] sm:$0xff]  ;;  %v19782_v4 = vcombine.low %v11181_v1, %v11189_v41 }
 0x9b5   : > { %14459 = vmatprep.subr.bf16.mxu1 %v19941_v3  ;;  %v10980_v3 = vld [vmem:[%s30185_s6 + $0x470] sm:$0xff] }
 0x9b6   : > { %v19572_v8 = vcombine.low %v10972_v15, %v10980_v3 }
 0x9b7   : > { %14419 = vmatpush2.bf16.msra.mxu0 %v19684_v18  ;;  %v19573_v18 = vcombine.high %v10972_v15, %v10980_v3  ;;  %v11149_v15 = vld [vmem:[%s30185_s6 + $0x9b8] sm:$0xff] }
 0x9b8   : > { %14460 = vmatpush2.bf16.msra.mxu1 %v19940_v19  ;;  %14420 = vmatprep.subr.bf16.mxu0 %v19669_v20  ;;  %v19829_v19 = vcombine.high %v11228_v35, %v11236_v43  ;;  %v10957_v20 = vld [vmem:[%s30185_s6 + $0x3b8] sm:$0xff] }
 0x9b9   : > { %14461 = vmatprep.subr.bf16.mxu1 %v19925_v36  ;;  %v10965_v36 = vld [vmem:[%s30185_s6 + $0x3f8] sm:$0xff] }
 0x9ba   : > { %v19558_v23 = vcombine.low %v10957_v20, %v10965_v36  ;;  %v11157_v3 = vld [vmem:[%s30185_s6 + $0x9f8] sm:$0xff] }
 0x9bb   : > { %14421 = vmatpush2.bf16.msra.mxu0 %v19668_v53  ;;  %v19559_v53 = vcombine.high %v10957_v20, %v10965_v36  ;;  %v11133_v20 = vld [vmem:[%s30185_s6 + $0x938] sm:$0xff] }
 0x9bc   : > { %14462 = vmatpush2.bf16.msra.mxu1 %v19924_v25  ;;  %14422 = vmatprep.subr.bf16.mxu0 %v19653_v22  ;;  %v19815_v25 = vcombine.high %v11213_v28, %v11221_v6  ;;  %v10941_v22 = vld [vmem:[%s30185_s6 + $0x338] sm:$0xff]  ;;  %v19750_v6 = vcombine.low %v11149_v15, %v11157_v3 }
 0x9bd   : > { %14463 = vmatprep.subr.bf16.mxu1 %v19909_v37  ;;  %v10949_v37 = vld [vmem:[%s30185_s6 + $0x378] sm:$0xff] }
 0x9be   : > { %v11141_v36 = vld [vmem:[%s30185_s6 + $0x978] sm:$0xff] }
 0x9bf   : > { %14423 = vmatpush2.bf16.msra.mxu0 %v19652_v40  ;;  %v19543_v40 = vcombine.high %v10941_v22, %v10949_v37 }
 0x9c0   : > { %14464 = vmatpush2.bf16.msra.mxu1 %v19908_v30  ;;  %14424 = vmatprep.subr.bf16.mxu0 %v19637_v32  ;;  %v10925_v30 = vld [vmem:[%s30185_s6 + $0x2b8] sm:$0xff] }
 0x9c1   : > { %14465 = vmatprep.subr.bf16.mxu1 %v19893_v24  ;;  %v10933_v32 = vld [vmem:[%s30185_s6 + $0x2f8] sm:$0xff] }
 0x9c2   : > { %v19527_v47 = vcombine.high %v10925_v30, %v10933_v32  ;;  %v19526_v48 = vcombine.low %v10925_v30, %v10933_v32  ;;  %v10853_v30 = vld [vmem:[%s30185_s6 + $0x78] sm:$0xff] }
 0x9c3   : > { %14425 = vmatpush2.bf16.msra.mxu0 %v19636_v42  ;;  %v19542_v42 = vcombine.low %v10941_v22, %v10949_v37  ;;  %v11117_v22 = vld [vmem:[%s30185_s6 + $0x8b8] sm:$0xff] }
 0x9c4   : > { %14466 = vmatpush2.bf16.msra.mxu1 %v19892_v45  ;;  %14426 = vmatprep.subr.bf16.mxu0 %v19621_v5  ;;  %v11125_v37 = vld [vmem:[%s30185_s6 + $0x8f8] sm:$0xff] }
 0x9c5   : > { %14467 = vmatprep.subr.bf16.mxu1 %v19877_v9  ;;  %v19798_v9 = vcombine.low %v11197_v26, %v11205_v29  ;;  %v19734_v26 = vcombine.low %v11133_v20, %v11141_v36  ;;  %v11101_v32 = vld [vmem:[%s30185_s6 + $0x838] sm:$0xff]  ;;  %v19718_v1 = vcombine.low %v11117_v22, %v11125_v37 }
 0x9c7   : > { %14427 = vmatpush2.bf16.msra.mxu0 %v19620_v58  ;;  %v10917_v58 = vld [vmem:[%s30185_s6 + $0x278] sm:$0xff] }
 0x9c8   : > { %14468 = vmatpush2.bf16.msra.mxu1 %v19876_v44  ;;  %14428 = vmatprep.subr.bf16.mxu0 %v19605_v27  ;;  %v11165_v27 = vld [vmem:[%s30185_s6 + $0xa38] sm:$0xff]  ;;  %v19511_v60 = vcombine.high %v10909_v61, %v10917_v58  ;;  %v19510_v35 = vcombine.low %v10909_v61, %v10917_v58 }
 0x9c9   : > { %14469 = vmatprep.subr.bf16.mxu1 %v19861_v12 }
 0x9cb   : > { %14429 = vmatpush2.bf16.msra.mxu0 %v19604_v39 }
 0x9cc   : > { %14470 = vmatpush2.bf16.msra.mxu1 %v19860_v7  ;;  %14430 = vmatprep.subr.bf16.mxu0 %v19589_v11  ;;  %v10893_v11 = vld [vmem:[%s30185_s6 + $0x1b8] sm:$0xff] }
 0x9cd   : > { %14471 = vmatprep.subr.bf16.mxu1 %v19845_v14  ;;  %v10901_v14 = vld [vmem:[%s30185_s6 + $0x1f8] sm:$0xff] }
 0x9ce   : > { %v19494_v28 = vcombine.low %v10893_v11, %v10901_v14 }
 0x9cf   : > { %14431 = vmatpush2.bf16.msra.mxu0 %v19588_v17  ;;  %v19495_v17 = vcombine.high %v10893_v11, %v10901_v14  ;;  %v11309_v11 = vld [vmem:[%s30185_s6 + $0xeb8] sm:$0xff] }
 0x9d0   : > { %14472 = vmatpush2.bf16.msra.mxu1 %v19844_v33  ;;  %14432 = vmatprep.subr.bf16.mxu0 %v19573_v18  ;;  %v19751_v33 = vcombine.high %v11149_v15, %v11157_v3  ;;  %v10877_v18 = vld [vmem:[%s30185_s6 + $0x138] sm:$0xff] }
 0x9d1   : > { %14473 = vmatprep.subr.bf16.mxu1 %v19829_v19  ;;  %v10885_v19 = vld [vmem:[%s30185_s6 + $0x178] sm:$0xff] }
 0x9d2   : > { %v11317_v14 = vld [vmem:[%s30185_s6 + $0xef8] sm:$0xff] }
 0x9d3   : > { %14433 = vmatpush2.bf16.msra.mxu0 %v19572_v8  ;;  %v19479_v8 = vcombine.high %v10877_v18, %v10885_v19 }
 0x9d4   : > { %14474 = vmatpush2.bf16.msra.mxu1 %v19828_v2  ;;  %14484 = vmatprep.subr.bf16.mxu0 %v19559_v53  ;;  %v19735_v2 = vcombine.high %v11133_v20, %v11141_v36  ;;  %v10861_v53 = vld [vmem:[%s30185_s6 + $0xb8] sm:$0xff]  ;;  %v19910_v36 = vcombine.low %v11309_v11, %v11317_v14 }
 0x9d5   : > { %14525 = vmatprep.subr.bf16.mxu1 %v19815_v25  ;;  %v10869_v25 = vld [vmem:[%s30185_s6 + $0xf8] sm:$0xff] }
 0x9d6   : > { %v14190_v24 = vpop.f32.mrf.mxu0  ;;  %14435 = vmatmul.mubr.bf16.vlgmr.msra.gmra.mxu0 %v27058_v57  ;;  %v19463_v29 = vcombine.high %v10861_v53, %v10869_v25 }
 0x9d7   : > { %v14231_v34 = vpop.f32.mrf.mxu1  ;;  %14476 = vmatmul.mubr.bf16.vlgmr.msra.gmra.mxu1 %v27062_v59  ;;  %14485 = vmatpush1.bf16.msra.mxu0 %v19558_v23  ;;  %v19478_v23 = vcombine.low %v10877_v18, %v10885_v19  ;;  %v11293_v18 = vld [vmem:[%s30185_s6 + $0xe38] sm:$0xff] }
 0x9d8   : > { %v28268_v45 = vadd.f32 %v14231_v34, %v14190_v24  ;;  %14516 = vmatprep.mubr.bf16.mxu0 %v27050_v50  ;;  %14526 = vmatpush1.bf16.msra.mxu1 %v19814_v55  ;;  %v14192_v5 = vpop.f32.mrf.mxu0  ;;  %v19719_v55 = vcombine.high %v11117_v22, %v11125_v37  ;;  %v11109_v24 = vld [vmem:[%s30185_s6 + $0x878] sm:$0xff] }
 0x9d9   : > { %14557 = vmatprep.mubr.bf16.mxu1 %v27054_v51  ;;  %v14233_v49 = vpop.f32.mrf.mxu1  ;;  %14486 = vmatprep.subr.bf16.mxu0 %v19543_v40  ;;  %v11173_v51 = vld [vmem:[%s30185_s6 + $0xa78] sm:$0xff]  ;;  %v19703_v34 = vcombine.high %v11101_v32, %v11109_v24 }
 0x9da   : > { %v28278_v44 = vadd.f32 %v14233_v49, %v14192_v5  ;;  %v14194_v50 = vpop.f32.mrf.mxu0  ;;  %14527 = vmatprep.subr.bf16.mxu1 %v19799_v31  ;;  %v19767_v7 = vcombine.high %v11165_v27, %v11173_v51  ;;  %v19766_v43 = vcombine.low %v11165_v27, %v11173_v51  ;;  %v10845_v40 = vld [vmem:[%s30185_s6 + $0x38] sm:$0xff]  ;;  %v19462_v31 = vcombine.low %v10861_v53, %v10869_v25 }
 0x9db   : > { %v14235_v12 = vpop.f32.mrf.mxu1  ;;  %14487 = vmatpush1.bf16.msra.mxu0 %v19542_v42  ;;  %v19447_v41 = vcombine.high %v10845_v40, %v10853_v30  ;;  %v11085_v42 = vld [vmem:[%s30185_s6 + $0x7b8] sm:$0xff]  ;;  %v19446_v49 = vcombine.low %v10845_v40, %v10853_v30 }
 0x9dc   : > { %14528 = vmatpush1.bf16.msra.mxu1 %v19798_v9  ;;  %v14195_v63 = vpop.f32.mrf.mxu0  ;;  %14488 = vmatprep.subr.bf16.mxu0 %v19527_v47  ;;  %v11093_v5 = vld [vmem:[%s30185_s6 + $0x7f8] sm:$0xff] }
 0x9dd   : > { %v14236_v39 = vpop.f32.mrf.mxu1  ;;  %14529 = vmatprep.subr.bf16.mxu1 %v19783_v13  ;;  %v11341_v9 = vld [vmem:[%s30185_s6 + $0xfb8] sm:$0xff]  ;;  %v19702_v13 = vcombine.low %v11101_v32, %v11109_v24  ;;  %v19687_v61 = vcombine.high %v11085_v42, %v11093_v5 }
 0x9de   : > { %v11349_v47 = vld [vmem:[%s30185_s6 + $0xff8] sm:$0xff] }
 0x9df   : > { %14489 = vmatpush1.bf16.msra.mxu0 %v19526_v48  ;;  %v19943_v58 = vcombine.high %v11341_v9, %v11349_v47  ;;  %v11069_v50 = vld [vmem:[%s30185_s6 + $0x738] sm:$0xff]  ;;  %v19686_v48 = vcombine.low %v11085_v42, %v11093_v5  ;;  %v19942_v63 = vcombine.low %v11341_v9, %v11349_v47 }
 0x9e0   : > { %14530 = vmatpush1.bf16.msra.mxu1 %v19782_v4  ;;  %14490 = vmatprep.subr.bf16.mxu0 %v19511_v60  ;;  %v11077_v27 = vld [vmem:[%s30185_s6 + $0x778] sm:$0xff] }
 0x9e1   : > { %14531 = vmatprep.subr.bf16.mxu1 %v19767_v7  ;;  %v11325_v51 = vld [vmem:[%s30185_s6 + $0xf38] sm:$0xff]  ;;  %v19671_v4 = vcombine.high %v11069_v50, %v11077_v27  ;;  %v19670_v15 = vcombine.low %v11069_v50, %v11077_v27 }
 0x9e2   : > { %v11333_v12 = vld [vmem:[%s30185_s6 + $0xf78] sm:$0xff] }
 0x9e3   : > { %14491 = vmatpush1.bf16.msra.mxu0 %v19510_v35  ;;  %v19927_v60 = vcombine.high %v11325_v51, %v11333_v12  ;;  %v11053_v39 = vld [vmem:[%s30185_s6 + $0x6b8] sm:$0xff]  ;;  %v19926_v3 = vcombine.low %v11325_v51, %v11333_v12 }
 0x9e4   : > { %14532 = vmatpush1.bf16.msra.mxu1 %v19766_v43  ;;  %14492 = vmatprep.subr.bf16.mxu0 %v19495_v17  ;;  %v11061_v7 = vld [vmem:[%s30185_s6 + $0x6f8] sm:$0xff]  ;;  %v19911_v43 = vcombine.high %v11309_v11, %v11317_v14  ;;  %v14567_v11 = vmax.f32 %v27672_v62, 0.0  ;;  %v14569_v14 = vmax.f32 %v27872_v38, 0.0  ;;  %v22671_v38 = vld [vmem:[%s30186_s7 + $0x2c4] ss:$16 sps:$4 sm:$0xff]  }
 0x9e5   : > { %14533 = vmatprep.subr.bf16.mxu1 %v19751_v33  ;;  %v19655_v35 = vcombine.high %v11053_v39, %v11061_v7  ;;  %v11037_v17 = vld [vmem:[%s30185_s6 + $0x638] sm:$0xff]  ;;  %v19654_v20 = vcombine.low %v11053_v39, %v11061_v7  ;;  %v22662_v39 = vld [vmem:[%s30186_s7 + $0xe4] ss:$16 sps:$4 sm:$0xff]  }
 0x9e6   : > { %v11045_v33 = vld [vmem:[%s30185_s6 + $0x678] sm:$0xff]  ;;  %v22665_v7 = vld [vmem:[%s30186_s7 + $0x2e4] ss:$16 sps:$4 sm:$0xff]  }
 0x9e7   : > { %14493 = vmatpush1.bf16.msra.mxu0 %v19494_v28  ;;  %v11301_v19 = vld [vmem:[%s30185_s6 + $0xe78] sm:$0xff]  ;;  %v19639_v28 = vcombine.high %v11037_v17, %v11045_v33  ;;  %v19638_v22 = vcombine.low %v11037_v17, %v11045_v33  ;;  %v28453_v17 = vpack.c.bf16 %v14569_v14, %v14569_v14  ;;  %v22723_v14 = vld [vmem:[%s30186_s7 + $0x3a0] ss:$16 sps:$4 sm:$0xff]  }
 0x9e8   : > { %14534 = vmatpush1.bf16.msra.mxu1 %v19750_v6  ;;  %14494 = vmatprep.subr.bf16.mxu0 %v19479_v8  ;;  %v19895_v6 = vcombine.high %v11293_v18, %v11301_v19  ;;  %v11021_v8 = vld [vmem:[%s30185_s6 + $0x5b8] sm:$0xff]  ;;  %v19894_v37 = vcombine.low %v11293_v18, %v11301_v19  ;;  %v22666_v18 = vld [vmem:[%s30186_s7 + $0xc0] ss:$16 sps:$4 sm:$0xff]  }
 0x9e9   : > { %14535 = vmatprep.subr.bf16.mxu1 %v19735_v2  ;;  %v11029_v2 = vld [vmem:[%s30185_s6 + $0x5f8] sm:$0xff] }
 0x9ea   : > { %v11277_v53 = vld [vmem:[%s30185_s6 + $0xdb8] sm:$0xff]  ;;  %v19622_v32 = vcombine.low %v11021_v8, %v11029_v2 }
 0x9eb   : > { %14495 = vmatpush1.bf16.msra.mxu0 %v19478_v23  ;;  %v11285_v25 = vld [vmem:[%s30185_s6 + $0xdf8] sm:$0xff]  ;;  %v19623_v23 = vcombine.high %v11021_v8, %v11029_v2 }
 0x9ec   : > { %14536 = vmatpush1.bf16.msra.mxu1 %v19734_v26  ;;  %14496 = vmatprep.subr.bf16.mxu0 %v19463_v29  ;;  %v19879_v26 = vcombine.high %v11277_v53, %v11285_v25  ;;  %v11005_v29 = vld [vmem:[%s30185_s6 + $0x538] sm:$0xff]  ;;  %v19878_v24 = vcombine.low %v11277_v53, %v11285_v25  ;;  %v22672_v53 = vld [vmem:[%s30186_s7 + $0xa0] ss:$16 sps:$4 sm:$0xff]  }
 0x9ed   : > { %14537 = vmatprep.subr.bf16.mxu1 %v19719_v55  ;;  %v11013_v55 = vld [vmem:[%s30185_s6 + $0x578] sm:$0xff] }
 0x9ee   : > { %v11261_v40 = vld [vmem:[%s30185_s6 + $0xd38] sm:$0xff]  ;;  %v19606_v9 = vcombine.low %v11005_v29, %v11013_v55 }
 0x9ef   : > { %14497 = vmatpush1.bf16.msra.mxu0 %v19462_v31  ;;  %v11269_v30 = vld [vmem:[%s30185_s6 + $0xd78] sm:$0xff]  ;;  %v19607_v31 = vcombine.high %v11005_v29, %v11013_v55  ;;  %v22678_v29 = vld [vmem:[%s30186_s7 + $0x80] ss:$16 sps:$4 sm:$0xff]  }
 0x9f0   : > { %14538 = vmatpush1.bf16.msra.mxu1 %v19718_v1  ;;  %14498 = vmatprep.subr.bf16.mxu0 %v19447_v41  ;;  %v19863_v1 = vcombine.high %v11261_v40, %v11269_v30  ;;  %v10989_v41 = vld [vmem:[%s30185_s6 + $0x4b8] sm:$0xff]  ;;  %v19862_v47 = vcombine.low %v11261_v40, %v11269_v30  ;;  %v22681_v55 = vld [vmem:[%s30186_s7 + $0x280] ss:$16 sps:$4 sm:$0xff]   ;;  %v22686_v40 = vld [vmem:[%s30186_s7 + $0x64] ss:$16 sps:$4 sm:$0xff]  }
 0x9f1   : > { %14539 = vmatprep.subr.bf16.mxu1 %v19703_v34  ;;  %v10997_v34 = vld [vmem:[%s30185_s6 + $0x4f8] sm:$0xff]  ;;  %v22689_v30 = vld [vmem:[%s30186_s7 + $0x264] ss:$16 sps:$4 sm:$0xff]  }
 0x9f2   : > { %v11245_v42 = vld [vmem:[%s30185_s6 + $0xcb8] sm:$0xff]  ;;  %v19590_v51 = vcombine.low %v10989_v41, %v10997_v34 }
 0x9f3   : > { %14499 = vmatpush1.bf16.msra.mxu0 %v19446_v49  ;;  %v11253_v5 = vld [vmem:[%s30185_s6 + $0xcf8] sm:$0xff]  ;;  %v19591_v49 = vcombine.high %v10989_v41, %v10997_v34  ;;  %v22690_v41 = vld [vmem:[%s30186_s7 + $0x40] ss:$16 sps:$4 sm:$0xff]  }
 0x9f4   : > { %14540 = vmatpush1.bf16.msra.mxu1 %v19702_v13  ;;  %14500 = vmatprep.subr.bf16.mxu0 %v19687_v61  ;;  %v19847_v13 = vcombine.high %v11245_v42, %v11253_v5  ;;  %v10973_v61 = vld [vmem:[%s30185_s6 + $0x438] sm:$0xff]  ;;  %v19846_v12 = vcombine.low %v11245_v42, %v11253_v5  ;;  %v22693_v34 = vld [vmem:[%s30186_s7 + $0x240] ss:$16 sps:$4 sm:$0xff]   ;;  %v22698_v42 = vld [vmem:[%s30186_s7 + $0x24] ss:$16 sps:$4 sm:$0xff]  }
 0x9f5   : > { %14541 = vmatprep.subr.bf16.mxu1 %v19943_v58  ;;  %v10981_v58 = vld [vmem:[%s30185_s6 + $0x478] sm:$0xff]  ;;  %v22701_v5 = vld [vmem:[%s30186_s7 + $0x224] ss:$16 sps:$4 sm:$0xff]  }
 0x9f6   : > { %v11229_v50 = vld [vmem:[%s30185_s6 + $0xc38] sm:$0xff] }
 0x9f7   : > { %14501 = vmatpush2.bf16.msra.mxu0 %v19686_v48  ;;  %v11237_v27 = vld [vmem:[%s30185_s6 + $0xc78] sm:$0xff]  ;;  %v19575_v48 = vcombine.high %v10973_v61, %v10981_v58 }
 0x9f8   : > { %14542 = vmatpush2.bf16.msra.mxu1 %v19942_v63  ;;  %14502 = vmatprep.subr.bf16.mxu0 %v19671_v4  ;;  %v19831_v63 = vcombine.high %v11229_v50, %v11237_v27  ;;  %v19574_v4 = vcombine.low %v10973_v61, %v10981_v58  ;;  %v22702_v61 = vld [vmem:[%s30186_s7] ss:$16 sps:$4 sm:$0xff]  }
 0x9f9   : > { %14543 = vmatprep.subr.bf16.mxu1 %v19927_v60  ;;  %v19830_v60 = vcombine.low %v11229_v50, %v11237_v27  ;;  %v22705_v58 = vld [vmem:[%s30186_s7 + $0x200] ss:$16 sps:$4 sm:$0xff]   ;;  %v22710_v50 = vld [vmem:[%s30186_s7 + $0x1e4] ss:$16 sps:$4 sm:$0xff]  }
 0x9fa   : > { %v22713_v27 = vld [vmem:[%s30186_s7 + $0x3e4] ss:$16 sps:$4 sm:$0xff]  }
 0x9fb   : > { %14503 = vmatpush2.bf16.msra.mxu0 %v19670_v15  ;;  %v22660_v15 = vld [vmem:[%s30186_s7 + $0xe0] ss:$16 sps:$4 sm:$0xff]  }
 0x9fc   : > { %14544 = vmatpush2.bf16.msra.mxu1 %v19926_v3  ;;  %14504 = vmatprep.subr.bf16.mxu0 %v19655_v35  ;;  %v22663_v3 = vld [vmem:[%s30186_s7 + $0x2e0] ss:$16 sps:$4 sm:$0xff]   ;;  %v22668_v35 = vld [vmem:[%s30186_s7 + $0xc4] ss:$16 sps:$4 sm:$0xff]  }
 0x9fd   : > { %14545 = vmatprep.subr.bf16.mxu1 %v19911_v43  ;;  %v28447_v43 = vpack.c.bf16 %v14567_v11, %v14567_v11  ;;  %v22720_v11 = vld [vmem:[%s30186_s7 + $0x1a0] ss:$16 sps:$4 sm:$0xff]  }
 0x9ff   : > { %14505 = vmatpush2.bf16.msra.mxu0 %v19654_v20  ;;  %v22669_v20 = vld [vmem:[%s30186_s7 + $0x2c0] ss:$16 sps:$4 sm:$0xff]  }
 0xa00   : > { %14546 = vmatpush2.bf16.msra.mxu1 %v19910_v36  ;;  %14506 = vmatprep.subr.bf16.mxu0 %v19639_v28  ;;  %v22674_v36 = vld [vmem:[%s30186_s7 + $0xa4] ss:$16 sps:$4 sm:$0xff]  }
 0xa01   : > { %14547 = vmatprep.subr.bf16.mxu1 %v19895_v6  ;;  %v22677_v28 = vld [vmem:[%s30186_s7 + $0x2a4] ss:$16 sps:$4 sm:$0xff]  }
 0xa03   : > { %14507 = vmatpush2.bf16.msra.mxu0 %v19638_v22  ;;  %v22675_v22 = vld [vmem:[%s30186_s7 + $0x2a0] ss:$16 sps:$4 sm:$0xff]  }
 0xa04   : > { %14548 = vmatpush2.bf16.msra.mxu1 %v19894_v37  ;;  %14508 = vmatprep.subr.bf16.mxu0 %v19623_v23  ;;  %v22680_v37 = vld [vmem:[%s30186_s7 + $0x84] ss:$16 sps:$4 sm:$0xff]  }
 0xa05   : > { %14549 = vmatprep.subr.bf16.mxu1 %v19879_v26  ;;  %v22683_v26 = vld [vmem:[%s30186_s7 + $0x284] ss:$16 sps:$4 sm:$0xff]  }
 0xa07   : > { %14509 = vmatpush2.bf16.msra.mxu0 %v19622_v32  ;;  %v22684_v32 = vld [vmem:[%s30186_s7 + $0x60] ss:$16 sps:$4 sm:$0xff]  }
 0xa08   : > { %14550 = vmatpush2.bf16.msra.mxu1 %v19878_v24  ;;  %14510 = vmatprep.subr.bf16.mxu0 %v19607_v31  ;;  %v22687_v24 = vld [vmem:[%s30186_s7 + $0x260] ss:$16 sps:$4 sm:$0xff]   ;;  %v22692_v31 = vld [vmem:[%s30186_s7 + $0x44] ss:$16 sps:$4 sm:$0xff]  }
 0xa09   : > { %14551 = vmatprep.subr.bf16.mxu1 %v19863_v1  ;;  %v22695_v1 = vld [vmem:[%s30186_s7 + $0x244] ss:$16 sps:$4 sm:$0xff]  }
 0xa0b   : > { %14511 = vmatpush2.bf16.msra.mxu0 %v19606_v9  ;;  %v22696_v9 = vld [vmem:[%s30186_s7 + $0x20] ss:$16 sps:$4 sm:$0xff]  }
 0xa0c   : > { %14552 = vmatpush2.bf16.msra.mxu1 %v19862_v47  ;;  %14512 = vmatprep.subr.bf16.mxu0 %v19591_v49  ;;  %v22699_v47 = vld [vmem:[%s30186_s7 + $0x220] ss:$16 sps:$4 sm:$0xff]   ;;  %v22704_v49 = vld [vmem:[%s30186_s7 + $0x4] ss:$16 sps:$4 sm:$0xff]  }
 0xa0d   : > { %14553 = vmatprep.subr.bf16.mxu1 %v19847_v13  ;;  %v22707_v13 = vld [vmem:[%s30186_s7 + $0x204] ss:$16 sps:$4 sm:$0xff]  }
 0xa0f   : > { %14513 = vmatpush2.bf16.msra.mxu0 %v19590_v51  ;;  %v22708_v51 = vld [vmem:[%s30186_s7 + $0x1e0] ss:$16 sps:$4 sm:$0xff]  }
 0xa10   : > { %14554 = vmatpush2.bf16.msra.mxu1 %v19846_v12  ;;  %14514 = vmatprep.subr.bf16.mxu0 %v19575_v48  ;;  %v22711_v12 = vld [vmem:[%s30186_s7 + $0x3e0] ss:$16 sps:$4 sm:$0xff]   ;;  %v22716_v48 = vld [vmem:[%s30186_s7 + $0x1c4] ss:$16 sps:$4 sm:$0xff]  }
 0xa11   : > { %14555 = vmatprep.subr.bf16.mxu1 %v19831_v63  ;;  %v22719_v63 = vld [vmem:[%s30186_s7 + $0x3c4] ss:$16 sps:$4 sm:$0xff]  }
 0xa13   : > { %14515 = vmatpush2.bf16.msra.mxu0 %v19574_v4  ;;  %v22714_v4 = vld [vmem:[%s30186_s7 + $0x1c0] ss:$16 sps:$4 sm:$0xff]  }
 0xa14   : > { %14556 = vmatpush2.bf16.msra.mxu1 %v19830_v60  ;;  %17670 = vmatprep.subr.bf16.mxu0 %v22662_v39  ;;  %v22717_v60 = vld [vmem:[%s30186_s7 + $0x3c0] ss:$16 sps:$4 sm:$0xff]   ;;  %v22722_v39 = vld [vmem:[%s30186_s7 + $0x1a4] ss:$16 sps:$4 sm:$0xff]  }
 0xa15   : > { %17711 = vmatprep.subr.bf16.mxu1 %v22665_v7  ;;  %v22725_v7 = vld [vmem:[%s30186_s7 + $0x3a4] ss:$16 sps:$4 sm:$0xff]  }
 0xa16   : > { %v14272_v62 = vpop.f32.mrf.mxu0  ;;  %14517 = vmatmul.mubr.bf16.vlgmr.msra.gmra.mxu0 %v27058_v57 }
 0xa17   : > { %v14313_v33 = vpop.f32.mrf.mxu1  ;;  %14558 = vmatmul.mubr.bf16.vlgmr.msra.gmra.mxu1 %v27062_v59  ;;  %17671 = vmatpush1.bf16.msra.mxu0 %v22660_v15  ;;  %v22728_v15 = vld [vmem:[%s30186_s7 + $0x184] ss:$16 sps:$4 sm:$0xff]  }
 0xa18   : > { %v28459_v19 = vadd.f32 %v14313_v33, %v14272_v62  ;;  %17702 = vmatprep.mubr.bf16.mxu0 %v28447_v43  ;;  %17712 = vmatpush1.bf16.msra.mxu1 %v22663_v3  ;;  %v14274_v57 = vpop.f32.mrf.mxu0  ;;  %v22731_v3 = vld [vmem:[%s30186_s7 + $0x384] ss:$16 sps:$4 sm:$0xff]   ;;  %v22729_v62 = vld [vmem:[%s30186_s7 + $0x380] ss:$16 sps:$4 sm:$0xff]  }
 0xa19   : > { %17743 = vmatprep.mubr.bf16.mxu1 %v28453_v17  ;;  %v14315_v59 = vpop.f32.mrf.mxu1  ;;  %17672 = vmatprep.subr.bf16.mxu0 %v22668_v35  ;;  %v22726_v35 = vld [vmem:[%s30186_s7 + $0x180] ss:$16 sps:$4 sm:$0xff]   ;;  %v22737_v33 = vld [vmem:[%s30186_s7 + $0x364] ss:$16 sps:$4 sm:$0xff]  }
 0xa1a   : > { %v28472_v6 = vadd.f32 %v14315_v59, %v14274_v57  ;;  %v14276_v8 = vpop.f32.mrf.mxu0  ;;  %17713 = vmatprep.subr.bf16.mxu1 %v22671_v38  ;;  %v22734_v38 = vld [vmem:[%s30186_s7 + $0x164] ss:$16 sps:$4 sm:$0xff]   ;;  %v22735_v57 = vld [vmem:[%s30186_s7 + $0x360] ss:$16 sps:$4 sm:$0xff]  }
 0xa1b   : > { %v14317_v2 = vpop.f32.mrf.mxu1  ;;  %17673 = vmatpush1.bf16.msra.mxu0 %v22666_v18  ;;  %v22732_v18 = vld [vmem:[%s30186_s7 + $0x160] ss:$16 sps:$4 sm:$0xff]   ;;  %v22746_v8 = vld [vmem:[%s30186_s7 + $0x124] ss:$16 sps:$4 sm:$0xff]  }
 0xa1c   : > { %17714 = vmatpush1.bf16.msra.mxu1 %v22669_v20  ;;  %v14277_v25 = vpop.f32.mrf.mxu0  ;;  %17674 = vmatprep.subr.bf16.mxu0 %v22674_v36  ;;  %v22740_v20 = vld [vmem:[%s30186_s7 + $0x144] ss:$16 sps:$4 sm:$0xff]   ;;  %v22738_v59 = vld [vmem:[%s30186_s7 + $0x140] ss:$16 sps:$4 sm:$0xff]  }
 0xa1d   : > { %v14318_v23 = vpop.f32.mrf.mxu1  ;;  %17715 = vmatprep.subr.bf16.mxu1 %v22677_v28  ;;  %v22743_v36 = vld [vmem:[%s30186_s7 + $0x344] ss:$16 sps:$4 sm:$0xff]   ;;  %v22741_v28 = vld [vmem:[%s30186_s7 + $0x340] ss:$16 sps:$4 sm:$0xff]  }
 0xa1e   : > { %v22749_v2 = vld [vmem:[%s30186_s7 + $0x324] ss:$16 sps:$4 sm:$0xff]   ;;  %v22747_v25 = vld [vmem:[%s30186_s7 + $0x320] ss:$16 sps:$4 sm:$0xff]  }
 0xa1f   : > { %17675 = vmatpush1.bf16.msra.mxu0 %v22672_v53  ;;  %v22744_v53 = vld [vmem:[%s30186_s7 + $0x120] ss:$16 sps:$4 sm:$0xff]  }
 0xa20   : > { %17716 = vmatpush1.bf16.msra.mxu1 %v22675_v22  ;;  %17676 = vmatprep.subr.bf16.mxu0 %v22680_v37  ;;  %v22752_v22 = vld [vmem:[%s30186_s7 + $0x104] ss:$16 sps:$4 sm:$0xff]   ;;  %v22750_v23 = vld [vmem:[%s30186_s7 + $0x100] ss:$16 sps:$4 sm:$0xff]  }
 0xa21   : > { %17717 = vmatprep.subr.bf16.mxu1 %v22683_v26  ;;  %v22755_v37 = vld [vmem:[%s30186_s7 + $0x304] ss:$16 sps:$4 sm:$0xff]   ;;  %v14566_v26 = vmax.f32 %v27668_v52, 0.0  ;;  %v14573_v52 = vmax.f32 %v28278_v44, 0.0 }
 0xa23   : > { %17677 = vmatpush1.bf16.msra.mxu0 %v22678_v29  ;;  %v22753_v29 = vld [vmem:[%s30186_s7 + $0x300] ss:$16 sps:$4 sm:$0xff]  }
 0xa24   : > { %17718 = vmatpush1.bf16.msra.mxu1 %v22681_v55  ;;  %17678 = vmatprep.subr.bf16.mxu0 %v22686_v40  ;;  %v22758_v55 = vld [vmem:[%s30186_s7 + $0x4e4] ss:$16 sps:$4 sm:$0xff]   ;;  %v14568_v40 = vmax.f32 %v27867_v10, 0.0  ;;  %v22759_v10 = vld [vmem:[%s30186_s7 + $0x6e0] ss:$16 sps:$4 sm:$0xff]  }
 0xa25   : > { %17719 = vmatprep.subr.bf16.mxu1 %v22689_v30  ;;  %v22761_v30 = vld [vmem:[%s30186_s7 + $0x6e4] ss:$16 sps:$4 sm:$0xff]  }
 0xa27   : > { %17679 = vmatpush1.bf16.msra.mxu0 %v22684_v32  ;;  %v14571_v32 = vmax.f32 %v28078_v16, 0.0  ;;  %v22764_v16 = vld [vmem:[%s30186_s7 + $0x4c4] ss:$16 sps:$4 sm:$0xff]  }
 0xa28   : > { %17720 = vmatpush1.bf16.msra.mxu1 %v22687_v24  ;;  %17680 = vmatprep.subr.bf16.mxu0 %v22692_v31  ;;  %v22756_v24 = vld [vmem:[%s30186_s7 + $0x4e0] ss:$16 sps:$4 sm:$0xff]   ;;  %v28649_v31 = vpack.c.bf16 %v14566_v26, %v14566_v26  ;;  %v22812_v26 = vld [vmem:[%s30186_s7 + $0x5c4] ss:$16 sps:$4 sm:$0xff]  }
 0xa29   : > { %17721 = vmatprep.subr.bf16.mxu1 %v22695_v1  ;;  %v28654_v1 = vpack.c.bf16 %v14568_v40, %v14568_v40  ;;  %v28659_v44 = vpack.c.bf16 %v14571_v32, %v14571_v32  ;;  %v22813_v40 = vld [vmem:[%s30186_s7 + $0x7c0] ss:$16 sps:$4 sm:$0xff]   ;;  %v22821_v32 = vld [vmem:[%s30186_s7 + $0x7a4] ss:$16 sps:$4 sm:$0xff]  }
 0xa2b   : > { %17681 = vmatpush1.bf16.msra.mxu0 %v22690_v41 }
 0xa2c   : > { %17722 = vmatpush1.bf16.msra.mxu1 %v22693_v34  ;;  %17682 = vmatprep.subr.bf16.mxu0 %v22698_v42  ;;  %v22767_v34 = vld [vmem:[%s30186_s7 + $0x6c4] ss:$16 sps:$4 sm:$0xff]   ;;  %v28665_v42 = vpack.c.bf16 %v14573_v52, %v14573_v52  ;;  %v22816_v52 = vld [vmem:[%s30186_s7 + $0x5a0] ss:$16 sps:$4 sm:$0xff]  }
 0xa2d   : > { %17723 = vmatprep.subr.bf16.mxu1 %v22701_v5 }
 0xa2f   : > { %17683 = vmatpush1.bf16.msra.mxu0 %v22696_v9  ;;  %v22762_v9 = vld [vmem:[%s30186_s7 + $0x4c0] ss:$16 sps:$4 sm:$0xff]  }
 0xa30   : > { %17724 = vmatpush1.bf16.msra.mxu1 %v22699_v47  ;;  %17684 = vmatprep.subr.bf16.mxu0 %v22704_v49 }
 0xa31   : > { %17725 = vmatprep.subr.bf16.mxu1 %v22707_v13  ;;  %v22765_v13 = vld [vmem:[%s30186_s7 + $0x6c0] ss:$16 sps:$4 sm:$0xff]  }
 0xa33   : > { %17685 = vmatpush1.bf16.msra.mxu0 %v22702_v61  ;;  %v22770_v61 = vld [vmem:[%s30186_s7 + $0x4a4] ss:$16 sps:$4 sm:$0xff]  }
 0xa34   : > { %17726 = vmatpush1.bf16.msra.mxu1 %v22705_v58  ;;  %17686 = vmatprep.subr.bf16.mxu0 %v22710_v50  ;;  %v22773_v50 = vld [vmem:[%s30186_s7 + $0x6a4] ss:$16 sps:$4 sm:$0xff]  }
 0xa35   : > { %17727 = vmatprep.subr.bf16.mxu1 %v22713_v27 }
 0xa37   : > { %17687 = vmatpush2.bf16.msra.mxu0 %v22708_v51 }
 0xa38   : > { %17728 = vmatpush2.bf16.msra.mxu1 %v22711_v12  ;;  %17688 = vmatprep.subr.bf16.mxu0 %v22716_v48  ;;  %v22768_v12 = vld [vmem:[%s30186_s7 + $0x4a0] ss:$16 sps:$4 sm:$0xff]  }
 0xa39   : > { %17729 = vmatprep.subr.bf16.mxu1 %v22719_v63  ;;  %v22771_v63 = vld [vmem:[%s30186_s7 + $0x6a0] ss:$16 sps:$4 sm:$0xff]  }
 0xa3b   : > { %17689 = vmatpush2.bf16.msra.mxu0 %v22714_v4  ;;  %v22776_v4 = vld [vmem:[%s30186_s7 + $0x484] ss:$16 sps:$4 sm:$0xff]  }
 0xa3c   : > { %17730 = vmatpush2.bf16.msra.mxu1 %v22717_v60  ;;  %17690 = vmatprep.subr.bf16.mxu0 %v22722_v39  ;;  %v22779_v39 = vld [vmem:[%s30186_s7 + $0x684] ss:$16 sps:$4 sm:$0xff]  }
 0xa3d   : > { %17731 = vmatprep.subr.bf16.mxu1 %v22725_v7  ;;  %v22774_v7 = vld [vmem:[%s30186_s7 + $0x480] ss:$16 sps:$4 sm:$0xff]  }
 0xa3f   : > { %17691 = vmatpush2.bf16.msra.mxu0 %v22720_v11  ;;  %v22777_v11 = vld [vmem:[%s30186_s7 + $0x680] ss:$16 sps:$4 sm:$0xff]  }
 0xa40   : > { %17732 = vmatpush2.bf16.msra.mxu1 %v22723_v14  ;;  %17692 = vmatprep.subr.bf16.mxu0 %v22728_v15  ;;  %v22782_v14 = vld [vmem:[%s30186_s7 + $0x464] ss:$16 sps:$4 sm:$0xff]  }
 0xa41   : > { %17733 = vmatprep.subr.bf16.mxu1 %v22731_v3  ;;  %v22785_v15 = vld [vmem:[%s30186_s7 + $0x664] ss:$16 sps:$4 sm:$0xff]   ;;  %v22780_v3 = vld [vmem:[%s30186_s7 + $0x460] ss:$16 sps:$4 sm:$0xff]  }
 0xa43   : > { %17693 = vmatpush2.bf16.msra.mxu0 %v22726_v35  ;;  %v22783_v35 = vld [vmem:[%s30186_s7 + $0x660] ss:$16 sps:$4 sm:$0xff]  }
 0xa44   : > { %17734 = vmatpush2.bf16.msra.mxu1 %v22729_v62  ;;  %17694 = vmatprep.subr.bf16.mxu0 %v22734_v38  ;;  %v22788_v62 = vld [vmem:[%s30186_s7 + $0x444] ss:$16 sps:$4 sm:$0xff]  }
 0xa45   : > { %17735 = vmatprep.subr.bf16.mxu1 %v22737_v33  ;;  %v22791_v38 = vld [vmem:[%s30186_s7 + $0x644] ss:$16 sps:$4 sm:$0xff]   ;;  %v22786_v33 = vld [vmem:[%s30186_s7 + $0x440] ss:$16 sps:$4 sm:$0xff]  }
 0xa47   : > { %17695 = vmatpush2.bf16.msra.mxu0 %v22732_v18  ;;  %v22789_v18 = vld [vmem:[%s30186_s7 + $0x640] ss:$16 sps:$4 sm:$0xff]  }
 0xa48   : > { %17736 = vmatpush2.bf16.msra.mxu1 %v22735_v57  ;;  %17696 = vmatprep.subr.bf16.mxu0 %v22740_v20  ;;  %v22794_v57 = vld [vmem:[%s30186_s7 + $0x424] ss:$16 sps:$4 sm:$0xff]  }
 0xa49   : > { %17737 = vmatprep.subr.bf16.mxu1 %v22743_v36  ;;  %v22797_v20 = vld [vmem:[%s30186_s7 + $0x624] ss:$16 sps:$4 sm:$0xff]   ;;  %v22792_v36 = vld [vmem:[%s30186_s7 + $0x420] ss:$16 sps:$4 sm:$0xff]  }
 0xa4b   : > { %17697 = vmatpush2.bf16.msra.mxu0 %v22738_v59  ;;  %v22795_v59 = vld [vmem:[%s30186_s7 + $0x620] ss:$16 sps:$4 sm:$0xff]  }
 0xa4c   : > { %17738 = vmatpush2.bf16.msra.mxu1 %v22741_v28  ;;  %17698 = vmatprep.subr.bf16.mxu0 %v22746_v8  ;;  %v22800_v28 = vld [vmem:[%s30186_s7 + $0x404] ss:$16 sps:$4 sm:$0xff]  }
 0xa4d   : > { %17739 = vmatprep.subr.bf16.mxu1 %v22749_v2  ;;  %v22803_v8 = vld [vmem:[%s30186_s7 + $0x604] ss:$16 sps:$4 sm:$0xff]   ;;  %v22798_v2 = vld [vmem:[%s30186_s7 + $0x400] ss:$16 sps:$4 sm:$0xff]  }
 0xa4f   : > { %17699 = vmatpush2.bf16.msra.mxu0 %v22744_v53  ;;  %v22801_v53 = vld [vmem:[%s30186_s7 + $0x600] ss:$16 sps:$4 sm:$0xff]  }
 0xa50   : > { %17740 = vmatpush2.bf16.msra.mxu1 %v22747_v25  ;;  %17700 = vmatprep.subr.bf16.mxu0 %v22752_v22  ;;  %v22806_v25 = vld [vmem:[%s30186_s7 + $0x5e4] ss:$16 sps:$4 sm:$0xff]  }
 0xa51   : > { %17741 = vmatprep.subr.bf16.mxu1 %v22755_v37  ;;  %v22809_v22 = vld [vmem:[%s30186_s7 + $0x7e4] ss:$16 sps:$4 sm:$0xff]   ;;  %v22804_v37 = vld [vmem:[%s30186_s7 + $0x5e0] ss:$16 sps:$4 sm:$0xff]  }
 0xa53   : > { %17701 = vmatpush2.bf16.msra.mxu0 %v22750_v23  ;;  %v22807_v23 = vld [vmem:[%s30186_s7 + $0x7e0] ss:$16 sps:$4 sm:$0xff]  }
 0xa54   : > { %17742 = vmatpush2.bf16.msra.mxu1 %v22753_v29  ;;  %17752 = vmatprep.subr.bf16.mxu0 %v22758_v55  ;;  %v22815_v29 = vld [vmem:[%s30186_s7 + $0x7c4] ss:$16 sps:$4 sm:$0xff]   ;;  %v22810_v55 = vld [vmem:[%s30186_s7 + $0x5c0] ss:$16 sps:$4 sm:$0xff]  }
 0xa55   : > { %17793 = vmatprep.subr.bf16.mxu1 %v22761_v30  ;;  %v22818_v30 = vld [vmem:[%s30186_s7 + $0x5a4] ss:$16 sps:$4 sm:$0xff]  }
 0xa56   : > { %v14354_v41 = vpop.f32.mrf.mxu0  ;;  %17703 = vmatmul.mubr.bf16.vlgmr.msra.gmra.mxu0 %v28649_v31 }
 0xa57   : > { %v14395_v5 = vpop.f32.mrf.mxu1  ;;  %17744 = vmatmul.mubr.bf16.vlgmr.msra.gmra.mxu1 %v28654_v1  ;;  %17753 = vmatpush1.bf16.msra.mxu0 %v22756_v24  ;;  %v22819_v24 = vld [vmem:[%s30186_s7 + $0x7a0] ss:$16 sps:$4 sm:$0xff]  }
 0xa58   : > { %v28671_v47 = vadd.f32 %v14395_v5, %v14354_v41  ;;  %17784 = vmatprep.mubr.bf16.mxu0 %v28659_v44  ;;  %17794 = vmatpush1.bf16.msra.mxu1 %v22759_v10  ;;  %v28674_v49 = vpop.f32.mrf.mxu0  ;;  %v22824_v10 = vld [vmem:[%s30186_s7 + $0x584] ss:$16 sps:$4 sm:$0xff]   ;;  %v22822_v41 = vld [vmem:[%s30186_s7 + $0x580] ss:$16 sps:$4 sm:$0xff]  }
 0xa59   : > { %17825 = vmatprep.mubr.bf16.mxu1 %v28665_v42  ;;  %v28683_v58 = vpop.f32.mrf.mxu1  ;;  %17754 = vmatprep.subr.bf16.mxu0 %v22764_v16  ;;  %v22827_v16 = vld [vmem:[%s30186_s7 + $0x784] ss:$16 sps:$4 sm:$0xff]  }
 0xa5a   : > { %v14358_v27 = vpop.f32.mrf.mxu0  ;;  %17795 = vmatprep.subr.bf16.mxu1 %v22767_v34  ;;  %v22825_v34 = vld [vmem:[%s30186_s7 + $0x780] ss:$16 sps:$4 sm:$0xff]   ;;  %v22830_v5 = vld [vmem:[%s30186_s7 + $0x564] ss:$16 sps:$4 sm:$0xff]  }
 0xa5b   : > { %v14399_v51 = vpop.f32.mrf.mxu1  ;;  %17755 = vmatpush1.bf16.msra.mxu0 %v22762_v9  ;;  %v22833_v9 = vld [vmem:[%s30186_s7 + $0x764] ss:$16 sps:$4 sm:$0xff]  }
 0xa5c   : > { %17796 = vmatpush1.bf16.msra.mxu1 %v22765_v13  ;;  %v14359_v48 = vpop.f32.mrf.mxu0  ;;  %17756 = vmatprep.subr.bf16.mxu0 %v22770_v61  ;;  %v22828_v13 = vld [vmem:[%s30186_s7 + $0x560] ss:$16 sps:$4 sm:$0xff]   ;;  %v22839_v27 = vld [vmem:[%s30186_s7 + $0x744] ss:$16 sps:$4 sm:$0xff]  }
 0xa5d   : > { %v14400_v60 = vpop.f32.mrf.mxu1  ;;  %17797 = vmatprep.subr.bf16.mxu1 %v22773_v50  ;;  %v22831_v61 = vld [vmem:[%s30186_s7 + $0x760] ss:$16 sps:$4 sm:$0xff]   ;;  %v22836_v50 = vld [vmem:[%s30186_s7 + $0x544] ss:$16 sps:$4 sm:$0xff]  }
 0xa5e   : > { %v22834_v51 = vld [vmem:[%s30186_s7 + $0x540] ss:$16 sps:$4 sm:$0xff]   ;;  %v22842_v48 = vld [vmem:[%s30186_s7 + $0x524] ss:$16 sps:$4 sm:$0xff]  }
 0xa5f   : > { %17757 = vmatpush1.bf16.msra.mxu0 %v22768_v12  ;;  %v22837_v12 = vld [vmem:[%s30186_s7 + $0x740] ss:$16 sps:$4 sm:$0xff]  }
 0xa60   : > { %17798 = vmatpush1.bf16.msra.mxu1 %v22771_v63  ;;  %17758 = vmatprep.subr.bf16.mxu0 %v22776_v4  ;;  %v22845_v63 = vld [vmem:[%s30186_s7 + $0x724] ss:$16 sps:$4 sm:$0xff]   ;;  %v22840_v4 = vld [vmem:[%s30186_s7 + $0x520] ss:$16 sps:$4 sm:$0xff]  }
 0xa61   : > { %17799 = vmatprep.subr.bf16.mxu1 %v22779_v39  ;;  %v22843_v60 = vld [vmem:[%s30186_s7 + $0x720] ss:$16 sps:$4 sm:$0xff]   ;;  %v22848_v39 = vld [vmem:[%s30186_s7 + $0x504] ss:$16 sps:$4 sm:$0xff]  }
 0xa63   : > { %17759 = vmatpush1.bf16.msra.mxu0 %v22774_v7  ;;  %v22851_v7 = vld [vmem:[%s30186_s7 + $0x704] ss:$16 sps:$4 sm:$0xff]  }
 0xa64   : > { %17800 = vmatpush1.bf16.msra.mxu1 %v22777_v11  ;;  %17760 = vmatprep.subr.bf16.mxu0 %v22782_v14  ;;  %v14398_v11 = vadd.f32 %v28683_v58, %v28674_v49  ;;  %v22846_v14 = vld [vmem:[%s30186_s7 + $0x500] ss:$16 sps:$4 sm:$0xff]   ;;  %v22857_v49 = vld [vmem:[%s30186_s7 + $0xae4] ss:$16 sps:$4 sm:$0xff]   ;;  %v14575_v58 = vmax.f32 %v28472_v6, 0.0 }
 0xa65   : > { %17801 = vmatprep.subr.bf16.mxu1 %v22785_v15  ;;  %v14570_v15 = vmax.f32 %v28068_v0, 0.0  ;;  %v22860_v6 = vld [vmem:[%s30186_s7 + $0x8c4] ss:$16 sps:$4 sm:$0xff]  }
 0xa66   : > { %v14577_v0 = vmax.f32 %v14398_v11, 0.0  ;;  %v22902_v11 = vld [vmem:[%s30186_s7 + $0x9e4] ss:$16 sps:$4 sm:$0xff]  }
 0xa67   : > { %17761 = vmatpush1.bf16.msra.mxu0 %v22780_v3  ;;  %v22849_v3 = vld [vmem:[%s30186_s7 + $0x700] ss:$16 sps:$4 sm:$0xff]  }
 0xa68   : > { %17802 = vmatpush1.bf16.msra.mxu1 %v22783_v35  ;;  %17762 = vmatprep.subr.bf16.mxu0 %v22788_v62  ;;  %v22854_v35 = vld [vmem:[%s30186_s7 + $0x8e4] ss:$16 sps:$4 sm:$0xff]   ;;  %v14572_v62 = vmax.f32 %v28268_v45, 0.0  ;;  %v22855_v45 = vld [vmem:[%s30186_s7 + $0xae0] ss:$16 sps:$4 sm:$0xff]  }
 0xa69   : > { %17803 = vmatprep.subr.bf16.mxu1 %v22791_v38  ;;  %v22852_v38 = vld [vmem:[%s30186_s7 + $0x8e0] ss:$16 sps:$4 sm:$0xff]  }
 0xa6b   : > { %17763 = vmatpush1.bf16.msra.mxu0 %v22786_v33  ;;  %v28864_v33 = vpack.c.bf16 %v14570_v15, %v14570_v15  ;;  %v22900_v15 = vld [vmem:[%s30186_s7 + $0x9e0] ss:$16 sps:$4 sm:$0xff]  }
 0xa6c   : > { %17804 = vmatpush1.bf16.msra.mxu1 %v22789_v18  ;;  %17764 = vmatprep.subr.bf16.mxu0 %v22794_v57  ;;  %v28869_v18 = vpack.c.bf16 %v14572_v62, %v14572_v62  ;;  %v28874_v57 = vpack.c.bf16 %v14575_v58, %v14575_v58  ;;  %v22911_v62 = vld [vmem:[%s30186_s7 + $0xbc4] ss:$16 sps:$4 sm:$0xff]   ;;  %v22909_v58 = vld [vmem:[%s30186_s7 + $0xbc0] ss:$16 sps:$4 sm:$0xff]  }
 0xa6d   : > { %17805 = vmatprep.subr.bf16.mxu1 %v22797_v20 }
 0xa6f   : > { %17765 = vmatpush1.bf16.msra.mxu0 %v22792_v36  ;;  %v22863_v36 = vld [vmem:[%s30186_s7 + $0xac4] ss:$16 sps:$4 sm:$0xff]  }
 0xa70   : > { %17806 = vmatpush1.bf16.msra.mxu1 %v22795_v59  ;;  %17766 = vmatprep.subr.bf16.mxu0 %v22800_v28  ;;  %v28880_v59 = vpack.c.bf16 %v14577_v0, %v14577_v0  ;;  %v22914_v0 = vld [vmem:[%s30186_s7 + $0x9a4] ss:$16 sps:$4 sm:$0xff]  }
 0xa71   : > { %17807 = vmatprep.subr.bf16.mxu1 %v22803_v8  ;;  %v22858_v8 = vld [vmem:[%s30186_s7 + $0x8c0] ss:$16 sps:$4 sm:$0xff]  }
 0xa73   : > { %17767 = vmatpush1.bf16.msra.mxu0 %v22798_v2 }
 0xa74   : > { %17808 = vmatpush1.bf16.msra.mxu1 %v22801_v53  ;;  %17768 = vmatprep.subr.bf16.mxu0 %v22806_v25  ;;  %v22861_v25 = vld [vmem:[%s30186_s7 + $0xac0] ss:$16 sps:$4 sm:$0xff]  }
 0xa75   : > { %17809 = vmatprep.subr.bf16.mxu1 %v22809_v22  ;;  %v22866_v22 = vld [vmem:[%s30186_s7 + $0x8a4] ss:$16 sps:$4 sm:$0xff]  }
 0xa77   : > { %17769 = vmatpush2.bf16.msra.mxu0 %v22804_v37 }
 0xa78   : > { %17810 = vmatpush2.bf16.msra.mxu1 %v22807_v23  ;;  %17770 = vmatprep.subr.bf16.mxu0 %v22812_v26  ;;  %v22869_v23 = vld [vmem:[%s30186_s7 + $0xaa4] ss:$16 sps:$4 sm:$0xff]  }
 0xa79   : > { %17811 = vmatprep.subr.bf16.mxu1 %v22815_v29 }
 0xa7b   : > { %17771 = vmatpush2.bf16.msra.mxu0 %v22810_v55  ;;  %v22864_v55 = vld [vmem:[%s30186_s7 + $0x8a0] ss:$16 sps:$4 sm:$0xff]  }
 0xa7c   : > { %17812 = vmatpush2.bf16.msra.mxu1 %v22813_v40  ;;  %17772 = vmatprep.subr.bf16.mxu0 %v22818_v30  ;;  %v22867_v30 = vld [vmem:[%s30186_s7 + $0xaa0] ss:$16 sps:$4 sm:$0xff]  }
 0xa7d   : > { %17813 = vmatprep.subr.bf16.mxu1 %v22821_v32  ;;  %v22872_v32 = vld [vmem:[%s30186_s7 + $0x884] ss:$16 sps:$4 sm:$0xff]  }
 0xa7f   : > { %17773 = vmatpush2.bf16.msra.mxu0 %v22816_v52 }
 0xa80   : > { %17814 = vmatpush2.bf16.msra.mxu1 %v22819_v24  ;;  %17774 = vmatprep.subr.bf16.mxu0 %v22824_v10  ;;  %v22875_v24 = vld [vmem:[%s30186_s7 + $0xa84] ss:$16 sps:$4 sm:$0xff]   ;;  %v22870_v10 = vld [vmem:[%s30186_s7 + $0x880] ss:$16 sps:$4 sm:$0xff]  }
 0xa81   : > { %17815 = vmatprep.subr.bf16.mxu1 %v22827_v16  ;;  %v22873_v16 = vld [vmem:[%s30186_s7 + $0xa80] ss:$16 sps:$4 sm:$0xff]  }
 0xa83   : > { %17775 = vmatpush2.bf16.msra.mxu0 %v22822_v41  ;;  %v22878_v41 = vld [vmem:[%s30186_s7 + $0x864] ss:$16 sps:$4 sm:$0xff]  }
 0xa84   : > { %17816 = vmatpush2.bf16.msra.mxu1 %v22825_v34  ;;  %17776 = vmatprep.subr.bf16.mxu0 %v22830_v5  ;;  %v22881_v34 = vld [vmem:[%s30186_s7 + $0xa64] ss:$16 sps:$4 sm:$0xff]   ;;  %v22876_v5 = vld [vmem:[%s30186_s7 + $0x860] ss:$16 sps:$4 sm:$0xff]  }
 0xa85   : > { %17817 = vmatprep.subr.bf16.mxu1 %v22833_v9  ;;  %v22879_v9 = vld [vmem:[%s30186_s7 + $0xa60] ss:$16 sps:$4 sm:$0xff]  }
 0xa87   : > { %17777 = vmatpush2.bf16.msra.mxu0 %v22828_v13  ;;  %v22884_v13 = vld [vmem:[%s30186_s7 + $0x844] ss:$16 sps:$4 sm:$0xff]  }
 0xa88   : > { %17818 = vmatpush2.bf16.msra.mxu1 %v22831_v61  ;;  %17778 = vmatprep.subr.bf16.mxu0 %v22836_v50  ;;  %v22887_v61 = vld [vmem:[%s30186_s7 + $0xa44] ss:$16 sps:$4 sm:$0xff]   ;;  %v22882_v50 = vld [vmem:[%s30186_s7 + $0x840] ss:$16 sps:$4 sm:$0xff]  }
 0xa89   : > { %17819 = vmatprep.subr.bf16.mxu1 %v22839_v27  ;;  %v22885_v27 = vld [vmem:[%s30186_s7 + $0xa40] ss:$16 sps:$4 sm:$0xff]  }
 0xa8b   : > { %17779 = vmatpush2.bf16.msra.mxu0 %v22834_v51  ;;  %v22890_v51 = vld [vmem:[%s30186_s7 + $0x824] ss:$16 sps:$4 sm:$0xff]  }
 0xa8c   : > { %17820 = vmatpush2.bf16.msra.mxu1 %v22837_v12  ;;  %17780 = vmatprep.subr.bf16.mxu0 %v22842_v48  ;;  %v22893_v12 = vld [vmem:[%s30186_s7 + $0xa24] ss:$16 sps:$4 sm:$0xff]   ;;  %v22888_v48 = vld [vmem:[%s30186_s7 + $0x820] ss:$16 sps:$4 sm:$0xff]  }
 0xa8d   : > { %17821 = vmatprep.subr.bf16.mxu1 %v22845_v63  ;;  %v22891_v63 = vld [vmem:[%s30186_s7 + $0xa20] ss:$16 sps:$4 sm:$0xff]  }
 0xa8f   : > { %17781 = vmatpush2.bf16.msra.mxu0 %v22840_v4  ;;  %v22896_v4 = vld [vmem:[%s30186_s7 + $0x804] ss:$16 sps:$4 sm:$0xff]  }
 0xa90   : > { %17822 = vmatpush2.bf16.msra.mxu1 %v22843_v60  ;;  %17782 = vmatprep.subr.bf16.mxu0 %v22848_v39  ;;  %v22899_v60 = vld [vmem:[%s30186_s7 + $0xa04] ss:$16 sps:$4 sm:$0xff]   ;;  %v22894_v39 = vld [vmem:[%s30186_s7 + $0x800] ss:$16 sps:$4 sm:$0xff]  }
 0xa91   : > { %17823 = vmatprep.subr.bf16.mxu1 %v22851_v7  ;;  %v22897_v7 = vld [vmem:[%s30186_s7 + $0xa00] ss:$16 sps:$4 sm:$0xff]  }
 0xa93   : > { %17783 = vmatpush2.bf16.msra.mxu0 %v22846_v14  ;;  %v22905_v14 = vld [vmem:[%s30186_s7 + $0xbe4] ss:$16 sps:$4 sm:$0xff]  }
 0xa94   : > { %17824 = vmatpush2.bf16.msra.mxu1 %v22849_v3  ;;  %17834 = vmatprep.subr.bf16.mxu0 %v22854_v35  ;;  %v22903_v3 = vld [vmem:[%s30186_s7 + $0xbe0] ss:$16 sps:$4 sm:$0xff]   ;;  %v22908_v35 = vld [vmem:[%s30186_s7 + $0x9c4] ss:$16 sps:$4 sm:$0xff]  }
 0xa95   : > { %17875 = vmatprep.subr.bf16.mxu1 %v22857_v49  ;;  %v22906_v49 = vld [vmem:[%s30186_s7 + $0x9c0] ss:$16 sps:$4 sm:$0xff]  }
 0xa96   : > { %v14436_v20 = vpop.f32.mrf.mxu0  ;;  %17785 = vmatmul.mubr.bf16.vlgmr.msra.gmra.mxu0 %v28864_v33 }
 0xa97   : > { %v14477_v28 = vpop.f32.mrf.mxu1  ;;  %17826 = vmatmul.mubr.bf16.vlgmr.msra.gmra.mxu1 %v28869_v18  ;;  %17835 = vmatpush1.bf16.msra.mxu0 %v22852_v38  ;;  %v22917_v38 = vld [vmem:[%s30186_s7 + $0xba4] ss:$16 sps:$4 sm:$0xff]  }
 0xa98   : > { %v28886_v2 = vadd.f32 %v14477_v28, %v14436_v20  ;;  %17866 = vmatprep.mubr.bf16.mxu0 %v28874_v57  ;;  %17876 = vmatpush1.bf16.msra.mxu1 %v22855_v45  ;;  %v28889_v53 = vpop.f32.mrf.mxu0  ;;  %v22912_v45 = vld [vmem:[%s30186_s7 + $0x9a0] ss:$16 sps:$4 sm:$0xff]   ;;  %v22920_v20 = vld [vmem:[%s30186_s7 + $0x984] ss:$16 sps:$4 sm:$0xff]  }
 0xa99   : > { %17907 = vmatprep.mubr.bf16.mxu1 %v28880_v59  ;;  %v28898_v37 = vpop.f32.mrf.mxu1  ;;  %17836 = vmatprep.subr.bf16.mxu0 %v22860_v6  ;;  %v22915_v6 = vld [vmem:[%s30186_s7 + $0xba0] ss:$16 sps:$4 sm:$0xff]  }
 0xa9a   : > { %v14440_v26 = vpop.f32.mrf.mxu0  ;;  %17877 = vmatprep.subr.bf16.mxu1 %v22863_v36  ;;  %v22923_v36 = vld [vmem:[%s30186_s7 + $0xb84] ss:$16 sps:$4 sm:$0xff]   ;;  %v22918_v28 = vld [vmem:[%s30186_s7 + $0x980] ss:$16 sps:$4 sm:$0xff]  }
 0xa9b   : > { %v14481_v29 = vpop.f32.mrf.mxu1  ;;  %17837 = vmatpush1.bf16.msra.mxu0 %v22858_v8  ;;  %v22921_v8 = vld [vmem:[%s30186_s7 + $0xb80] ss:$16 sps:$4 sm:$0xff]  }
 0xa9c   : > { %17878 = vmatpush1.bf16.msra.mxu1 %v22861_v25  ;;  %v14441_v40 = vpop.f32.mrf.mxu0  ;;  %17838 = vmatprep.subr.bf16.mxu0 %v22866_v22  ;;  %v22926_v25 = vld [vmem:[%s30186_s7 + $0x964] ss:$16 sps:$4 sm:$0xff]   ;;  %v22927_v26 = vld [vmem:[%s30186_s7 + $0xb60] ss:$16 sps:$4 sm:$0xff]  }
 0xa9d   : > { %v14482_v52 = vpop.f32.mrf.mxu1  ;;  %17879 = vmatprep.subr.bf16.mxu1 %v22869_v23  ;;  %v22929_v22 = vld [vmem:[%s30186_s7 + $0xb64] ss:$16 sps:$4 sm:$0xff]   ;;  %v22924_v23 = vld [vmem:[%s30186_s7 + $0x960] ss:$16 sps:$4 sm:$0xff]  }
 0xa9e   : > { %v22932_v29 = vld [vmem:[%s30186_s7 + $0x944] ss:$16 sps:$4 sm:$0xff]   ;;  %v22930_v40 = vld [vmem:[%s30186_s7 + $0x940] ss:$16 sps:$4 sm:$0xff]  }
 0xa9f   : > { %17839 = vmatpush1.bf16.msra.mxu0 %v22864_v55  ;;  %v22935_v55 = vld [vmem:[%s30186_s7 + $0xb44] ss:$16 sps:$4 sm:$0xff]  }
 0xaa0   : > { %17880 = vmatpush1.bf16.msra.mxu1 %v22867_v30  ;;  %17840 = vmatprep.subr.bf16.mxu0 %v22872_v32  ;;  %v22933_v30 = vld [vmem:[%s30186_s7 + $0xb40] ss:$16 sps:$4 sm:$0xff]   ;;  %v22938_v32 = vld [vmem:[%s30186_s7 + $0x924] ss:$16 sps:$4 sm:$0xff]  }
 0xaa1   : > { %17881 = vmatprep.subr.bf16.mxu1 %v22875_v24  ;;  %v22941_v52 = vld [vmem:[%s30186_s7 + $0xb24] ss:$16 sps:$4 sm:$0xff]   ;;  %v22936_v24 = vld [vmem:[%s30186_s7 + $0x920] ss:$16 sps:$4 sm:$0xff]  }
 0xaa3   : > { %17841 = vmatpush1.bf16.msra.mxu0 %v22870_v10  ;;  %v22939_v10 = vld [vmem:[%s30186_s7 + $0xb20] ss:$16 sps:$4 sm:$0xff]  }
 0xaa4   : > { %17882 = vmatpush1.bf16.msra.mxu1 %v22873_v16  ;;  %17842 = vmatprep.subr.bf16.mxu0 %v22878_v41  ;;  %v22944_v16 = vld [vmem:[%s30186_s7 + $0x904] ss:$16 sps:$4 sm:$0xff]  }
 0xaa5   : > { %17883 = vmatprep.subr.bf16.mxu1 %v22881_v34  ;;  %v22947_v41 = vld [vmem:[%s30186_s7 + $0xb04] ss:$16 sps:$4 sm:$0xff]   ;;  %v14480_v34 = vadd.f32 %v28898_v37, %v28889_v53 }
 0xaa6   : > { %v22953_v53 = vld [vmem:[%s30186_s7 + $0xee4] ss:$16 sps:$4 sm:$0xff]  }
 0xaa7   : > { %17843 = vmatpush1.bf16.msra.mxu0 %v22876_v5  ;;  %v22942_v5 = vld [vmem:[%s30186_s7 + $0x900] ss:$16 sps:$4 sm:$0xff]   ;;  %v14579_v37 = vmax.f32 %v14480_v34, 0.0  ;;  %v22995_v34 = vld [vmem:[%s30186_s7 + $0xe04] ss:$16 sps:$4 sm:$0xff]  }
 0xaa8   : > { %17884 = vmatpush1.bf16.msra.mxu1 %v22879_v9  ;;  %17844 = vmatprep.subr.bf16.mxu0 %v22884_v13  ;;  %v14574_v9 = vmax.f32 %v28459_v19, 0.0  ;;  %v22945_v13 = vld [vmem:[%s30186_s7 + $0xb00] ss:$16 sps:$4 sm:$0xff]  }
 0xaa9   : > { %17885 = vmatprep.subr.bf16.mxu1 %v22887_v61  ;;  %v22950_v61 = vld [vmem:[%s30186_s7 + $0xce4] ss:$16 sps:$4 sm:$0xff]   ;;  %v22948_v19 = vld [vmem:[%s30186_s7 + $0xce0] ss:$16 sps:$4 sm:$0xff]  }
 0xaab   : > { %17845 = vmatpush1.bf16.msra.mxu0 %v22882_v50  ;;  %v14576_v50 = vmax.f32 %v28671_v47, 0.0 }
 0xaac   : > { %17886 = vmatpush1.bf16.msra.mxu1 %v22885_v27  ;;  %17846 = vmatprep.subr.bf16.mxu0 %v22890_v51  ;;  %v29078_v27 = vpack.c.bf16 %v14574_v9, %v14574_v9  ;;  %v22951_v51 = vld [vmem:[%s30186_s7 + $0xee0] ss:$16 sps:$4 sm:$0xff]  }
 0xaad   : > { %17887 = vmatprep.subr.bf16.mxu1 %v22893_v12  ;;  %v29083_v47 = vpack.c.bf16 %v14576_v50, %v14576_v50  ;;  %v22956_v12 = vld [vmem:[%s30186_s7 + $0xcc4] ss:$16 sps:$4 sm:$0xff]   ;;  %v22993_v9 = vld [vmem:[%s30186_s7 + $0xe00] ss:$16 sps:$4 sm:$0xff]  }
 0xaae   : > { %v22996_v50 = vld [vmem:[%s30186_s7 + $0xde0] ss:$16 sps:$4 sm:$0xff]  }
 0xaaf   : > { %17847 = vmatpush1.bf16.msra.mxu0 %v22888_v48  ;;  %v22959_v48 = vld [vmem:[%s30186_s7 + $0xec4] ss:$16 sps:$4 sm:$0xff]  }
 0xab0   : > { %17888 = vmatpush1.bf16.msra.mxu1 %v22891_v63  ;;  %17848 = vmatprep.subr.bf16.mxu0 %v22896_v4  ;;  %v29091_v63 = vpack.c.bf16 %v14579_v37, %v14579_v37  ;;  %v23004_v37 = vld [vmem:[%s30186_s7 + $0xdc4] ss:$16 sps:$4 sm:$0xff]  }
 0xab1   : > { %17889 = vmatprep.subr.bf16.mxu1 %v22899_v60 }
 0xab3   : > { %17849 = vmatpush1.bf16.msra.mxu0 %v22894_v39  ;;  %v22954_v39 = vld [vmem:[%s30186_s7 + $0xcc0] ss:$16 sps:$4 sm:$0xff]  }
 0xab4   : > { %17890 = vmatpush1.bf16.msra.mxu1 %v22897_v7  ;;  %17850 = vmatprep.subr.bf16.mxu0 %v22902_v11  ;;  %v22957_v11 = vld [vmem:[%s30186_s7 + $0xec0] ss:$16 sps:$4 sm:$0xff]  }
 0xab5   : > { %17891 = vmatprep.subr.bf16.mxu1 %v22905_v14  ;;  %v22962_v14 = vld [vmem:[%s30186_s7 + $0xca4] ss:$16 sps:$4 sm:$0xff]  }
 0xab7   : > { %17851 = vmatpush2.bf16.msra.mxu0 %v22900_v15 }
 0xab8   : > { %17892 = vmatpush2.bf16.msra.mxu1 %v22903_v3  ;;  %17852 = vmatprep.subr.bf16.mxu0 %v22908_v35  ;;  %v22965_v3 = vld [vmem:[%s30186_s7 + $0xea4] ss:$16 sps:$4 sm:$0xff]  }
 0xab9   : > { %17893 = vmatprep.subr.bf16.mxu1 %v22911_v62 }
 0xabb   : > { %17853 = vmatpush2.bf16.msra.mxu0 %v22906_v49 }
 0xabc   : > { %17894 = vmatpush2.bf16.msra.mxu1 %v22909_v58  ;;  %17854 = vmatprep.subr.bf16.mxu0 %v22914_v0  ;;  %v22960_v58 = vld [vmem:[%s30186_s7 + $0xca0] ss:$16 sps:$4 sm:$0xff]  }
 0xabd   : > { %17895 = vmatprep.subr.bf16.mxu1 %v22917_v38 }
 0xabf   : > { %17855 = vmatpush2.bf16.msra.mxu0 %v22912_v45  ;;  %v22963_v45 = vld [vmem:[%s30186_s7 + $0xea0] ss:$16 sps:$4 sm:$0xff]  }
 0xac0   : > { %17896 = vmatpush2.bf16.msra.mxu1 %v22915_v6  ;;  %17856 = vmatprep.subr.bf16.mxu0 %v22920_v20  ;;  %v22968_v20 = vld [vmem:[%s30186_s7 + $0xc84] ss:$16 sps:$4 sm:$0xff]  }
 0xac1   : > { %17897 = vmatprep.subr.bf16.mxu1 %v22923_v36  ;;  %v22971_v36 = vld [vmem:[%s30186_s7 + $0xe84] ss:$16 sps:$4 sm:$0xff]  }
 0xac3   : > { %17857 = vmatpush2.bf16.msra.mxu0 %v22918_v28 }
 0xac4   : > { %17898 = vmatpush2.bf16.msra.mxu1 %v22921_v8  ;;  %17858 = vmatprep.subr.bf16.mxu0 %v22926_v25  ;;  %v22966_v8 = vld [vmem:[%s30186_s7 + $0xc80] ss:$16 sps:$4 sm:$0xff]  }
 0xac5   : > { %17899 = vmatprep.subr.bf16.mxu1 %v22929_v22  ;;  %v22969_v25 = vld [vmem:[%s30186_s7 + $0xe80] ss:$16 sps:$4 sm:$0xff]   ;;  %v22974_v22 = vld [vmem:[%s30186_s7 + $0xc64] ss:$16 sps:$4 sm:$0xff]  }
 0xac7   : > { %17859 = vmatpush2.bf16.msra.mxu0 %v22924_v23  ;;  %v22977_v23 = vld [vmem:[%s30186_s7 + $0xe64] ss:$16 sps:$4 sm:$0xff]  }
 0xac8   : > { %17900 = vmatpush2.bf16.msra.mxu1 %v22927_v26  ;;  %17860 = vmatprep.subr.bf16.mxu0 %v22932_v29  ;;  %v22972_v26 = vld [vmem:[%s30186_s7 + $0xc60] ss:$16 sps:$4 sm:$0xff]  }
 0xac9   : > { %17901 = vmatprep.subr.bf16.mxu1 %v22935_v55  ;;  %v22975_v29 = vld [vmem:[%s30186_s7 + $0xe60] ss:$16 sps:$4 sm:$0xff]   ;;  %v22980_v55 = vld [vmem:[%s30186_s7 + $0xc44] ss:$16 sps:$4 sm:$0xff]  }
 0xacb   : > { %17861 = vmatpush2.bf16.msra.mxu0 %v22930_v40  ;;  %v22983_v40 = vld [vmem:[%s30186_s7 + $0xe44] ss:$16 sps:$4 sm:$0xff]  }
 0xacc   : > { %17902 = vmatpush2.bf16.msra.mxu1 %v22933_v30  ;;  %17862 = vmatprep.subr.bf16.mxu0 %v22938_v32  ;;  %v22978_v30 = vld [vmem:[%s30186_s7 + $0xc40] ss:$16 sps:$4 sm:$0xff]  }
 0xacd   : > { %17903 = vmatprep.subr.bf16.mxu1 %v22941_v52  ;;  %v22981_v32 = vld [vmem:[%s30186_s7 + $0xe40] ss:$16 sps:$4 sm:$0xff]   ;;  %v22986_v52 = vld [vmem:[%s30186_s7 + $0xc24] ss:$16 sps:$4 sm:$0xff]  }
 0xacf   : > { %17863 = vmatpush2.bf16.msra.mxu0 %v22936_v24  ;;  %v22989_v24 = vld [vmem:[%s30186_s7 + $0xe24] ss:$16 sps:$4 sm:$0xff]  }
 0xad0   : > { %17904 = vmatpush2.bf16.msra.mxu1 %v22939_v10  ;;  %17864 = vmatprep.subr.bf16.mxu0 %v22944_v16  ;;  %v22984_v10 = vld [vmem:[%s30186_s7 + $0xc20] ss:$16 sps:$4 sm:$0xff]  }
 0xad1   : > { %17905 = vmatprep.subr.bf16.mxu1 %v22947_v41  ;;  %v22987_v16 = vld [vmem:[%s30186_s7 + $0xe20] ss:$16 sps:$4 sm:$0xff]   ;;  %v22992_v41 = vld [vmem:[%s30186_s7 + $0xc04] ss:$16 sps:$4 sm:$0xff]  }
 0xad3   : > { %17865 = vmatpush2.bf16.msra.mxu0 %v22942_v5  ;;  %v22990_v5 = vld [vmem:[%s30186_s7 + $0xc00] ss:$16 sps:$4 sm:$0xff]  }
 0xad4   : > { %17906 = vmatpush2.bf16.msra.mxu1 %v22945_v13  ;;  %17916 = vmatprep.subr.bf16.mxu0 %v22950_v61  ;;  %v22998_v13 = vld [vmem:[%s30186_s7 + $0xde4] ss:$16 sps:$4 sm:$0xff]  }
 0xad5   : > { %17957 = vmatprep.subr.bf16.mxu1 %v22953_v53  ;;  %v23001_v61 = vld [vmem:[%s30186_s7 + $0xfe4] ss:$16 sps:$4 sm:$0xff]   ;;  %v22999_v53 = vld [vmem:[%s30186_s7 + $0xfe0] ss:$16 sps:$4 sm:$0xff]  }
 0xad6   : > { %v29093_v4 = vpop.f32.mrf.mxu0  ;;  %17867 = vmatmul.mubr.bf16.vlgmr.msra.gmra.mxu0 %v29078_v27 }
 0xad7   : > { %v29096_v60 = vpop.f32.mrf.mxu1  ;;  %17908 = vmatmul.mubr.bf16.vlgmr.msra.gmra.mxu1 %v29083_v47  ;;  %17917 = vmatpush1.bf16.msra.mxu0 %v22948_v19  ;;  %v23007_v19 = vld [vmem:[%s30186_s7 + $0xfc4] ss:$16 sps:$4 sm:$0xff]  }
 0xad8   : > { %17948 = vmatprep.mubr.bf16.mxu0 %v29091_v63  ;;  %17958 = vmatpush1.bf16.msra.mxu1 %v22951_v51  ;;  %v14520_v7 = vpop.f32.mrf.mxu0  ;;  %v23002_v51 = vld [vmem:[%s30186_s7 + $0xdc0] ss:$16 sps:$4 sm:$0xff]  }
 0xad9   : > { %v14561_v15 = vpop.f32.mrf.mxu1  ;;  %17918 = vmatprep.subr.bf16.mxu0 %v22956_v12  ;;  %17959 = vmatprep.subr.bf16.mxu1 %v22959_v48  ;;  %v23005_v12 = vld [vmem:[%s30186_s7 + $0xfc0] ss:$16 sps:$4 sm:$0xff]   ;;  %v23010_v48 = vld [vmem:[%s30186_s7 + $0xda4] ss:$16 sps:$4 sm:$0xff]  }
 0xada   : > { %v14562_v35 = vadd.f32 %v14561_v15, %v14520_v7  ;;  %v14522_v62 = vpop.f32.mrf.mxu0  ;;  %v23008_v7 = vld [vmem:[%s30186_s7 + $0xda0] ss:$16 sps:$4 sm:$0xff]   ;;  %v23019_v15 = vld [vmem:[%s30186_s7 + $0xf84] ss:$16 sps:$4 sm:$0xff]  }
 0xadb   : > { %v14563_v49 = vpop.f32.mrf.mxu1  ;;  %17919 = vmatpush1.bf16.msra.mxu0 %v22954_v39  ;;  %v23013_v39 = vld [vmem:[%s30186_s7 + $0xfa4] ss:$16 sps:$4 sm:$0xff]  }
 0xadc   : > { %v14581_v0 = vmax.f32 %v14562_v35, 0.0  ;;  %17960 = vmatpush1.bf16.msra.mxu1 %v22957_v11  ;;  %v14523_v38 = vpop.f32.mrf.mxu0  ;;  %17920 = vmatprep.subr.bf16.mxu0 %v22962_v14  ;;  %v23011_v11 = vld [vmem:[%s30186_s7 + $0xfa0] ss:$16 sps:$4 sm:$0xff]   ;;  %v23016_v14 = vld [vmem:[%s30186_s7 + $0xd84] ss:$16 sps:$4 sm:$0xff]  }
 0xadd   : > { %v14564_v6 = vpop.f32.mrf.mxu1  ;;  %17961 = vmatprep.subr.bf16.mxu1 %v22965_v3  ;;  %v23014_v3 = vld [vmem:[%s30186_s7 + $0xd80] ss:$16 sps:$4 sm:$0xff]   ;;  %v23022_v62 = vld [vmem:[%s30186_s7 + $0xd64] ss:$16 sps:$4 sm:$0xff]  }
 0xade   : > { %v29124_v28 = vpack.c.bf16 %v14581_v0, %v14581_v0  ;;  %v23017_v35 = vld [vmem:[%s30186_s7 + $0xf80] ss:$16 sps:$4 sm:$0xff]   ;;  %v23025_v49 = vld [vmem:[%s30186_s7 + $0xf64] ss:$16 sps:$4 sm:$0xff]  }
 0xadf   : > { %17921 = vmatpush1.bf16.msra.mxu0 %v22960_v58  ;;  %v23020_v58 = vld [vmem:[%s30186_s7 + $0xd60] ss:$16 sps:$4 sm:$0xff]   ;;  %v23028_v38 = vld [vmem:[%s30186_s7 + $0xd44] ss:$16 sps:$4 sm:$0xff]  }
 0xae0   : > { %17962 = vmatpush1.bf16.msra.mxu1 %v22963_v45  ;;  %17989 = vmatprep.mubr.bf16.mxu1 %v29124_v28  ;;  %v23023_v0 = vld [vmem:[%s30186_s7 + $0xf60] ss:$16 sps:$4 sm:$0xff]   ;;  %v23031_v45 = vld [vmem:[%s30186_s7 + $0xf44] ss:$16 sps:$4 sm:$0xff]  }
 0xae1   : > { %17922 = vmatprep.subr.bf16.mxu0 %v22968_v20  ;;  %17963 = vmatprep.subr.bf16.mxu1 %v22971_v36  ;;  %v23026_v6 = vld [vmem:[%s30186_s7 + $0xd40] ss:$16 sps:$4 sm:$0xff]   ;;  %v23034_v36 = vld [vmem:[%s30186_s7 + $0xd24] ss:$16 sps:$4 sm:$0xff]  }
 0xae2   : > { %v23029_v20 = vld [vmem:[%s30186_s7 + $0xf40] ss:$16 sps:$4 sm:$0xff]  }
 0xae3   : > { %17923 = vmatpush1.bf16.msra.mxu0 %v22966_v8  ;;  %v23037_v8 = vld [vmem:[%s30186_s7 + $0xf24] ss:$16 sps:$4 sm:$0xff]  }
 0xae4   : > { %17964 = vmatpush1.bf16.msra.mxu1 %v22969_v25  ;;  %17924 = vmatprep.subr.bf16.mxu0 %v22974_v22  ;;  %v23032_v25 = vld [vmem:[%s30186_s7 + $0xd20] ss:$16 sps:$4 sm:$0xff]  }
 0xae5   : > { %17965 = vmatprep.subr.bf16.mxu1 %v22977_v23  ;;  %v23035_v22 = vld [vmem:[%s30186_s7 + $0xf20] ss:$16 sps:$4 sm:$0xff]   ;;  %v23040_v23 = vld [vmem:[%s30186_s7 + $0xd04] ss:$16 sps:$4 sm:$0xff]  }
 0xae7   : > { %17925 = vmatpush1.bf16.msra.mxu0 %v22972_v26  ;;  %v14560_v26 = vadd.f32 %v29096_v60, %v29093_v4  ;;  %v23046_v4 = vld [vmem:[%s30186_s7 + $0xec] ss:$16 sps:$4 sm:$0xff]  }
 0xae8   : > { %17966 = vmatpush1.bf16.msra.mxu1 %v22975_v29  ;;  %17926 = vmatprep.subr.bf16.mxu0 %v22980_v55  ;;  %v23043_v29 = vld [vmem:[%s30186_s7 + $0xf04] ss:$16 sps:$4 sm:$0xff]   ;;  %v23038_v55 = vld [vmem:[%s30186_s7 + $0xd00] ss:$16 sps:$4 sm:$0xff]  }
 0xae9   : > { %17967 = vmatprep.subr.bf16.mxu1 %v22983_v40  ;;  %v14578_v40 = vmax.f32 %v28886_v2, 0.0  ;;  %v14580_v60 = vmax.f32 %v14560_v26, 0.0  ;;  %v23044_v2 = vld [vmem:[%s30186_s7 + $0xe8] ss:$16 sps:$4 sm:$0xff]  }
 0xaea   : > { %v23086_v26 = vld [vmem:[%s30186_s7 + $0x8] ss:$16 sps:$4 sm:$0xff]  }
 0xaeb   : > { %17927 = vmatpush1.bf16.msra.mxu0 %v22978_v30  ;;  %v23041_v30 = vld [vmem:[%s30186_s7 + $0xf00] ss:$16 sps:$4 sm:$0xff]  }
 0xaec   : > { %17968 = vmatpush1.bf16.msra.mxu1 %v22981_v32  ;;  %17928 = vmatprep.subr.bf16.mxu0 %v22986_v52  ;;  %v23049_v32 = vld [vmem:[%s30186_s7 + $0x2ec] ss:$16 sps:$4 sm:$0xff]   ;;  %v29289_v52 = vpack.c.bf16 %v14578_v40, %v14578_v40 }
 0xaed   : > { %17969 = vmatprep.subr.bf16.mxu1 %v22989_v24  ;;  %v23047_v24 = vld [vmem:[%s30186_s7 + $0x2e8] ss:$16 sps:$4 sm:$0xff]   ;;  %v23097_v40 = vld [vmem:[%s30186_s7 + $0x3ec] ss:$16 sps:$4 sm:$0xff]  }
 0xaef   : > { %17929 = vmatpush1.bf16.msra.mxu0 %v22984_v10  ;;  %v29294_v10 = vpack.c.bf16 %v14580_v60, %v14580_v60  ;;  %v23100_v60 = vld [vmem:[%s30186_s7 + $0x1cc] ss:$16 sps:$4 sm:$0xff]  }
 0xaf0   : > { %17970 = vmatpush1.bf16.msra.mxu1 %v22987_v16  ;;  %17930 = vmatprep.subr.bf16.mxu0 %v22992_v41  ;;  %v23052_v16 = vld [vmem:[%s30186_s7 + $0xcc] ss:$16 sps:$4 sm:$0xff]  }
 0xaf1   : > { %17971 = vmatprep.subr.bf16.mxu1 %v22995_v34  ;;  %v23055_v34 = vld [vmem:[%s30186_s7 + $0x2cc] ss:$16 sps:$4 sm:$0xff]  }
 0xaf3   : > { %17931 = vmatpush1.bf16.msra.mxu0 %v22990_v5 }
 0xaf4   : > { %17972 = vmatpush1.bf16.msra.mxu1 %v22993_v9  ;;  %17932 = vmatprep.subr.bf16.mxu0 %v22998_v13  ;;  %v23050_v13 = vld [vmem:[%s30186_s7 + $0xc8] ss:$16 sps:$4 sm:$0xff]  }
 0xaf5   : > { %17973 = vmatprep.subr.bf16.mxu1 %v23001_v61 }
 0xaf7   : > { %17933 = vmatpush2.bf16.msra.mxu0 %v22996_v50  ;;  %v23053_v50 = vld [vmem:[%s30186_s7 + $0x2c8] ss:$16 sps:$4 sm:$0xff]  }
 0xaf8   : > { %17974 = vmatpush2.bf16.msra.mxu1 %v22999_v53  ;;  %17934 = vmatprep.subr.bf16.mxu0 %v23004_v37 }
 0xaf9   : > { %17975 = vmatprep.subr.bf16.mxu1 %v23007_v19 }
 0xafb   : > { %17935 = vmatpush2.bf16.msra.mxu0 %v23002_v51 }
 0xafc   : > { %17976 = vmatpush2.bf16.msra.mxu1 %v23005_v12  ;;  %17936 = vmatprep.subr.bf16.mxu0 %v23010_v48 }
 0xafd   : > { %17977 = vmatprep.subr.bf16.mxu1 %v23013_v39  ;;  %v23056_v39 = vld [vmem:[%s30186_s7 + $0xa8] ss:$16 sps:$4 sm:$0xff]  }
 0xaff   : > { %17937 = vmatpush2.bf16.msra.mxu0 %v23008_v7  ;;  %v23064_v7 = vld [vmem:[%s30186_s7 + $0x8c] ss:$16 sps:$4 sm:$0xff]  }
 0xb00   : > { %17978 = vmatpush2.bf16.msra.mxu1 %v23011_v11  ;;  %17938 = vmatprep.subr.bf16.mxu0 %v23016_v14  ;;  %v23067_v14 = vld [vmem:[%s30186_s7 + $0x28c] ss:$16 sps:$4 sm:$0xff]  }
 0xb01   : > { %17979 = vmatprep.subr.bf16.mxu1 %v23019_v15  ;;  %v23062_v15 = vld [vmem:[%s30186_s7 + $0x88] ss:$16 sps:$4 sm:$0xff]  }
 0xb03   : > { %17939 = vmatpush2.bf16.msra.mxu0 %v23014_v3  ;;  %v23065_v3 = vld [vmem:[%s30186_s7 + $0x288] ss:$16 sps:$4 sm:$0xff]  }
 0xb04   : > { %17980 = vmatpush2.bf16.msra.mxu1 %v23017_v35  ;;  %17940 = vmatprep.subr.bf16.mxu0 %v23022_v62  ;;  %v23070_v35 = vld [vmem:[%s30186_s7 + $0x6c] ss:$16 sps:$4 sm:$0xff]  }
 0xb05   : > { %17981 = vmatprep.subr.bf16.mxu1 %v23025_v49  ;;  %v23073_v62 = vld [vmem:[%s30186_s7 + $0x26c] ss:$16 sps:$4 sm:$0xff]   ;;  %v23068_v49 = vld [vmem:[%s30186_s7 + $0x68] ss:$16 sps:$4 sm:$0xff]  }
 0xb07   : > { %17941 = vmatpush2.bf16.msra.mxu0 %v23020_v58  ;;  %v23071_v58 = vld [vmem:[%s30186_s7 + $0x268] ss:$16 sps:$4 sm:$0xff]  }
 0xb08   : > { %17982 = vmatpush2.bf16.msra.mxu1 %v23023_v0  ;;  %17942 = vmatprep.subr.bf16.mxu0 %v23028_v38  ;;  %v23076_v0 = vld [vmem:[%s30186_s7 + $0x4c] ss:$16 sps:$4 sm:$0xff]  }
 0xb09   : > { %17983 = vmatprep.subr.bf16.mxu1 %v23031_v45  ;;  %v23079_v38 = vld [vmem:[%s30186_s7 + $0x24c] ss:$16 sps:$4 sm:$0xff]   ;;  %v23074_v45 = vld [vmem:[%s30186_s7 + $0x48] ss:$16 sps:$4 sm:$0xff]  }
 0xb0b   : > { %17943 = vmatpush2.bf16.msra.mxu0 %v23026_v6  ;;  %v23077_v6 = vld [vmem:[%s30186_s7 + $0x248] ss:$16 sps:$4 sm:$0xff]  }
 0xb0c   : > { %17984 = vmatpush2.bf16.msra.mxu1 %v23029_v20  ;;  %17944 = vmatprep.subr.bf16.mxu0 %v23034_v36  ;;  %v23082_v20 = vld [vmem:[%s30186_s7 + $0x2c] ss:$16 sps:$4 sm:$0xff]  }
 0xb0d   : > { %17985 = vmatprep.subr.bf16.mxu1 %v23037_v8  ;;  %v23085_v36 = vld [vmem:[%s30186_s7 + $0x22c] ss:$16 sps:$4 sm:$0xff]   ;;  %v23080_v8 = vld [vmem:[%s30186_s7 + $0x28] ss:$16 sps:$4 sm:$0xff]  }
 0xb0f   : > { %17945 = vmatpush2.bf16.msra.mxu0 %v23032_v25  ;;  %v23083_v25 = vld [vmem:[%s30186_s7 + $0x228] ss:$16 sps:$4 sm:$0xff]  }
 0xb10   : > { %17986 = vmatpush2.bf16.msra.mxu1 %v23035_v22  ;;  %17946 = vmatprep.subr.bf16.mxu0 %v23040_v23  ;;  %v23088_v22 = vld [vmem:[%s30186_s7 + $0xc] ss:$16 sps:$4 sm:$0xff]  }
 0xb11   : > { %17987 = vmatprep.subr.bf16.mxu1 %v23043_v29  ;;  %v23091_v23 = vld [vmem:[%s30186_s7 + $0x20c] ss:$16 sps:$4 sm:$0xff]   ;;  %v23089_v29 = vld [vmem:[%s30186_s7 + $0x208] ss:$16 sps:$4 sm:$0xff]  }
 0xb13   : > { %17947 = vmatpush2.bf16.msra.mxu0 %v23038_v55  ;;  %v23094_v55 = vld [vmem:[%s30186_s7 + $0x1ec] ss:$16 sps:$4 sm:$0xff]  }
 0xb14   : > { %17988 = vmatpush2.bf16.msra.mxu1 %v23041_v30  ;;  %17998 = vmatprep.subr.bf16.mxu0 %v23046_v4  ;;  %v23092_v30 = vld [vmem:[%s30186_s7 + $0x1e8] ss:$16 sps:$4 sm:$0xff]  }
 0xb15   : > { %18039 = vmatprep.subr.bf16.mxu1 %v23049_v32  ;;  %v23095_v4 = vld [vmem:[%s30186_s7 + $0x3e8] ss:$16 sps:$4 sm:$0xff]   ;;  %v23103_v32 = vld [vmem:[%s30186_s7 + $0x3cc] ss:$16 sps:$4 sm:$0xff]  }
 0xb16   : > { %v17704_v41 = vpop.f32.mrf.mxu0  ;;  %17949 = vmatmul.mubr.bf16.vlgmr.msra.gmra.mxu0 %v29289_v52 }
 0xb17   : > { %v17705_v5 = vadd.f32 %v17704_v41, %v27031_v56  ;;  %v17745_v9 = vpop.f32.mrf.mxu1  ;;  %17990 = vmatmul.mubr.bf16.vlgmr.msra.gmra.mxu1 %v29294_v10  ;;  %17999 = vmatpush1.bf16.msra.mxu0 %v23044_v2  ;;  %v23058_v56 = vld [vmem:[%s30186_s7 + $0xac] ss:$16 sps:$4 sm:$0xff]   ;;  %v23098_v2 = vld [vmem:[%s30186_s7 + $0x1c8] ss:$16 sps:$4 sm:$0xff]  }
 0xb18   : > { %18030 = vmatprep.mubr.bf16.mxu0 %v28447_v43  ;;  %18040 = vmatpush1.bf16.msra.mxu1 %v23047_v24  ;;  %v17706_v61 = vpop.f32.mrf.mxu0  ;;  %v23061_v43 = vld [vmem:[%s30186_s7 + $0x2ac] ss:$16 sps:$4 sm:$0xff]   ;;  %v23101_v24 = vld [vmem:[%s30186_s7 + $0x3c8] ss:$16 sps:$4 sm:$0xff]  }
 0xb19   : > { %v29315_v53 = vadd.f32 %v17745_v9, %v17705_v5  ;;  %18071 = vmatprep.mubr.bf16.mxu1 %v28453_v17  ;;  %v17707_v37 = vadd.f32 %v17706_v61, %v27025_v46  ;;  %v17747_v19 = vpop.f32.mrf.mxu1  ;;  %18000 = vmatprep.subr.bf16.mxu0 %v23052_v16  ;;  %v23059_v46 = vld [vmem:[%s30186_s7 + $0x2a8] ss:$16 sps:$4 sm:$0xff]   ;;  %v23106_v16 = vld [vmem:[%s30186_s7 + $0x1ac] ss:$16 sps:$4 sm:$0xff]  }
 0xb1a   : > { %v17708_v51 = vpop.f32.mrf.mxu0  ;;  %18041 = vmatprep.subr.bf16.mxu1 %v23055_v34  ;;  %v23109_v41 = vld [vmem:[%s30186_s7 + $0x3ac] ss:$16 sps:$4 sm:$0xff]   ;;  %v23104_v34 = vld [vmem:[%s30186_s7 + $0x1a8] ss:$16 sps:$4 sm:$0xff]  }
 0xb1b   : > { %v29322_v12 = vadd.f32 %v17747_v19, %v17707_v37  ;;  %v17749_v48 = vpop.f32.mrf.mxu1  ;;  %18001 = vmatpush1.bf16.msra.mxu0 %v23050_v13  ;;  %v23107_v5 = vld [vmem:[%s30186_s7 + $0x3a8] ss:$16 sps:$4 sm:$0xff]   ;;  %v23112_v9 = vld [vmem:[%s30186_s7 + $0x18c] ss:$16 sps:$4 sm:$0xff]  }
 0xb1c   : > { %18042 = vmatpush1.bf16.msra.mxu1 %v23053_v50  ;;  %v17709_v17 = vpop.f32.mrf.mxu0  ;;  %18002 = vmatprep.subr.bf16.mxu0 %v23058_v56  ;;  %v23115_v13 = vld [vmem:[%s30186_s7 + $0x38c] ss:$16 sps:$4 sm:$0xff]   ;;  %v23110_v61 = vld [vmem:[%s30186_s7 + $0x188] ss:$16 sps:$4 sm:$0xff]  }
 0xb1d   : > { %v17750_v11 = vpop.f32.mrf.mxu1  ;;  %18043 = vmatprep.subr.bf16.mxu1 %v23061_v43  ;;  %v23113_v50 = vld [vmem:[%s30186_s7 + $0x388] ss:$16 sps:$4 sm:$0xff]   ;;  %v23118_v56 = vld [vmem:[%s30186_s7 + $0x16c] ss:$16 sps:$4 sm:$0xff]  }
 0xb1e   : > { %v23121_v37 = vld [vmem:[%s30186_s7 + $0x36c] ss:$16 sps:$4 sm:$0xff]   ;;  %v23116_v19 = vld [vmem:[%s30186_s7 + $0x168] ss:$16 sps:$4 sm:$0xff]  }
 0xb1f   : > { %18003 = vmatpush1.bf16.msra.mxu0 %v23056_v39  ;;  %v23119_v43 = vld [vmem:[%s30186_s7 + $0x368] ss:$16 sps:$4 sm:$0xff]   ;;  %v23124_v51 = vld [vmem:[%s30186_s7 + $0x14c] ss:$16 sps:$4 sm:$0xff]  }
 0xb20   : > { %18044 = vmatpush1.bf16.msra.mxu1 %v23059_v46  ;;  %18004 = vmatprep.subr.bf16.mxu0 %v23064_v7  ;;  %v23127_v48 = vld [vmem:[%s30186_s7 + $0x34c] ss:$16 sps:$4 sm:$0xff]   ;;  %v23122_v39 = vld [vmem:[%s30186_s7 + $0x148] ss:$16 sps:$4 sm:$0xff]  }
 0xb21   : > { %18045 = vmatprep.subr.bf16.mxu1 %v23067_v14  ;;  %v23125_v17 = vld [vmem:[%s30186_s7 + $0x348] ss:$16 sps:$4 sm:$0xff]   ;;  %v23130_v46 = vld [vmem:[%s30186_s7 + $0x12c] ss:$16 sps:$4 sm:$0xff]  }
 0xb22   : > { %v23133_v7 = vld [vmem:[%s30186_s7 + $0x32c] ss:$16 sps:$4 sm:$0xff]   ;;  %v23128_v11 = vld [vmem:[%s30186_s7 + $0x128] ss:$16 sps:$4 sm:$0xff]  }
 0xb23   : > { %18005 = vmatpush1.bf16.msra.mxu0 %v23062_v15  ;;  %v23131_v14 = vld [vmem:[%s30186_s7 + $0x328] ss:$16 sps:$4 sm:$0xff]   ;;  %v23136_v15 = vld [vmem:[%s30186_s7 + $0x10c] ss:$16 sps:$4 sm:$0xff]  }
 0xb24   : > { %18046 = vmatpush1.bf16.msra.mxu1 %v23065_v3  ;;  %18006 = vmatprep.subr.bf16.mxu0 %v23070_v35  ;;  %v23139_v3 = vld [vmem:[%s30186_s7 + $0x30c] ss:$16 sps:$4 sm:$0xff]   ;;  %v23134_v35 = vld [vmem:[%s30186_s7 + $0x108] ss:$16 sps:$4 sm:$0xff]  }
 0xb25   : > { %18047 = vmatprep.subr.bf16.mxu1 %v23073_v62  ;;  %v23137_v62 = vld [vmem:[%s30186_s7 + $0x308] ss:$16 sps:$4 sm:$0xff]  }
 0xb27   : > { %18007 = vmatpush1.bf16.msra.mxu0 %v23068_v49  ;;  %v23142_v49 = vld [vmem:[%s30186_s7 + $0x4ec] ss:$16 sps:$4 sm:$0xff]  }
 0xb28   : > { %18048 = vmatpush1.bf16.msra.mxu1 %v23071_v58  ;;  %18008 = vmatprep.subr.bf16.mxu0 %v23076_v0  ;;  %v23145_v58 = vld [vmem:[%s30186_s7 + $0x6ec] ss:$16 sps:$4 sm:$0xff]   ;;  %v23140_v0 = vld [vmem:[%s30186_s7 + $0x4e8] ss:$16 sps:$4 sm:$0xff]  }
 0xb29   : > { %18049 = vmatprep.subr.bf16.mxu1 %v23079_v38  ;;  %v23143_v38 = vld [vmem:[%s30186_s7 + $0x6e8] ss:$16 sps:$4 sm:$0xff]  }
 0xb2b   : > { %18009 = vmatpush1.bf16.msra.mxu0 %v23074_v45  ;;  %v23148_v45 = vld [vmem:[%s30186_s7 + $0x4cc] ss:$16 sps:$4 sm:$0xff]  }
 0xb2c   : > { %18050 = vmatpush1.bf16.msra.mxu1 %v23077_v6  ;;  %18010 = vmatprep.subr.bf16.mxu0 %v23082_v20  ;;  %v23151_v20 = vld [vmem:[%s30186_s7 + $0x6cc] ss:$16 sps:$4 sm:$0xff]  }
 0xb2d   : > { %18051 = vmatprep.subr.bf16.mxu1 %v23085_v36 }
 0xb2f   : > { %18011 = vmatpush1.bf16.msra.mxu0 %v23080_v8 }
 0xb30   : > { %18052 = vmatpush1.bf16.msra.mxu1 %v23083_v25  ;;  %18012 = vmatprep.subr.bf16.mxu0 %v23088_v22  ;;  %v23146_v25 = vld [vmem:[%s30186_s7 + $0x4c8] ss:$16 sps:$4 sm:$0xff]  }
 0xb31   : > { %18053 = vmatprep.subr.bf16.mxu1 %v23091_v23 }
 0xb33   : > { %18013 = vmatpush1.bf16.msra.mxu0 %v23086_v26 }
 0xb34   : > { %18054 = vmatpush1.bf16.msra.mxu1 %v23089_v29  ;;  %18014 = vmatprep.subr.bf16.mxu0 %v23094_v55 }
 0xb35   : > { %18055 = vmatprep.subr.bf16.mxu1 %v23097_v40 }
 0xb37   : > { %18015 = vmatpush2.bf16.msra.mxu0 %v23092_v30  ;;  %v23152_v30 = vld [vmem:[%s30186_s7 + $0x4a8] ss:$16 sps:$4 sm:$0xff]  }
 0xb38   : > { %18056 = vmatpush2.bf16.msra.mxu1 %v23095_v4  ;;  %18016 = vmatprep.subr.bf16.mxu0 %v23100_v60  ;;  %v23160_v4 = vld [vmem:[%s30186_s7 + $0x48c] ss:$16 sps:$4 sm:$0xff]  }
 0xb39   : > { %18057 = vmatprep.subr.bf16.mxu1 %v23103_v32  ;;  %v23163_v32 = vld [vmem:[%s30186_s7 + $0x68c] ss:$16 sps:$4 sm:$0xff]  }
 0xb3b   : > { %18017 = vmatpush2.bf16.msra.mxu0 %v23098_v2  ;;  %v23158_v2 = vld [vmem:[%s30186_s7 + $0x488] ss:$16 sps:$4 sm:$0xff]  }
 0xb3c   : > { %18058 = vmatpush2.bf16.msra.mxu1 %v23101_v24  ;;  %18018 = vmatprep.subr.bf16.mxu0 %v23106_v16  ;;  %v23161_v24 = vld [vmem:[%s30186_s7 + $0x688] ss:$16 sps:$4 sm:$0xff]   ;;  %v23166_v16 = vld [vmem:[%s30186_s7 + $0x46c] ss:$16 sps:$4 sm:$0xff]  }
 0xb3d   : > { %18059 = vmatprep.subr.bf16.mxu1 %v23109_v41  ;;  %v23169_v41 = vld [vmem:[%s30186_s7 + $0x66c] ss:$16 sps:$4 sm:$0xff]  }
 0xb3f   : > { %18019 = vmatpush2.bf16.msra.mxu0 %v23104_v34  ;;  %v23164_v34 = vld [vmem:[%s30186_s7 + $0x468] ss:$16 sps:$4 sm:$0xff]  }
 0xb40   : > { %18060 = vmatpush2.bf16.msra.mxu1 %v23107_v5  ;;  %18020 = vmatprep.subr.bf16.mxu0 %v23112_v9  ;;  %v23167_v5 = vld [vmem:[%s30186_s7 + $0x668] ss:$16 sps:$4 sm:$0xff]   ;;  %v23172_v9 = vld [vmem:[%s30186_s7 + $0x44c] ss:$16 sps:$4 sm:$0xff]  }
 0xb41   : > { %18061 = vmatprep.subr.bf16.mxu1 %v23115_v13  ;;  %v23175_v13 = vld [vmem:[%s30186_s7 + $0x64c] ss:$16 sps:$4 sm:$0xff]  }
 0xb43   : > { %18021 = vmatpush2.bf16.msra.mxu0 %v23110_v61  ;;  %v23170_v61 = vld [vmem:[%s30186_s7 + $0x448] ss:$16 sps:$4 sm:$0xff]  }
 0xb44   : > { %18062 = vmatpush2.bf16.msra.mxu1 %v23113_v50  ;;  %18022 = vmatprep.subr.bf16.mxu0 %v23118_v56  ;;  %v23173_v50 = vld [vmem:[%s30186_s7 + $0x648] ss:$16 sps:$4 sm:$0xff]   ;;  %v23178_v56 = vld [vmem:[%s30186_s7 + $0x42c] ss:$16 sps:$4 sm:$0xff]  }
 0xb45   : > { %18063 = vmatprep.subr.bf16.mxu1 %v23121_v37  ;;  %v23181_v37 = vld [vmem:[%s30186_s7 + $0x62c] ss:$16 sps:$4 sm:$0xff]  }
 0xb47   : > { %18023 = vmatpush2.bf16.msra.mxu0 %v23116_v19  ;;  %v23176_v19 = vld [vmem:[%s30186_s7 + $0x428] ss:$16 sps:$4 sm:$0xff]  }
 0xb48   : > { %18064 = vmatpush2.bf16.msra.mxu1 %v23119_v43  ;;  %18024 = vmatprep.subr.bf16.mxu0 %v23124_v51  ;;  %v23179_v43 = vld [vmem:[%s30186_s7 + $0x628] ss:$16 sps:$4 sm:$0xff]   ;;  %v23184_v51 = vld [vmem:[%s30186_s7 + $0x40c] ss:$16 sps:$4 sm:$0xff]  }
 0xb49   : > { %18065 = vmatprep.subr.bf16.mxu1 %v23127_v48  ;;  %v23187_v48 = vld [vmem:[%s30186_s7 + $0x60c] ss:$16 sps:$4 sm:$0xff]  }
 0xb4b   : > { %18025 = vmatpush2.bf16.msra.mxu0 %v23122_v39  ;;  %v23182_v39 = vld [vmem:[%s30186_s7 + $0x408] ss:$16 sps:$4 sm:$0xff]  }
 0xb4c   : > { %18066 = vmatpush2.bf16.msra.mxu1 %v23125_v17  ;;  %18026 = vmatprep.subr.bf16.mxu0 %v23130_v46  ;;  %v23185_v17 = vld [vmem:[%s30186_s7 + $0x608] ss:$16 sps:$4 sm:$0xff]   ;;  %v23190_v46 = vld [vmem:[%s30186_s7 + $0x5ec] ss:$16 sps:$4 sm:$0xff]  }
 0xb4d   : > { %18067 = vmatprep.subr.bf16.mxu1 %v23133_v7  ;;  %v23193_v7 = vld [vmem:[%s30186_s7 + $0x7ec] ss:$16 sps:$4 sm:$0xff]  }
 0xb4f   : > { %18027 = vmatpush2.bf16.msra.mxu0 %v23128_v11  ;;  %v23188_v11 = vld [vmem:[%s30186_s7 + $0x5e8] ss:$16 sps:$4 sm:$0xff]  }
 0xb50   : > { %18068 = vmatpush2.bf16.msra.mxu1 %v23131_v14  ;;  %18028 = vmatprep.subr.bf16.mxu0 %v23136_v15  ;;  %v23191_v14 = vld [vmem:[%s30186_s7 + $0x7e8] ss:$16 sps:$4 sm:$0xff]   ;;  %v23196_v15 = vld [vmem:[%s30186_s7 + $0x5cc] ss:$16 sps:$4 sm:$0xff]  }
 0xb51   : > { %18069 = vmatprep.subr.bf16.mxu1 %v23139_v3  ;;  %v23199_v3 = vld [vmem:[%s30186_s7 + $0x7cc] ss:$16 sps:$4 sm:$0xff]  }
 0xb53   : > { %18029 = vmatpush2.bf16.msra.mxu0 %v23134_v35  ;;  %v23194_v35 = vld [vmem:[%s30186_s7 + $0x5c8] ss:$16 sps:$4 sm:$0xff]  }
 0xb54   : > { %18070 = vmatpush2.bf16.msra.mxu1 %v23137_v62  ;;  %18080 = vmatprep.subr.bf16.mxu0 %v23142_v49  ;;  %v23197_v62 = vld [vmem:[%s30186_s7 + $0x7c8] ss:$16 sps:$4 sm:$0xff]   ;;  %v23202_v49 = vld [vmem:[%s30186_s7 + $0x5ac] ss:$16 sps:$4 sm:$0xff]  }
 0xb55   : > { %18121 = vmatprep.subr.bf16.mxu1 %v23145_v58  ;;  %v23205_v58 = vld [vmem:[%s30186_s7 + $0x7ac] ss:$16 sps:$4 sm:$0xff]  }
 0xb56   : > { %v17786_v6 = vpop.f32.mrf.mxu0  ;;  %18031 = vmatmul.mubr.bf16.vlgmr.msra.gmra.mxu0 %v28649_v31  ;;  %v23149_v31 = vld [vmem:[%s30186_s7 + $0x6c8] ss:$16 sps:$4 sm:$0xff]  }
 0xb57   : > { %v17787_v36 = vadd.f32 %v17786_v6, %v29315_v53  ;;  %v17827_v8 = vpop.f32.mrf.mxu1  ;;  %18072 = vmatmul.mubr.bf16.vlgmr.msra.gmra.mxu1 %v28654_v1  ;;  %18081 = vmatpush1.bf16.msra.mxu0 %v23140_v0  ;;  %v23154_v53 = vld [vmem:[%s30186_s7 + $0x4ac] ss:$16 sps:$4 sm:$0xff]   ;;  %v23200_v0 = vld [vmem:[%s30186_s7 + $0x5a8] ss:$16 sps:$4 sm:$0xff]  }
 0xb58   : > { %18112 = vmatprep.mubr.bf16.mxu0 %v28659_v44  ;;  %18122 = vmatpush1.bf16.msra.mxu1 %v23143_v38  ;;  %v17788_v22 = vpop.f32.mrf.mxu0  ;;  %v23157_v44 = vld [vmem:[%s30186_s7 + $0x6ac] ss:$16 sps:$4 sm:$0xff]   ;;  %v23203_v38 = vld [vmem:[%s30186_s7 + $0x7a8] ss:$16 sps:$4 sm:$0xff]  }
 0xb59   : > { %v29517_v23 = vadd.f32 %v17827_v8, %v17787_v36  ;;  %18153 = vmatprep.mubr.bf16.mxu1 %v28665_v42  ;;  %v17789_v1 = vadd.f32 %v17788_v22, %v29322_v12  ;;  %v17829_v26 = vpop.f32.mrf.mxu1  ;;  %18082 = vmatprep.subr.bf16.mxu0 %v23148_v45  ;;  %v23155_v12 = vld [vmem:[%s30186_s7 + $0x6a8] ss:$16 sps:$4 sm:$0xff]   ;;  %v23208_v45 = vld [vmem:[%s30186_s7 + $0x58c] ss:$16 sps:$4 sm:$0xff]  }
 0xb5a   : > { %v17790_v29 = vpop.f32.mrf.mxu0  ;;  %18123 = vmatprep.subr.bf16.mxu1 %v23151_v20  ;;  %v23211_v6 = vld [vmem:[%s30186_s7 + $0x78c] ss:$16 sps:$4 sm:$0xff]   ;;  %v23206_v20 = vld [vmem:[%s30186_s7 + $0x588] ss:$16 sps:$4 sm:$0xff]  }
 0xb5b   : > { %v29524_v55 = vadd.f32 %v17829_v26, %v17789_v1  ;;  %v17831_v40 = vpop.f32.mrf.mxu1  ;;  %18083 = vmatpush1.bf16.msra.mxu0 %v23146_v25  ;;  %v23209_v36 = vld [vmem:[%s30186_s7 + $0x788] ss:$16 sps:$4 sm:$0xff]   ;;  %v23214_v8 = vld [vmem:[%s30186_s7 + $0x56c] ss:$16 sps:$4 sm:$0xff]  }
 0xb5c   : > { %18124 = vmatpush1.bf16.msra.mxu1 %v23149_v31  ;;  %v17791_v42 = vpop.f32.mrf.mxu0  ;;  %18084 = vmatprep.subr.bf16.mxu0 %v23154_v53  ;;  %v23217_v25 = vld [vmem:[%s30186_s7 + $0x76c] ss:$16 sps:$4 sm:$0xff]   ;;  %v23212_v22 = vld [vmem:[%s30186_s7 + $0x568] ss:$16 sps:$4 sm:$0xff]  }
 0xb5d   : > { %v17832_v60 = vpop.f32.mrf.mxu1  ;;  %18125 = vmatprep.subr.bf16.mxu1 %v23157_v44  ;;  %v23215_v31 = vld [vmem:[%s30186_s7 + $0x768] ss:$16 sps:$4 sm:$0xff]   ;;  %v23220_v53 = vld [vmem:[%s30186_s7 + $0x54c] ss:$16 sps:$4 sm:$0xff]  }
 0xb5e   : > { %v23223_v1 = vld [vmem:[%s30186_s7 + $0x74c] ss:$16 sps:$4 sm:$0xff]   ;;  %v23218_v26 = vld [vmem:[%s30186_s7 + $0x548] ss:$16 sps:$4 sm:$0xff]  }
 0xb5f   : > { %18085 = vmatpush1.bf16.msra.mxu0 %v23152_v30  ;;  %v23221_v44 = vld [vmem:[%s30186_s7 + $0x748] ss:$16 sps:$4 sm:$0xff]   ;;  %v23226_v29 = vld [vmem:[%s30186_s7 + $0x52c] ss:$16 sps:$4 sm:$0xff]  }
 0xb60   : > { %18126 = vmatpush1.bf16.msra.mxu1 %v23155_v12  ;;  %18086 = vmatprep.subr.bf16.mxu0 %v23160_v4  ;;  %v23229_v40 = vld [vmem:[%s30186_s7 + $0x72c] ss:$16 sps:$4 sm:$0xff]   ;;  %v23224_v30 = vld [vmem:[%s30186_s7 + $0x528] ss:$16 sps:$4 sm:$0xff]  }
 0xb61   : > { %18127 = vmatprep.subr.bf16.mxu1 %v23163_v32  ;;  %v23227_v42 = vld [vmem:[%s30186_s7 + $0x728] ss:$16 sps:$4 sm:$0xff]   ;;  %v23232_v12 = vld [vmem:[%s30186_s7 + $0x50c] ss:$16 sps:$4 sm:$0xff]  }
 0xb62   : > { %v23235_v4 = vld [vmem:[%s30186_s7 + $0x70c] ss:$16 sps:$4 sm:$0xff]   ;;  %v23230_v60 = vld [vmem:[%s30186_s7 + $0x508] ss:$16 sps:$4 sm:$0xff]  }
 0xb63   : > { %18087 = vmatpush1.bf16.msra.mxu0 %v23158_v2  ;;  %v23233_v32 = vld [vmem:[%s30186_s7 + $0x708] ss:$16 sps:$4 sm:$0xff]   ;;  %v23238_v2 = vld [vmem:[%s30186_s7 + $0x8ec] ss:$16 sps:$4 sm:$0xff]  }
 0xb64   : > { %18128 = vmatpush1.bf16.msra.mxu1 %v23161_v24  ;;  %18088 = vmatprep.subr.bf16.mxu0 %v23166_v16  ;;  %v23241_v24 = vld [vmem:[%s30186_s7 + $0xaec] ss:$16 sps:$4 sm:$0xff]   ;;  %v23236_v16 = vld [vmem:[%s30186_s7 + $0x8e8] ss:$16 sps:$4 sm:$0xff]  }
 0xb65   : > { %18129 = vmatprep.subr.bf16.mxu1 %v23169_v41  ;;  %v23239_v41 = vld [vmem:[%s30186_s7 + $0xae8] ss:$16 sps:$4 sm:$0xff]  }
 0xb67   : > { %18089 = vmatpush1.bf16.msra.mxu0 %v23164_v34  ;;  %v23244_v34 = vld [vmem:[%s30186_s7 + $0x8cc] ss:$16 sps:$4 sm:$0xff]  }
 0xb68   : > { %18130 = vmatpush1.bf16.msra.mxu1 %v23167_v5  ;;  %18090 = vmatprep.subr.bf16.mxu0 %v23172_v9  ;;  %v23247_v9 = vld [vmem:[%s30186_s7 + $0xacc] ss:$16 sps:$4 sm:$0xff]  }
 0xb69   : > { %18131 = vmatprep.subr.bf16.mxu1 %v23175_v13 }
 0xb6b   : > { %18091 = vmatpush1.bf16.msra.mxu0 %v23170_v61 }
 0xb6c   : > { %18132 = vmatpush1.bf16.msra.mxu1 %v23173_v50  ;;  %18092 = vmatprep.subr.bf16.mxu0 %v23178_v56  ;;  %v23242_v50 = vld [vmem:[%s30186_s7 + $0x8c8] ss:$16 sps:$4 sm:$0xff]  }
 0xb6d   : > { %18133 = vmatprep.subr.bf16.mxu1 %v23181_v37 }
 0xb6f   : > { %18093 = vmatpush1.bf16.msra.mxu0 %v23176_v19 }
 0xb70   : > { %18134 = vmatpush1.bf16.msra.mxu1 %v23179_v43  ;;  %18094 = vmatprep.subr.bf16.mxu0 %v23184_v51 }
 0xb71   : > { %18135 = vmatprep.subr.bf16.mxu1 %v23187_v48 }
 0xb73   : > { %18095 = vmatpush1.bf16.msra.mxu0 %v23182_v39  ;;  %v23248_v39 = vld [vmem:[%s30186_s7 + $0x8a8] ss:$16 sps:$4 sm:$0xff]  }
 0xb74   : > { %18136 = vmatpush1.bf16.msra.mxu1 %v23185_v17  ;;  %18096 = vmatprep.subr.bf16.mxu0 %v23190_v46  ;;  %v23256_v17 = vld [vmem:[%s30186_s7 + $0x88c] ss:$16 sps:$4 sm:$0xff]  }
 0xb75   : > { %18137 = vmatprep.subr.bf16.mxu1 %v23193_v7  ;;  %v23259_v7 = vld [vmem:[%s30186_s7 + $0xa8c] ss:$16 sps:$4 sm:$0xff]  }
 0xb77   : > { %18097 = vmatpush2.bf16.msra.mxu0 %v23188_v11  ;;  %v23254_v11 = vld [vmem:[%s30186_s7 + $0x888] ss:$16 sps:$4 sm:$0xff]  }
 0xb78   : > { %18138 = vmatpush2.bf16.msra.mxu1 %v23191_v14  ;;  %18098 = vmatprep.subr.bf16.mxu0 %v23196_v15  ;;  %v23257_v14 = vld [vmem:[%s30186_s7 + $0xa88] ss:$16 sps:$4 sm:$0xff]   ;;  %v23262_v15 = vld [vmem:[%s30186_s7 + $0x86c] ss:$16 sps:$4 sm:$0xff]  }
 0xb79   : > { %18139 = vmatprep.subr.bf16.mxu1 %v23199_v3  ;;  %v23265_v3 = vld [vmem:[%s30186_s7 + $0xa6c] ss:$16 sps:$4 sm:$0xff]  }
 0xb7b   : > { %18099 = vmatpush2.bf16.msra.mxu0 %v23194_v35  ;;  %v23260_v35 = vld [vmem:[%s30186_s7 + $0x868] ss:$16 sps:$4 sm:$0xff]  }
 0xb7c   : > { %18140 = vmatpush2.bf16.msra.mxu1 %v23197_v62  ;;  %18100 = vmatprep.subr.bf16.mxu0 %v23202_v49  ;;  %v23263_v62 = vld [vmem:[%s30186_s7 + $0xa68] ss:$16 sps:$4 sm:$0xff]   ;;  %v23268_v49 = vld [vmem:[%s30186_s7 + $0x84c] ss:$16 sps:$4 sm:$0xff]  }
 0xb7d   : > { %18141 = vmatprep.subr.bf16.mxu1 %v23205_v58  ;;  %v23271_v58 = vld [vmem:[%s30186_s7 + $0xa4c] ss:$16 sps:$4 sm:$0xff]  }
 0xb7f   : > { %18101 = vmatpush2.bf16.msra.mxu0 %v23200_v0  ;;  %v23266_v0 = vld [vmem:[%s30186_s7 + $0x848] ss:$16 sps:$4 sm:$0xff]  }
 0xb80   : > { %18142 = vmatpush2.bf16.msra.mxu1 %v23203_v38  ;;  %18102 = vmatprep.subr.bf16.mxu0 %v23208_v45  ;;  %v23269_v38 = vld [vmem:[%s30186_s7 + $0xa48] ss:$16 sps:$4 sm:$0xff]   ;;  %v23274_v45 = vld [vmem:[%s30186_s7 + $0x82c] ss:$16 sps:$4 sm:$0xff]  }
 0xb81   : > { %18143 = vmatprep.subr.bf16.mxu1 %v23211_v6  ;;  %v23277_v6 = vld [vmem:[%s30186_s7 + $0xa2c] ss:$16 sps:$4 sm:$0xff]  }
 0xb83   : > { %18103 = vmatpush2.bf16.msra.mxu0 %v23206_v20  ;;  %v23272_v20 = vld [vmem:[%s30186_s7 + $0x828] ss:$16 sps:$4 sm:$0xff]  }
 0xb84   : > { %18144 = vmatpush2.bf16.msra.mxu1 %v23209_v36  ;;  %18104 = vmatprep.subr.bf16.mxu0 %v23214_v8  ;;  %v23275_v36 = vld [vmem:[%s30186_s7 + $0xa28] ss:$16 sps:$4 sm:$0xff]   ;;  %v23280_v8 = vld [vmem:[%s30186_s7 + $0x80c] ss:$16 sps:$4 sm:$0xff]  }
 0xb85   : > { %18145 = vmatprep.subr.bf16.mxu1 %v23217_v25  ;;  %v23283_v25 = vld [vmem:[%s30186_s7 + $0xa0c] ss:$16 sps:$4 sm:$0xff]  }
 0xb87   : > { %18105 = vmatpush2.bf16.msra.mxu0 %v23212_v22  ;;  %v23278_v22 = vld [vmem:[%s30186_s7 + $0x808] ss:$16 sps:$4 sm:$0xff]  }
 0xb88   : > { %18146 = vmatpush2.bf16.msra.mxu1 %v23215_v31  ;;  %18106 = vmatprep.subr.bf16.mxu0 %v23220_v53  ;;  %v23281_v31 = vld [vmem:[%s30186_s7 + $0xa08] ss:$16 sps:$4 sm:$0xff]   ;;  %v23286_v53 = vld [vmem:[%s30186_s7 + $0x9ec] ss:$16 sps:$4 sm:$0xff]  }
 0xb89   : > { %18147 = vmatprep.subr.bf16.mxu1 %v23223_v1  ;;  %v23289_v1 = vld [vmem:[%s30186_s7 + $0xbec] ss:$16 sps:$4 sm:$0xff]  }
 0xb8b   : > { %18107 = vmatpush2.bf16.msra.mxu0 %v23218_v26  ;;  %v23284_v26 = vld [vmem:[%s30186_s7 + $0x9e8] ss:$16 sps:$4 sm:$0xff]  }
 0xb8c   : > { %18148 = vmatpush2.bf16.msra.mxu1 %v23221_v44  ;;  %18108 = vmatprep.subr.bf16.mxu0 %v23226_v29  ;;  %v23287_v44 = vld [vmem:[%s30186_s7 + $0xbe8] ss:$16 sps:$4 sm:$0xff]   ;;  %v23292_v29 = vld [vmem:[%s30186_s7 + $0x9cc] ss:$16 sps:$4 sm:$0xff]  }
 0xb8d   : > { %18149 = vmatprep.subr.bf16.mxu1 %v23229_v40  ;;  %v23295_v40 = vld [vmem:[%s30186_s7 + $0xbcc] ss:$16 sps:$4 sm:$0xff]  }
 0xb8f   : > { %18109 = vmatpush2.bf16.msra.mxu0 %v23224_v30  ;;  %v23290_v30 = vld [vmem:[%s30186_s7 + $0x9c8] ss:$16 sps:$4 sm:$0xff]  }
 0xb90   : > { %18150 = vmatpush2.bf16.msra.mxu1 %v23227_v42  ;;  %18110 = vmatprep.subr.bf16.mxu0 %v23232_v12  ;;  %v23293_v42 = vld [vmem:[%s30186_s7 + $0xbc8] ss:$16 sps:$4 sm:$0xff]   ;;  %v23298_v12 = vld [vmem:[%s30186_s7 + $0x9ac] ss:$16 sps:$4 sm:$0xff]  }
 0xb91   : > { %18151 = vmatprep.subr.bf16.mxu1 %v23235_v4  ;;  %v23301_v4 = vld [vmem:[%s30186_s7 + $0xbac] ss:$16 sps:$4 sm:$0xff]  }
 0xb93   : > { %18111 = vmatpush2.bf16.msra.mxu0 %v23230_v60  ;;  %v23296_v60 = vld [vmem:[%s30186_s7 + $0x9a8] ss:$16 sps:$4 sm:$0xff]  }
 0xb94   : > { %18152 = vmatpush2.bf16.msra.mxu1 %v23233_v32  ;;  %18162 = vmatprep.subr.bf16.mxu0 %v23238_v2  ;;  %v23299_v32 = vld [vmem:[%s30186_s7 + $0xba8] ss:$16 sps:$4 sm:$0xff]   ;;  %v23304_v2 = vld [vmem:[%s30186_s7 + $0x98c] ss:$16 sps:$4 sm:$0xff]  }
 0xb95   : > { %18203 = vmatprep.subr.bf16.mxu1 %v23241_v24  ;;  %v23307_v24 = vld [vmem:[%s30186_s7 + $0xb8c] ss:$16 sps:$4 sm:$0xff]  }
 0xb96   : > { %v17868_v5 = vpop.f32.mrf.mxu0  ;;  %18113 = vmatmul.mubr.bf16.vlgmr.msra.gmra.mxu0 %v28864_v33  ;;  %v23245_v33 = vld [vmem:[%s30186_s7 + $0xac8] ss:$16 sps:$4 sm:$0xff]  }
 0xb97   : > { %v17869_v13 = vadd.f32 %v17868_v5, %v29517_v23  ;;  %v17909_v61 = vpop.f32.mrf.mxu1  ;;  %18154 = vmatmul.mubr.bf16.vlgmr.msra.gmra.mxu1 %v28869_v18  ;;  %18163 = vmatpush1.bf16.msra.mxu0 %v23236_v16  ;;  %v23250_v23 = vld [vmem:[%s30186_s7 + $0x8ac] ss:$16 sps:$4 sm:$0xff]   ;;  %v23302_v16 = vld [vmem:[%s30186_s7 + $0x988] ss:$16 sps:$4 sm:$0xff]  }
 0xb98   : > { %18194 = vmatprep.mubr.bf16.mxu0 %v28874_v57  ;;  %18204 = vmatpush1.bf16.msra.mxu1 %v23239_v41  ;;  %v17870_v56 = vpop.f32.mrf.mxu0  ;;  %v23253_v57 = vld [vmem:[%s30186_s7 + $0xaac] ss:$16 sps:$4 sm:$0xff]   ;;  %v23305_v41 = vld [vmem:[%s30186_s7 + $0xb88] ss:$16 sps:$4 sm:$0xff]  }
 0xb99   : > { %v29719_v37 = vadd.f32 %v17909_v61, %v17869_v13  ;;  %18235 = vmatprep.mubr.bf16.mxu1 %v28880_v59  ;;  %v17871_v18 = vadd.f32 %v17870_v56, %v29524_v55  ;;  %v17911_v19 = vpop.f32.mrf.mxu1  ;;  %18164 = vmatprep.subr.bf16.mxu0 %v23244_v34  ;;  %v23251_v55 = vld [vmem:[%s30186_s7 + $0xaa8] ss:$16 sps:$4 sm:$0xff]   ;;  %v23310_v34 = vld [vmem:[%s30186_s7 + $0x96c] ss:$16 sps:$4 sm:$0xff]  }
 0xb9a   : > { %v17872_v43 = vpop.f32.mrf.mxu0  ;;  %18205 = vmatprep.subr.bf16.mxu1 %v23247_v9  ;;  %v23313_v5 = vld [vmem:[%s30186_s7 + $0xb6c] ss:$16 sps:$4 sm:$0xff]   ;;  %v23308_v9 = vld [vmem:[%s30186_s7 + $0x968] ss:$16 sps:$4 sm:$0xff]  }
 0xb9b   : > { %v29726_v51 = vadd.f32 %v17911_v19, %v17871_v18  ;;  %v17913_v48 = vpop.f32.mrf.mxu1  ;;  %18165 = vmatpush1.bf16.msra.mxu0 %v23242_v50  ;;  %v23311_v13 = vld [vmem:[%s30186_s7 + $0xb68] ss:$16 sps:$4 sm:$0xff]   ;;  %v23316_v61 = vld [vmem:[%s30186_s7 + $0x94c] ss:$16 sps:$4 sm:$0xff]  }
 0xb9c   : > { %18206 = vmatpush1.bf16.msra.mxu1 %v23245_v33  ;;  %v17873_v59 = vpop.f32.mrf.mxu0  ;;  %18166 = vmatprep.subr.bf16.mxu0 %v23250_v23  ;;  %v23319_v50 = vld [vmem:[%s30186_s7 + $0xb4c] ss:$16 sps:$4 sm:$0xff]   ;;  %v23314_v56 = vld [vmem:[%s30186_s7 + $0x948] ss:$16 sps:$4 sm:$0xff]  }
 0xb9d   : > { %v17914_v46 = vpop.f32.mrf.mxu1  ;;  %18207 = vmatprep.subr.bf16.mxu1 %v23253_v57  ;;  %v23317_v33 = vld [vmem:[%s30186_s7 + $0xb48] ss:$16 sps:$4 sm:$0xff]   ;;  %v23322_v23 = vld [vmem:[%s30186_s7 + $0x92c] ss:$16 sps:$4 sm:$0xff]  }
 0xb9e   : > { %v23325_v18 = vld [vmem:[%s30186_s7 + $0xb2c] ss:$16 sps:$4 sm:$0xff]   ;;  %v23320_v19 = vld [vmem:[%s30186_s7 + $0x928] ss:$16 sps:$4 sm:$0xff]  }
 0xb9f   : > { %18167 = vmatpush1.bf16.msra.mxu0 %v23248_v39  ;;  %v23323_v57 = vld [vmem:[%s30186_s7 + $0xb28] ss:$16 sps:$4 sm:$0xff]   ;;  %v23328_v43 = vld [vmem:[%s30186_s7 + $0x90c] ss:$16 sps:$4 sm:$0xff]  }
 0xba0   : > { %18208 = vmatpush1.bf16.msra.mxu1 %v23251_v55  ;;  %18168 = vmatprep.subr.bf16.mxu0 %v23256_v17  ;;  %v23331_v48 = vld [vmem:[%s30186_s7 + $0xb0c] ss:$16 sps:$4 sm:$0xff]   ;;  %v23326_v39 = vld [vmem:[%s30186_s7 + $0x908] ss:$16 sps:$4 sm:$0xff]  }
 0xba1   : > { %18209 = vmatprep.subr.bf16.mxu1 %v23259_v7  ;;  %v23329_v59 = vld [vmem:[%s30186_s7 + $0xb08] ss:$16 sps:$4 sm:$0xff]   ;;  %v23334_v55 = vld [vmem:[%s30186_s7 + $0xcec] ss:$16 sps:$4 sm:$0xff]  }
 0xba2   : > { %v23337_v17 = vld [vmem:[%s30186_s7 + $0xeec] ss:$16 sps:$4 sm:$0xff]   ;;  %v23332_v46 = vld [vmem:[%s30186_s7 + $0xce8] ss:$16 sps:$4 sm:$0xff]  }
 0xba3   : > { %18169 = vmatpush1.bf16.msra.mxu0 %v23254_v11  ;;  %v23335_v7 = vld [vmem:[%s30186_s7 + $0xee8] ss:$16 sps:$4 sm:$0xff]   ;;  %v23340_v11 = vld [vmem:[%s30186_s7 + $0xccc] ss:$16 sps:$4 sm:$0xff]  }
 0xba4   : > { %18210 = vmatpush1.bf16.msra.mxu1 %v23257_v14  ;;  %18170 = vmatprep.subr.bf16.mxu0 %v23262_v15  ;;  %v23343_v15 = vld [vmem:[%s30186_s7 + $0xecc] ss:$16 sps:$4 sm:$0xff]  }
 0xba5   : > { %18211 = vmatprep.subr.bf16.mxu1 %v23265_v3 }
 0xba7   : > { %18171 = vmatpush1.bf16.msra.mxu0 %v23260_v35 }
 0xba8   : > { %18212 = vmatpush1.bf16.msra.mxu1 %v23263_v62  ;;  %18172 = vmatprep.subr.bf16.mxu0 %v23268_v49  ;;  %v23338_v62 = vld [vmem:[%s30186_s7 + $0xcc8] ss:$16 sps:$4 sm:$0xff]  }
 0xba9   : > { %18213 = vmatprep.subr.bf16.mxu1 %v23271_v58 }
 0xbab   : > { %18173 = vmatpush1.bf16.msra.mxu0 %v23266_v0 }
 0xbac   : > { %18214 = vmatpush1.bf16.msra.mxu1 %v23269_v38  ;;  %18174 = vmatprep.subr.bf16.mxu0 %v23274_v45 }
 0xbad   : > { %18215 = vmatprep.subr.bf16.mxu1 %v23277_v6 }
 0xbaf   : > { %18175 = vmatpush1.bf16.msra.mxu0 %v23272_v20  ;;  %v23344_v20 = vld [vmem:[%s30186_s7 + $0xca8] ss:$16 sps:$4 sm:$0xff]  }
 0xbb0   : > { %18216 = vmatpush1.bf16.msra.mxu1 %v23275_v36  ;;  %18176 = vmatprep.subr.bf16.mxu0 %v23280_v8  ;;  %v23352_v36 = vld [vmem:[%s30186_s7 + $0xc8c] ss:$16 sps:$4 sm:$0xff]  }
 0xbb1   : > { %18217 = vmatprep.subr.bf16.mxu1 %v23283_v25  ;;  %v23355_v25 = vld [vmem:[%s30186_s7 + $0xe8c] ss:$16 sps:$4 sm:$0xff]  }
 0xbb3   : > { %18177 = vmatpush1.bf16.msra.mxu0 %v23278_v22  ;;  %v23350_v22 = vld [vmem:[%s30186_s7 + $0xc88] ss:$16 sps:$4 sm:$0xff]  }
 0xbb4   : > { %18218 = vmatpush1.bf16.msra.mxu1 %v23281_v31  ;;  %18178 = vmatprep.subr.bf16.mxu0 %v23286_v53  ;;  %v23353_v31 = vld [vmem:[%s30186_s7 + $0xe88] ss:$16 sps:$4 sm:$0xff]   ;;  %v23358_v53 = vld [vmem:[%s30186_s7 + $0xc6c] ss:$16 sps:$4 sm:$0xff]  }
 0xbb5   : > { %18219 = vmatprep.subr.bf16.mxu1 %v23289_v1  ;;  %v23361_v1 = vld [vmem:[%s30186_s7 + $0xe6c] ss:$16 sps:$4 sm:$0xff]  }
 0xbb7   : > { %18179 = vmatpush2.bf16.msra.mxu0 %v23284_v26  ;;  %v23356_v26 = vld [vmem:[%s30186_s7 + $0xc68] ss:$16 sps:$4 sm:$0xff]  }
 0xbb8   : > { %18220 = vmatpush2.bf16.msra.mxu1 %v23287_v44  ;;  %18180 = vmatprep.subr.bf16.mxu0 %v23292_v29  ;;  %v23359_v44 = vld [vmem:[%s30186_s7 + $0xe68] ss:$16 sps:$4 sm:$0xff]   ;;  %v23364_v29 = vld [vmem:[%s30186_s7 + $0xc4c] ss:$16 sps:$4 sm:$0xff]  }
 0xbb9   : > { %18221 = vmatprep.subr.bf16.mxu1 %v23295_v40  ;;  %v23367_v40 = vld [vmem:[%s30186_s7 + $0xe4c] ss:$16 sps:$4 sm:$0xff]  }
 0xbbb   : > { %18181 = vmatpush2.bf16.msra.mxu0 %v23290_v30  ;;  %v23362_v30 = vld [vmem:[%s30186_s7 + $0xc48] ss:$16 sps:$4 sm:$0xff]  }
 0xbbc   : > { %18222 = vmatpush2.bf16.msra.mxu1 %v23293_v42  ;;  %18182 = vmatprep.subr.bf16.mxu0 %v23298_v12  ;;  %v23365_v42 = vld [vmem:[%s30186_s7 + $0xe48] ss:$16 sps:$4 sm:$0xff]   ;;  %v23370_v12 = vld [vmem:[%s30186_s7 + $0xc2c] ss:$16 sps:$4 sm:$0xff]  }
 0xbbd   : > { %18223 = vmatprep.subr.bf16.mxu1 %v23301_v4  ;;  %v23373_v4 = vld [vmem:[%s30186_s7 + $0xe2c] ss:$16 sps:$4 sm:$0xff]  }
 0xbbf   : > { %18183 = vmatpush2.bf16.msra.mxu0 %v23296_v60  ;;  %v23368_v60 = vld [vmem:[%s30186_s7 + $0xc28] ss:$16 sps:$4 sm:$0xff]  }
 0xbc0   : > { %18224 = vmatpush2.bf16.msra.mxu1 %v23299_v32  ;;  %18184 = vmatprep.subr.bf16.mxu0 %v23304_v2  ;;  %v23371_v32 = vld [vmem:[%s30186_s7 + $0xe28] ss:$16 sps:$4 sm:$0xff]   ;;  %v23376_v2 = vld [vmem:[%s30186_s7 + $0xc0c] ss:$16 sps:$4 sm:$0xff]  }
 0xbc1   : > { %18225 = vmatprep.subr.bf16.mxu1 %v23307_v24  ;;  %v23379_v24 = vld [vmem:[%s30186_s7 + $0xe0c] ss:$16 sps:$4 sm:$0xff]  }
 0xbc3   : > { %18185 = vmatpush2.bf16.msra.mxu0 %v23302_v16  ;;  %v23374_v16 = vld [vmem:[%s30186_s7 + $0xc08] ss:$16 sps:$4 sm:$0xff]  }
 0xbc4   : > { %18226 = vmatpush2.bf16.msra.mxu1 %v23305_v41  ;;  %18186 = vmatprep.subr.bf16.mxu0 %v23310_v34  ;;  %v23377_v41 = vld [vmem:[%s30186_s7 + $0xe08] ss:$16 sps:$4 sm:$0xff]   ;;  %v23382_v34 = vld [vmem:[%s30186_s7 + $0xdec] ss:$16 sps:$4 sm:$0xff]  }
 0xbc5   : > { %18227 = vmatprep.subr.bf16.mxu1 %v23313_v5  ;;  %v23385_v5 = vld [vmem:[%s30186_s7 + $0xfec] ss:$16 sps:$4 sm:$0xff]  }
 0xbc7   : > { %18187 = vmatpush2.bf16.msra.mxu0 %v23308_v9  ;;  %v23380_v9 = vld [vmem:[%s30186_s7 + $0xde8] ss:$16 sps:$4 sm:$0xff]  }
 0xbc8   : > { %18228 = vmatpush2.bf16.msra.mxu1 %v23311_v13  ;;  %18188 = vmatprep.subr.bf16.mxu0 %v23316_v61  ;;  %v23383_v13 = vld [vmem:[%s30186_s7 + $0xfe8] ss:$16 sps:$4 sm:$0xff]   ;;  %v23388_v61 = vld [vmem:[%s30186_s7 + $0xdcc] ss:$16 sps:$4 sm:$0xff]  }
 0xbc9   : > { %18229 = vmatprep.subr.bf16.mxu1 %v23319_v50  ;;  %v23391_v50 = vld [vmem:[%s30186_s7 + $0xfcc] ss:$16 sps:$4 sm:$0xff]  }
 0xbcb   : > { %18189 = vmatpush2.bf16.msra.mxu0 %v23314_v56  ;;  %v23386_v56 = vld [vmem:[%s30186_s7 + $0xdc8] ss:$16 sps:$4 sm:$0xff]  }
 0xbcc   : > { %18230 = vmatpush2.bf16.msra.mxu1 %v23317_v33  ;;  %18190 = vmatprep.subr.bf16.mxu0 %v23322_v23  ;;  %v23389_v33 = vld [vmem:[%s30186_s7 + $0xfc8] ss:$16 sps:$4 sm:$0xff]   ;;  %v23394_v23 = vld [vmem:[%s30186_s7 + $0xdac] ss:$16 sps:$4 sm:$0xff]  }
 0xbcd   : > { %18231 = vmatprep.subr.bf16.mxu1 %v23325_v18  ;;  %v23397_v18 = vld [vmem:[%s30186_s7 + $0xfac] ss:$16 sps:$4 sm:$0xff]  }
 0xbcf   : > { %18191 = vmatpush2.bf16.msra.mxu0 %v23320_v19  ;;  %v23392_v19 = vld [vmem:[%s30186_s7 + $0xda8] ss:$16 sps:$4 sm:$0xff]  }
 0xbd0   : > { %18232 = vmatpush2.bf16.msra.mxu1 %v23323_v57  ;;  %18192 = vmatprep.subr.bf16.mxu0 %v23328_v43  ;;  %v23395_v57 = vld [vmem:[%s30186_s7 + $0xfa8] ss:$16 sps:$4 sm:$0xff]   ;;  %v23400_v43 = vld [vmem:[%s30186_s7 + $0xd8c] ss:$16 sps:$4 sm:$0xff]  }
 0xbd1   : > { %18233 = vmatprep.subr.bf16.mxu1 %v23331_v48  ;;  %v23403_v48 = vld [vmem:[%s30186_s7 + $0xf8c] ss:$16 sps:$4 sm:$0xff]  }
 0xbd3   : > { %18193 = vmatpush2.bf16.msra.mxu0 %v23326_v39  ;;  %v23398_v39 = vld [vmem:[%s30186_s7 + $0xd88] ss:$16 sps:$4 sm:$0xff]  }
 0xbd4   : > { %18234 = vmatpush2.bf16.msra.mxu1 %v23329_v59  ;;  %18244 = vmatprep.subr.bf16.mxu0 %v23334_v55  ;;  %v23401_v59 = vld [vmem:[%s30186_s7 + $0xf88] ss:$16 sps:$4 sm:$0xff]   ;;  %v23406_v55 = vld [vmem:[%s30186_s7 + $0xd6c] ss:$16 sps:$4 sm:$0xff]  }
 0xbd5   : > { %18285 = vmatprep.subr.bf16.mxu1 %v23337_v17  ;;  %v23409_v17 = vld [vmem:[%s30186_s7 + $0xf6c] ss:$16 sps:$4 sm:$0xff]  }
 0xbd6   : > { %v17950_v14 = vpop.f32.mrf.mxu0  ;;  %18195 = vmatmul.mubr.bf16.vlgmr.msra.gmra.mxu0 %v29078_v27  ;;  %v23341_v27 = vld [vmem:[%s30186_s7 + $0xec8] ss:$16 sps:$4 sm:$0xff]  }
 0xbd7   : > { %v17951_v3 = vadd.f32 %v17950_v14, %v29719_v37  ;;  %v17991_v35 = vpop.f32.mrf.mxu1  ;;  %18236 = vmatmul.mubr.bf16.vlgmr.msra.gmra.mxu1 %v29083_v47  ;;  %18245 = vmatpush1.bf16.msra.mxu0 %v23332_v46  ;;  %v23346_v37 = vld [vmem:[%s30186_s7 + $0xcac] ss:$16 sps:$4 sm:$0xff]   ;;  %v23404_v46 = vld [vmem:[%s30186_s7 + $0xd68] ss:$16 sps:$4 sm:$0xff]  }
 0xbd8   : > { %18276 = vmatprep.mubr.bf16.mxu0 %v29091_v63  ;;  %18286 = vmatpush1.bf16.msra.mxu1 %v23335_v7  ;;  %v17952_v49 = vpop.f32.mrf.mxu0  ;;  %v23349_v63 = vld [vmem:[%s30186_s7 + $0xeac] ss:$16 sps:$4 sm:$0xff]   ;;  %v23407_v7 = vld [vmem:[%s30186_s7 + $0xf68] ss:$16 sps:$4 sm:$0xff]  }
 0xbd9   : > { %v29921_v58 = vadd.f32 %v17991_v35, %v17951_v3  ;;  %18317 = vmatprep.mubr.bf16.mxu1 %v29124_v28  ;;  %v17953_v47 = vadd.f32 %v17952_v49, %v29726_v51  ;;  %v17993_v0 = vpop.f32.mrf.mxu1  ;;  %18246 = vmatprep.subr.bf16.mxu0 %v23340_v11  ;;  %v23347_v51 = vld [vmem:[%s30186_s7 + $0xea8] ss:$16 sps:$4 sm:$0xff]   ;;  %v23412_v11 = vld [vmem:[%s30186_s7 + $0xd4c] ss:$16 sps:$4 sm:$0xff]  }
 0xbda   : > { %v17954_v38 = vpop.f32.mrf.mxu0  ;;  %18287 = vmatprep.subr.bf16.mxu1 %v23343_v15  ;;  %v23415_v14 = vld [vmem:[%s30186_s7 + $0xf4c] ss:$16 sps:$4 sm:$0xff]   ;;  %v23410_v15 = vld [vmem:[%s30186_s7 + $0xd48] ss:$16 sps:$4 sm:$0xff]  }
 0xbdb   : > { %v29928_v45 = vadd.f32 %v17993_v0, %v17953_v47  ;;  %v17995_v6 = vpop.f32.mrf.mxu1  ;;  %18247 = vmatpush1.bf16.msra.mxu0 %v23338_v62  ;;  %v23413_v3 = vld [vmem:[%s30186_s7 + $0xf48] ss:$16 sps:$4 sm:$0xff]   ;;  %v23418_v35 = vld [vmem:[%s30186_s7 + $0xd2c] ss:$16 sps:$4 sm:$0xff]  }
 0xbdc   : > { %18288 = vmatpush1.bf16.msra.mxu1 %v23341_v27  ;;  %v17955_v28 = vpop.f32.mrf.mxu0  ;;  %18248 = vmatprep.subr.bf16.mxu0 %v23346_v37  ;;  %v23421_v62 = vld [vmem:[%s30186_s7 + $0xf2c] ss:$16 sps:$4 sm:$0xff]   ;;  %v23416_v49 = vld [vmem:[%s30186_s7 + $0xd28] ss:$16 sps:$4 sm:$0xff]  }
 0xbdd   : > { %v17996_v8 = vpop.f32.mrf.mxu1  ;;  %18289 = vmatprep.subr.bf16.mxu1 %v23349_v63  ;;  %v23419_v27 = vld [vmem:[%s30186_s7 + $0xf28] ss:$16 sps:$4 sm:$0xff]   ;;  %v23424_v37 = vld [vmem:[%s30186_s7 + $0xd0c] ss:$16 sps:$4 sm:$0xff]  }
 0xbde   : > { %v23427_v47 = vld [vmem:[%s30186_s7 + $0xf0c] ss:$16 sps:$4 sm:$0xff]   ;;  %v23422_v0 = vld [vmem:[%s30186_s7 + $0xd08] ss:$16 sps:$4 sm:$0xff]  }
 0xbdf   : > { %18249 = vmatpush1.bf16.msra.mxu0 %v23344_v20  ;;  %v23425_v63 = vld [vmem:[%s30186_s7 + $0xf08] ss:$16 sps:$4 sm:$0xff]  }
 0xbe0   : > { %18290 = vmatpush1.bf16.msra.mxu1 %v23347_v51  ;;  %18250 = vmatprep.subr.bf16.mxu0 %v23352_v36 }
 0xbe1   : > { %18291 = vmatprep.subr.bf16.mxu1 %v23355_v25 }
 0xbe3   : > { %18251 = vmatpush1.bf16.msra.mxu0 %v23350_v22 }
 0xbe4   : > { %18292 = vmatpush1.bf16.msra.mxu1 %v23353_v31  ;;  %18252 = vmatprep.subr.bf16.mxu0 %v23358_v53 }
 0xbe5   : > { %18293 = vmatprep.subr.bf16.mxu1 %v23361_v1 }
 0xbe7   : > { %18253 = vmatpush1.bf16.msra.mxu0 %v23356_v26 }
 0xbe8   : > { %18294 = vmatpush1.bf16.msra.mxu1 %v23359_v44  ;;  %18254 = vmatprep.subr.bf16.mxu0 %v23364_v29 }
 0xbe9   : > { %18295 = vmatprep.subr.bf16.mxu1 %v23367_v40 }
 0xbeb   : > { %18255 = vmatpush1.bf16.msra.mxu0 %v23362_v30 }
 0xbec   : > { %18296 = vmatpush1.bf16.msra.mxu1 %v23365_v42  ;;  %18256 = vmatprep.subr.bf16.mxu0 %v23370_v12 }
 0xbed   : > { %18297 = vmatprep.subr.bf16.mxu1 %v23373_v4 }
 0xbef   : > { %18257 = vmatpush1.bf16.msra.mxu0 %v23368_v60 }
 0xbf0   : > { %18298 = vmatpush1.bf16.msra.mxu1 %v23371_v32  ;;  %18258 = vmatprep.subr.bf16.mxu0 %v23376_v2 }
 0xbf1   : > { %18299 = vmatprep.subr.bf16.mxu1 %v23379_v24 }
 0xbf3   : > { %18259 = vmatpush1.bf16.msra.mxu0 %v23374_v16 }
 0xbf4   : > { %18300 = vmatpush1.bf16.msra.mxu1 %v23377_v41  ;;  %18260 = vmatprep.subr.bf16.mxu0 %v23382_v34 }
 0xbf5   : > { %18301 = vmatprep.subr.bf16.mxu1 %v23385_v5 }
 0xbf7   : > { %18261 = vmatpush2.bf16.msra.mxu0 %v23380_v9 }
 0xbf8   : > { %18302 = vmatpush2.bf16.msra.mxu1 %v23383_v13  ;;  %18262 = vmatprep.subr.bf16.mxu0 %v23388_v61 }
 0xbf9   : > { %18303 = vmatprep.subr.bf16.mxu1 %v23391_v50 }
 0xbfb   : > { %18263 = vmatpush2.bf16.msra.mxu0 %v23386_v56 }
 0xbfc   : > { %18304 = vmatpush2.bf16.msra.mxu1 %v23389_v33  ;;  %18264 = vmatprep.subr.bf16.mxu0 %v23394_v23 }
 0xbfd   : > { %18305 = vmatprep.subr.bf16.mxu1 %v23397_v18 }
 0xbff   : > { %18265 = vmatpush2.bf16.msra.mxu0 %v23392_v19  ;;  %v18326_v19 = vadd.f32 %v29928_v45, %v29921_v58 }
 0xc00   : > { %18306 = vmatpush2.bf16.msra.mxu1 %v23395_v57  ;;  %18266 = vmatprep.subr.bf16.mxu0 %v23400_v43 }
 0xc01   : > { %18307 = vmatprep.subr.bf16.mxu1 %v23403_v48 }
 0xc03   : > { %18267 = vmatpush2.bf16.msra.mxu0 %v23398_v39 }
 0xc04   : > { %18308 = vmatpush2.bf16.msra.mxu1 %v23401_v59  ;;  %18268 = vmatprep.subr.bf16.mxu0 %v23406_v55 }
 0xc05   : > { %18309 = vmatprep.subr.bf16.mxu1 %v23409_v17 }
 0xc07   : > { %18269 = vmatpush2.bf16.msra.mxu0 %v23404_v46 }
 0xc08   : > { %18310 = vmatpush2.bf16.msra.mxu1 %v23407_v7  ;;  %18270 = vmatprep.subr.bf16.mxu0 %v23412_v11 }
 0xc09   : > { %18311 = vmatprep.subr.bf16.mxu1 %v23415_v14 }
 0xc0b   : > { %18271 = vmatpush2.bf16.msra.mxu0 %v23410_v15 }
 0xc0c   : > { %18312 = vmatpush2.bf16.msra.mxu1 %v23413_v3  ;;  %18272 = vmatprep.subr.bf16.mxu0 %v23418_v35 }
 0xc0d   : > { %18313 = vmatprep.subr.bf16.mxu1 %v23421_v62 }
 0xc0f   : > { %18273 = vmatpush2.bf16.msra.mxu0 %v23416_v49 }
 0xc10   : > { %18314 = vmatpush2.bf16.msra.mxu1 %v23419_v27  ;;  %18274 = vmatprep.subr.bf16.mxu0 %v23424_v37 }
 0xc11   : > { %18315 = vmatprep.subr.bf16.mxu1 %v23427_v47 }
 0xc13   : > { %18275 = vmatpush2.bf16.msra.mxu0 %v23422_v0 }
 0xc14   : > { %18316 = vmatpush2.bf16.msra.mxu1 %v23425_v63 }
 0xc16   : > { %v18032_v38 = vpop.f32.mrf.mxu0  ;;  %18277 = vmatmul.mubr.bf16.vlgmr.msra.gmra.mxu0 %v29289_v52 }
 0xc17   : > { %v18033_v6 = vadd.f32 %v18032_v38, %v27034_v21  ;;  %v18073_v20 = vpop.f32.mrf.mxu1  ;;  %18318 = vmatmul.mubr.bf16.vlgmr.msra.gmra.mxu1 %v29294_v10 }
 0xc18   : > { %v18034_v28 = vpop.f32.mrf.mxu0 }
 0xc19   : > { %v18074_v51 = vadd.f32 %v18073_v20, %v18033_v6  ;;  %v18035_v36 = vadd.f32 %v18034_v28, %v27028_v54  ;;  %v18075_v8 = vpop.f32.mrf.mxu1 }
 0xc1a   : > { %v18036_v25 = vpop.f32.mrf.mxu0 }
 0xc1b   : > { %v18076_v22 = vadd.f32 %v18075_v8, %v18035_v36  ;;  %v18077_v31 = vpop.f32.mrf.mxu1 }
 0xc1c   : > { %v18037_v53 = vpop.f32.mrf.mxu0 }
 0xc1d   : > { %v18078_v1 = vpop.f32.mrf.mxu1 }
 0xc56   : > { %v18114_v26 = vpop.f32.mrf.mxu0 }
 0xc57   : > { %v18115_v44 = vadd.f32 %v18114_v26, %v18074_v51  ;;  %v18155_v29 = vpop.f32.mrf.mxu1 }
 0xc58   : > { %v18116_v40 = vpop.f32.mrf.mxu0 }
 0xc59   : > { %v18156_v52 = vadd.f32 %v18155_v29, %v18115_v44  ;;  %v18117_v30 = vadd.f32 %v18116_v40, %v18076_v22  ;;  %v18157_v21 = vpop.f32.mrf.mxu1 }
 0xc5a   : > { %v18118_v42 = vpop.f32.mrf.mxu0 }
 0xc5b   : > { %v18158_v12 = vadd.f32 %v18157_v21, %v18117_v30  ;;  %v18159_v10 = vpop.f32.mrf.mxu1 }
 0xc5c   : > { %v18119_v4 = vpop.f32.mrf.mxu0 }
 0xc5d   : > { %v18160_v60 = vpop.f32.mrf.mxu1 }
 0xc96   : > { %v18196_v32 = vpop.f32.mrf.mxu0 }
 0xc97   : > { %v18237_v54 = vpop.f32.mrf.mxu1  ;;  %v18197_v9 = vadd.f32 %v18196_v32, %v18156_v52 }
 0xc98   : > { %v18198_v2 = vpop.f32.mrf.mxu0 }
 0xc99   : > { %v18239_v24 = vpop.f32.mrf.mxu1  ;;  %v18199_v13 = vadd.f32 %v18198_v2, %v18158_v12  ;;  %v18238_v61 = vadd.f32 %v18237_v54, %v18197_v9 }
 0xc9a   : > { %v18200_v16 = vpop.f32.mrf.mxu0 }
 0xc9b   : > { %v18241_v41 = vpop.f32.mrf.mxu1  ;;  %v18240_v56 = vadd.f32 %v18239_v24, %v18199_v13 }
 0xc9c   : > { %v18201_v34 = vpop.f32.mrf.mxu0 }
 0xc9d   : > { %v18242_v5 = vpop.f32.mrf.mxu1 }
 0xcd6   : > { %v18278_v50 = vpop.f32.mrf.mxu0 }
 0xcd7   : > { %v18279_v33 = vadd.f32 %v18278_v50, %v18238_v61  ;;  %v18319_v23 = vpop.f32.mrf.mxu1 }
 0xcd8   : > { %v18280_v18 = vpop.f32.mrf.mxu0 }
 0xcd9   : > { %v18320_v57 = vadd.f32 %v18319_v23, %v18279_v33  ;;  %v18281_v43 = vadd.f32 %v18280_v18, %v18240_v56  ;;  %v18321_v48 = vpop.f32.mrf.mxu1 }
 0xcda   : > { %v18282_v39 = vpop.f32.mrf.mxu0 }
 0xcdb   : > { %v18327_v59 = vadd.f32 %v18326_v19, %v18320_v57  ;;  %v18322_v55 = vadd.f32 %v18321_v48, %v18281_v43  ;;  %v18323_v17 = vpop.f32.mrf.mxu1 }
 0xcdc   : > { %v18283_v46 = vpop.f32.mrf.mxu0 }
 0xcdd   : > { %v18324_v7 = vpop.f32.mrf.mxu1  ;;  %v18328_v11 = vadd.f32 %v18327_v59, %v18322_v55 }
 0xcdf   : > { %18329 = vadd.xlane.f32.xlu0 %v18328_v11 }
 0xd68   : > { %v18330_v14 = vpop.xlane.xlu0 %18329 }
 0xd69   : > { %v18331_v15 = vmul.f32 0.001953125, %v18330_v14 }
 0xd6b   : > { %v18332_v3 = vsub.f32 %v29921_v58, %v18331_v15  ;;  %v18333_v35 = vsub.f32 %v29928_v45, %v18331_v15  ;;  %v18334_v62 = vsub.f32 %v18320_v57, %v18331_v15  ;;  %v18335_v49 = vsub.f32 %v18322_v55, %v18331_v15 }
 0xd6d   : > { %v18336_v27 = vmul.f32 %v18332_v3, %v18332_v3  ;;  %v18337_v37 = vmul.f32 %v18333_v35, %v18333_v35  ;;  %v18338_v47 = vmul.f32 %v18334_v62, %v18334_v62  ;;  %v18339_v63 = vmul.f32 %v18335_v49, %v18335_v49 }
 0xd6f   : > { %v18340_v0 = vadd.f32 %v18337_v37, %v18336_v27 }
 0xd71   : > { %v18341_v38 = vadd.f32 %v18340_v0, %v18338_v47 }
 0xd73   : > { %v18342_v6 = vadd.f32 %v18341_v38, %v18339_v63 }
 0xd75   : > { %18343 = vadd.xlane.f32.xlu1 %v18342_v6 }
 0xd76   : > { %23481 = shalt.err (!%p23478_p3)
}
 0xd77   : > { %s23482_s25 = scalar_lea.hbm %s30107_s26, 1024  ;;  %s23486_s28 = scalar_lea.hbm %s30188_s9, 2048 }
 0xd78   : > { %p23483_p4 = scmp.ne.s32.totalorder %s30107_s26, %s23482_s25  ;;  %p23487_p9 = scmp.lt.s32.totalorder %s30107_s26, %s30188_s9 }
 0xd79   : > { %p23488_p10 = scmp.lt.s32.totalorder %s23486_s28, %s23482_s25 }
 0xd7a   : > { %p23484_p7 = pnand %p23483_p4, %p23655_p5 }
 0xd7b   : > { %p23489_p11 = por %p23488_p10, %p23487_p9 }
 0xd7c   : > { %p23485_p8 = pneg %p23484_p7 }
 0xd7e   : > { %p23490_p12 = pnand %p23489_p11, %p23485_p8 }
 0xd80   : > { %23493 = shalt.err (!%p23490_p12)
}
 0xd81   : > { %s23564_s22 = smov 128   ;;  %s23565_s24 = smov 8  }
 0xd82   : > { %21652 = dma.vmem_to_hbm [thread:$0]  (%p23655_p5), %s30102_s14, 1024, %s30107_s26, %s18362_s0, %s23564_s22, %s23564_s22, %s23565_s24  }
 0xd83   : > { %s18499_s29 = sshll.u32 %s26277_s16, 5  ;;  %s20465_s25 = sshll.u32 %s23638_s13, 9 }
 0xd84   : > { %s342_s27 = scalar_lea.vmem [#allocation2], %s18499_s29  ;;  %s30137_s23 = scalar_lea.hbm %s30187_s8, %s20465_s25 }
 0xd85   : > { %s18376_s17 = sshll.u32 %s342_s27, 4  ;;  %s18357_s13 = scalar_lea.sflag [#allocation3], %s26277_s16  ;;  %s30139_s17 = int_to_ptr.vmem [resolvable:$true] %s18376_s17 }
 0xd86   : > { %s23494_s14 = scalar_lea.vmem %s30139_s17, 512  ;;  %s23566_s26 = smov [#allocation2]  }
 0xd87   : > { %p23495_p13 = scmp.ne.s32.totalorder %s30139_s17, %s23494_s14  ;;  %s23498_s0 = sshll.u32 %s23566_s26, 4  ;;  %s23499_s0 = int_to_ptr.vmem [resolvable:$false] %s23498_s0 }
 0xd88   : > { %s23500_s22 = scalar_lea.vmem %s23499_s0, 1024  ;;  %p23501_p2 = scmp.lt.s32.totalorder %s30139_s17, %s23499_s0 }
 0xd89   : > { %p23496_p0 = pnand %p23495_p13, %p23655_p5  ;;  %p23502_p3 = scmp.lt.s32.totalorder %s23500_s22, %s23494_s14 }
 0xd8b   : > { %p23497_p1 = pneg %p23496_p0  ;;  %p23503_p4 = por %p23502_p3, %p23501_p2 }
 0xd8d   : > { %p23504_p7 = pnand %p23503_p4, %p23497_p1 }
 0xdfe   : > { %v18344_v58 = vpop.xlane.xlu1 %18343 }
 0xdff   : > { %v18345_v45 = vmul.f32 0.001953125, %v18344_v58 }
 0xe01   : > { %v18346_v20 = vadd.f32 1e-05, %v18345_v45 }
 0xe03   : > { %23462 = vrsqrt.f32 %v18346_v20 }
 0xe10   : > { %v23463_v28 = vpop.eup %23462 }
 0xe11   : > { %v18348_v51 = vmul.f32 %v23463_v28, %v18332_v3  ;;  %v18349_v36 = vmul.f32 %v23463_v28, %v18333_v35  ;;  %v18350_v8 = vmul.f32 %v23463_v28, %v18334_v62  ;;  %v18351_v25 = vmul.f32 %v23463_v28, %v18335_v49 }
 0xe13   : > { %18352 = vst [vmem:[%s342_s27] sm:$0xff] %v18348_v51  ;;  %18353 = vst [vmem:[%s342_s27 + $0x8] sm:$0xff] %v18349_v36 }
 0xe14   : > { %18354 = vst [vmem:[%s342_s27 + $0x10] sm:$0xff] %v18350_v8  ;;  %18355 = vst [vmem:[%s342_s27 + $0x18] sm:$0xff] %v18351_v25 }
 0xe15   : > { %23507 = shalt.err (!%p23504_p7)
}
 0xe16   : > { %s23508_s24 = scalar_lea.hbm %s30137_s23, 512  ;;  %s23512_s25 = scalar_lea.hbm %s30187_s8, 1024 }
 0xe17   : > { %p23509_p8 = scmp.ne.s32.totalorder %s30137_s23, %s23508_s24  ;;  %p23513_p11 = scmp.lt.s32.totalorder %s30137_s23, %s30187_s8 }
 0xe18   : > { %p23514_p12 = scmp.lt.s32.totalorder %s23512_s25, %s23508_s24 }
 0xe19   : > { %p23510_p9 = pnand %p23509_p8, %p23655_p5 }
 0xe1a   : > { %p23515_p13 = por %p23514_p12, %p23513_p11 }
 0xe1b   : > { %p23511_p10 = pneg %p23510_p9 }
 0xe1d   : > { %p23516_p0 = pnand %p23515_p13, %p23511_p10 }
 0xe1f   : > { %23519 = shalt.err (!%p23516_p0)
}
 0xe20   : > { %21651 = dma.vmem_to_hbm [thread:$0]  (%p23655_p5), %s30139_s17, 512, %s30137_s23, %s18357_s13  }
 0xe21 PF: > { %p21662_p1 = scmp.ge.s32.totalorder %s23558_s12, 2  ;;  %s18404_s21 = sand.u32 1, %s23546_s30  }
 0xe22   : > { %s18405_s14 = scalar_lea.sflag [#allocation3], %s18404_s21 }
 0xe23   : > { %p21656_p2 = pnand %p21662_p1, %p23659_p6 }
 0xe25   : > { %p21657_p3 = pneg %p21656_p2 }
 0xe27   : > { %23537 = dma.done.wait (%p21657_p3), %s18405_s14, 512  }
 0xe28   : > { %23539 = vsyncadd (%p21657_p3), %s18405_s14, 4294966784  ;;  %s18414_s26 = scalar_lea.sflag [#allocation5], %s18404_s21 }
 0xe29   : > { %23541 = dma.done.wait (%p21657_p3), %s18414_s26, 1024  }
 0xe2a   : > { %23543 = vsyncadd (%p21657_p3), %s18414_s26, 4294966272  ;;  %p23_p5 = scmp.ge.s32.totalorder %s23642_s15, 4   ;;  %s30193_s30 = smov %s23550_s10 }
 0xe2b   : > { %s30194_s10 = smov %s23554_s11  ;;  %s30195_s11 = smov %s23653_s18 }
 0xe2c   : > { %s30196_s12 = smov %s23642_s15  ;;  %25 = sbr.rel (!%p23_p5) target bundleno = 7 (0x7), region = 107 }
 0xe31   :  { %18419 = vsyncpa [#allocation3], 1 }
 0xe32   :  { %18421 = vsyncpa [#allocation3 + $0x1], 1 }
 0xe33   :  { %18422 = vsyncpa [#allocation5], 1 }
 0xe34   :  { %18424 = vsyncpa [#allocation5 + $0x1], 1 }

</bundles_post_ra>
